<compile_context>
chip_gen: v6e
topology: v6e:2x2x1
jax: 0.10.0
libtpu: 0.0.40
codegen_flags: <defaults>
</compile_context>

<pallas_src>
import jax
import jax.numpy as jnp
from jax.experimental import pallas as pl
from jax.experimental.pallas import tpu as pltpu

F_IN = 300
K1_PAD = 384           # layer-1 contraction dim padded to 3*128 lanes
H1, H2, NCLS = 1024, 256, 10
TM_MAX = 1024          # max batch rows per grid step


def _round_up(n, m):
    return ((n + m - 1) // m) * m


def _pick_tm(n):
    """Large batch tile (amortize per-step overhead) but >=2 grid steps when the
    batch allows it (v7x has 2 TensorCores sharding the 'parallel' axis)."""
    n8 = _round_up(max(n, 8), 8)
    half = _round_up(pl.cdiv(n8, 2), 8)
    return max(8, min(TM_MAX, half))


# ---------------------------------------------------------------------------
# Kernel: one (TM, K1_PAD) bf16 batch tile -> (TM, 10) softmax probabilities.
# ---------------------------------------------------------------------------
def dnn_kernel(x_ref, w1_ref, b1_ref, w2_ref, b2_ref, w3_ref, b3_ref, out_ref):
    # Layer 1 (BN0 and BN1 already folded into w1/b1), ReLU.  Dropout = identity (eval).
    h = jnp.dot(x_ref[...], w1_ref[...],
                preferred_element_type=jnp.float32) + b1_ref[...]
    h = jnp.maximum(h, 0.0)

    # Layer 2 (BN2 folded into w2/b2), ReLU.  Dropout = identity (eval).
    h = jnp.dot(h.astype(jnp.bfloat16), w2_ref[...],
                preferred_element_type=jnp.float32) + b2_ref[...]
    h = jnp.maximum(h, 0.0)

    # Layer 3: logits.
    logits = jnp.dot(h.astype(jnp.bfloat16), w3_ref[...],
                     preferred_element_type=jnp.float32) + b3_ref[...]

    # Exactly-normalized softmax over the 10 classes (dim=1).
    m = jnp.max(logits, axis=1, keepdims=True)
    e = jnp.exp(logits - m)
    s = jnp.sum(e, axis=1, keepdims=True)
    out_ref[...] = e / s


# ---------------------------------------------------------------------------
# Wrapper: batch-tiled pallas_call with resident weights.
# ---------------------------------------------------------------------------
def dnn_forward(x, fp):
    """x: (N, 300) float32. fp: folded params from fold_params()."""
    n, f = x.shape
    k1 = fp["w1"].shape[0]

    tm = _pick_tm(n)
    n_pad = _round_up(n, tm)
    # Single pad+cast pass: stream x to the kernel as bf16 (halves the only real
    # streamed HBM input; weights are VMEM-resident).
    x_p = jnp.pad(x.astype(jnp.bfloat16), ((0, n_pad - n), (0, k1 - f)))

    grid = (n_pad // tm,)
    const = lambda i: (0, 0)  # weights: same block every step -> stay resident in VMEM

    flops = 2 * n_pad * (k1 * H1 + H1 * H2 + H2 * NCLS)
    bytes_accessed = int(
        x_p.size * x_p.dtype.itemsize
        + sum(int(v.size) * v.dtype.itemsize for v in fp.values())
        + n_pad * NCLS * 4
    )

    out = pl.pallas_call(
        dnn_kernel,
        out_shape=jax.ShapeDtypeStruct((n_pad, NCLS), jnp.float32),
        grid_spec=pltpu.PrefetchScalarGridSpec(
            num_scalar_prefetch=0,
            grid=grid,
            in_specs=[
                pl.BlockSpec((tm, k1), lambda i: (i, 0)),   # x tile (bf16, pipelined)
                pl.BlockSpec((k1, H1), const),              # w1 (bf16, resident)
                pl.BlockSpec((1, H1), const),               # b1 (f32)
                pl.BlockSpec((H1, H2), const),              # w2
                pl.BlockSpec((1, H2), const),               # b2
                pl.BlockSpec((H2, NCLS), const),            # w3
                pl.BlockSpec((1, NCLS), const),             # b3
            ],
            out_specs=pl.BlockSpec((tm, NCLS), lambda i: (i, 0)),
        ),
        compiler_params=pltpu.CompilerParams(
            dimension_semantics=("parallel",),       # shard batch tiles across TCs (v7x)
            vmem_limit_bytes=32 * 1024 * 1024,       # ~13 MB used at TM=1024; safe on all gens
        ),
        cost_estimate=pl.CostEstimate(
            flops=flops,
            transcendentals=n_pad * NCLS,            # exp per logit
            bytes_accessed=bytes_accessed,
        ),
    )(x_p, fp["w1"], fp["b1"], fp["w2"], fp["b2"], fp["w3"], fp["b3"])

    return out[:n]


# ---------------------------------------------------------------------------
# Host-side parameter prep: fold eval-mode BatchNorms into the Linears.
# ---------------------------------------------------------------------------
def fold_params(raw, eps=1e-5, k_pad=K1_PAD):
    def bn_scale_shift(g, b, m, v):
        s = g / jnp.sqrt(v + eps)
        return s, b - m * s

    s0, t0 = bn_scale_shift(raw["bn0_g"], raw["bn0_b"], raw["bn0_m"], raw["bn0_v"])
    s1, t1 = bn_scale_shift(raw["bn1_g"], raw["bn1_b"], raw["bn1_m"], raw["bn1_v"])
    s2, t2 = bn_scale_shift(raw["bn2_g"], raw["bn2_b"], raw["bn2_m"], raw["bn2_v"])

    # BN0 (input scale) and BN1 (output scale) folded into Linear(300->1024).
    w1 = (s0[:, None] * raw["w1"]) * s1[None, :]
    b1 = (t0 @ raw["w1"] + raw["b1"]) * s1 + t1
    # BN2 folded into Linear(1024->256).
    w2 = raw["w2"] * s2[None, :]
    b2 = raw["b2"] * s2 + t2
    w3, b3 = raw["w3"], raw["b3"]

    # Zero-pad the layer-1 contraction dim 300 -> 384 (matches the padded x columns).
    w1 = jnp.pad(w1, ((0, k_pad - w1.shape[0]), (0, 0)))

    # TODO(synk): optional fp8 (v7x) / int8 (v5e/v6e) weight quantization for the two
    # big matmuls was not applied -- needs accuracy validation.
    return {
        "w1": w1.astype(jnp.bfloat16), "b1": b1[None, :].astype(jnp.float32),
        "w2": w2.astype(jnp.bfloat16), "b2": b2[None, :].astype(jnp.float32),
        "w3": w3.astype(jnp.bfloat16), "b3": b3[None, :].astype(jnp.float32),
    }


def make_raw_params(key):
    f32 = jnp.float32
    ks = jax.random.split(key, 18)

    def lin(kw, kb, fan_in, fan_out):
        bound = 1.0 / (fan_in ** 0.5)
        w = jax.random.uniform(kw, (fan_in, fan_out), f32, -bound, bound)
        b = jax.random.uniform(kb, (fan_out,), f32, -bound, bound)
        return w, b

    def bn(kg, kb, km, kv, d):
        g = 1.0 + 0.1 * jax.random.normal(kg, (d,), f32)
        b = 0.1 * jax.random.normal(kb, (d,), f32)
        m = 0.1 * jax.random.normal(km, (d,), f32)
        v = jnp.abs(1.0 + 0.1 * jax.random.normal(kv, (d,), f32))
        return g, b, m, v

    p = {}
    p["bn0_g"], p["bn0_b"], p["bn0_m"], p["bn0_v"] = bn(ks[0], ks[1], ks[2], ks[3], F_IN)
    p["w1"], p["b1"] = lin(ks[4], ks[5], F_IN, H1)
    p["bn1_g"], p["bn1_b"], p["bn1_m"], p["bn1_v"] = bn(ks[6], ks[7], ks[8], ks[9], H1)
    p["w2"], p["b2"] = lin(ks[10], ks[11], H1, H2)
    p["bn2_g"], p["bn2_b"], p["bn2_m"], p["bn2_v"] = bn(ks[12], ks[13], ks[14], ks[15], H2)
    p["w3"], p["b3"] = lin(ks[16], ks[17], H2, NCLS)
    return p


# ---------------------------------------------------------------------------
# References for sanity checks.
# ---------------------------------------------------------------------------
def reference_unfolded(x, raw, eps=1e-5):
    """Full-precision, un-folded eval-mode math (mirrors the PyTorch module)."""
    def bn(h, g, b, m, v):
        return (h - m) / jnp.sqrt(v + eps) * g + b

    h = bn(x, raw["bn0_g"], raw["bn0_b"], raw["bn0_m"], raw["bn0_v"])
    h = h @ raw["w1"] + raw["b1"]
    h = jnp.maximum(bn(h, raw["bn1_g"], raw["bn1_b"], raw["bn1_m"], raw["bn1_v"]), 0.0)
    h = h @ raw["w2"] + raw["b2"]
    h = jnp.maximum(bn(h, raw["bn2_g"], raw["bn2_b"], raw["bn2_m"], raw["bn2_v"]), 0.0)
    logits = h @ raw["w3"] + raw["b3"]
    return jax.nn.softmax(logits, axis=1)


def reference_folded_bf16(x, fp):
    """Pure-JAX replica of the exact kernel pipeline (folded params, bf16 dots)."""
    k1 = fp["w1"].shape[0]
    xp = jnp.pad(x.astype(jnp.bfloat16), ((0, 0), (0, k1 - x.shape[1])))
    h = jnp.dot(xp, fp["w1"], preferred_element_type=jnp.float32) + fp["b1"]
    h = jnp.maximum(h, 0.0)
    h = jnp.dot(h.astype(jnp.bfloat16), fp["w2"], preferred_element_type=jnp.float32) + fp["b2"]
    h = jnp.maximum(h, 0.0)
    logits = jnp.dot(h.astype(jnp.bfloat16), fp["w3"],
                     preferred_element_type=jnp.float32) + fp["b3"]
    return jax.nn.softmax(logits, axis=1)


if __name__ == "__main__":
    key = jax.random.PRNGKey(0)
    kx, kp = jax.random.split(key)

    N = 512  # exercises tiling (>=2 grid steps) + resident weights
    x = jax.random.normal(kx, (N, F_IN), jnp.float32)
    raw = make_raw_params(kp)
    fp = fold_params(raw)

    out = jax.block_until_ready(dnn_forward(x, fp))

    assert out.shape == (N, NCLS)
    # Exact softmax normalization: rows sum to 1.
    assert jnp.allclose(jnp.sum(out, axis=1), 1.0, atol=1e-3)

    # Tight check vs. a pure-JAX replica of the exact folded/bf16 pipeline.
    ref_b = reference_folded_bf16(x, fp)
    assert jnp.allclose(out, ref_b, atol=2e-3), float(jnp.max(jnp.abs(out - ref_b)))

    # Semantic check vs. the full-precision, un-folded PyTorch-style eval forward.
    ref_f = reference_unfolded(x, raw)
    assert jnp.allclose(out, ref_f, atol=5e-2), float(jnp.max(jnp.abs(out - ref_f)))

    print("KERNEL_OK")
</pallas_src>

<mosaic_0001>
module attributes {stable_mosaic.version = 11 : i64} {
  func.func @dnn_kernel(%arg0: i32, %arg1: memref<256x384xbf16, #tpu.memory_space<vmem>>, %arg2: memref<384x1024xbf16, #tpu.memory_space<vmem>>, %arg3: memref<1x1024xf32, #tpu.memory_space<vmem>>, %arg4: memref<1024x256xbf16, #tpu.memory_space<vmem>>, %arg5: memref<1x256xf32, #tpu.memory_space<vmem>>, %arg6: memref<256x10xbf16, #tpu.memory_space<vmem>>, %arg7: memref<1x10xf32, #tpu.memory_space<vmem>>, %arg8: memref<256x10xf32, #tpu.memory_space<vmem>>) attributes {dimension_semantics = [#tpu.dimension_semantics<parallel>], iteration_bounds = array<i64: 2>, scalar_prefetch = 0 : i64, scratch_operands = 0 : i64, tpu.core_type = #tpu.core_type<tc>, window_params = [{transform_indices = @transform_0, window_bounds = array<i64: 256, 384>}, {pipeline_mode = #tpu.pipeline_mode<synchronous>, transform_indices = @transform_1, window_bounds = array<i64: 384, 1024>}, {pipeline_mode = #tpu.pipeline_mode<synchronous>, transform_indices = @transform_2, window_bounds = array<i64: 1, 1024>}, {pipeline_mode = #tpu.pipeline_mode<synchronous>, transform_indices = @transform_3, window_bounds = array<i64: 1024, 256>}, {pipeline_mode = #tpu.pipeline_mode<synchronous>, transform_indices = @transform_4, window_bounds = array<i64: 1, 256>}, {pipeline_mode = #tpu.pipeline_mode<synchronous>, transform_indices = @transform_5, window_bounds = array<i64: 256, 10>}, {pipeline_mode = #tpu.pipeline_mode<synchronous>, transform_indices = @transform_6, window_bounds = array<i64: 1, 10>}, {transform_indices = @transform_7, window_bounds = array<i64: 256, 10>}]} {
    %c0 = arith.constant 0 : index
    %c0_0 = arith.constant 0 : index
    %0 = vector.load %arg1[%c0, %c0_0] : memref<256x384xbf16, #tpu.memory_space<vmem>>, vector<256x384xbf16>
    %c0_1 = arith.constant 0 : index
    %c0_2 = arith.constant 0 : index
    %1 = vector.load %arg2[%c0_1, %c0_2] : memref<384x1024xbf16, #tpu.memory_space<vmem>>, vector<384x1024xbf16>
    %cst = arith.constant dense<0.000000e+00> : vector<256x1024xf32>
    %2 = tpu.matmul %0, %1, %cst {dimension_numbers = #tpu.dot_dimension_numbers<[1], [0], [0], [1], [0, 0, 1, 1], [], []>} : vector<256x384xbf16>, vector<384x1024xbf16>, vector<256x1024xf32> -> vector<256x1024xf32>
    %c0_3 = arith.constant 0 : index
    %c0_4 = arith.constant 0 : index
    %3 = vector.load %arg3[%c0_3, %c0_4] : memref<1x1024xf32, #tpu.memory_space<vmem>>, vector<1x1024xf32>
    %4 = vector.broadcast %3 : vector<1x1024xf32> to vector<256x1024xf32>
    %5 = arith.addf %2, %4 : vector<256x1024xf32>
    %cst_5 = arith.constant 0.000000e+00 : f32
    %6 = vector.broadcast %cst_5 : f32 to vector<256x1024xf32>
    %7 = arith.maximumf %5, %6 : vector<256x1024xf32>
    %8 = arith.truncf %7 : vector<256x1024xf32> to vector<256x1024xbf16>
    %c0_6 = arith.constant 0 : index
    %c0_7 = arith.constant 0 : index
    %9 = vector.load %arg4[%c0_6, %c0_7] : memref<1024x256xbf16, #tpu.memory_space<vmem>>, vector<1024x256xbf16>
    %cst_8 = arith.constant dense<0.000000e+00> : vector<256x256xf32>
    %10 = tpu.matmul %8, %9, %cst_8 {dimension_numbers = #tpu.dot_dimension_numbers<[1], [0], [0], [1], [0, 0, 1, 1], [], []>} : vector<256x1024xbf16>, vector<1024x256xbf16>, vector<256x256xf32> -> vector<256x256xf32>
    %c0_9 = arith.constant 0 : index
    %c0_10 = arith.constant 0 : index
    %11 = vector.load %arg5[%c0_9, %c0_10] : memref<1x256xf32, #tpu.memory_space<vmem>>, vector<1x256xf32>
    %12 = vector.broadcast %11 : vector<1x256xf32> to vector<256x256xf32>
    %13 = arith.addf %10, %12 : vector<256x256xf32>
    %cst_11 = arith.constant 0.000000e+00 : f32
    %14 = vector.broadcast %cst_11 : f32 to vector<256x256xf32>
    %15 = arith.maximumf %13, %14 : vector<256x256xf32>
    %16 = arith.truncf %15 : vector<256x256xf32> to vector<256x256xbf16>
    %c0_12 = arith.constant 0 : index
    %c0_13 = arith.constant 0 : index
    %17 = vector.load %arg6[%c0_12, %c0_13] : memref<256x10xbf16, #tpu.memory_space<vmem>>, vector<256x10xbf16>
    %cst_14 = arith.constant dense<0.000000e+00> : vector<256x10xf32>
    %18 = tpu.matmul %16, %17, %cst_14 {dimension_numbers = #tpu.dot_dimension_numbers<[1], [0], [0], [1], [0, 0, 1, 1], [], []>} : vector<256x256xbf16>, vector<256x10xbf16>, vector<256x10xf32> -> vector<256x10xf32>
    %c0_15 = arith.constant 0 : index
    %c0_16 = arith.constant 0 : index
    %19 = vector.load %arg7[%c0_15, %c0_16] : memref<1x10xf32, #tpu.memory_space<vmem>>, vector<1x10xf32>
    %20 = vector.broadcast %19 : vector<1x10xf32> to vector<256x10xf32>
    %21 = arith.addf %18, %20 : vector<256x10xf32>
    %cst_17 = arith.constant dense<0xFF800000> : vector<256xf32>
    %22 = vector.multi_reduction <maximumf>, %21, %cst_17 [1] : vector<256x10xf32> to vector<256xf32>
    %23 = vector.shape_cast %22 : vector<256xf32> to vector<256x1xf32>
    %24 = vector.broadcast %23 : vector<256x1xf32> to vector<256x10xf32>
    %25 = arith.subf %21, %24 : vector<256x10xf32>
    %26 = math.exp %25 : vector<256x10xf32>
    %cst_18 = arith.constant dense<0.000000e+00> : vector<256xf32>
    %27 = vector.multi_reduction <add>, %26, %cst_18 [1] : vector<256x10xf32> to vector<256xf32>
    %28 = vector.shape_cast %27 : vector<256xf32> to vector<256x1xf32>
    %29 = vector.broadcast %28 : vector<256x1xf32> to vector<256x10xf32>
    %30 = arith.divf %26, %29 : vector<256x10xf32>
    %c0_19 = arith.constant 0 : index
    %c0_20 = arith.constant 0 : index
    %31 = vector.load %arg8[%c0_19, %c0_20] : memref<256x10xf32, #tpu.memory_space<vmem>>, vector<256x10xf32>
    tpu.vector_store %arg8[%c0_19, %c0_20], %30 {strides = array<i32>} : memref<256x10xf32, #tpu.memory_space<vmem>>, vector<256x10xf32>,
    return
  }
  func.func @transform_0(%arg0: i32) -> (i32, i32) {
    %c0_i32 = arith.constant 0 : i32
    %c0_i32_0 = arith.constant 0 : i32
    return %arg0, %c0_i32 : i32, i32
  }
  func.func @transform_1(%arg0: i32) -> (i32, i32) {
    %c0_i32 = arith.constant 0 : i32
    %c0_i32_0 = arith.constant 0 : i32
    %c0_i32_1 = arith.constant 0 : i32
    return %c0_i32, %c0_i32_0 : i32, i32
  }
  func.func @transform_2(%arg0: i32) -> (i32, i32) {
    %c0_i32 = arith.constant 0 : i32
    %c0_i32_0 = arith.constant 0 : i32
    %c0_i32_1 = arith.constant 0 : i32
    return %c0_i32, %c0_i32_0 : i32, i32
  }
  func.func @transform_3(%arg0: i32) -> (i32, i32) {
    %c0_i32 = arith.constant 0 : i32
    %c0_i32_0 = arith.constant 0 : i32
    %c0_i32_1 = arith.constant 0 : i32
    return %c0_i32, %c0_i32_0 : i32, i32
  }
  func.func @transform_4(%arg0: i32) -> (i32, i32) {
    %c0_i32 = arith.constant 0 : i32
    %c0_i32_0 = arith.constant 0 : i32
    %c0_i32_1 = arith.constant 0 : i32
    return %c0_i32, %c0_i32_0 : i32, i32
  }
  func.func @transform_5(%arg0: i32) -> (i32, i32) {
    %c0_i32 = arith.constant 0 : i32
    %c0_i32_0 = arith.constant 0 : i32
    %c0_i32_1 = arith.constant 0 : i32
    return %c0_i32, %c0_i32_0 : i32, i32
  }
  func.func @transform_6(%arg0: i32) -> (i32, i32) {
    %c0_i32 = arith.constant 0 : i32
    %c0_i32_0 = arith.constant 0 : i32
    %c0_i32_1 = arith.constant 0 : i32
    return %c0_i32, %c0_i32_0 : i32, i32
  }
  func.func @transform_7(%arg0: i32) -> (i32, i32) {
    %c0_i32 = arith.constant 0 : i32
    %c0_i32_0 = arith.constant 0 : i32
    return %arg0, %c0_i32 : i32, i32
  }
}

</mosaic_0001>

<bundles_post_ra>
// kernel: tpu_custom_call.1
= control target key start
LH: loop header
LB: loop body
LE: loop exit
PB: predicated region body
PF: predicated region fallthrough
CT: control target
= control target key end

     0   :  { %12 = vsyncpa [#allocation3], 0  ;;  %s10648_s0 = inlined_call_operand.hbm [shape: bf16[512,384], index: 0, kind: input, shape index: {}]   ;;  %s10649_s1 = inlined_call_operand.hbm [shape: bf16[384,1024], index: 1, kind: input, shape index: {}]   ;;  %s10650_s2 = inlined_call_operand.vmem [shape: f32[1,1024], index: 2, kind: input, shape index: {}]   ;;  %s10651_s3 = inlined_call_operand.hbm [shape: bf16[1024,256], index: 3, kind: input, shape index: {}]   ;;  %s10652_s4 = inlined_call_operand.vmem [shape: f32[1,256], index: 4, kind: input, shape index: {}]   ;;  %s10653_s5 = inlined_call_operand.vmem [shape: bf16[256,10], index: 5, kind: input, shape index: {}]   ;;  %s10654_s6 = inlined_call_operand.vmem [shape: f32[1,10], index: 6, kind: input, shape index: {}]   ;;  %s10655_s7 = inlined_call_operand.vmem [shape: f32[512,10], index: 7, kind: output, shape index: {}]  }
   0x1   :  { %14 = vsyncpa [#allocation3 + $0x1], 0 }
   0x2   :  { %15 = vsyncpa [#allocation5], 0  ;;  %s7433_s24 = smov 0   ;;  %s7435_s25 = smov 0  }
   0x3   :  { %s7437_s26 = smov 0   ;;  %s7439_s27 = smov 0  }
   0x4 LB: > { %s6189_s28 = sadd.s32 4294967295, %s7381_s27   ;;  %p41_p0 = scmp.ne.s32.totalorder %s7373_s25, %s7369_s24  ;;  %s7381_s27 = sphi %s7439_s27, %s11255_s27   ;;  %s7377_s26 = sphi %s7437_s26, %s11258_s26   ;;  %s7373_s25 = sphi %s7435_s25, %s11257_s25   ;;  %s7369_s24 = sphi %s7433_s24, %s11256_s24  }
   0x5   : > { %p7455_p1 = scmp.eq.s32.totalorder %s6189_s28, 0  ;;  %p6191_p2 = scmp.ge.s32.totalorder %s7381_s27, 1 }
   0x6   : > { %p204_p3 = scmp.lt.s32.totalorder %s7381_s27, 3  ;;  %s7383_s9 = smov [#allocation4]  }
   0x7   : > { %s10686_s29 = scalar_select %p7455_p1, 1, 0 }
   0x8   : > { %p7463_p4 = por %p7455_p1, %p41_p0  ;;  %p7467_p5 = pnand %p6191_p2, %p204_p3 }
   0x9   : > { %s216_s10 = sshll.u32 %s7383_s9, 4  ;;  %s7384_s12 = smov [#allocation6]   ;;  %s217_s10 = int_to_ptr.vmem [resolvable:$true] %s216_s10 }
   0xa   : > { %s10687_s30 = scalar_select %p7463_p4, 1, 0 }
   0xb   : > { %s10688_s8 = scalar_select %p7467_p5, 1, 0 }
   0xc   : > { %p6731_p6 = pneg %p7467_p5  ;;  %s232_s13 = sshll.u32 %s7384_s12, 4  ;;  %s233_s13 = int_to_ptr.vmem [resolvable:$true] %s232_s13 }
   0xd   : > { %s7274_s14 = scalar_lea.vmem %s217_s10, 24576  ;;  %p7282_p12 = scmp.lt.s32.totalorder %s217_s10, %s217_s10 }
   0xe   : > { %p7475_p7 = pnand %p6731_p6, %p7455_p1  ;;  %p7275_p9 = scmp.ne.s32.totalorder %s217_s10, %s7274_s14 }
   0xf   : > { %p7283_p13 = scmp.lt.s32.totalorder %s7274_s14, %s7274_s14 }
  0x10   : > { %p7265_p8 = pneg %p7475_p7 }
  0x11   : > { %p7284_p0 = por %p7283_p13, %p7282_p12 }
  0x12   : > { %p7277_p10 = pnand %p7275_p9, %p7265_p8 }
  0x14   : > { %p7278_p11 = pneg %p7277_p10 }
  0x16   : > { %p7285_p2 = pnand %p7284_p0, %p7278_p11 }
  0x18   : > { %7288 = shalt.err (!%p7285_p2)
}
  0x19   : > { %s7385_s15 = smov 512   ;;  %s7386_s16 = smov 32  }
  0x1a   : > { %6734 = dma.hbm_to_vmem [thread:$0]  (!%p7475_p7), %s10649_s1, 24576, %s217_s10, [#allocation5], %s7385_s15, %s7385_s15, %s7386_s16  }
  0x1b   : > { %s7300_s19 = scalar_lea.vmem %s233_s13, 16384  ;;  %p7308_p10 = scmp.lt.s32.totalorder %s233_s13, %s233_s13 }
  0x1c   : > { %p7301_p3 = scmp.ne.s32.totalorder %s233_s13, %s7300_s19  ;;  %p7309_p1 = scmp.lt.s32.totalorder %s7300_s19, %s7300_s19 }
  0x1e   : > { %p7303_p6 = pnand %p7301_p3, %p7265_p8  ;;  %p7310_p12 = por %p7309_p1, %p7308_p10 }
  0x20   : > { %p7304_p9 = pneg %p7303_p6 }
  0x22   : > { %p7311_p11 = pnand %p7310_p12, %p7304_p9 }
  0x24   : > { %7314 = shalt.err (!%p7311_p11)
}
  0x25   : > { %s7387_s20 = smov 128   ;;  %s7388_s21 = smov 8  }
  0x26   : > { %6737 = dma.hbm_to_vmem [thread:$0]  (!%p7475_p7), %s10651_s3, 16384, %s233_s13, [#allocation5], %s7387_s20, %s7387_s20, %s7388_s21  }
  0x27   : > { %s7498_s24 = sadd.s32 1, %s7381_s27   ;;  %s28_s10 = sadd.s32 1, %s7377_s26 }
  0x28   : > { %s25_s9 = ssub.s32 %s7381_s27, %s7498_s24  ;;  %p35_p8 = scmp.ne.s32.totalorder %s7377_s26, %s7373_s25 }
  0x29   : > { %p26_p1 = scmp.eq.s32.totalorder %s25_s9, 0  ;;  %p36_p13 = scmp.eq.s32.totalorder %s7381_s27, 0 }
  0x2a   : > { %p6744_p2 = scmp.lt.s32.totalorder %s7381_s27, 2  ;;  %s255_s14 = sand.u32 1, %s7377_s26  }
  0x2b   : > { %s7507_s12 = scalar_select %p26_p1, %s7377_s26, %s28_s10  }
  0x2c   : > { %p37_p0 = por %p36_p13, %p35_p8  ;;  %s6719_s15 = smul.u32 6144, %s7381_s27 }
  0x2d   : > { %s6718_s16 = smul.u32 384, %s255_s14  ;;  %s7523_s21 = scalar_lea.sflag [#allocation3], %s255_s14 }
  0x2e   : > { %s7515_s18 = scalar_lea.hbm %s10648_s0, %s6719_s15  ;;  %p7517_p7 = pnand %p6744_p2, %p37_p0 }
  0x2f   : > { %s259_s19 = scalar_lea.vmem [#allocation2], %s6718_s16  ;;  %s7315_s22 = scalar_lea.hbm %s7515_s18, 6144 }
  0x30   : > { %s267_s20 = sshll.u32 %s259_s19, 4  ;;  %p7316_p3 = scmp.ne.s32.totalorder %s7515_s18, %s7315_s22  ;;  %s7521_s20 = int_to_ptr.vmem [resolvable:$true] %s267_s20 }
  0x31   : > { %p7317_p6 = pneg %p7517_p7  ;;  %s7320_s10 = scalar_lea.hbm %s10648_s0, 12288 }
  0x32   : > { %p7321_p12 = scmp.lt.s32.totalorder %s7515_s18, %s10648_s0  ;;  %p7322_p11 = scmp.lt.s32.totalorder %s7320_s10, %s7315_s22 }
  0x33   : > { %p7318_p9 = pnand %p7317_p6, %p7316_p3 }
  0x34   : > { %p7323_p1 = por %p7322_p11, %p7321_p12 }
  0x35   : > { %p7319_p10 = pneg %p7318_p9 }
  0x37   : > { %p7324_p8 = pnand %p7323_p1, %p7319_p10 }
  0x39   : > { %7327 = shalt.err (!%p7324_p8)
}
  0x3a   : > { %s7328_s14 = scalar_lea.vmem %s7521_s20, 6144  ;;  %s7389_s16 = smov [#allocation2]  }
  0x3b   : > { %p7329_p13 = scmp.ne.s32.totalorder %s7521_s20, %s7328_s14  ;;  %s7333_s17 = sshll.u32 %s7389_s16, 4  ;;  %s7334_s17 = int_to_ptr.vmem [resolvable:$false] %s7333_s17 }
  0x3c   : > { %s7335_s19 = scalar_lea.vmem %s7334_s17, 12288  ;;  %p7336_p3 = scmp.lt.s32.totalorder %s7521_s20, %s7334_s17 }
  0x3d   : > { %p7331_p0 = pnand %p7329_p13, %p7317_p6  ;;  %p7337_p9 = scmp.lt.s32.totalorder %s7335_s19, %s7328_s14 }
  0x3f   : > { %p7332_p2 = pneg %p7331_p0  ;;  %p7338_p4 = por %p7337_p9, %p7336_p3 }
  0x41   : > { %p7339_p5 = pnand %p7338_p4, %p7332_p2 }
  0x43   : > { %7342 = shalt.err (!%p7339_p5)
}
  0x44   : > { %s7390_s22 = smov 192   ;;  %s7391_s23 = smov 12  }
  0x45   : > { %6741 = dma.hbm_to_vmem [thread:$0]  (!%p7517_p7), %s7515_s18, 6144, %s7521_s20, %s7523_s21, %s7390_s22, %s7390_s22, %s7391_s23  }
  0x46   : > { %p10691_p6 = scmp.ne.s32.totalorder %s10688_s8, 0 }
  0x48   : > { %279 = sbr.rel (%p10691_p6) target bundleno = 1684 (0x694), region = 48 }
  0x4d   : > { %s281_s9 = sand.u32 1, %s7373_s25   ;;  %p10692_p4 = scmp.ne.s32.totalorder %s10687_s30, 0 }
  0x4e   : > { %s6720_s10 = smul.u32 384, %s281_s9  ;;  %s282_s15 = scalar_lea.sflag [#allocation3], %s281_s9 }
  0x50   : > { %s7547_s11 = scalar_lea.vmem [#allocation2], %s6720_s10 }
  0x51   : > { %7360 = dma.done.wait (%p10692_p4), %s282_s15, 6144  }
  0x52   : > { %7362 = vsyncadd (%p10692_p4), %s282_s15, 4294961152  ;;  %p10693_p5 = scmp.ne.s32.totalorder %s10686_s29, 0 }
  0x54   : > { %7364 = dma.done.wait (%p10693_p5), [#allocation5], 40960  }
  0x55   : > { %7366 = vsyncadd (%p10693_p5), [#allocation5], 4294926336  ;;  %v10662_v0 = vmov 0   ;;  %v452_v1 = vld [vmem:[#allocation4 + $0x1c0] sm:$0xff]  ;;  %vm5718_vm0 = vcmask 80896   ;;  %s6201_s16 = sshll.u32 %s6189_s28, 5 }
  0x56   : > { %2131 = vmatprep.mubr.bf16.mxu1 %v10662_v0  ;;  %v456_v2 = vld [vmem:[#allocation4 + $0x1e0] sm:$0xff]  ;;  %p326_p7 = scmp.lt.s32.totalorder %s6201_s16, 63 }
  0x57   : > { %v580_v3 = vld [vmem:[#allocation4 + $0x5c0] sm:$0xff]  ;;  %v6308_v4 = vcombine.high %v452_v1, %v456_v2  ;;  %v6307_v6 = vcombine.low %v452_v1, %v456_v2 }
  0x58   : > { %v584_v5 = vld [vmem:[#allocation4 + $0x5e0] sm:$0xff]  ;;  %s11260_s16 = smov (!%p326_p7, %s6201_s16), 63 }
  0x59   : > { %v444_v7 = vld [vmem:[#allocation4 + $0x180] sm:$0xff]  ;;  %v7558_v9 = vcombine.high %v580_v3, %v584_v5  ;;  %v7560_v10 = vcombine.low %v580_v3, %v584_v5  ;;  %1846 = vmatprep.subr.bf16.mxu0 %v6308_v4  ;;  %v453_v3 = vld [vmem:[#allocation4 + $0x1c8] sm:$0xff]  ;;  %s6202_s17 = sshll.u32 %s11260_s16, 3 }
  0x5a   : > { %v448_v8 = vld [vmem:[#allocation4 + $0x1a0] sm:$0xff]  ;;  %1847 = vmatpush1.bf16.msra.mxu0 %v6307_v6  ;;  %v457_v4 = vld [vmem:[#allocation4 + $0x1e8] sm:$0xff]  ;;  %s10537_s23 = scalar_lea.vmem %s10655_s7, %s6202_s17 }
  0x5b   : > { %v6300_v11 = vcombine.high %v444_v7, %v448_v8  ;;  %v572_v12 = vld [vmem:[#allocation4 + $0x580] sm:$0xff]  ;;  %6702 = vmatprep.subr.bf16.mxu1 %v7558_v9  ;;  %v6299_v19 = vcombine.low %v444_v7, %v448_v8 }
  0x5c   : > { %v576_v13 = vld [vmem:[#allocation4 + $0x5a0] sm:$0xff]  ;;  %6710 = vmatpush1.bf16.msra.mxu1 %v7560_v10 }
  0x5d   : > { %v436_v14 = vld [vmem:[#allocation4 + $0x140] sm:$0xff]  ;;  %v7562_v15 = vcombine.high %v572_v12, %v576_v13  ;;  %1848 = vmatprep.subr.bf16.mxu0 %v6300_v11  ;;  %v7566_v20 = vcombine.low %v572_v12, %v576_v13  ;;  %v6310_v12 = vcombine.high %v453_v3, %v457_v4 }
  0x5e   : > { %v440_v16 = vld [vmem:[#allocation4 + $0x160] sm:$0xff]  ;;  %1849 = vmatpush1.bf16.msra.mxu0 %v6299_v19 }
  0x5f   : > { %v564_v17 = vld [vmem:[#allocation4 + $0x540] sm:$0xff]  ;;  %v6292_v21 = vcombine.high %v436_v14, %v440_v16  ;;  %6703 = vmatprep.subr.bf16.mxu1 %v7562_v15  ;;  %v6291_v27 = vcombine.low %v436_v14, %v440_v16  ;;  %v445_v16 = vld [vmem:[#allocation4 + $0x188] sm:$0xff] }
  0x60   : > { %v568_v18 = vld [vmem:[#allocation4 + $0x560] sm:$0xff]  ;;  %6711 = vmatpush1.bf16.msra.mxu1 %v7566_v20 }
  0x61   : > { %v7569_v22 = vcombine.high %v564_v17, %v568_v18  ;;  %v428_v23 = vld [vmem:[#allocation4 + $0x100] sm:$0xff]  ;;  %1850 = vmatprep.subr.bf16.mxu0 %v6292_v21  ;;  %v7572_v28 = vcombine.low %v564_v17, %v568_v18  ;;  %v449_v17 = vld [vmem:[#allocation4 + $0x1a8] sm:$0xff] }
  0x62   : > { %v432_v24 = vld [vmem:[#allocation4 + $0x120] sm:$0xff]  ;;  %1851 = vmatpush1.bf16.msra.mxu0 %v6291_v27  ;;  %v441_v27 = vld [vmem:[#allocation4 + $0x168] sm:$0xff] }
  0x63   : > { %v556_v25 = vld [vmem:[#allocation4 + $0x500] sm:$0xff]  ;;  %v6284_v29 = vcombine.high %v428_v23, %v432_v24  ;;  %6704 = vmatprep.subr.bf16.mxu1 %v7569_v22  ;;  %v6283_v35 = vcombine.low %v428_v23, %v432_v24  ;;  %v6309_v23 = vcombine.low %v453_v3, %v457_v4  ;;  %v6302_v24 = vcombine.high %v445_v16, %v449_v17 }
  0x64   : > { %v560_v26 = vld [vmem:[#allocation4 + $0x520] sm:$0xff]  ;;  %6712 = vmatpush1.bf16.msra.mxu1 %v7572_v28 }
  0x65   : > { %v7575_v30 = vcombine.high %v556_v25, %v560_v26  ;;  %v420_v31 = vld [vmem:[#allocation4 + $0xc0] sm:$0xff]  ;;  %1852 = vmatprep.subr.bf16.mxu0 %v6284_v29  ;;  %v7578_v36 = vcombine.low %v556_v25, %v560_v26  ;;  %v437_v26 = vld [vmem:[#allocation4 + $0x148] sm:$0xff] }
  0x66   : > { %v424_v32 = vld [vmem:[#allocation4 + $0xe0] sm:$0xff]  ;;  %1853 = vmatpush1.bf16.msra.mxu0 %v6283_v35  ;;  %v6789_v35 = vld [vmem:[%s7547_s11 + $0xb0] ss:$12 sps:$4 sm:$0xff]  }
  0x67   : > { %v548_v33 = vld [vmem:[#allocation4 + $0x4c0] sm:$0xff]  ;;  %v6276_v37 = vcombine.high %v420_v31, %v424_v32  ;;  %6705 = vmatprep.subr.bf16.mxu1 %v7575_v30  ;;  %v6275_v43 = vcombine.low %v420_v31, %v424_v32 }
  0x68   : > { %v552_v34 = vld [vmem:[#allocation4 + $0x4e0] sm:$0xff]  ;;  %6713 = vmatpush1.bf16.msra.mxu1 %v7578_v36 }
  0x69   : > { %v7581_v38 = vcombine.high %v548_v33, %v552_v34  ;;  %v412_v39 = vld [vmem:[#allocation4 + $0x80] sm:$0xff]  ;;  %1854 = vmatprep.subr.bf16.mxu0 %v6276_v37  ;;  %v7584_v44 = vcombine.low %v548_v33, %v552_v34  ;;  %v6301_v33 = vcombine.low %v445_v16, %v449_v17  ;;  %v6294_v34 = vcombine.high %v437_v26, %v441_v27 }
  0x6a   : > { %v416_v40 = vld [vmem:[#allocation4 + $0xa0] sm:$0xff]  ;;  %1855 = vmatpush1.bf16.msra.mxu0 %v6275_v43 }
  0x6b   : > { %v540_v41 = vld [vmem:[#allocation4 + $0x480] sm:$0xff]  ;;  %v6268_v45 = vcombine.high %v412_v39, %v416_v40  ;;  %6706 = vmatprep.subr.bf16.mxu1 %v7581_v38  ;;  %v6267_v51 = vcombine.low %v412_v39, %v416_v40  ;;  %v429_v39 = vld [vmem:[#allocation4 + $0x108] sm:$0xff] }
  0x6c   : > { %v544_v42 = vld [vmem:[#allocation4 + $0x4a0] sm:$0xff]  ;;  %6714 = vmatpush1.bf16.msra.mxu1 %v7584_v44  ;;  %v433_v40 = vld [vmem:[#allocation4 + $0x128] sm:$0xff] }
  0x6d   : > { %v7587_v46 = vcombine.high %v540_v41, %v544_v42  ;;  %v404_v47 = vld [vmem:[#allocation4 + $0x40] sm:$0xff]  ;;  %1856 = vmatprep.subr.bf16.mxu0 %v6268_v45  ;;  %v7590_v52 = vcombine.low %v540_v41, %v544_v42  ;;  %v6293_v45 = vcombine.low %v437_v26, %v441_v27 }
  0x6e   : > { %v408_v48 = vld [vmem:[#allocation4 + $0x60] sm:$0xff]  ;;  %1857 = vmatpush1.bf16.msra.mxu0 %v6267_v51 }
  0x6f   : > { %v532_v49 = vld [vmem:[#allocation4 + $0x440] sm:$0xff]  ;;  %v6260_v53 = vcombine.high %v404_v47, %v408_v48  ;;  %6707 = vmatprep.subr.bf16.mxu1 %v7587_v46  ;;  %v6259_v60 = vcombine.low %v404_v47, %v408_v48  ;;  %v6286_v47 = vcombine.high %v429_v39, %v433_v40 }
  0x70   : > { %v536_v50 = vld [vmem:[#allocation4 + $0x460] sm:$0xff]  ;;  %6715 = vmatpush1.bf16.msra.mxu1 %v7590_v52 }
  0x71   : > { %v396_v54 = vld [vmem:[#allocation4] sm:$0xff]  ;;  %v7593_v55 = vcombine.high %v532_v49, %v536_v50  ;;  %1858 = vmatprep.subr.bf16.mxu0 %v6260_v53  ;;  %v7599_v61 = vcombine.low %v532_v49, %v536_v50  ;;  %v421_v49 = vld [vmem:[#allocation4 + $0xc8] sm:$0xff] }
  0x72   : > { %v400_v56 = vld [vmem:[#allocation4 + $0x20] sm:$0xff]  ;;  %1859 = vmatpush1.bf16.msra.mxu0 %v6259_v60  ;;  %v425_v50 = vld [vmem:[#allocation4 + $0xe8] sm:$0xff] }
  0x73   : > { %v524_v57 = vld [vmem:[#allocation4 + $0x400] sm:$0xff]  ;;  %v6252_v62 = vcombine.high %v396_v54, %v400_v56  ;;  %6708 = vmatprep.subr.bf16.mxu1 %v7593_v55  ;;  %v6251_v5 = vcombine.low %v396_v54, %v400_v56  ;;  %v6285_v56 = vcombine.low %v429_v39, %v433_v40  ;;  %v513_v39 = vld [vmem:[#allocation4 + $0x3a8] sm:$0xff] }
  0x74   : > { %v528_v58 = vld [vmem:[#allocation4 + $0x420] sm:$0xff]  ;;  %6716 = vmatpush1.bf16.msra.mxu1 %v7599_v61 }
  0x75   : > { %v7596_v59 = vld [vmem:[%s7547_s11 + $0x4] ss:$12 sps:$4 sm:$0xff]   ;;  %v7602_v1 = vcombine.high %v524_v57, %v528_v58  ;;  %1860 = vmatprep.subr.bf16.mxu0 %v6252_v62  ;;  %v7606_v6 = vcombine.low %v524_v57, %v528_v58  ;;  %v6790_v57 = vld [vmem:[%s7547_s11 + $0xc8] ss:$12 sps:$4 sm:$0xff]   ;;  %v6278_v58 = vcombine.high %v421_v49, %v425_v50 }
  0x76   : > { %v516_v63 = vld [vmem:[#allocation4 + $0x3c0] sm:$0xff]  ;;  %1878 = vmatprep.mubr.bf16.mxu0 %v7596_v59  ;;  %1861 = vmatpush1.bf16.msra.mxu0 %v6251_v5  ;;  %v413_v62 = vld [vmem:[#allocation4 + $0x88] sm:$0xff]  ;;  %v6277_v5 = vcombine.low %v421_v49, %v425_v50 }
  0x77   : > { %v520_v2 = vld [vmem:[#allocation4 + $0x3e0] sm:$0xff]  ;;  %6709 = vmatprep.subr.bf16.mxu1 %v7602_v1  ;;  %v7630_v49 = vld [vmem:[#allocation4 + $0x5e8] sm:$0xff] }
  0x78   : > { %v6372_v7 = vcombine.high %v516_v63, %v520_v2  ;;  %v508_v8 = vld [vmem:[#allocation4 + $0x380] sm:$0xff]  ;;  %v6371_v14 = vcombine.low %v516_v63, %v520_v2  ;;  %6717 = vmatpush1.bf16.msra.mxu1 %v7606_v6  ;;  %v417_v63 = vld [vmem:[#allocation4 + $0xa8] sm:$0xff] }
  0x79   : > { %v512_v11 = vld [vmem:[#allocation4 + $0x3a0] sm:$0xff]  ;;  %2232 = vmatprep.subr.bf16.mxu1 %v6310_v12  ;;  %v409_v12 = vld [vmem:[#allocation4 + $0x68] sm:$0xff]  ;;  %v6269_v17 = vcombine.low %v413_v62, %v417_v63 }
  0x7a   : > { %v6788_v13 = vld [vmem:[%s7547_s11 + $0x98] ss:$12 sps:$4 sm:$0xff]   ;;  %1862 = vmatprep.subr.bf16.mxu0 %v6372_v7  ;;  %v6364_v18 = vcombine.high %v508_v8, %v512_v11  ;;  %v6363_v25 = vcombine.low %v508_v8, %v512_v11  ;;  %v6270_v7 = vcombine.high %v413_v62, %v417_v63  ;;  %v405_v11 = vld [vmem:[#allocation4 + $0x48] sm:$0xff]  ;;  %v7650_v63 = vld [vmem:[%s7547_s11 + $0x30] ss:$12 sps:$4 sm:$0xff]  }
  0x7b   : > { %v500_v19 = vld [vmem:[#allocation4 + $0x340] sm:$0xff]  ;;  %2132 = vmatmul.mubr.bf16.vlgmr.msra.gmra.mxu1 %v6788_v13  ;;  %1863 = vmatpush2.bf16.msra.mxu0 %v6371_v14  ;;  %v6261_v26 = vcombine.low %v405_v11, %v409_v12  ;;  %v489_v62 = vld [vmem:[#allocation4 + $0x2e8] sm:$0xff] }
  0x7c   : > { %v504_v21 = vld [vmem:[#allocation4 + $0x360] sm:$0xff]  ;;  %1864 = vmatprep.subr.bf16.mxu0 %v6364_v18  ;;  %2141 = vmatprep.mubr.bf16.mxu1 %v10662_v0  ;;  %v6262_v18 = vcombine.high %v405_v11, %v409_v12  ;;  %v473_v11 = vld [vmem:[#allocation4 + $0x268] sm:$0xff] }
  0x7d   : > { %v6356_v29 = vcombine.high %v500_v19, %v504_v21  ;;  %v492_v31 = vld [vmem:[#allocation4 + $0x300] sm:$0xff]  ;;  %2233 = vmatpush1.bf16.msra.mxu1 %v6309_v23  ;;  %v6355_v37 = vcombine.low %v500_v19, %v504_v21  ;;  %v397_v23 = vld [vmem:[#allocation4 + $0x8] sm:$0xff] }
  0x7e   : > { %v496_v32 = vld [vmem:[#allocation4 + $0x320] sm:$0xff]  ;;  %2234 = vmatprep.subr.bf16.mxu1 %v6302_v24  ;;  %v401_v24 = vld [vmem:[#allocation4 + $0x28] sm:$0xff] }
  0x7f   : > { %1865 = vmatpush2.bf16.msra.mxu0 %v6363_v25  ;;  %v6348_v41 = vcombine.high %v492_v31, %v496_v32  ;;  %v484_v42 = vld [vmem:[#allocation4 + $0x2c0] sm:$0xff]  ;;  %v6347_v48 = vcombine.low %v492_v31, %v496_v32  ;;  %v6254_v27 = vcombine.high %v397_v23, %v401_v24  ;;  %v517_v31 = vld [vmem:[#allocation4 + $0x3c8] sm:$0xff] }
  0x80   : > { %1866 = vmatprep.subr.bf16.mxu0 %v6356_v29  ;;  %v488_v43 = vld [vmem:[#allocation4 + $0x2e0] sm:$0xff]  ;;  %v521_v32 = vld [vmem:[#allocation4 + $0x3e8] sm:$0xff] }
  0x81   : > { %2235 = vmatpush1.bf16.msra.mxu1 %v6301_v33  ;;  %v6340_v51 = vcombine.high %v484_v42, %v488_v43  ;;  %v476_v53 = vld [vmem:[#allocation4 + $0x280] sm:$0xff]  ;;  %v6339_v60 = vcombine.low %v484_v42, %v488_v43  ;;  %v6374_v40 = vcombine.high %v517_v31, %v521_v32  ;;  %v6373_v42 = vcombine.low %v517_v31, %v521_v32  ;;  %v501_v43 = vld [vmem:[#allocation4 + $0x348] sm:$0xff]  ;;  %v438_v32 = vld [vmem:[#allocation4 + $0x150] sm:$0xff] }
  0x82   : > { %2236 = vmatprep.subr.bf16.mxu1 %v6294_v34  ;;  %v480_v54 = vld [vmem:[#allocation4 + $0x2a0] sm:$0xff] }
  0x83   : > { %2142 = vmatmul.mubr.bf16.gmra.mxu1 %v6789_v35  ;;  %1867 = vmatpush2.bf16.msra.mxu0 %v6355_v37  ;;  %v6332_v2 = vcombine.high %v476_v53, %v480_v54  ;;  %v468_v3 = vld [vmem:[#allocation4 + $0x240] sm:$0xff]  ;;  %v6331_v8 = vcombine.low %v476_v53, %v480_v54  ;;  %v6253_v35 = vcombine.low %v397_v23, %v401_v24  ;;  %v509_v37 = vld [vmem:[#allocation4 + $0x388] sm:$0xff] }
  0x84   : > { %1868 = vmatprep.subr.bf16.mxu0 %v6348_v41  ;;  %2151 = vmatprep.mubr.bf16.mxu1 %v10662_v0  ;;  %v472_v4 = vld [vmem:[#allocation4 + $0x260] sm:$0xff]  ;;  %v7624_v41 = vld [vmem:[%s7547_s11 + $0x1c] ss:$12 sps:$4 sm:$0xff]  }
  0x85   : > { %2237 = vmatpush1.bf16.msra.mxu1 %v6293_v45  ;;  %v6324_v13 = vcombine.high %v468_v3, %v472_v4  ;;  %v460_v14 = vld [vmem:[#allocation4 + $0x200] sm:$0xff]  ;;  %v6323_v21 = vcombine.low %v468_v3, %v472_v4  ;;  %v6366_v45 = vcombine.high %v509_v37, %v513_v39  ;;  %v493_v54 = vld [vmem:[#allocation4 + $0x308] sm:$0xff] }
  0x86   : > { %2238 = vmatprep.subr.bf16.mxu1 %v6286_v47  ;;  %v464_v16 = vld [vmem:[#allocation4 + $0x220] sm:$0xff]  ;;  %v505_v47 = vld [vmem:[#allocation4 + $0x368] sm:$0xff] }
  0x87   : > { %1869 = vmatpush2.bf16.msra.mxu0 %v6347_v48  ;;  %v6791_v19 = vld [vmem:[%s7547_s11 + $0xe0] ss:$12 sps:$4 sm:$0xff]   ;;  %v6316_v25 = vcombine.high %v460_v14, %v464_v16  ;;  %v6315_v29 = vcombine.low %v460_v14, %v464_v16  ;;  %v6795_v34 = vld [vmem:[%s7547_s11 + $0xf8] ss:$12 sps:$4 sm:$0xff]  }
  0x88   : > { %1870 = vmatprep.subr.bf16.mxu0 %v6340_v51  ;;  %v7619_v33 = vld [vmem:[%s7547_s11] ss:$12 sps:$4 sm:$0xff]   ;;  %v6799_v51 = vld [vmem:[%s7547_s11 + $0x110] ss:$12 sps:$4 sm:$0xff]  }
  0x89   : > { %2239 = vmatpush1.bf16.msra.mxu1 %v6285_v56  ;;  %v7628_v48 = vld [vmem:[#allocation4 + $0x5c8] sm:$0xff]  ;;  %v7641_v53 = vld [vmem:[%s7547_s11 + $0x34] ss:$12 sps:$4 sm:$0xff]   ;;  %v6358_v56 = vcombine.high %v501_v43, %v505_v47  ;;  %v7669_v12 = vld [vmem:[%s7547_s11 + $0x64] ss:$12 sps:$4 sm:$0xff]  }
  0x8a   : > { %2240 = vmatprep.subr.bf16.mxu1 %v6278_v58  ;;  %v6437_v50 = vcombine.low %v7628_v48, %v7630_v49  ;;  %v6357_v58 = vcombine.low %v501_v43, %v505_v47  ;;  %v477_v3 = vld [vmem:[#allocation4 + $0x288] sm:$0xff]  ;;  %v6438_v23 = vcombine.high %v7628_v48, %v7630_v49  ;;  %v422_v47 = vld [vmem:[#allocation4 + $0xd0] sm:$0xff] }
  0x8b   : > { %2152 = vmatmul.mubr.bf16.gmra.mxu1 %v6790_v57  ;;  %1871 = vmatpush2.bf16.msra.mxu0 %v6339_v60  ;;  %v497_v57 = vld [vmem:[#allocation4 + $0x328] sm:$0xff] }
  0x8c   : > { %1872 = vmatprep.subr.bf16.mxu0 %v6332_v2  ;;  %2161 = vmatprep.mubr.bf16.mxu1 %v10662_v0  ;;  %v6350_v60 = vcombine.high %v493_v54, %v497_v57  ;;  %v7655_v2 = vld [vmem:[%s7547_s11 + $0x4c] ss:$12 sps:$4 sm:$0xff]  }
  0x8d   : > { %2241 = vmatpush1.bf16.msra.mxu1 %v6277_v5  ;;  %v481_v4 = vld [vmem:[#allocation4 + $0x2a8] sm:$0xff] }
  0x8e   : > { %2242 = vmatprep.subr.bf16.mxu1 %v6270_v7  ;;  %v465_v14 = vld [vmem:[#allocation4 + $0x228] sm:$0xff] }
  0x8f   : > { %1873 = vmatpush2.bf16.msra.mxu0 %v6331_v8  ;;  %v469_v8 = vld [vmem:[#allocation4 + $0x248] sm:$0xff] }
  0x90   : > { %1874 = vmatprep.subr.bf16.mxu0 %v6324_v13  ;;  %v461_v13 = vld [vmem:[#allocation4 + $0x208] sm:$0xff]  ;;  %v6326_v16 = vcombine.high %v469_v8, %v473_v11 }
  0x91   : > { %2243 = vmatpush1.bf16.msra.mxu1 %v6269_v17  ;;  %v6325_v17 = vcombine.low %v469_v8, %v473_v11 }
  0x92   : > { %2244 = vmatprep.subr.bf16.mxu1 %v6262_v18  ;;  %v454_v18 = vld [vmem:[#allocation4 + $0x1d0] sm:$0xff] }
  0x93   : > { %2162 = vmatmul.mubr.bf16.gmra.mxu1 %v6791_v19  ;;  %1875 = vmatpush2.bf16.msra.mxu0 %v6323_v21  ;;  %v458_v19 = vld [vmem:[#allocation4 + $0x1f0] sm:$0xff]  ;;  %v7683_v21 = vld [vmem:[%s7547_s11 + $0x7c] ss:$12 sps:$4 sm:$0xff]  }
  0x94   : > { %1876 = vmatprep.subr.bf16.mxu0 %v6316_v25  ;;  %2171 = vmatprep.mubr.bf16.mxu1 %v10662_v0  ;;  %v6312_v24 = vcombine.high %v454_v18, %v458_v19  ;;  %v7697_v25 = vld [vmem:[%s7547_s11 + $0x94] ss:$12 sps:$4 sm:$0xff]   ;;  %v6311_v31 = vcombine.low %v454_v18, %v458_v19 }
  0x95   : > { %2245 = vmatpush1.bf16.msra.mxu1 %v6261_v26  ;;  %v446_v26 = vld [vmem:[#allocation4 + $0x190] sm:$0xff] }
  0x96   : > { %2246 = vmatprep.subr.bf16.mxu1 %v6254_v27  ;;  %v7706_v27 = vld [vmem:[%s7547_s11 + $0xac] ss:$12 sps:$4 sm:$0xff]   ;;  %v7753_v19 = vld [vmem:[%s7547_s11 + $0x108] ss:$12 sps:$4 sm:$0xff]  }
  0x97   : > { %1877 = vmatpush2.bf16.msra.mxu0 %v6315_v29  ;;  %v450_v29 = vld [vmem:[#allocation4 + $0x1b0] sm:$0xff] }
  0x98   : > { %2039 = vmatprep.subr.bf16.mxu0 %v7558_v9  ;;  %v7635_v9 = vld [vmem:[%s7547_s11 + $0x18] ss:$12 sps:$4 sm:$0xff]  }
  0x99   : > { %2247 = vmatpush1.bf16.msra.mxu1 %v6253_v35  ;;  %v6304_v35 = vcombine.high %v446_v26, %v450_v29 }
  0x9a   : > { %1879 = vmatmul.mubr.bf16.vlgmr.msra.gmra.mxu0 %v7619_v33  ;;  %2248 = vmatprep.subr.bf16.mxu1 %v6374_v40  ;;  %v434_v40 = vld [vmem:[#allocation4 + $0x130] sm:$0xff] }
  0x9b   : > { %2172 = vmatmul.mubr.bf16.gmra.mxu1 %v6795_v34  ;;  %2040 = vmatpush1.bf16.msra.mxu0 %v7560_v10  ;;  %v6365_v10 = vcombine.low %v509_v37, %v513_v39  ;;  %v442_v34 = vld [vmem:[#allocation4 + $0x170] sm:$0xff]  ;;  %v6303_v37 = vcombine.low %v446_v26, %v450_v29 }
  0x9c   : > { %1888 = vmatprep.mubr.bf16.mxu0 %v7624_v41  ;;  %2181 = vmatprep.mubr.bf16.mxu1 %v10662_v0  ;;  %v430_v39 = vld [vmem:[#allocation4 + $0x110] sm:$0xff]  ;;  %v6296_v43 = vcombine.high %v438_v32, %v442_v34 }
  0x9d   : > { %2041 = vmatprep.subr.bf16.mxu0 %v7562_v15  ;;  %2249 = vmatpush2.bf16.msra.mxu1 %v6373_v42  ;;  %v485_v15 = vld [vmem:[#allocation4 + $0x2c8] sm:$0xff]  ;;  %v7716_v42 = vld [vmem:[%s7547_s11 + $0xc4] ss:$12 sps:$4 sm:$0xff]  }
  0x9e   : > { %2250 = vmatprep.subr.bf16.mxu1 %v6366_v45  ;;  %v6342_v5 = vcombine.high %v485_v15, %v489_v62  ;;  %v6341_v7 = vcombine.low %v485_v15, %v489_v62  ;;  %v6295_v45 = vcombine.low %v438_v32, %v442_v34  ;;  %v406_v15 = vld [vmem:[#allocation4 + $0x50] sm:$0xff]  ;;  %v7733_v62 = vld [vmem:[%s7547_s11 + $0xd8] ss:$12 sps:$4 sm:$0xff]  }
  0x9f   : > { %2042 = vmatpush1.bf16.msra.mxu0 %v7566_v20  ;;  %v6803_v20 = vld [vmem:[%s7547_s11 + $0x128] ss:$12 sps:$4 sm:$0xff]  }
  0xa0   : > { %2043 = vmatprep.subr.bf16.mxu0 %v7569_v22  ;;  %v6349_v22 = vcombine.low %v493_v54, %v497_v57  ;;  %v414_v54 = vld [vmem:[#allocation4 + $0x90] sm:$0xff] }
  0xa1   : > { %2251 = vmatpush2.bf16.msra.mxu1 %v6365_v10  ;;  %v6287_v10 = vcombine.low %v430_v39, %v434_v40  ;;  %v478_v32 = vld [vmem:[#allocation4 + $0x290] sm:$0xff] }
  0xa2   : > { %1889 = vmatmul.mubr.bf16.gmra.mxu0 %v7635_v9  ;;  %2252 = vmatprep.subr.bf16.mxu1 %v6358_v56  ;;  %v7726_v56 = vld [vmem:[%s7547_s11 + $0xdc] ss:$12 sps:$4 sm:$0xff]   ;;  %v482_v34 = vld [vmem:[#allocation4 + $0x2b0] sm:$0xff] }
  0xa3   : > { %2182 = vmatmul.mubr.bf16.gmra.mxu1 %v6799_v51  ;;  %1898 = vmatprep.mubr.bf16.mxu0 %v7641_v53  ;;  %v6288_v51 = vcombine.high %v430_v39, %v434_v40  ;;  %v6336_v39 = vcombine.high %v478_v32, %v482_v34  ;;  %v470_v40 = vld [vmem:[#allocation4 + $0x250] sm:$0xff] }
  0xa4   : > { %2191 = vmatprep.mubr.bf16.mxu1 %v10662_v0  ;;  %2044 = vmatpush1.bf16.msra.mxu0 %v7572_v28  ;;  %v6334_v28 = vcombine.high %v477_v3, %v481_v4 }
  0xa5   : > { %2253 = vmatpush2.bf16.msra.mxu1 %v6357_v58  ;;  %2045 = vmatprep.subr.bf16.mxu0 %v7575_v30  ;;  %v7664_v30 = vld [vmem:[%s7547_s11 + $0x48] ss:$12 sps:$4 sm:$0xff]  }
  0xa6   : > { %2254 = vmatprep.subr.bf16.mxu1 %v6350_v60  ;;  %v418_v58 = vld [vmem:[#allocation4 + $0xb0] sm:$0xff] }
  0xa8   : > { %2046 = vmatpush1.bf16.msra.mxu0 %v7578_v36  ;;  %v6807_v36 = vld [vmem:[%s7547_s11 + $0x140] ss:$12 sps:$4 sm:$0xff]  }
  0xa9   : > { %2255 = vmatpush2.bf16.msra.mxu1 %v6349_v22  ;;  %2047 = vmatprep.subr.bf16.mxu0 %v7581_v38  ;;  %v6333_v38 = vcombine.low %v477_v3, %v481_v4  ;;  %v398_v22 = vld [vmem:[#allocation4 + $0x10] sm:$0xff] }
  0xaa   : > { %1899 = vmatmul.mubr.bf16.gmra.mxu0 %v7650_v63  ;;  %2256 = vmatprep.subr.bf16.mxu1 %v6342_v5  ;;  %v402_v3 = vld [vmem:[#allocation4 + $0x30] sm:$0xff] }
  0xab   : > { %2192 = vmatmul.mubr.bf16.gmra.mxu1 %v6803_v20  ;;  %1908 = vmatprep.mubr.bf16.mxu0 %v7655_v2  ;;  %v6271_v20 = vcombine.low %v414_v54, %v418_v58  ;;  %v7736_v5 = vld [vmem:[%s7547_s11 + $0xf4] ss:$12 sps:$4 sm:$0xff]   ;;  %v6255_v8 = vcombine.low %v398_v22, %v402_v3 }
  0xac   : > { %2201 = vmatprep.mubr.bf16.mxu1 %v10662_v0  ;;  %2048 = vmatpush1.bf16.msra.mxu0 %v7584_v44  ;;  %v6318_v44 = vcombine.high %v461_v13, %v465_v14 }
  0xad   : > { %2257 = vmatpush2.bf16.msra.mxu1 %v6341_v7  ;;  %2049 = vmatprep.subr.bf16.mxu0 %v7587_v46  ;;  %v7678_v46 = vld [vmem:[%s7547_s11 + $0x60] ss:$12 sps:$4 sm:$0xff]  }
  0xae   : > { %2258 = vmatprep.subr.bf16.mxu1 %v6334_v28  ;;  %v518_v28 = vld [vmem:[#allocation4 + $0x3d0] sm:$0xff] }
  0xb0   : > { %2050 = vmatpush1.bf16.msra.mxu0 %v7590_v52  ;;  %v6811_v52 = vld [vmem:[%s7547_s11 + $0x158] ss:$12 sps:$4 sm:$0xff]  }
  0xb1   : > { %2259 = vmatpush2.bf16.msra.mxu1 %v6333_v38  ;;  %2051 = vmatprep.subr.bf16.mxu0 %v7593_v55  ;;  %v6317_v55 = vcombine.low %v461_v13, %v465_v14  ;;  %v510_v38 = vld [vmem:[#allocation4 + $0x390] sm:$0xff]  ;;  %v7746_v14 = vld [vmem:[%s7547_s11 + $0x10c] ss:$12 sps:$4 sm:$0xff]  }
  0xb2   : > { %1909 = vmatmul.mubr.bf16.gmra.mxu0 %v7664_v30  ;;  %2260 = vmatprep.subr.bf16.mxu1 %v6326_v16  ;;  %v514_v13 = vld [vmem:[#allocation4 + $0x3b0] sm:$0xff] }
  0xb3   : > { %2202 = vmatmul.mubr.bf16.gmra.mxu1 %v6807_v36  ;;  %1918 = vmatprep.mubr.bf16.mxu0 %v7669_v12  ;;  %v7743_v36 = vld [vmem:[%s7547_s11 + $0xf0] ss:$12 sps:$4 sm:$0xff]  }
  0xb4   : > { %2211 = vmatprep.mubr.bf16.mxu1 %v10662_v0  ;;  %2052 = vmatpush1.bf16.msra.mxu0 %v7599_v61  ;;  %v7693_v61 = vld [vmem:[%s7547_s11 + $0x78] ss:$12 sps:$4 sm:$0xff]  }
  0xb5   : > { %2261 = vmatpush2.bf16.msra.mxu1 %v6325_v17  ;;  %2053 = vmatprep.subr.bf16.mxu0 %v7602_v1  ;;  %v6815_v1 = vld [vmem:[%s7547_s11 + $0x170] ss:$12 sps:$4 sm:$0xff]  }
  0xb6   : > { %2262 = vmatprep.subr.bf16.mxu1 %v6318_v44  ;;  %v502_v17 = vld [vmem:[#allocation4 + $0x350] sm:$0xff]  ;;  %v6367_v44 = vcombine.low %v510_v38, %v514_v13 }
  0xb8   : > { %2054 = vmatpush1.bf16.msra.mxu0 %v7606_v6  ;;  %v7703_v6 = vld [vmem:[%s7547_s11 + $0x90] ss:$12 sps:$4 sm:$0xff]  }
  0xb9   : > { %2263 = vmatpush2.bf16.msra.mxu1 %v6317_v55  ;;  %2425 = vmatprep.subr.bf16.mxu0 %v6438_v23  ;;  %v498_v55 = vld [vmem:[#allocation4 + $0x330] sm:$0xff] }
  0xba   : > { %1919 = vmatmul.mubr.bf16.gmra.mxu0 %v7678_v46  ;;  %2618 = vmatprep.subr.bf16.mxu1 %v6312_v24  ;;  %v7756_v23 = vld [vmem:[%s7547_s11 + $0x124] ss:$12 sps:$4 sm:$0xff]  }
  0xbb   : > { %2212 = vmatmul.mubr.bf16.gmra.mxu1 %v6811_v52  ;;  %1928 = vmatprep.mubr.bf16.mxu0 %v7683_v21  ;;  %v494_v52 = vld [vmem:[#allocation4 + $0x310] sm:$0xff] }
  0xbc   : > { %2221 = vmatprep.mubr.bf16.mxu1 %v10662_v0  ;;  %v6351_v26 = vcombine.low %v494_v52, %v498_v55 }
  0xc2   : > { %1929 = vmatmul.mubr.bf16.gmra.mxu0 %v7693_v61 }
  0xc3   : > { %2222 = vmatmul.mubr.bf16.gmra.mxu1 %v6815_v1  ;;  %1938 = vmatprep.mubr.bf16.mxu0 %v7697_v25  ;;  %v486_v1 = vld [vmem:[#allocation4 + $0x2d0] sm:$0xff] }
  0xc4   : > { %2264 = vmatprep.mubr.bf16.mxu1 %v7596_v59  ;;  %v7713_v59 = vld [vmem:[%s7547_s11 + $0xa8] ss:$12 sps:$4 sm:$0xff]  }
  0xca   : > { %1939 = vmatmul.mubr.bf16.gmra.mxu0 %v7703_v6 }
  0xcb   : > { %2265 = vmatmul.mubr.bf16.vlgmr.msra.gmra.mxu1 %v7619_v33  ;;  %1948 = vmatprep.mubr.bf16.mxu0 %v7706_v27  ;;  %v426_v33 = vld [vmem:[#allocation4 + $0xf0] sm:$0xff] }
  0xcc   : > { %2274 = vmatprep.mubr.bf16.mxu1 %v7624_v41  ;;  %2619 = vmatpush1.bf16.msra.mxu1 %v6311_v31  ;;  %v7723_v41 = vld [vmem:[%s7547_s11 + $0xc0] ss:$12 sps:$4 sm:$0xff]   ;;  %v6280_v57 = vcombine.high %v422_v47, %v426_v33  ;;  %v6279_v60 = vcombine.low %v422_v47, %v426_v33  ;;  %v7773_v33 = vld [vmem:[%s7547_s11 + $0x138] ss:$12 sps:$4 sm:$0xff]  }
  0xcd   : > { %2620 = vmatprep.subr.bf16.mxu1 %v6304_v35  ;;  %v7763_v31 = vld [vmem:[%s7547_s11 + $0x120] ss:$12 sps:$4 sm:$0xff]   ;;  %v7766_v35 = vld [vmem:[%s7547_s11 + $0x13c] ss:$12 sps:$4 sm:$0xff]  }
  0xd0   : > { %2621 = vmatpush1.bf16.msra.mxu1 %v6303_v37 }
  0xd1   : > { %2622 = vmatprep.subr.bf16.mxu1 %v6296_v43  ;;  %v474_v43 = vld [vmem:[#allocation4 + $0x270] sm:$0xff] }
  0xd2   : > { %1949 = vmatmul.mubr.bf16.gmra.mxu0 %v7713_v59  ;;  %v6328_v47 = vcombine.high %v470_v40, %v474_v43 }
  0xd3   : > { %2275 = vmatmul.mubr.bf16.gmra.mxu1 %v7635_v9  ;;  %1958 = vmatprep.mubr.bf16.mxu0 %v7716_v42  ;;  %v6272_v9 = vcombine.high %v414_v54, %v418_v58  ;;  %v7776_v54 = vld [vmem:[%s7547_s11 + $0x154] ss:$12 sps:$4 sm:$0xff]  }
  0xd4   : > { %2284 = vmatprep.mubr.bf16.mxu1 %v7641_v53  ;;  %2623 = vmatpush1.bf16.msra.mxu1 %v6295_v45  ;;  %v410_v53 = vld [vmem:[#allocation4 + $0x70] sm:$0xff]  ;;  %v6335_v45 = vcombine.low %v478_v32, %v482_v34  ;;  %10694 = vst [vmem:[#allocation9_spill] sm:$0xff] %v7776_v54 }
  0xd5   : > { %2624 = vmatprep.subr.bf16.mxu1 %v6288_v51  ;;  %v6264_v4 = vcombine.high %v406_v15, %v410_v53  ;;  %v6263_v7 = vcombine.low %v406_v15, %v410_v53  ;;  %v462_v51 = vld [vmem:[#allocation4 + $0x210] sm:$0xff]  ;;  %v7786_v15 = vld [vmem:[%s7547_s11 + $0x16c] ss:$12 sps:$4 sm:$0xff]  }
  0xd6   : > { %10696 = vst [vmem:[#allocation11_spill] sm:$0xff] %v7786_v15  ;;  %v7788_v53 = vld [vmem:[#allocation4 + $0x1d8] sm:$0xff] }
  0xd7   : > { %v7832_v34 = vld [vmem:[%s7547_s11 + $0x50] ss:$12 sps:$4 sm:$0xff]  }
  0xd8   : > { %2625 = vmatpush1.bf16.msra.mxu1 %v6287_v10  ;;  %v466_v10 = vld [vmem:[#allocation4 + $0x230] sm:$0xff] }
  0xd9   : > { %2626 = vmatprep.subr.bf16.mxu1 %v6280_v57  ;;  %v6327_v57 = vcombine.low %v470_v40, %v474_v43  ;;  %v6320_v58 = vcombine.high %v462_v51, %v466_v10 }
  0xda   : > { %1959 = vmatmul.mubr.bf16.gmra.mxu0 %v7723_v41 }
  0xdb   : > { %2285 = vmatmul.mubr.bf16.gmra.mxu1 %v7650_v63  ;;  %1968 = vmatprep.mubr.bf16.mxu0 %v7726_v56  ;;  %v6256_v63 = vcombine.high %v398_v22, %v402_v3 }
  0xdc   : > { %2294 = vmatprep.mubr.bf16.mxu1 %v7655_v2  ;;  %2627 = vmatpush1.bf16.msra.mxu1 %v6279_v60  ;;  %v522_v2 = vld [vmem:[#allocation4 + $0x3f0] sm:$0xff]  ;;  %v6319_v60 = vcombine.low %v462_v51, %v466_v10 }
  0xdd   : > { %2628 = vmatprep.subr.bf16.mxu1 %v6272_v9  ;;  %v6376_v11 = vcombine.high %v518_v28, %v522_v2  ;;  %v6375_v16 = vcombine.low %v518_v28, %v522_v2  ;;  %v7783_v9 = vld [vmem:[%s7547_s11 + $0x150] ss:$12 sps:$4 sm:$0xff]   ;;  %v7808_v28 = vld [vmem:[%s7547_s11 + $0x8] ss:$12 sps:$4 sm:$0xff]  }
  0xde   : > { %10695 = vst [vmem:[#allocation10_spill] sm:$0xff] %v7783_v9 }
  0xe0   : > { %2629 = vmatpush1.bf16.msra.mxu1 %v6271_v20  ;;  %v7790_v20 = vld [vmem:[#allocation4 + $0x1f8] sm:$0xff] }
  0xe1   : > { %2630 = vmatprep.subr.bf16.mxu1 %v6264_v4  ;;  %v6314_v22 = vcombine.high %v7788_v53, %v7790_v20  ;;  %v6313_v3 = vcombine.low %v7788_v53, %v7790_v20  ;;  %v7801_v4 = vld [vmem:[%s7547_s11 + $0x168] ss:$12 sps:$4 sm:$0xff]  }
  0xe2   : > { %1969 = vmatmul.mubr.bf16.gmra.mxu0 %v7733_v62  ;;  %10697 = vst [vmem:[#allocation12_spill] sm:$0xff] %v7801_v4  ;;  %v546_v53 = vld [vmem:[#allocation4 + $0x4b0] sm:$0xff] }
  0xe3   : > { %2295 = vmatmul.mubr.bf16.gmra.mxu1 %v7664_v30  ;;  %1978 = vmatprep.mubr.bf16.mxu0 %v7736_v5  ;;  %v6368_v30 = vcombine.high %v510_v38, %v514_v13 }
  0xe4   : > { %2304 = vmatprep.mubr.bf16.mxu1 %v7669_v12  ;;  %2631 = vmatpush1.bf16.msra.mxu1 %v6263_v7  ;;  %v506_v12 = vld [vmem:[#allocation4 + $0x370] sm:$0xff]  ;;  %v573_v7 = vld [vmem:[#allocation4 + $0x588] sm:$0xff] }
  0xe5   : > { %2632 = vmatprep.subr.bf16.mxu1 %v6256_v63  ;;  %v6360_v18 = vcombine.high %v502_v17, %v506_v12  ;;  %v6359_v24 = vcombine.low %v502_v17, %v506_v12  ;;  %v577_v63 = vld [vmem:[#allocation4 + $0x5a8] sm:$0xff] }
  0xe6   : > { %v6430_v2 = vcombine.high %v573_v7, %v577_v63  ;;  %v6429_v38 = vcombine.low %v573_v7, %v577_v63  ;;  %v561_v17 = vld [vmem:[#allocation4 + $0x528] sm:$0xff] }
  0xe8   : > { %2633 = vmatpush1.bf16.msra.mxu1 %v6255_v8  ;;  %v565_v8 = vld [vmem:[#allocation4 + $0x548] sm:$0xff] }
  0xe9   : > { %2634 = vmatprep.subr.bf16.mxu1 %v6376_v11  ;;  %v569_v11 = vld [vmem:[#allocation4 + $0x568] sm:$0xff] }
  0xea   : > { %1979 = vmatmul.mubr.bf16.gmra.mxu0 %v7743_v36  ;;  %v6422_v13 = vcombine.high %v565_v8, %v569_v11  ;;  %v6421_v12 = vcombine.low %v565_v8, %v569_v11  ;;  %v7862_v8 = vld [vmem:[%s7547_s11 + $0x4] ss:$12 sps:$4 sm:$0xff]  }
  0xeb   : > { %2305 = vmatmul.mubr.bf16.gmra.mxu1 %v7678_v46  ;;  %1988 = vmatprep.mubr.bf16.mxu0 %v7746_v14  ;;  %v6352_v46 = vcombine.high %v494_v52, %v498_v55  ;;  %v553_v52 = vld [vmem:[#allocation4 + $0x4e8] sm:$0xff]  ;;  %10698 = vst [vmem:[#allocation13_spill] sm:$0xff] %v7862_v8 }
  0xec   : > { %2314 = vmatprep.mubr.bf16.mxu1 %v7683_v21  ;;  %2635 = vmatpush2.bf16.msra.mxu1 %v6375_v16  ;;  %v490_v21 = vld [vmem:[#allocation4 + $0x2f0] sm:$0xff]  ;;  %v7818_v16 = vld [vmem:[%s7547_s11 + $0x20] ss:$12 sps:$4 sm:$0xff]  }
  0xed   : > { %2636 = vmatprep.subr.bf16.mxu1 %v6368_v30  ;;  %v6344_v29 = vcombine.high %v486_v1, %v490_v21  ;;  %v6343_v37 = vcombine.low %v486_v1, %v490_v21  ;;  %v557_v30 = vld [vmem:[#allocation4 + $0x508] sm:$0xff] }
  0xee   : > { %v6413_v48 = vcombine.low %v557_v30, %v561_v17  ;;  %v541_v55 = vld [vmem:[#allocation4 + $0x488] sm:$0xff] }
  0xef   : > { %v533_v21 = vld [vmem:[#allocation4 + $0x448] sm:$0xff] }
  0xf0   : > { %2637 = vmatpush2.bf16.msra.mxu1 %v6367_v44  ;;  %v6414_v44 = vcombine.high %v557_v30, %v561_v17 }
  0xf1   : > { %2638 = vmatprep.subr.bf16.mxu1 %v6360_v18  ;;  %v549_v18 = vld [vmem:[#allocation4 + $0x4c8] sm:$0xff] }
  0xf2   : > { %1989 = vmatmul.mubr.bf16.gmra.mxu0 %v7753_v19  ;;  %v6406_v49 = vcombine.high %v549_v18, %v553_v52 }
  0xf3   : > { %2315 = vmatmul.mubr.bf16.gmra.mxu1 %v7693_v61  ;;  %1998 = vmatprep.mubr.bf16.mxu0 %v7756_v23 }
  0xf4   : > { %2324 = vmatprep.mubr.bf16.mxu1 %v7697_v25  ;;  %2639 = vmatpush2.bf16.msra.mxu1 %v6359_v24  ;;  %v545_v24 = vld [vmem:[#allocation4 + $0x4a8] sm:$0xff] }
  0xf5   : > { %2640 = vmatprep.subr.bf16.mxu1 %v6352_v46  ;;  %v6405_v46 = vcombine.low %v549_v18, %v553_v52  ;;  %v6398_v1 = vcombine.high %v541_v55, %v545_v24 }
  0xf8   : > { %2641 = vmatpush2.bf16.msra.mxu1 %v6351_v26  ;;  %v537_v26 = vld [vmem:[#allocation4 + $0x468] sm:$0xff] }
  0xf9   : > { %2642 = vmatprep.subr.bf16.mxu1 %v6344_v29  ;;  %v6397_v29 = vcombine.low %v541_v55, %v545_v24  ;;  %v6390_v32 = vcombine.high %v533_v21, %v537_v26  ;;  %v6389_v40 = vcombine.low %v533_v21, %v537_v26  ;;  %v439_v21 = vld [vmem:[#allocation4 + $0x158] sm:$0xff] }
  0xfa   : > { %1999 = vmatmul.mubr.bf16.gmra.mxu0 %v7763_v31  ;;  %v443_v26 = vld [vmem:[#allocation4 + $0x178] sm:$0xff] }
  0xfb   : > { %2325 = vmatmul.mubr.bf16.gmra.mxu1 %v7703_v6  ;;  %2008 = vmatprep.mubr.bf16.mxu0 %v7766_v35 }
  0xfc   : > { %2334 = vmatprep.mubr.bf16.mxu1 %v7706_v27  ;;  %2643 = vmatpush2.bf16.msra.mxu1 %v6343_v37  ;;  %v525_v37 = vld [vmem:[#allocation4 + $0x408] sm:$0xff] }
  0xfd   : > { %2644 = vmatprep.subr.bf16.mxu1 %v6336_v39  ;;  %v529_v39 = vld [vmem:[#allocation4 + $0x428] sm:$0xff] }
  0xfe   : > { %v6382_v43 = vcombine.high %v525_v37, %v529_v39  ;;  %v6381_v51 = vcombine.low %v525_v37, %v529_v39  ;;  %v558_v39 = vld [vmem:[#allocation4 + $0x510] sm:$0xff] }
 0x100   : > { %2645 = vmatpush2.bf16.msra.mxu1 %v6335_v45  ;;  %v582_v45 = vld [vmem:[#allocation4 + $0x5d0] sm:$0xff] }
 0x101   : > { %2646 = vmatprep.subr.bf16.mxu1 %v6328_v47  ;;  %v586_v47 = vld [vmem:[#allocation4 + $0x5f0] sm:$0xff] }
 0x102   : > { %2009 = vmatmul.mubr.bf16.gmra.mxu0 %v7773_v33  ;;  %v6440_v10 = vcombine.high %v582_v45, %v586_v47  ;;  %v6439_v17 = vcombine.low %v582_v45, %v586_v47  ;;  %v431_v45 = vld [vmem:[#allocation4 + $0x118] sm:$0xff] }
 0x103   : > { %2335 = vmatmul.mubr.bf16.gmra.mxu1 %v7713_v59  ;;  %2018 = vmatprep.mubr.bf16.mxu0 %v7776_v54 }
 0x104   : > { %2344 = vmatprep.mubr.bf16.mxu1 %v7716_v42  ;;  %2647 = vmatpush2.bf16.msra.mxu1 %v6327_v57  ;;  %v7839_v57 = vld [vmem:[%s7547_s11 + $0x68] ss:$12 sps:$4 sm:$0xff]  }
 0x105   : > { %2648 = vmatprep.subr.bf16.mxu1 %v6320_v58 }
 0x108   : > { %2649 = vmatpush2.bf16.msra.mxu1 %v6319_v60 }
 0x109   : > { %3004 = vmatprep.subr.bf16.mxu1 %v6314_v22  ;;  %v7850_v22 = vld [vmem:[%s7547_s11 + $0x80] ss:$12 sps:$4 sm:$0xff]  }
 0x10a   : > { %2019 = vmatmul.mubr.bf16.gmra.mxu0 %v7783_v9 }
 0x10b   : > { %2345 = vmatmul.mubr.bf16.gmra.mxu1 %v7723_v41  ;;  %2028 = vmatprep.mubr.bf16.mxu0 %v7786_v15 }
 0x10c   : > { %2354 = vmatprep.mubr.bf16.mxu1 %v7726_v56 }
 0x112   : > { %2029 = vmatmul.mubr.bf16.gmra.mxu0 %v7801_v4 }
 0x113   : > { %2355 = vmatmul.mubr.bf16.gmra.mxu1 %v7733_v62  ;;  %2071 = vmatprep.mubr.bf16.mxu0 %v10662_v0 }
 0x114   : > { %2364 = vmatprep.mubr.bf16.mxu1 %v7736_v5 }
 0x11a   : > { %2072 = vmatmul.mubr.bf16.vlgmr.msra.gmra.mxu0 %v7808_v28 }
 0x11b   : > { %2365 = vmatmul.mubr.bf16.gmra.mxu1 %v7743_v36  ;;  %2426 = vmatpush1.bf16.msra.mxu0 %v6437_v50  ;;  %v7825_v50 = vld [vmem:[%s7547_s11 + $0x38] ss:$12 sps:$4 sm:$0xff]  }
 0x11c   : > { %2427 = vmatprep.subr.bf16.mxu0 %v6430_v2  ;;  %2081 = vmatprep.mubr.bf16.mxu0 %v10662_v0 }
 0x11d   : > { %2374 = vmatprep.mubr.bf16.mxu1 %v7746_v14 }
 0x11f   : > { %2428 = vmatpush1.bf16.msra.mxu0 %v6429_v38  ;;  %v574_v38 = vld [vmem:[#allocation4 + $0x590] sm:$0xff] }
 0x120   : > { %2429 = vmatprep.subr.bf16.mxu0 %v6422_v13  ;;  %v578_v13 = vld [vmem:[#allocation4 + $0x5b0] sm:$0xff] }
 0x121   : > { %v6432_v52 = vcombine.high %v574_v38, %v578_v13 }
 0x122   : > { %2082 = vmatmul.mubr.bf16.gmra.mxu0 %v7818_v16 }
 0x123   : > { %2375 = vmatmul.mubr.bf16.gmra.mxu1 %v7753_v19  ;;  %2430 = vmatpush1.bf16.msra.mxu0 %v6421_v12  ;;  %v447_v12 = vld [vmem:[#allocation4 + $0x198] sm:$0xff] }
 0x124   : > { %2091 = vmatprep.mubr.bf16.mxu0 %v10662_v0  ;;  %2384 = vmatprep.mubr.bf16.mxu1 %v7756_v23 }
 0x125   : > { %2431 = vmatprep.subr.bf16.mxu0 %v6414_v44  ;;  %v451_v44 = vld [vmem:[#allocation4 + $0x1b8] sm:$0xff] }
 0x126   : > { %v6306_v55 = vcombine.high %v447_v12, %v451_v44 }
 0x127   : > { %2432 = vmatpush1.bf16.msra.mxu0 %v6413_v48  ;;  %v566_v48 = vld [vmem:[#allocation4 + $0x550] sm:$0xff] }
 0x128   : > { %2433 = vmatprep.subr.bf16.mxu0 %v6406_v49  ;;  %v570_v49 = vld [vmem:[#allocation4 + $0x570] sm:$0xff] }
 0x12a   : > { %2092 = vmatmul.mubr.bf16.gmra.mxu0 %v7825_v50 }
 0x12b   : > { %2385 = vmatmul.mubr.bf16.gmra.mxu1 %v7763_v31  ;;  %2101 = vmatprep.mubr.bf16.mxu0 %v10662_v0 }
 0x12c   : > { %2394 = vmatprep.mubr.bf16.mxu1 %v7766_v35  ;;  %2434 = vmatpush1.bf16.msra.mxu0 %v6405_v46  ;;  %v7875_v46 = vld [vmem:[%s7547_s11] ss:$12 sps:$4 sm:$0xff]  }
 0x12d   : > { %2435 = vmatprep.subr.bf16.mxu0 %v6398_v1  ;;  %10699 = vst [vmem:[#allocation14_spill] sm:$0xff] %v7875_v46  ;;  %v6431_v1 = vcombine.low %v574_v38, %v578_v13  ;;  %v7892_v38 = vld [vmem:[#allocation4 + $0x5f8] sm:$0xff]  ;;  %v6423_v13 = vcombine.low %v566_v48, %v570_v49 }
 0x12e   : > { %10702 = vst [vmem:[#allocation17_spill] sm:$0xff] %v7892_v38 }
 0x130   : > { %2436 = vmatpush1.bf16.msra.mxu0 %v6397_v29  ;;  %v7880_v29 = vld [vmem:[%s7547_s11 + $0x1c] ss:$12 sps:$4 sm:$0xff]  }
 0x131   : > { %2437 = vmatprep.subr.bf16.mxu0 %v6390_v32  ;;  %10700 = vst [vmem:[#allocation15_spill] sm:$0xff] %v7880_v29  ;;  %v6424_v32 = vcombine.high %v566_v48, %v570_v49  ;;  %v423_v48 = vld [vmem:[#allocation4 + $0xd8] sm:$0xff] }
 0x132   : > { %2102 = vmatmul.mubr.bf16.gmra.mxu0 %v7832_v34  ;;  %v427_v49 = vld [vmem:[#allocation4 + $0xf8] sm:$0xff] }
 0x133   : > { %2395 = vmatmul.mubr.bf16.gmra.mxu1 %v7773_v33  ;;  %2111 = vmatprep.mubr.bf16.mxu0 %v10662_v0 }
 0x134   : > { %2404 = vmatprep.mubr.bf16.mxu1 %v7776_v54  ;;  %2438 = vmatpush1.bf16.msra.mxu0 %v6389_v40  ;;  %v562_v40 = vld [vmem:[#allocation4 + $0x530] sm:$0xff]  ;;  %v403_v54 = vld [vmem:[#allocation4 + $0x38] sm:$0xff] }
 0x135   : > { %2439 = vmatprep.subr.bf16.mxu0 %v6382_v43  ;;  %v6298_v43 = vcombine.high %v439_v21, %v443_v26 }
 0x138   : > { %2440 = vmatpush1.bf16.msra.mxu0 %v6381_v51  ;;  %v435_v51 = vld [vmem:[#allocation4 + $0x138] sm:$0xff] }
 0x139   : > { %2811 = vmatprep.subr.bf16.mxu0 %v6440_v10  ;;  %v7890_v10 = vld [vmem:[#allocation4 + $0x5d8] sm:$0xff] }
 0x13a   : > { %2112 = vmatmul.mubr.bf16.gmra.mxu0 %v7839_v57  ;;  %10701 = vst [vmem:[#allocation16_spill] sm:$0xff] %v7890_v10 }
 0x13b   : > { %v7842_v58 = vpop.f32.mrf.mxu1  ;;  %2405 = vmatmul.mubr.bf16.gmra.mxu1 %v7783_v9  ;;  %2121 = vmatprep.mubr.bf16.mxu0 %v10662_v0 }
 0x13c   : > { %2414 = vmatprep.mubr.bf16.mxu1 %v7786_v15  ;;  %v530_v15 = vld [vmem:[#allocation4 + $0x430] sm:$0xff] }
 0x13d   : > { %v7847_v60 = vpop.f32.mrf.mxu1 }
 0x13f   : > { %v7852_v7 = vpop.f32.mrf.mxu1 }
 0x141   : > { %v7854_v63 = vpop.f32.mrf.mxu1 }
 0x142   : > { %2122 = vmatmul.mubr.bf16.gmra.mxu0 %v7850_v22 }
 0x143   : > { %v7857_v2 = vpop.f32.mrf.mxu1  ;;  %2415 = vmatmul.mubr.bf16.gmra.mxu1 %v7801_v4  ;;  %2457 = vmatprep.mubr.bf16.mxu0 %v10662_v0  ;;  %v526_v4 = vld [vmem:[#allocation4 + $0x410] sm:$0xff] }
 0x144   : > { %2650 = vmatprep.mubr.bf16.mxu1 %v7862_v8 }
 0x145   : > { %v7865_v11 = vpop.f32.mrf.mxu1 }
 0x147   : > { %v7867_v30 = vpop.f32.mrf.mxu1 }
 0x149   : > { %v7869_v18 = vpop.f32.mrf.mxu1 }
 0x14a   : > { %2458 = vmatmul.mubr.bf16.vlgmr.msra.gmra.mxu0 %v7808_v28  ;;  %v6305_v28 = vcombine.low %v447_v12, %v451_v44  ;;  %v550_v12 = vld [vmem:[#allocation4 + $0x4d0] sm:$0xff] }
 0x14b   : > { %v7872_v24 = vpop.f32.mrf.mxu1  ;;  %2651 = vmatmul.mubr.bf16.vlgmr.msra.gmra.mxu1 %v7875_v46  ;;  %2812 = vmatpush1.bf16.msra.mxu0 %v6439_v17  ;;  %v6297_v17 = vcombine.low %v439_v21, %v443_v26  ;;  %v554_v44 = vld [vmem:[#allocation4 + $0x4f0] sm:$0xff]  ;;  %v419_v46 = vld [vmem:[#allocation4 + $0xb8] sm:$0xff] }
 0x14c   : > { %2467 = vmatprep.mubr.bf16.mxu0 %v10662_v0  ;;  %2660 = vmatprep.mubr.bf16.mxu1 %v7880_v29  ;;  %v6408_v26 = vcombine.high %v550_v12, %v554_v44  ;;  %v6407_v8 = vcombine.low %v550_v12, %v554_v44  ;;  %v10707_v12 = vmov 0   ;;  %v407_v44 = vld [vmem:[#allocation4 + $0x58] sm:$0xff] }
 0x14d   : > { %v7883_v37 = vpop.f32.mrf.mxu1  ;;  %2813 = vmatprep.subr.bf16.mxu0 %v6432_v52  ;;  %3005 = vmatpush1.bf16.msra.mxu1 %v6313_v3  ;;  %v6416_v3 = vcombine.high %v558_v39, %v562_v40  ;;  %v6290_v52 = vcombine.high %v431_v45, %v435_v51 }
 0x14e   : > { %3006 = vmatprep.subr.bf16.mxu1 %v6306_v55 }
 0x14f   : > { %v7888_v47 = vpop.f32.mrf.mxu1  ;;  %2814 = vmatpush1.bf16.msra.mxu0 %v6431_v1  ;;  %v7902_v1 = vld [vmem:[%s7547_s11 + $0x18] ss:$12 sps:$4 sm:$0xff]  }
 0x150   : > { %2815 = vmatprep.subr.bf16.mxu0 %v6424_v32  ;;  %10703 = vst [vmem:[#allocation18_spill] sm:$0xff] %v7902_v1  ;;  %v7907_v32 = vld [vmem:[%s7547_s11 + $0x34] ss:$12 sps:$4 sm:$0xff]  }
 0x151   : > { %v7896_v20 = vpop.f32.mrf.mxu1  ;;  %3007 = vmatpush1.bf16.msra.mxu1 %v6305_v28  ;;  %10704 = vst [vmem:[#allocation19_spill] sm:$0xff] %v7907_v32  ;;  %v6289_v28 = vcombine.low %v431_v45, %v435_v51  ;;  %v534_v51 = vld [vmem:[#allocation4 + $0x450] sm:$0xff] }
 0x152   : > { %2468 = vmatmul.mubr.bf16.gmra.mxu0 %v7818_v16  ;;  %3008 = vmatprep.subr.bf16.mxu1 %v6298_v43  ;;  %v6415_v16 = vcombine.low %v558_v39, %v562_v40  ;;  %v542_v43 = vld [vmem:[#allocation4 + $0x490] sm:$0xff]  ;;  %v6281_v40 = vcombine.low %v423_v48, %v427_v49 }
 0x153   : > { %v7899_v55 = vpop.f32.mrf.mxu1  ;;  %2661 = vmatmul.mubr.bf16.gmra.mxu1 %v7902_v1  ;;  %2477 = vmatprep.mubr.bf16.mxu0 %v10662_v0  ;;  %v6282_v1 = vcombine.high %v423_v48, %v427_v49  ;;  %v415_v0 = vld [vmem:[#allocation4 + $0x98] sm:$0xff]  ;;  %v6400_v39 = vcombine.high %v542_v43, %v546_v53 }
 0x154   : > { %2670 = vmatprep.mubr.bf16.mxu1 %v7907_v32  ;;  %2816 = vmatpush1.bf16.msra.mxu0 %v6423_v13  ;;  %v6274_v45 = vcombine.high %v415_v0, %v419_v46  ;;  %v7929_v48 = vld [vmem:[%s7547_s11 + $0x4c] ss:$12 sps:$4 sm:$0xff]   ;;  %v6273_v49 = vcombine.low %v415_v0, %v419_v46  ;;  %v6384_v46 = vcombine.high %v526_v4, %v530_v15 }
 0x155   : > { %v7910_v21 = vpop.f32.mrf.mxu1  ;;  %2817 = vmatprep.subr.bf16.mxu0 %v6416_v3  ;;  %3009 = vmatpush1.bf16.msra.mxu1 %v6297_v17  ;;  %v538_v3 = vld [vmem:[#allocation4 + $0x470] sm:$0xff]  ;;  %10709 = vst [vmem:[#allocation23_spill] sm:$0xff] %v7929_v48 }
 0x156   : > { %3010 = vmatprep.subr.bf16.mxu1 %v6290_v52  ;;  %v7922_v52 = vld [vmem:[%s7547_s11 + $0x30] ss:$12 sps:$4 sm:$0xff]  }
 0x157   : > { %v7912_v29 = vpop.f32.mrf.mxu1  ;;  %10706 = vst [vmem:[#allocation21_spill] sm:$0xff] %v7922_v52 }
 0x158   : > { %2818 = vmatpush1.bf16.msra.mxu0 %v6415_v16  ;;  %v411_v16 = vld [vmem:[#allocation4 + $0x78] sm:$0xff] }
 0x159   : > { %v7914_v32 = vpop.f32.mrf.mxu1  ;;  %2819 = vmatprep.subr.bf16.mxu0 %v6408_v26  ;;  %3011 = vmatpush1.bf16.msra.mxu1 %v6289_v28  ;;  %v6392_v28 = vcombine.high %v534_v51, %v538_v3  ;;  %v6265_v0 = vcombine.low %v407_v44, %v411_v16 }
 0x15a   : > { %v7916_v13 = vpop.f32.mrf.mxu0  ;;  %2478 = vmatmul.mubr.bf16.gmra.mxu0 %v7825_v50  ;;  %3012 = vmatprep.subr.bf16.mxu1 %v6282_v1  ;;  %v6399_v50 = vcombine.low %v542_v43, %v546_v53 }
 0x15b   : > { %10705 = vst [vmem:[#allocation20_spill] sm:$0xff] %v7916_v13  ;;  %v7919_v17 = vpop.f32.mrf.mxu1  ;;  %2671 = vmatmul.mubr.bf16.gmra.mxu1 %v7922_v52  ;;  %2487 = vmatprep.mubr.bf16.mxu0 %v10707_v12  ;;  %v6266_v52 = vcombine.high %v407_v44, %v411_v16  ;;  %v7955_v44 = vld [vmem:[%s7547_s11 + $0x64] ss:$12 sps:$4 sm:$0xff]  }
 0x15c   : > { %v7926_v26 = vpop.f32.mrf.mxu0  ;;  %2680 = vmatprep.mubr.bf16.mxu1 %v7929_v48  ;;  %2820 = vmatpush1.bf16.msra.mxu0 %v6407_v8  ;;  %v6391_v8 = vcombine.low %v534_v51, %v538_v3  ;;  %v519_v51 = vld [vmem:[#allocation4 + $0x3d8] sm:$0xff]  ;;  %10715 = vst [vmem:[#allocation29_spill] sm:$0xff] %v7955_v44 }
 0x15d   : > { %10708 = vst [vmem:[#allocation22_spill] sm:$0xff] %v7926_v26  ;;  %v7932_v1 = vpop.f32.mrf.mxu1  ;;  %2821 = vmatprep.subr.bf16.mxu0 %v6400_v39  ;;  %3013 = vmatpush1.bf16.msra.mxu1 %v6281_v40  ;;  %v399_v26 = vld [vmem:[#allocation4 + $0x18] sm:$0xff] }
 0x15e   : > { %v7934_v13 = vpop.f32.mrf.mxu0  ;;  %3014 = vmatprep.subr.bf16.mxu1 %v6274_v45  ;;  %v6258_v39 = vcombine.high %v399_v26, %v403_v54  ;;  %v7948_v45 = vld [vmem:[%s7547_s11 + $0x48] ss:$12 sps:$4 sm:$0xff]   ;;  %v523_v3 = vld [vmem:[#allocation4 + $0x3f8] sm:$0xff]  ;;  %v6257_v16 = vcombine.low %v399_v26, %v403_v54 }
 0x15f   : > { %10710 = vst [vmem:[#allocation24_spill] sm:$0xff] %v7934_v13  ;;  %v7936_v9 = vpop.f32.mrf.mxu1  ;;  %10713 = vst [vmem:[#allocation27_spill] sm:$0xff] %v7948_v45  ;;  %v6377_v54 = vcombine.low %v519_v51, %v523_v3 }
 0x160   : > { %v7938_v48 = vpop.f32.mrf.mxu0  ;;  %2822 = vmatpush1.bf16.msra.mxu0 %v6399_v50 }
 0x161   : > { %10711 = vst [vmem:[#allocation25_spill] sm:$0xff] %v7938_v48  ;;  %v7940_v53 = vpop.f32.mrf.mxu1  ;;  %3015 = vmatpush1.bf16.msra.mxu1 %v6273_v49  ;;  %2823 = vmatprep.subr.bf16.mxu0 %v6392_v28  ;;  %v6442_v49 = vcombine.high %v7890_v10, %v7892_v38  ;;  %v515_v48 = vld [vmem:[#allocation4 + $0x3b8] sm:$0xff] }
 0x162   : > { %v7942_v43 = vpop.f32.mrf.mxu0  ;;  %2488 = vmatmul.mubr.bf16.gmra.mxu0 %v7832_v34  ;;  %3016 = vmatprep.subr.bf16.mxu1 %v6266_v52  ;;  %v6383_v34 = vcombine.low %v526_v4, %v530_v15 }
 0x163   : > { %10712 = vst [vmem:[#allocation26_spill] sm:$0xff] %v7942_v43  ;;  %v7945_v40 = vpop.f32.mrf.mxu1  ;;  %2681 = vmatmul.mubr.bf16.gmra.mxu1 %v7948_v45  ;;  %2497 = vmatprep.mubr.bf16.mxu0 %v10707_v12  ;;  %v6378_v45 = vcombine.high %v519_v51, %v523_v3  ;;  %v511_v43 = vld [vmem:[#allocation4 + $0x398] sm:$0xff] }
 0x164   : > { %v7952_v50 = vpop.f32.mrf.mxu0  ;;  %2690 = vmatprep.mubr.bf16.mxu1 %v7955_v44  ;;  %2824 = vmatpush1.bf16.msra.mxu0 %v6391_v8  ;;  %v6370_v26 = vcombine.high %v511_v43, %v515_v48  ;;  %v7983_v51 = vld [vmem:[%s7547_s11 + $0x7c] ss:$12 sps:$4 sm:$0xff]  }
 0x165   : > { %10714 = vst [vmem:[#allocation28_spill] sm:$0xff] %v7952_v50  ;;  %v7958_v52 = vpop.f32.mrf.mxu1  ;;  %3017 = vmatpush1.bf16.msra.mxu1 %v6265_v0  ;;  %2825 = vmatprep.subr.bf16.mxu0 %v6384_v46  ;;  %v7976_v0 = vld [vmem:[%s7547_s11 + $0x60] ss:$12 sps:$4 sm:$0xff]   ;;  %v503_v46 = vld [vmem:[#allocation4 + $0x358] sm:$0xff]  ;;  %10721 = vst [vmem:[#allocation35_spill] sm:$0xff] %v7983_v51 }
 0x166   : > { %v7962_v28 = vpop.f32.mrf.mxu0  ;;  %3018 = vmatprep.subr.bf16.mxu1 %v6258_v39  ;;  %10719 = vst [vmem:[#allocation33_spill] sm:$0xff] %v7976_v0  ;;  %v507_v39 = vld [vmem:[#allocation4 + $0x378] sm:$0xff] }
 0x167   : > { %10716 = vst [vmem:[#allocation30_spill] sm:$0xff] %v7962_v28  ;;  %v7964_v50 = vpop.f32.mrf.mxu1 }
 0x168   : > { %v7966_v44 = vpop.f32.mrf.mxu0  ;;  %2826 = vmatpush1.bf16.msra.mxu0 %v6383_v34 }
 0x169   : > { %10717 = vst [vmem:[#allocation31_spill] sm:$0xff] %v7966_v44  ;;  %v7968_v15 = vpop.f32.mrf.mxu1  ;;  %3019 = vmatpush1.bf16.msra.mxu1 %v6257_v16  ;;  %3197 = vmatprep.subr.bf16.mxu0 %v6442_v49  ;;  %v6362_v16 = vcombine.high %v503_v46, %v507_v39 }
 0x16a   : > { %v7970_v4 = vpop.f32.mrf.mxu0  ;;  %2498 = vmatmul.mubr.bf16.gmra.mxu0 %v7839_v57  ;;  %3020 = vmatprep.subr.bf16.mxu1 %v6378_v45  ;;  %v6369_v57 = vcombine.low %v511_v43, %v515_v48 }
 0x16b   : > { %10718 = vst [vmem:[#allocation32_spill] sm:$0xff] %v7970_v4  ;;  %v7973_v8 = vpop.f32.mrf.mxu1  ;;  %2691 = vmatmul.mubr.bf16.gmra.mxu1 %v7976_v0  ;;  %2507 = vmatprep.mubr.bf16.mxu0 %v10707_v12  ;;  %v495_v0 = vld [vmem:[#allocation4 + $0x318] sm:$0xff] }
 0x16c   : > { %v7980_v34 = vpop.f32.mrf.mxu0  ;;  %2700 = vmatprep.mubr.bf16.mxu1 %v7983_v51  ;;  %v499_v4 = vld [vmem:[#allocation4 + $0x338] sm:$0xff] }
 0x16d   : > { %10720 = vst [vmem:[#allocation34_spill] sm:$0xff] %v7980_v34  ;;  %v7986_v3 = vpop.f32.mrf.mxu1  ;;  %3021 = vmatpush2.bf16.msra.mxu1 %v6377_v54  ;;  %v6361_v34 = vcombine.low %v503_v46, %v507_v39  ;;  %v6354_v48 = vcombine.high %v495_v0, %v499_v4  ;;  %v487_v54 = vld [vmem:[#allocation4 + $0x2d8] sm:$0xff]  ;;  %v6353_v39 = vcombine.low %v495_v0, %v499_v4 }
 0x16e   : > { %v7988_v45 = vpop.f32.mrf.mxu0  ;;  %3022 = vmatprep.subr.bf16.mxu1 %v6370_v26  ;;  %v491_v26 = vld [vmem:[#allocation4 + $0x2f8] sm:$0xff] }
 0x16f   : > { %10722 = vst [vmem:[#allocation36_spill] sm:$0xff] %v7988_v45  ;;  %v7990_v49 = vpop.f32.mrf.mxu1 }
 0x170   : > { %v7992_v44 = vpop.f32.mrf.mxu0 }
 0x171   : > { %10723 = vst [vmem:[#allocation37_spill] sm:$0xff] %v7992_v44  ;;  %v7994_v28 = vpop.f32.mrf.mxu1  ;;  %3023 = vmatpush2.bf16.msra.mxu1 %v6369_v57  ;;  %v6346_v57 = vcombine.high %v487_v54, %v491_v26 }
 0x172   : > { %v7996_v13 = vpop.f32.mrf.mxu0  ;;  %2508 = vmatmul.mubr.bf16.gmra.mxu0 %v7850_v22  ;;  %3024 = vmatprep.subr.bf16.mxu1 %v6362_v16 }
 0x173   : > { %10724 = vst [vmem:[#allocation38_spill] sm:$0xff] %v7996_v13  ;;  %v7999_v43 = vpop.f32.mrf.mxu1  ;;  %2701 = vmatmul.mubr.bf16.gmra.mxu1 %v7693_v61  ;;  %2517 = vmatprep.mubr.bf16.mxu0 %v10707_v12  ;;  %v479_v61 = vld [vmem:[#allocation4 + $0x298] sm:$0xff] }
 0x174   : > { %v8003_v45 = vpop.f32.mrf.mxu0  ;;  %2710 = vmatprep.mubr.bf16.mxu1 %v7697_v25  ;;  %v483_v13 = vld [vmem:[#allocation4 + $0x2b8] sm:$0xff] }
 0x175   : > { %10725 = vst [vmem:[#allocation39_spill] sm:$0xff] %v8003_v45  ;;  %v8006_v46 = vpop.f32.mrf.mxu1  ;;  %3025 = vmatpush2.bf16.msra.mxu1 %v6361_v34  ;;  %v6345_v45 = vcombine.low %v487_v54, %v491_v26  ;;  %v8019_v25 = vld [vmem:[%s7547_s11 + $0x98] ss:$12 sps:$4 sm:$0xff]   ;;  %v6338_v4 = vcombine.high %v479_v61, %v483_v13  ;;  %v590_v54 = vlaneseq }
 0x176   : > { %v8008_v22 = vpop.f32.mrf.mxu0  ;;  %3026 = vmatprep.subr.bf16.mxu1 %v6354_v48  ;;  %10730 = vst [vmem:[#allocation44_spill] sm:$0xff] %v8019_v25  ;;  %v471_v34 = vld [vmem:[#allocation4 + $0x258] sm:$0xff] }
 0x177   : > { %10726 = vst [vmem:[#allocation40_spill] sm:$0xff] %v8008_v22  ;;  %v8010_v16 = vpop.f32.mrf.mxu1  ;;  %v475_v48 = vld [vmem:[#allocation4 + $0x278] sm:$0xff]  ;;  %v8037_v10 = vshrl.u32 %v590_v54, 7 }
 0x178   : > { %v8012_v44 = vpop.f32.mrf.mxu0  ;;  %v467_v22 = vld [vmem:[#allocation4 + $0x238] sm:$0xff] }
 0x179   : > { %10727 = vst [vmem:[#allocation41_spill] sm:$0xff] %v8012_v44  ;;  %v8014_v51 = vpop.f32.mrf.mxu1  ;;  %3027 = vmatpush2.bf16.msra.mxu1 %v6353_v39  ;;  %v6337_v39 = vcombine.low %v479_v61, %v483_v13  ;;  %10735 = vst [vmem:[#allocation49_spill] sm:$0xff] %v8037_v10  ;;  %v10680_v54 = vsub.s32 0, %v8037_v10 }
 0x17a   : > { %10728 = vst [vmem:[#allocation42_spill] sm:$0xff] %v8014_v51  ;;  %v8016_v38 = vpop.f32.mrf.mxu0  ;;  %2518 = vmatmul.mubr.bf16.gmra.mxu0 %v8019_v25  ;;  %3028 = vmatprep.subr.bf16.mxu1 %v6346_v57  ;;  %v6330_v25 = vcombine.high %v471_v34, %v475_v48 }
 0x17b   : > { %10729 = vst [vmem:[#allocation43_spill] sm:$0xff] %v8016_v38  ;;  %v8022_v0 = vpop.f32.mrf.mxu1  ;;  %2711 = vmatmul.mubr.bf16.gmra.mxu1 %v7703_v6  ;;  %2527 = vmatprep.mubr.bf16.mxu0 %v10707_v12  ;;  %v463_v6 = vld [vmem:[#allocation4 + $0x218] sm:$0xff] }
 0x17c   : > { %10731 = vst [vmem:[#allocation45_spill] sm:$0xff] %v8022_v0  ;;  %v8026_v44 = vpop.f32.mrf.mxu0  ;;  %2720 = vmatprep.mubr.bf16.mxu1 %v7706_v27  ;;  %v6329_v27 = vcombine.low %v471_v34, %v475_v48  ;;  %v6322_v13 = vcombine.high %v463_v6, %v467_v22  ;;  %v6321_v48 = vcombine.low %v463_v6, %v467_v22  ;;  %v6854_v6 = vld [vmem:[#allocation6 + $0x74] ss:$8 sps:$4 sm:$0xff]  }
 0x17d   : > { %10732 = vst [vmem:[#allocation46_spill] sm:$0xff] %v8026_v44  ;;  %v8029_v26 = vpop.f32.mrf.mxu1  ;;  %3029 = vmatpush2.bf16.msra.mxu1 %v6345_v45  ;;  %v7200_v45 = vld [vmem:[%s7547_s11 + $0xb0] ss:$12 sps:$4 sm:$0xff]  }
 0x17e   : > { %v8031_v57 = vpop.f32.mrf.mxu0  ;;  %3030 = vmatprep.subr.bf16.mxu1 %v6338_v4 }
 0x17f   : > { %10733 = vst [vmem:[#allocation47_spill] sm:$0xff] %v8031_v57  ;;  %v8033_v38 = vpop.f32.mrf.mxu1 }
 0x180   : > { %v8035_v0 = vpop.f32.mrf.mxu0 }
 0x181   : > { %10734 = vst [vmem:[#allocation48_spill] sm:$0xff] %v8035_v0  ;;  %v8039_v44 = vpop.f32.mrf.mxu1  ;;  %3031 = vmatpush2.bf16.msra.mxu1 %v6337_v39 }
 0x182   : > { %v8041_v51 = vpop.f32.mrf.mxu0  ;;  %2528 = vmatmul.mubr.bf16.gmra.mxu0 %v7200_v45  ;;  %3032 = vmatprep.subr.bf16.mxu1 %v6330_v25  ;;  %v8057_v25 = vld [vmem:[%s10650_s2] sm:$0xff] }
 0x183   : > { %10736 = vst [vmem:[#allocation50_spill] sm:$0xff] %v8041_v51  ;;  %v8044_v61 = vpop.f32.mrf.mxu1  ;;  %2721 = vmatmul.mubr.bf16.gmra.mxu1 %v7713_v59  ;;  %2537 = vmatprep.mubr.bf16.mxu0 %v10707_v12  ;;  %10738 = vst [vmem:[#allocation52_spill] sm:$0xff] %v8057_v25  ;;  %v10681_v59 = vsub.s32 1, %v8037_v10  ;;  %v7201_v51 = vld [vmem:[%s7547_s11 + $0xc8] ss:$12 sps:$4 sm:$0xff]  }
 0x184   : > { %v8048_v4 = vpop.f32.mrf.mxu0  ;;  %2730 = vmatprep.mubr.bf16.mxu1 %v7716_v42 }
 0x185   : > { %10737 = vst [vmem:[#allocation51_spill] sm:$0xff] %v8048_v4  ;;  %v8052_v34 = vpop.f32.mrf.mxu1  ;;  %3033 = vmatpush2.bf16.msra.mxu1 %v6329_v27  ;;  %v8069_v4 = vrot.slane %v8057_v25, %v10680_v54 }
 0x186   : > { %v8059_v39 = vpop.f32.mrf.mxu0  ;;  %3034 = vmatprep.subr.bf16.mxu1 %v6322_v13  ;;  %v8077_v13 = vrot.slane %v8057_v25, %v10681_v59 }
 0x187   : > { %10739 = vst [vmem:[#allocation53_spill] sm:$0xff] %v8059_v39  ;;  %v8062_v45 = vpop.f32.mrf.mxu1 }
 0x188   : > { %v8064_v42 = vpop.f32.mrf.mxu0 }
 0x189   : > { %10740 = vst [vmem:[#allocation54_spill] sm:$0xff] %v8064_v42  ;;  %v8071_v22 = vpop.f32.mrf.mxu1  ;;  %3035 = vmatpush2.bf16.msra.mxu1 %v6321_v48 }
 0x18a   : > { %10741 = vst [vmem:[#allocation55_spill] sm:$0xff] %v8071_v22  ;;  %v1940_v27 = vpop.f32.mrf.mxu0  ;;  %2538 = vmatmul.mubr.bf16.gmra.mxu0 %v7201_v51  ;;  %4554 = vmatprep.subr.bf16.mxu1 %v6854_v6 }
 0x18b   : > { %v1941_v39 = vadd.f32 %v1940_v27, %v8069_v4  ;;  %v8080_v42 = vpop.f32.mrf.mxu1  ;;  %2731 = vmatmul.mubr.bf16.gmra.mxu1 %v7723_v41  ;;  %2547 = vmatprep.mubr.bf16.mxu0 %v10707_v12 }
 0x18c   : > { %10742 = vst [vmem:[#allocation56_spill] sm:$0xff] %v8080_v42  ;;  %v1942_v54 = vpop.f32.mrf.mxu0  ;;  %2740 = vmatprep.mubr.bf16.mxu1 %v7726_v56 }
 0x18d   : > { %v1943_v51 = vadd.f32 %v1942_v54, %v8077_v13  ;;  %v8086_v48 = vpop.f32.mrf.mxu1  ;;  %v2134_v59 = vadd.f32 %v7842_v58, %v1941_v39  ;;  %v7202_v54 = vld [vmem:[%s7547_s11 + $0xe0] ss:$12 sps:$4 sm:$0xff]  }
 0x18e   : > { %10743 = vst [vmem:[#allocation57_spill] sm:$0xff] %v8086_v48  ;;  %v1944_v0 = vpop.f32.mrf.mxu0 }
 0x18f   : > { %v1945_v27 = vadd.f32 %v1944_v0, %v8069_v4  ;;  %v8090_v25 = vpop.f32.mrf.mxu1  ;;  %v2136_v41 = vadd.f32 %v7847_v60, %v1943_v51  ;;  %v3486_v48 = vmax.f32 %v2134_v59, 0.0 }
 0x190   : > { %v1946_v42 = vpop.f32.mrf.mxu0 }
 0x191   : > { %v2138_v10 = vadd.f32 %v7852_v7, %v1945_v27  ;;  %v1947_v57 = vadd.f32 %v1946_v42, %v8077_v13  ;;  %v8095_v56 = vpop.f32.mrf.mxu1  ;;  %v3487_v7 = vmax.f32 %v2136_v41, 0.0 }
 0x192   : > { %v1950_v6 = vpop.f32.mrf.mxu0  ;;  %2548 = vmatmul.mubr.bf16.gmra.mxu0 %v7202_v54 }
 0x193   : > { %v3494_v22 = vmax.f32 %v2138_v10, 0.0  ;;  %v2140_v58 = vadd.f32 %v7854_v63, %v1947_v57  ;;  %v1951_v0 = vadd.f32 %v1950_v6, %v8069_v4  ;;  %v8100_v39 = vpop.f32.mrf.mxu1  ;;  %2741 = vmatmul.mubr.bf16.gmra.mxu1 %v7733_v62  ;;  %2557 = vmatprep.mubr.bf16.mxu0 %v10707_v12 }
 0x194   : > { %v1952_v60 = vpop.f32.mrf.mxu0  ;;  %2750 = vmatprep.mubr.bf16.mxu1 %v7736_v5 }
 0x195   : > { %v8105_v42 = vpack.c.bf16 %v3494_v22, %v3486_v48  ;;  %v3495_v51 = vmax.f32 %v2140_v58, 0.0  ;;  %v1953_v10 = vadd.f32 %v1952_v60, %v8077_v13  ;;  %v8108_v59 = vpop.f32.mrf.mxu1  ;;  %v2144_v57 = vadd.f32 %v7857_v2, %v1951_v0  ;;  %v7203_v60 = vld [vmem:[%s7547_s11 + $0xf8] ss:$12 sps:$4 sm:$0xff]  }
 0x196   : > { %v1954_v63 = vpop.f32.mrf.mxu0 }
 0x197   : > { %10744 = vst [vmem:[#allocation58_spill] sm:$0xff] %v8105_v42  ;;  %v1955_v27 = vadd.f32 %v1954_v63, %v8069_v4  ;;  %v8112_v62 = vpop.f32.mrf.mxu1  ;;  %v8114_v6 = vpack.c.bf16 %v3495_v51, %v3487_v7  ;;  %v2146_v5 = vadd.f32 %v7865_v11, %v1953_v10  ;;  %v3502_v42 = vmax.f32 %v2144_v57, 0.0 }
 0x198   : > { %v1956_v54 = vpop.f32.mrf.mxu0 }
 0x199   : > { %10745 = vst [vmem:[#allocation59_spill] sm:$0xff] %v8114_v6  ;;  %v2148_v22 = vadd.f32 %v7867_v30, %v1955_v27  ;;  %v1957_v48 = vadd.f32 %v1956_v54, %v8077_v13  ;;  %v8119_v41 = vpop.f32.mrf.mxu1  ;;  %v3503_v30 = vmax.f32 %v2146_v5, 0.0 }
 0x19a   : > { %v1960_v58 = vpop.f32.mrf.mxu0  ;;  %2558 = vmatmul.mubr.bf16.gmra.mxu0 %v7203_v60 }
 0x19b   : > { %v3510_v2 = vmax.f32 %v2148_v22, 0.0  ;;  %v2150_v0 = vadd.f32 %v7869_v18, %v1957_v48  ;;  %v1961_v63 = vadd.f32 %v1960_v58, %v8069_v4  ;;  %v8124_v7 = vpop.f32.mrf.mxu1  ;;  %2751 = vmatmul.mubr.bf16.gmra.mxu1 %v7743_v36  ;;  %2567 = vmatprep.mubr.bf16.mxu0 %v10707_v12 }
 0x19c   : > { %v1962_v11 = vpop.f32.mrf.mxu0  ;;  %2760 = vmatprep.mubr.bf16.mxu1 %v7746_v14 }
 0x19d   : > { %v8129_v51 = vpack.c.bf16 %v3510_v2, %v3502_v42  ;;  %v3511_v10 = vmax.f32 %v2150_v0, 0.0  ;;  %v1963_v57 = vadd.f32 %v1962_v11, %v8077_v13  ;;  %v8132_v27 = vpop.f32.mrf.mxu1  ;;  %v2154_v54 = vadd.f32 %v7872_v24, %v1961_v63  ;;  %v7204_v0 = vld [vmem:[%s7547_s11 + $0x110] ss:$12 sps:$4 sm:$0xff]  }
 0x19e   : > { %v1964_v18 = vpop.f32.mrf.mxu0 }
 0x19f   : > { %10746 = vst [vmem:[#allocation60_spill] sm:$0xff] %v8129_v51  ;;  %v1965_v22 = vadd.f32 %v1964_v18, %v8069_v4  ;;  %v8136_v36 = vpop.f32.mrf.mxu1  ;;  %v8138_v48 = vpack.c.bf16 %v3511_v10, %v3503_v30  ;;  %v2156_v14 = vadd.f32 %v7883_v37, %v1963_v57  ;;  %v3518_v11 = vmax.f32 %v2154_v54, 0.0  ;;  %v10768_v51 = vld [vmem:[#allocation17_spill] sm:$0xff] }
 0x1a0   : > { %v1966_v58 = vpop.f32.mrf.mxu0 }
 0x1a1   : > { %10747 = vst [vmem:[#allocation61_spill] sm:$0xff] %v8138_v48  ;;  %v2158_v42 = vadd.f32 %v7888_v47, %v1965_v22  ;;  %v1967_v5 = vadd.f32 %v1966_v58, %v8077_v13  ;;  %v8143_v60 = vpop.f32.mrf.mxu1  ;;  %v3519_v47 = vmax.f32 %v2156_v14, 0.0 }
 0x1a2   : > { %v1970_v2 = vpop.f32.mrf.mxu0  ;;  %2568 = vmatmul.mubr.bf16.gmra.mxu0 %v7204_v0 }
 0x1a3   : > { %v3526_v24 = vmax.f32 %v2158_v42, 0.0  ;;  %v2160_v63 = vadd.f32 %v7896_v20, %v1967_v5  ;;  %v1971_v18 = vadd.f32 %v1970_v2, %v8069_v4  ;;  %v8148_v30 = vpop.f32.mrf.mxu1  ;;  %2761 = vmatmul.mubr.bf16.gmra.mxu1 %v7753_v19  ;;  %2577 = vmatprep.mubr.bf16.mxu0 %v10707_v12 }
 0x1a4   : > { %v1972_v37 = vpop.f32.mrf.mxu0  ;;  %2770 = vmatprep.mubr.bf16.mxu1 %v7756_v23 }
 0x1a5   : > { %v8153_v10 = vpack.c.bf16 %v3526_v24, %v3518_v11  ;;  %v3527_v57 = vmax.f32 %v2160_v63, 0.0  ;;  %v1973_v54 = vadd.f32 %v1972_v37, %v8077_v13  ;;  %v8156_v22 = vpop.f32.mrf.mxu1  ;;  %v2164_v58 = vadd.f32 %v7899_v55, %v1971_v18  ;;  %v7205_v63 = vld [vmem:[%s7547_s11 + $0x128] ss:$12 sps:$4 sm:$0xff]  }
 0x1a6   : > { %v1974_v20 = vpop.f32.mrf.mxu0 }
 0x1a7   : > { %10748 = vst [vmem:[#allocation62_spill] sm:$0xff] %v8153_v10  ;;  %v1975_v42 = vadd.f32 %v1974_v20, %v8069_v4  ;;  %v8160_v19 = vpop.f32.mrf.mxu1  ;;  %v8162_v5 = vpack.c.bf16 %v3527_v57, %v3519_v47  ;;  %v2166_v23 = vadd.f32 %v7910_v21, %v1973_v54  ;;  %v3534_v37 = vmax.f32 %v2164_v58, 0.0 }
 0x1a8   : > { %v1976_v2 = vpop.f32.mrf.mxu0 }
 0x1a9   : > { %10749 = vst [vmem:[#allocation63_spill] sm:$0xff] %v8162_v5  ;;  %v2168_v14 = vadd.f32 %v7912_v29, %v1975_v42  ;;  %v1977_v0 = vadd.f32 %v1976_v2, %v8077_v13  ;;  %v8167_v11 = vpop.f32.mrf.mxu1  ;;  %v3535_v21 = vmax.f32 %v2166_v23, 0.0  ;;  %v10764_v5 = vld [vmem:[#allocation42_spill] sm:$0xff] }
 0x1aa   : > { %v1980_v24 = vpop.f32.mrf.mxu0  ;;  %2578 = vmatmul.mubr.bf16.gmra.mxu0 %v7205_v63 }
 0x1ab   : > { %v3542_v55 = vmax.f32 %v2168_v14, 0.0  ;;  %v2170_v18 = vadd.f32 %v7914_v32, %v1977_v0  ;;  %v1981_v20 = vadd.f32 %v1980_v24, %v8069_v4  ;;  %v8172_v47 = vpop.f32.mrf.mxu1  ;;  %2771 = vmatmul.mubr.bf16.gmra.mxu1 %v7763_v31  ;;  %2587 = vmatprep.mubr.bf16.mxu0 %v10707_v12 }
 0x1ac   : > { %v1982_v29 = vpop.f32.mrf.mxu0  ;;  %2780 = vmatprep.mubr.bf16.mxu1 %v7766_v35 }
 0x1ad   : > { %v8177_v57 = vpack.c.bf16 %v3542_v55, %v3534_v37  ;;  %v3543_v54 = vmax.f32 %v2170_v18, 0.0  ;;  %v1983_v58 = vadd.f32 %v1982_v29, %v8077_v13  ;;  %v8180_v42 = vpop.f32.mrf.mxu1  ;;  %v2174_v2 = vadd.f32 %v7919_v17, %v1981_v20  ;;  %v7206_v18 = vld [vmem:[%s7547_s11 + $0x140] ss:$12 sps:$4 sm:$0xff]  }
 0x1ae   : > { %v1984_v32 = vpop.f32.mrf.mxu0 }
 0x1af   : > { %10750 = vst [vmem:[#allocation64_spill] sm:$0xff] %v8177_v57  ;;  %v1985_v14 = vadd.f32 %v1984_v32, %v8069_v4  ;;  %v8184_v31 = vpop.f32.mrf.mxu1  ;;  %v8186_v0 = vpack.c.bf16 %v3543_v54, %v3535_v21  ;;  %v2176_v35 = vadd.f32 %v7932_v1, %v1983_v58  ;;  %v3550_v29 = vmax.f32 %v2174_v2, 0.0  ;;  %v10752_v1 = vld [vmem:[#allocation9_spill] sm:$0xff] }
 0x1b0   : > { %v1986_v24 = vpop.f32.mrf.mxu0 }
 0x1b1   : > { %10751 = vst [vmem:[#allocation65_spill] sm:$0xff] %v8186_v0  ;;  %v2178_v23 = vadd.f32 %v7936_v9, %v1985_v14  ;;  %v1987_v63 = vadd.f32 %v1986_v24, %v8077_v13  ;;  %v8191_v37 = vpop.f32.mrf.mxu1  ;;  %v3551_v54 = vmax.f32 %v2176_v35, 0.0  ;;  %v571_v0 = vld [vmem:[#allocation4 + $0x578] sm:$0xff] }
 0x1b2   : > { %v1990_v55 = vpop.f32.mrf.mxu0  ;;  %2588 = vmatmul.mubr.bf16.gmra.mxu0 %v7206_v18 }
 0x1b3   : > { %v3558_v17 = vmax.f32 %v2178_v23, 0.0  ;;  %v2180_v20 = vadd.f32 %v7940_v53, %v1987_v63  ;;  %v1991_v32 = vadd.f32 %v1990_v55, %v8069_v4  ;;  %v8196_v21 = vpop.f32.mrf.mxu1  ;;  %2781 = vmatmul.mubr.bf16.gmra.mxu1 %v7773_v33  ;;  %2597 = vmatprep.mubr.bf16.mxu0 %v10707_v12 }
 0x1b4   : > { %v1992_v9 = vpop.f32.mrf.mxu0  ;;  %2790 = vmatprep.mubr.bf16.mxu1 %v10752_v1  ;;  %v7207_v1 = vld [vmem:[%s7547_s11 + $0x158] ss:$12 sps:$4 sm:$0xff]  }
 0x1b5   : > { %v8201_v58 = vpack.c.bf16 %v3558_v17, %v3550_v29  ;;  %v3559_v14 = vmax.f32 %v2180_v20, 0.0  ;;  %v1993_v2 = vadd.f32 %v1992_v9, %v8077_v13  ;;  %v8204_v24 = vpop.f32.mrf.mxu1  ;;  %v2184_v23 = vadd.f32 %v7945_v40, %v1991_v32 }
 0x1b6   : > { %v1994_v53 = vpop.f32.mrf.mxu0 }
 0x1b7   : > { %10753 = vst [vmem:[#allocation9_spill] sm:$0xff] %v8201_v58  ;;  %v1995_v63 = vadd.f32 %v1994_v53, %v8069_v4  ;;  %v8208_v33 = vpop.f32.mrf.mxu1  ;;  %v8210_v55 = vpack.c.bf16 %v3559_v14, %v3551_v54  ;;  %v2186_v35 = vadd.f32 %v7958_v52, %v1993_v2  ;;  %v3566_v58 = vmax.f32 %v2184_v23, 0.0  ;;  %v10755_v14 = vld [vmem:[#allocation10_spill] sm:$0xff]  ;;  %v10756_v52 = vld [vmem:[#allocation11_spill] sm:$0xff] }
 0x1b8   : > { %v1996_v18 = vpop.f32.mrf.mxu0 }
 0x1b9   : > { %10754 = vst [vmem:[#allocation66_spill] sm:$0xff] %v8210_v55  ;;  %v2188_v29 = vadd.f32 %v7964_v50, %v1995_v63  ;;  %v1997_v17 = vadd.f32 %v1996_v18, %v8077_v13  ;;  %v8215_v20 = vpop.f32.mrf.mxu1  ;;  %v3567_v2 = vmax.f32 %v2186_v35, 0.0 }
 0x1ba   : > { %v2000_v9 = vpop.f32.mrf.mxu0  ;;  %2598 = vmatmul.mubr.bf16.gmra.mxu0 %v7207_v1 }
 0x1bb   : > { %v3574_v40 = vmax.f32 %v2188_v29, 0.0  ;;  %v2190_v32 = vadd.f32 %v7968_v15, %v1997_v17  ;;  %v2001_v53 = vadd.f32 %v2000_v9, %v8069_v4  ;;  %v8220_v54 = vpop.f32.mrf.mxu1  ;;  %2791 = vmatmul.mubr.bf16.gmra.mxu1 %v10755_v14  ;;  %2607 = vmatprep.mubr.bf16.mxu0 %v10707_v12 }
 0x1bc   : > { %v2002_v50 = vpop.f32.mrf.mxu0  ;;  %2800 = vmatprep.mubr.bf16.mxu1 %v10756_v52  ;;  %v7208_v52 = vld [vmem:[%s7547_s11 + $0x170] ss:$12 sps:$4 sm:$0xff]  }
 0x1bd   : > { %v8225_v63 = vpack.c.bf16 %v3574_v40, %v3566_v58  ;;  %v3575_v18 = vmax.f32 %v2190_v32, 0.0  ;;  %v2003_v23 = vadd.f32 %v2002_v50, %v8077_v13  ;;  %v8228_v29 = vpop.f32.mrf.mxu1  ;;  %v2194_v17 = vadd.f32 %v7973_v8, %v2001_v53 }
 0x1be   : > { %v2004_v15 = vpop.f32.mrf.mxu0 }
 0x1bf   : > { %10757 = vst [vmem:[#allocation10_spill] sm:$0xff] %v8225_v63  ;;  %v2005_v9 = vadd.f32 %v2004_v15, %v8069_v4  ;;  %v8232_v1 = vpop.f32.mrf.mxu1  ;;  %v8234_v14 = vpack.c.bf16 %v3575_v18, %v3567_v2  ;;  %v2196_v35 = vadd.f32 %v7986_v3, %v2003_v23  ;;  %v3582_v63 = vmax.f32 %v2194_v17, 0.0  ;;  %v10759_v18 = vld [vmem:[#allocation12_spill] sm:$0xff] }
 0x1c0   : > { %v2006_v55 = vpop.f32.mrf.mxu0 }
 0x1c1   : > { %10758 = vst [vmem:[#allocation11_spill] sm:$0xff] %v8234_v14  ;;  %v2198_v58 = vadd.f32 %v7990_v49, %v2005_v9  ;;  %v2007_v40 = vadd.f32 %v2006_v55, %v8077_v13  ;;  %v8239_v32 = vpop.f32.mrf.mxu1  ;;  %v10760_v49 = vld [vmem:[#allocation13_spill] sm:$0xff]  ;;  %v3583_v55 = vmax.f32 %v2196_v35, 0.0 }
 0x1c2   : > { %v2010_v50 = vpop.f32.mrf.mxu0  ;;  %2608 = vmatmul.mubr.bf16.gmra.mxu0 %v7208_v52 }
 0x1c3   : > { %v3590_v8 = vmax.f32 %v2198_v58, 0.0  ;;  %v2200_v53 = vadd.f32 %v7994_v28, %v2007_v40  ;;  %v2011_v15 = vadd.f32 %v2010_v50, %v8069_v4  ;;  %v8244_v2 = vpop.f32.mrf.mxu1  ;;  %2801 = vmatmul.mubr.bf16.gmra.mxu1 %v10759_v18  ;;  %2843 = vmatprep.mubr.bf16.mxu0 %v10707_v12  ;;  %v575_v40 = vld [vmem:[#allocation4 + $0x598] sm:$0xff] }
 0x1c4   : > { %v2012_v3 = vpop.f32.mrf.mxu0  ;;  %3036 = vmatprep.mubr.bf16.mxu1 %v10760_v49  ;;  %v579_v50 = vld [vmem:[#allocation4 + $0x5b8] sm:$0xff] }
 0x1c5   : > { %v8249_v23 = vpack.c.bf16 %v3590_v8, %v3582_v63  ;;  %v3591_v9 = vmax.f32 %v2200_v53, 0.0  ;;  %v2013_v17 = vadd.f32 %v2012_v3, %v8077_v13  ;;  %v8252_v58 = vpop.f32.mrf.mxu1  ;;  %v2204_v52 = vadd.f32 %v7999_v43, %v2011_v15  ;;  %v6852_v43 = vld [vmem:[#allocation6 + $0x70] ss:$8 sps:$4 sm:$0xff]  }
 0x1c6   : > { %v2014_v28 = vpop.f32.mrf.mxu0  ;;  %v6434_v49 = vcombine.high %v575_v40, %v579_v50  ;;  %v6433_v10 = vcombine.low %v575_v40, %v579_v50 }
 0x1c7   : > { %10761 = vst [vmem:[#allocation12_spill] sm:$0xff] %v8249_v23  ;;  %v2015_v18 = vadd.f32 %v2014_v28, %v8069_v4  ;;  %v8256_v14 = vpop.f32.mrf.mxu1  ;;  %v8258_v57 = vpack.c.bf16 %v3591_v9, %v3583_v55  ;;  %v2206_v63 = vadd.f32 %v8006_v46, %v2013_v17  ;;  %v8265_v23 = vld [vmem:[#allocation4 + $0x558] sm:$0xff]  ;;  %v7209_v28 = vld [vmem:[%s7547_s11 + $0x8] ss:$12 sps:$4 sm:$0xff]   ;;  %v6857_v55 = vld [vmem:[#allocation6 + $0x64] ss:$8 sps:$4 sm:$0xff]  }
 0x1c8   : > { %v2016_v35 = vpop.f32.mrf.mxu0  ;;  %v3598_v9 = vmax.f32 %v2204_v52, 0.0  ;;  %v6426_v40 = vcombine.high %v8265_v23, %v571_v0 }
 0x1c9   : > { %10762 = vst [vmem:[#allocation13_spill] sm:$0xff] %v8258_v57  ;;  %v2208_v8 = vadd.f32 %v8010_v16, %v2015_v18  ;;  %v2017_v53 = vadd.f32 %v2016_v35, %v8077_v13  ;;  %v8263_v3 = vpop.f32.mrf.mxu1  ;;  %v10766_v18 = vld [vmem:[#allocation14_spill] sm:$0xff]  ;;  %v10767_v35 = vld [vmem:[#allocation16_spill] sm:$0xff]  ;;  %v3599_v50 = vmax.f32 %v2206_v63, 0.0 }
 0x1ca   : > { %10763 = vst [vmem:[#allocation67_spill] sm:$0xff] %v8263_v3  ;;  %v2020_v15 = vpop.f32.mrf.mxu0  ;;  %2844 = vmatmul.mubr.bf16.vlgmr.msra.gmra.mxu0 %v7209_v28  ;;  %v10769_v48 = vcombine.low %v10767_v35, %v10768_v51  ;;  %v10770_v28 = vld [vmem:[#allocation15_spill] sm:$0xff] }
 0x1cb   : > { %v3606_v57 = vmax.f32 %v2208_v8, 0.0  ;;  %v2210_v46 = vadd.f32 %v10764_v5, %v2017_v53  ;;  %v2021_v16 = vadd.f32 %v2020_v15, %v8069_v4  ;;  %v8270_v17 = vpop.f32.mrf.mxu1  ;;  %3037 = vmatmul.mubr.bf16.vlgmr.msra.gmra.mxu1 %v10766_v18  ;;  %2853 = vmatprep.mubr.bf16.mxu0 %v10707_v12  ;;  %v6855_v15 = vld [vmem:[#allocation6 + $0x60] ss:$8 sps:$4 sm:$0xff]   ;;  %v563_v18 = vld [vmem:[#allocation4 + $0x538] sm:$0xff] }
 0x1cc   : > { %10765 = vst [vmem:[#allocation42_spill] sm:$0xff] %v8270_v17  ;;  %3198 = vmatpush1.bf16.msra.mxu0 %v10769_v48  ;;  %v2022_v6 = vpop.f32.mrf.mxu0  ;;  %3046 = vmatprep.mubr.bf16.mxu1 %v10770_v28  ;;  %v559_v48 = vld [vmem:[#allocation4 + $0x518] sm:$0xff]  ;;  %v10772_v17 = vld [vmem:[#allocation45_spill] sm:$0xff] }
 0x1cd   : > { %v8279_v52 = vpack.c.bf16 %v3606_v57, %v3598_v9  ;;  %v3607_v5 = vmax.f32 %v2210_v46, 0.0  ;;  %v2023_v8 = vadd.f32 %v2022_v6, %v8077_v13  ;;  %v8282_v53 = vpop.f32.mrf.mxu1  ;;  %3199 = vmatprep.subr.bf16.mxu0 %v6434_v49  ;;  %4555 = vmatpush1.bf16.msra.mxu1 %v6852_v43  ;;  %v6860_v35 = vld [vmem:[#allocation6 + $0x54] ss:$8 sps:$4 sm:$0xff]   ;;  %v2214_v28 = vadd.f32 %v10772_v17, %v2021_v16 }
 0x1ce   : > { %v2024_v51 = vpop.f32.mrf.mxu0  ;;  %4556 = vmatprep.subr.bf16.mxu1 %v6857_v55  ;;  %v6425_v49 = vcombine.low %v8265_v23, %v571_v0  ;;  %v6418_v16 = vcombine.high %v559_v48, %v563_v18  ;;  %v8296_v17 = vld [vmem:[#allocation4 + $0x4d8] sm:$0xff]  ;;  %v6863_v0 = vld [vmem:[#allocation6 + $0x44] ss:$8 sps:$4 sm:$0xff]  }
 0x1cf   : > { %10771 = vst [vmem:[#allocation14_spill] sm:$0xff] %v8279_v52  ;;  %v2025_v3 = vadd.f32 %v2024_v51, %v8069_v4  ;;  %v8286_v63 = vpop.f32.mrf.mxu1  ;;  %v8288_v57 = vpack.c.bf16 %v3607_v5, %v3599_v50  ;;  %v2216_v43 = vadd.f32 %v8029_v26, %v2023_v8  ;;  %v8298_v51 = vld [vmem:[#allocation4 + $0x4f8] sm:$0xff]  ;;  %v7210_v5 = vld [vmem:[%s7547_s11 + $0x20] ss:$12 sps:$4 sm:$0xff]   ;;  %v3614_v23 = vmax.f32 %v2214_v28, 0.0 }
 0x1d0   : > { %3200 = vmatpush1.bf16.msra.mxu0 %v6433_v10  ;;  %v2026_v6 = vpop.f32.mrf.mxu0  ;;  %v6858_v10 = vld [vmem:[#allocation6 + $0x50] ss:$8 sps:$4 sm:$0xff]   ;;  %v10775_v8 = vld [vmem:[#allocation18_spill] sm:$0xff]  ;;  %v6417_v52 = vcombine.low %v559_v48, %v563_v18 }
 0x1d1   : > { %10773 = vst [vmem:[#allocation16_spill] sm:$0xff] %v8288_v57  ;;  %3201 = vmatprep.subr.bf16.mxu0 %v6426_v40  ;;  %v2218_v9 = vadd.f32 %v8033_v38, %v2025_v3  ;;  %v2027_v55 = vadd.f32 %v2026_v6, %v8077_v13  ;;  %v8294_v46 = vpop.f32.mrf.mxu1  ;;  %4557 = vmatpush1.bf16.msra.mxu1 %v6855_v15  ;;  %v10776_v15 = vld [vmem:[#allocation19_spill] sm:$0xff]  ;;  %v3615_v28 = vmax.f32 %v2216_v43, 0.0  ;;  %v547_v57 = vld [vmem:[#allocation4 + $0x4b8] sm:$0xff] }
 0x1d2   : > { %v2030_v50 = vpop.f32.mrf.mxu0  ;;  %2854 = vmatmul.mubr.bf16.gmra.mxu0 %v7210_v5  ;;  %4558 = vmatprep.subr.bf16.mxu1 %v6860_v35  ;;  %v6410_v35 = vcombine.high %v8296_v17, %v8298_v51  ;;  %v6861_v5 = vld [vmem:[#allocation6 + $0x40] ss:$8 sps:$4 sm:$0xff]  }
 0x1d3   : > { %v3622_v26 = vmax.f32 %v2218_v9, 0.0  ;;  %v2220_v38 = vadd.f32 %v8039_v44, %v2027_v55  ;;  %v2031_v3 = vadd.f32 %v2030_v50, %v8069_v4  ;;  %v8303_v40 = vpop.f32.mrf.mxu1  ;;  %3047 = vmatmul.mubr.bf16.gmra.mxu1 %v10775_v8  ;;  %2863 = vmatprep.mubr.bf16.mxu0 %v10707_v12  ;;  %v543_v8 = vld [vmem:[#allocation4 + $0x498] sm:$0xff] }
 0x1d4   : > { %10774 = vst [vmem:[#allocation17_spill] sm:$0xff] %v8303_v40  ;;  %v2032_v6 = vpop.f32.mrf.mxu0  ;;  %3056 = vmatprep.mubr.bf16.mxu1 %v10776_v15  ;;  %3202 = vmatpush1.bf16.msra.mxu0 %v6425_v49  ;;  %v6866_v49 = vld [vmem:[#allocation6 + $0x34] ss:$8 sps:$4 sm:$0xff]   ;;  %v6864_v15 = vld [vmem:[#allocation6 + $0x30] ss:$8 sps:$4 sm:$0xff]  }
 0x1d5   : > { %v8310_v9 = vpack.c.bf16 %v3622_v26, %v3614_v23  ;;  %v3623_v44 = vmax.f32 %v2220_v38, 0.0  ;;  %v2033_v55 = vadd.f32 %v2032_v6, %v8077_v13  ;;  %v8313_v50 = vpop.f32.mrf.mxu1  ;;  %3203 = vmatprep.subr.bf16.mxu0 %v6418_v16  ;;  %4559 = vmatpush1.bf16.msra.mxu1 %v6858_v10  ;;  %v2224_v48 = vadd.f32 %v8044_v61, %v2031_v3  ;;  %v10781_v26 = vld [vmem:[#allocation20_spill] sm:$0xff] }
 0x1d6   : > { %10778 = vst [vmem:[#allocation45_spill] sm:$0xff] %v8313_v50  ;;  %v2034_v40 = vpop.f32.mrf.mxu0  ;;  %4560 = vmatprep.subr.bf16.mxu1 %v6863_v0  ;;  %v1881_v38 = vadd.f32 %v10781_v26, %v8069_v4  ;;  %v6409_v10 = vcombine.low %v8296_v17, %v8298_v51  ;;  %v6402_v6 = vcombine.high %v543_v8, %v547_v57  ;;  %v7211_v51 = vld [vmem:[%s7547_s11 + $0x38] ss:$12 sps:$4 sm:$0xff]  }
 0x1d7   : > { %10777 = vst [vmem:[#allocation15_spill] sm:$0xff] %v8310_v9  ;;  %v2035_v18 = vadd.f32 %v2034_v40, %v8069_v4  ;;  %v8317_v43 = vpop.f32.mrf.mxu1  ;;  %v8319_v23 = vpack.c.bf16 %v3623_v44, %v3615_v28  ;;  %v2226_v0 = vadd.f32 %v8052_v34, %v2033_v55  ;;  %v8330_v28 = vld [vmem:[#allocation4 + $0x458] sm:$0xff]  ;;  %v6869_v34 = vld [vmem:[#allocation6 + $0x24] ss:$8 sps:$4 sm:$0xff]  }
 0x1d8   : > { %10779 = vst [vmem:[#allocation18_spill] sm:$0xff] %v8317_v43  ;;  %v2036_v16 = vpop.f32.mrf.mxu0  ;;  %3204 = vmatpush1.bf16.msra.mxu0 %v6417_v52  ;;  %v8332_v44 = vld [vmem:[#allocation4 + $0x478] sm:$0xff]  ;;  %v10783_v52 = vld [vmem:[#allocation22_spill] sm:$0xff]  ;;  %v10788_v43 = vld [vmem:[#allocation23_spill] sm:$0xff] }
 0x1d9   : > { %10780 = vst [vmem:[#allocation19_spill] sm:$0xff] %v8319_v23  ;;  %v2228_v61 = vadd.f32 %v8062_v45, %v2035_v18  ;;  %v2037_v3 = vadd.f32 %v2036_v16, %v8077_v13  ;;  %v8328_v40 = vpop.f32.mrf.mxu1  ;;  %3205 = vmatprep.subr.bf16.mxu0 %v6410_v35  ;;  %4561 = vmatpush1.bf16.msra.mxu1 %v6861_v5  ;;  %v3630_v45 = vmax.f32 %v2224_v48, 0.0  ;;  %v10784_v18 = vld [vmem:[#allocation55_spill] sm:$0xff]  ;;  %v10786_v5 = vld [vmem:[#allocation21_spill] sm:$0xff]  ;;  %v10787_v23 = vld [vmem:[#allocation24_spill] sm:$0xff] }
 0x1da   : > { %10782 = vst [vmem:[#allocation20_spill] sm:$0xff] %v8328_v40  ;;  %v1883_v26 = vadd.f32 %v10783_v52, %v8077_v13  ;;  %v2073_v17 = vpop.f32.mrf.mxu0  ;;  %2864 = vmatmul.mubr.bf16.gmra.mxu0 %v7211_v51  ;;  %4562 = vmatprep.subr.bf16.mxu1 %v6866_v49  ;;  %v1885_v40 = vadd.f32 %v10787_v23, %v8069_v4  ;;  %v6872_v23 = vld [vmem:[#allocation6 + $0x14] ss:$8 sps:$4 sm:$0xff]  }
 0x1db   : > { %v3638_v55 = vmax.f32 %v2228_v61, 0.0  ;;  %v2230_v16 = vadd.f32 %v10784_v18, %v2037_v3  ;;  %v2074_v9 = vadd.f32 %v2073_v17, %v1881_v38  ;;  %v8338_v35 = vpop.f32.mrf.mxu1  ;;  %3057 = vmatmul.mubr.bf16.gmra.mxu1 %v10786_v5  ;;  %2873 = vmatprep.mubr.bf16.mxu0 %v10707_v12  ;;  %v6401_v49 = vcombine.low %v543_v8, %v547_v57  ;;  %v6867_v18 = vld [vmem:[#allocation6 + $0x20] ss:$8 sps:$4 sm:$0xff]  }
 0x1dc   : > { %10785 = vst [vmem:[#allocation22_spill] sm:$0xff] %v8338_v35  ;;  %v2075_v52 = vpop.f32.mrf.mxu0  ;;  %3066 = vmatprep.mubr.bf16.mxu1 %v10788_v43  ;;  %3206 = vmatpush1.bf16.msra.mxu0 %v6409_v10  ;;  %v6394_v48 = vcombine.high %v8330_v28, %v8332_v44  ;;  %v3631_v61 = vmax.f32 %v2226_v0, 0.0  ;;  %v527_v35 = vld [vmem:[#allocation4 + $0x418] sm:$0xff]  ;;  %v10790_v57 = vld [vmem:[#allocation25_spill] sm:$0xff] }
 0x1dd   : > { %v8347_v3 = vpack.c.bf16 %v3638_v55, %v3630_v45  ;;  %v3639_v38 = vmax.f32 %v2230_v16, 0.0  ;;  %v2076_v17 = vadd.f32 %v2075_v52, %v1883_v26  ;;  %v8349_v51 = vpop.f32.mrf.mxu1  ;;  %3207 = vmatprep.subr.bf16.mxu0 %v6402_v6  ;;  %4563 = vmatpush1.bf16.msra.mxu1 %v6864_v15  ;;  %v531_v43 = vld [vmem:[#allocation4 + $0x438] sm:$0xff]  ;;  %v1887_v8 = vadd.f32 %v10790_v57, %v8077_v13  ;;  %v10793_v26 = vld [vmem:[#allocation26_spill] sm:$0xff] }
 0x1de   : > { %v2077_v5 = vpop.f32.mrf.mxu0  ;;  %4564 = vmatprep.subr.bf16.mxu1 %v6869_v34  ;;  %v1891_v45 = vadd.f32 %v10793_v26, %v8069_v4  ;;  %v6393_v15 = vcombine.low %v8330_v28, %v8332_v44  ;;  %v3390_v34 = vmax.f32 %v2074_v9, 0.0 }
 0x1df   : > { %10789 = vst [vmem:[#allocation55_spill] sm:$0xff] %v8347_v3  ;;  %v2078_v10 = vadd.f32 %v2077_v5, %v1885_v40  ;;  %v8353_v50 = vpop.f32.mrf.mxu1  ;;  %v8355_v0 = vpack.c.bf16 %v3639_v38, %v3631_v61  ;;  %v6870_v40 = vld [vmem:[#allocation6 + $0x10] ss:$8 sps:$4 sm:$0xff]   ;;  %v6386_v5 = vcombine.high %v527_v35, %v531_v43  ;;  %v3391_v26 = vmax.f32 %v2076_v17, 0.0 }
 0x1e0   : > { %10791 = vst [vmem:[#allocation21_spill] sm:$0xff] %v8353_v50  ;;  %v2079_v6 = vpop.f32.mrf.mxu0  ;;  %3208 = vmatpush1.bf16.msra.mxu0 %v6401_v49  ;;  %v10795_v61 = vld [vmem:[#allocation28_spill] sm:$0xff]  ;;  %v6875_v49 = vld [vmem:[#allocation6 + $0x4] ss:$8 sps:$4 sm:$0xff]   ;;  %v10836_v50 = vld [vmem:[#allocation51_spill] sm:$0xff] }
 0x1e1   : > { %10792 = vst [vmem:[#allocation24_spill] sm:$0xff] %v8355_v0  ;;  %v3398_v55 = vmax.f32 %v2078_v10, 0.0  ;;  %v2080_v16 = vadd.f32 %v2079_v6, %v1887_v8  ;;  %v8361_v52 = vpop.f32.mrf.mxu1  ;;  %4565 = vmatpush1.bf16.msra.mxu1 %v6867_v18  ;;  %3209 = vmatprep.subr.bf16.mxu0 %v6394_v48  ;;  %v1893_v38 = vadd.f32 %v10795_v61, %v8077_v13  ;;  %v7212_v3 = vld [vmem:[%s7547_s11 + $0x50] ss:$12 sps:$4 sm:$0xff]   ;;  %v10798_v18 = vld [vmem:[#allocation29_spill] sm:$0xff] }
 0x1e2   : > { %10794 = vst [vmem:[#allocation23_spill] sm:$0xff] %v8361_v52  ;;  %v2083_v57 = vpop.f32.mrf.mxu0  ;;  %2874 = vmatmul.mubr.bf16.gmra.mxu0 %v7212_v3  ;;  %4566 = vmatprep.subr.bf16.mxu1 %v6872_v23  ;;  %v10797_v8 = vld [vmem:[#allocation27_spill] sm:$0xff]  ;;  %v6385_v10 = vcombine.low %v527_v35, %v531_v43  ;;  %v10799_v3 = vld [vmem:[#allocation30_spill] sm:$0xff] }
 0x1e3   : > { %v8366_v0 = vpack.c.bf16 %v3398_v55, %v3390_v34  ;;  %v3399_v9 = vmax.f32 %v2080_v16, 0.0  ;;  %v2084_v28 = vadd.f32 %v2083_v57, %v1891_v45  ;;  %v8368_v44 = vpop.f32.mrf.mxu1  ;;  %3067 = vmatmul.mubr.bf16.gmra.mxu1 %v10797_v8  ;;  %2883 = vmatprep.mubr.bf16.mxu0 %v10707_v12  ;;  %v1895_v23 = vadd.f32 %v10799_v3, %v8069_v4  ;;  %v6873_v34 = vld [vmem:[#allocation6] ss:$8 sps:$4 sm:$0xff]   ;;  %v6902_v55 = vld [vmem:[#allocation6 + $0x174] ss:$8 sps:$4 sm:$0xff]  }
 0x1e4   : > { %10796 = vst [vmem:[#allocation25_spill] sm:$0xff] %v8368_v44  ;;  %v2085_v48 = vpop.f32.mrf.mxu0  ;;  %3076 = vmatprep.mubr.bf16.mxu1 %v10798_v18  ;;  %3210 = vmatpush1.bf16.msra.mxu0 %v6393_v15  ;;  %v6878_v61 = vld [vmem:[#allocation6 + $0xf4] ss:$8 sps:$4 sm:$0xff]   ;;  %v10805_v18 = vld [vmem:[#allocation34_spill] sm:$0xff] }
 0x1e5   : > { %v2086_v6 = vadd.f32 %v2085_v48, %v1893_v38  ;;  %v8375_v17 = vpop.f32.mrf.mxu1  ;;  %4567 = vmatpush1.bf16.msra.mxu1 %v6870_v40  ;;  %3211 = vmatprep.subr.bf16.mxu0 %v6386_v5  ;;  %v8377_v45 = vpack.c.bf16 %v3399_v9, %v3391_v26  ;;  %v10801_v57 = vld [vmem:[#allocation31_spill] sm:$0xff]  ;;  %v10803_v38 = vld [vmem:[#allocation32_spill] sm:$0xff]  ;;  %v3406_v48 = vmax.f32 %v2084_v28, 0.0  ;;  %v1903_v3 = vadd.f32 %v10805_v18, %v8077_v13 }
 0x1e6   : > { %10800 = vst [vmem:[#allocation26_spill] sm:$0xff] %v8375_v17  ;;  %v2087_v16 = vpop.f32.mrf.mxu0  ;;  %4568 = vmatprep.subr.bf16.mxu1 %v6875_v49  ;;  %v1897_v15 = vadd.f32 %v10801_v57, %v8077_v13  ;;  %v1901_v40 = vadd.f32 %v10803_v38, %v8069_v4  ;;  %v6876_v49 = vld [vmem:[#allocation6 + $0xf0] ss:$8 sps:$4 sm:$0xff]  }
 0x1e7   : > { %v2088_v35 = vadd.f32 %v2087_v16, %v1895_v23  ;;  %v8381_v43 = vpop.f32.mrf.mxu1  ;;  %v7213_v23 = vld [vmem:[%s7547_s11 + $0x68] ss:$12 sps:$4 sm:$0xff]   ;;  %v6881_v16 = vld [vmem:[#allocation6 + $0xe4] ss:$8 sps:$4 sm:$0xff]  }
 0x1e8   : > { %10802 = vst [vmem:[#allocation28_spill] sm:$0xff] %v8381_v43  ;;  %v2089_v8 = vpop.f32.mrf.mxu0  ;;  %3212 = vmatpush1.bf16.msra.mxu0 %v6385_v10  ;;  %v3407_v10 = vmax.f32 %v2086_v6, 0.0  ;;  %v6879_v6 = vld [vmem:[#allocation6 + $0xe0] ss:$8 sps:$4 sm:$0xff]   ;;  %v10822_v44 = vld [vmem:[#allocation43_spill] sm:$0xff] }
 0x1e9   : > { %v3414_v5 = vmax.f32 %v2088_v35, 0.0  ;;  %v2090_v26 = vadd.f32 %v2089_v8, %v1897_v15  ;;  %v8385_v9 = vpop.f32.mrf.mxu1  ;;  %4569 = vmatpush1.bf16.msra.mxu1 %v6873_v34  ;;  %4747 = vmatprep.subr.bf16.mxu0 %v6902_v55  ;;  %v10807_v15 = vld [vmem:[#allocation33_spill] sm:$0xff]  ;;  %v10808_v55 = vld [vmem:[#allocation35_spill] sm:$0xff]  ;;  %v10809_v8 = vld [vmem:[#allocation36_spill] sm:$0xff] }
 0x1ea   : > { %10804 = vst [vmem:[#allocation27_spill] sm:$0xff] %v8385_v9  ;;  %v2093_v57 = vpop.f32.mrf.mxu0  ;;  %2884 = vmatmul.mubr.bf16.gmra.mxu0 %v7213_v23  ;;  %4570 = vmatprep.subr.bf16.mxu1 %v6878_v61  ;;  %v1905_v18 = vadd.f32 %v10809_v8, %v8069_v4  ;;  %v10813_v8 = vld [vmem:[#allocation38_spill] sm:$0xff] }
 0x1eb   : > { %v8390_v43 = vpack.c.bf16 %v3414_v5, %v3406_v48  ;;  %v3415_v38 = vmax.f32 %v2090_v26, 0.0  ;;  %v2094_v28 = vadd.f32 %v2093_v57, %v1901_v40  ;;  %v8392_v35 = vpop.f32.mrf.mxu1  ;;  %3077 = vmatmul.mubr.bf16.gmra.mxu1 %v10807_v15  ;;  %2893 = vmatprep.mubr.bf16.mxu0 %v10707_v12  ;;  %v6884_v5 = vld [vmem:[#allocation6 + $0xd4] ss:$8 sps:$4 sm:$0xff]   ;;  %v10811_v26 = vld [vmem:[#allocation37_spill] sm:$0xff] }
 0x1ec   : > { %10806 = vst [vmem:[#allocation29_spill] sm:$0xff] %v8392_v35  ;;  %v2095_v34 = vpop.f32.mrf.mxu0  ;;  %3086 = vmatprep.mubr.bf16.mxu1 %v10808_v55  ;;  %v1907_v57 = vadd.f32 %v10811_v26, %v8077_v13 }
 0x1ed   : > { %v2096_v23 = vadd.f32 %v2095_v34, %v1903_v3  ;;  %v8399_v61 = vpop.f32.mrf.mxu1  ;;  %4571 = vmatpush2.bf16.msra.mxu1 %v6876_v49  ;;  %v8401_v48 = vpack.c.bf16 %v3415_v38, %v3407_v10  ;;  %v1911_v3 = vadd.f32 %v10813_v8, %v8069_v4  ;;  %v3422_v34 = vmax.f32 %v2094_v28, 0.0  ;;  %v6882_v38 = vld [vmem:[#allocation6 + $0xd0] ss:$8 sps:$4 sm:$0xff]  }
 0x1ee   : > { %10810 = vst [vmem:[#allocation30_spill] sm:$0xff] %v8399_v61  ;;  %v2097_v40 = vpop.f32.mrf.mxu0  ;;  %4572 = vmatprep.subr.bf16.mxu1 %v6881_v16  ;;  %v10815_v16 = vld [vmem:[#allocation39_spill] sm:$0xff] }
 0x1ef   : > { %v2098_v15 = vadd.f32 %v2097_v40, %v1905_v18  ;;  %v8405_v35 = vpop.f32.mrf.mxu1  ;;  %v1913_v9 = vadd.f32 %v10815_v16, %v8077_v13  ;;  %v7214_v18 = vld [vmem:[%s7547_s11 + $0x80] ss:$12 sps:$4 sm:$0xff]   ;;  %v10818_v16 = vld [vmem:[#allocation40_spill] sm:$0xff] }
 0x1f0   : > { %10812 = vst [vmem:[#allocation31_spill] sm:$0xff] %v8405_v35  ;;  %v2099_v55 = vpop.f32.mrf.mxu0  ;;  %v6887_v40 = vld [vmem:[#allocation6 + $0xc4] ss:$8 sps:$4 sm:$0xff]   ;;  %v3423_v35 = vmax.f32 %v2096_v23, 0.0  ;;  %v6885_v23 = vld [vmem:[#allocation6 + $0xc0] ss:$8 sps:$4 sm:$0xff]  }
 0x1f1   : > { %v3430_v61 = vmax.f32 %v2098_v15, 0.0  ;;  %v2100_v49 = vadd.f32 %v2099_v55, %v1907_v57  ;;  %v8409_v10 = vpop.f32.mrf.mxu1  ;;  %4573 = vmatpush2.bf16.msra.mxu1 %v6879_v6  ;;  %v7215_v57 = vld [vmem:[%s7547_s11 + $0x78] ss:$12 sps:$4 sm:$0xff]   ;;  %v7216_v55 = vld [vmem:[%s7547_s11 + $0x94] ss:$12 sps:$4 sm:$0xff]  }
 0x1f2   : > { %10814 = vst [vmem:[#allocation32_spill] sm:$0xff] %v8409_v10  ;;  %v2103_v26 = vpop.f32.mrf.mxu0  ;;  %2894 = vmatmul.mubr.bf16.gmra.mxu0 %v7214_v18  ;;  %4574 = vmatprep.subr.bf16.mxu1 %v6884_v5  ;;  %v1915_v10 = vadd.f32 %v10818_v16, %v8069_v4  ;;  %v1921_v16 = vadd.f32 %v10822_v44, %v8069_v4 }
 0x1f3   : > { %v8414_v17 = vpack.c.bf16 %v3430_v61, %v3422_v34  ;;  %v3431_v28 = vmax.f32 %v2100_v49, 0.0  ;;  %v2104_v15 = vadd.f32 %v2103_v26, %v1911_v3  ;;  %v8416_v8 = vpop.f32.mrf.mxu1  ;;  %3087 = vmatmul.mubr.bf16.gmra.mxu1 %v7215_v57  ;;  %2903 = vmatprep.mubr.bf16.mxu0 %v10707_v12  ;;  %v6890_v34 = vld [vmem:[#allocation6 + $0xb4] ss:$8 sps:$4 sm:$0xff]   ;;  %v10820_v49 = vld [vmem:[#allocation41_spill] sm:$0xff] }
 0x1f4   : > { %10817 = vst [vmem:[#allocation33_spill] sm:$0xff] %v8416_v8  ;;  %v2105_v6 = vpop.f32.mrf.mxu0  ;;  %3096 = vmatprep.mubr.bf16.mxu1 %v7216_v55  ;;  %v1917_v26 = vadd.f32 %v10820_v49, %v8077_v13 }
 0x1f5   : > { %10816 = vst [vmem:[#allocation34_spill] sm:$0xff] %v8414_v17  ;;  %v2106_v18 = vadd.f32 %v2105_v6, %v1913_v9  ;;  %v8423_v5 = vpop.f32.mrf.mxu1  ;;  %4575 = vmatpush2.bf16.msra.mxu1 %v6882_v38  ;;  %v8425_v61 = vpack.c.bf16 %v3431_v28, %v3423_v35  ;;  %v3438_v9 = vmax.f32 %v2104_v15, 0.0  ;;  %v6888_v35 = vld [vmem:[#allocation6 + $0xb0] ss:$8 sps:$4 sm:$0xff]  }
 0x1f6   : > { %10819 = vst [vmem:[#allocation35_spill] sm:$0xff] %v8423_v5  ;;  %v2107_v3 = vpop.f32.mrf.mxu0  ;;  %4576 = vmatprep.subr.bf16.mxu1 %v6887_v40  ;;  %v10824_v40 = vld [vmem:[#allocation46_spill] sm:$0xff]  ;;  %v10837_v17 = vld [vmem:[#allocation52_spill] sm:$0xff] }
 0x1f7   : > { %v2108_v57 = vadd.f32 %v2107_v3, %v1915_v10  ;;  %v8429_v8 = vpop.f32.mrf.mxu1  ;;  %v1923_v28 = vadd.f32 %v10824_v40, %v8077_v13  ;;  %v10825_v10 = vld [vmem:[#allocation44_spill] sm:$0xff]  ;;  %v6893_v3 = vld [vmem:[#allocation6 + $0xa4] ss:$8 sps:$4 sm:$0xff]   ;;  %v10828_v40 = vld [vmem:[#allocation47_spill] sm:$0xff] }
 0x1f8   : > { %10821 = vst [vmem:[#allocation36_spill] sm:$0xff] %v8429_v8  ;;  %v2109_v55 = vpop.f32.mrf.mxu0  ;;  %v3439_v8 = vmax.f32 %v2106_v18, 0.0  ;;  %v6891_v18 = vld [vmem:[#allocation6 + $0xa0] ss:$8 sps:$4 sm:$0xff]  }
 0x1f9   : > { %v3446_v6 = vmax.f32 %v2108_v57, 0.0  ;;  %v2110_v38 = vadd.f32 %v2109_v55, %v1917_v26  ;;  %v8433_v5 = vpop.f32.mrf.mxu1  ;;  %4577 = vmatpush2.bf16.msra.mxu1 %v6885_v23  ;;  %v7217_v26 = vld [vmem:[%s7547_s11 + $0x90] ss:$12 sps:$4 sm:$0xff]   ;;  %v7218_v55 = vld [vmem:[%s7547_s11 + $0xac] ss:$12 sps:$4 sm:$0xff]  }
 0x1fa   : > { %10823 = vst [vmem:[#allocation37_spill] sm:$0xff] %v8433_v5  ;;  %v2113_v49 = vpop.f32.mrf.mxu0  ;;  %2904 = vmatmul.mubr.bf16.gmra.mxu0 %v10825_v10  ;;  %4578 = vmatprep.subr.bf16.mxu1 %v6890_v34  ;;  %v1925_v5 = vadd.f32 %v10828_v40, %v8069_v4 }
 0x1fb   : > { %v8438_v52 = vpack.c.bf16 %v3446_v6, %v3438_v9  ;;  %v3447_v44 = vmax.f32 %v2110_v38, 0.0  ;;  %v2114_v15 = vadd.f32 %v2113_v49, %v1921_v16  ;;  %v8440_v57 = vpop.f32.mrf.mxu1  ;;  %3097 = vmatmul.mubr.bf16.gmra.mxu1 %v7217_v26  ;;  %2913 = vmatprep.mubr.bf16.mxu0 %v10707_v12  ;;  %v10831_v16 = vld [vmem:[#allocation49_spill] sm:$0xff]  ;;  %v6896_v49 = vld [vmem:[#allocation6 + $0x94] ss:$8 sps:$4 sm:$0xff]  }
 0x1fc   : > { %10827 = vst [vmem:[#allocation39_spill] sm:$0xff] %v8440_v57  ;;  %v2115_v23 = vpop.f32.mrf.mxu0  ;;  %3106 = vmatprep.mubr.bf16.mxu1 %v7218_v55  ;;  %v600_v6 = vsub.s32 2, %v10831_v16  ;;  %v10832_v26 = vld [vmem:[#allocation48_spill] sm:$0xff] }
 0x1fd   : > { %10826 = vst [vmem:[#allocation38_spill] sm:$0xff] %v8438_v52  ;;  %v2116_v10 = vadd.f32 %v2115_v23, %v1923_v28  ;;  %v8447_v34 = vpop.f32.mrf.mxu1  ;;  %4579 = vmatpush2.bf16.msra.mxu1 %v6888_v35  ;;  %v8449_v9 = vpack.c.bf16 %v3447_v44, %v3439_v8  ;;  %v1927_v57 = vadd.f32 %v10832_v26, %v8077_v13  ;;  %v10834_v28 = vld [vmem:[#allocation50_spill] sm:$0xff]  ;;  %v3454_v35 = vmax.f32 %v2114_v15, 0.0 }
 0x1fe   : > { %10829 = vst [vmem:[#allocation40_spill] sm:$0xff] %v8447_v34  ;;  %v2117_v38 = vpop.f32.mrf.mxu0  ;;  %4580 = vmatprep.subr.bf16.mxu1 %v6893_v3  ;;  %v1931_v23 = vadd.f32 %v10834_v28, %v8069_v4  ;;  %v6894_v3 = vld [vmem:[#allocation6 + $0x90] ss:$8 sps:$4 sm:$0xff]   ;;  %v8463_v26 = vrot.slane %v10837_v17, %v600_v6  ;;  %v6899_v15 = vld [vmem:[#allocation6 + $0x84] ss:$8 sps:$4 sm:$0xff]  }
 0x1ff   : > { %10830 = vst [vmem:[#allocation41_spill] sm:$0xff] %v8449_v9  ;;  %v2118_v55 = vadd.f32 %v2117_v38, %v1925_v5  ;;  %v8454_v52 = vpop.f32.mrf.mxu1  ;;  %v1933_v9 = vadd.f32 %v10836_v50, %v8077_v13  ;;  %v604_v5 = vsub.s32 3, %v10831_v16  ;;  %v7221_v17 = vld [vmem:[%s7547_s11 + $0xc4] ss:$12 sps:$4 sm:$0xff]  }
 0x200   : > { %10833 = vst [vmem:[#allocation43_spill] sm:$0xff] %v8454_v52  ;;  %v2119_v40 = vpop.f32.mrf.mxu0  ;;  %v7219_v52 = vld [vmem:[%s7547_s11 + $0xb0] ss:$12 sps:$4 sm:$0xff]   ;;  %v10839_v6 = vld [vmem:[#allocation53_spill] sm:$0xff] }
 0x201   : > { %v3462_v34 = vmax.f32 %v2118_v55, 0.0  ;;  %v2120_v8 = vadd.f32 %v2119_v40, %v1927_v57  ;;  %v8458_v44 = vpop.f32.mrf.mxu1  ;;  %4581 = vmatpush2.bf16.msra.mxu1 %v6891_v18  ;;  %v3455_v57 = vmax.f32 %v2116_v10, 0.0  ;;  %v1935_v16 = vadd.f32 %v10839_v6, %v8069_v4  ;;  %v6897_v10 = vld [vmem:[#allocation6 + $0x80] ss:$8 sps:$4 sm:$0xff]   ;;  %v10842_v4 = vld [vmem:[#allocation56_spill] sm:$0xff] }
 0x202   : > { %10835 = vst [vmem:[#allocation46_spill] sm:$0xff] %v8458_v44  ;;  %v2123_v38 = vpop.f32.mrf.mxu0  ;;  %2914 = vmatmul.mubr.bf16.gmra.mxu0 %v7219_v52  ;;  %4582 = vmatprep.subr.bf16.mxu1 %v6896_v49  ;;  %v7220_v44 = vld [vmem:[%s7547_s11 + $0xa8] ss:$12 sps:$4 sm:$0xff]  }
 0x203   : > { %v8467_v55 = vpack.c.bf16 %v3462_v34, %v3454_v35  ;;  %v3463_v40 = vmax.f32 %v2120_v8, 0.0  ;;  %v2124_v18 = vadd.f32 %v2123_v38, %v1931_v23  ;;  %v8469_v28 = vpop.f32.mrf.mxu1  ;;  %3107 = vmatmul.mubr.bf16.gmra.mxu1 %v7220_v44  ;;  %2923 = vmatprep.mubr.bf16.mxu0 %v10707_v12  ;;  %v7222_v23 = vld [vmem:[%s10650_s2] sm:$0xff]  ;;  %v10841_v44 = vld [vmem:[#allocation54_spill] sm:$0xff] }
 0x204   : > { %10838 = vst [vmem:[#allocation44_spill] sm:$0xff] %v8469_v28  ;;  %v2125_v50 = vpop.f32.mrf.mxu0  ;;  %3116 = vmatprep.mubr.bf16.mxu1 %v7221_v17  ;;  %v8483_v35 = vrot.slane %v7222_v23, %v604_v5  ;;  %v1937_v38 = vadd.f32 %v10841_v44, %v8077_v13  ;;  %v6929_v5 = vld [vmem:[#allocation6 + $0x274] ss:$8 sps:$4 sm:$0xff]  }
 0x205   : > { %v2126_v52 = vadd.f32 %v2125_v50, %v1933_v9  ;;  %v8476_v49 = vpop.f32.mrf.mxu1  ;;  %4583 = vmatpush2.bf16.msra.mxu1 %v6894_v3  ;;  %v8478_v34 = vpack.c.bf16 %v3463_v40, %v3455_v57  ;;  %v2267_v9 = vadd.f32 %v10842_v4, %v8463_v26  ;;  %v3470_v40 = vmax.f32 %v2124_v18, 0.0  ;;  %v7223_v44 = vld [vmem:[%s7547_s11 + $0xc8] ss:$12 sps:$4 sm:$0xff]   ;;  %v7224_v18 = vld [vmem:[%s7547_s11 + $0xc0] ss:$12 sps:$4 sm:$0xff]  }
 0x206   : > { %10840 = vst [vmem:[#allocation47_spill] sm:$0xff] %v8476_v49  ;;  %v2127_v8 = vpop.f32.mrf.mxu0  ;;  %4584 = vmatprep.subr.bf16.mxu1 %v6899_v15  ;;  %v10844_v15 = vld [vmem:[#allocation57_spill] sm:$0xff] }
 0x207   : > { %v2128_v50 = vadd.f32 %v2127_v8, %v1935_v16  ;;  %v8489_v3 = vpop.f32.mrf.mxu1  ;;  %v2269_v23 = vadd.f32 %v10844_v15, %v8483_v35  ;;  %v3471_v4 = vmax.f32 %v2126_v52, 0.0 }
 0x208   : > { %10843 = vst [vmem:[#allocation48_spill] sm:$0xff] %v8489_v3  ;;  %v2129_v57 = vpop.f32.mrf.mxu0 }
 0x209   : > { %v3478_v17 = vmax.f32 %v2128_v50, 0.0  ;;  %v2130_v6 = vadd.f32 %v2129_v57, %v1937_v38  ;;  %v8491_v49 = vpop.f32.mrf.mxu1  ;;  %4585 = vmatpush2.bf16.msra.mxu1 %v6897_v10  ;;  %v7225_v10 = vld [vmem:[%s7547_s11 + $0xdc] ss:$12 sps:$4 sm:$0xff]   ;;  %v2271_v50 = vadd.f32 %v8090_v25, %v8463_v26 }
 0x20a   : > { %v2459_v13 = vpop.f32.mrf.mxu0  ;;  %2924 = vmatmul.mubr.bf16.gmra.mxu0 %v7223_v44  ;;  %4940 = vmatprep.subr.bf16.mxu1 %v6929_v5 }
 0x20b   : > { %v8496_v16 = vpack.c.bf16 %v3478_v17, %v3470_v40  ;;  %v3479_v8 = vmax.f32 %v2130_v6, 0.0  ;;  %v2460_v3 = vadd.f32 %v2459_v13, %v2267_v9  ;;  %v8498_v28 = vpop.f32.mrf.mxu1  ;;  %3117 = vmatmul.mubr.bf16.gmra.mxu1 %v7224_v18  ;;  %2933 = vmatprep.mubr.bf16.mxu0 %v10707_v12  ;;  %v2273_v17 = vadd.f32 %v8095_v56, %v8483_v35 }
 0x20c   : > { %v2461_v38 = vpop.f32.mrf.mxu0  ;;  %3126 = vmatprep.mubr.bf16.mxu1 %v7225_v10  ;;  %v2277_v6 = vadd.f32 %v8100_v39, %v8463_v26 }
 0x20d   : > { %v2462_v57 = vadd.f32 %v2461_v38, %v2269_v23  ;;  %v8505_v52 = vpop.f32.mrf.mxu1  ;;  %v8507_v40 = vpack.c.bf16 %v3479_v8, %v3471_v4  ;;  %v3392_v44 = vmax.f32 %v2460_v3, 0.0  ;;  %v2279_v4 = vadd.f32 %v8108_v59, %v8483_v35  ;;  %v7226_v38 = vld [vmem:[%s7547_s11 + $0xe0] ss:$12 sps:$4 sm:$0xff]  }
 0x20e   : > { %v2463_v9 = vpop.f32.mrf.mxu0  ;;  %v2281_v59 = vadd.f32 %v8112_v62, %v8463_v26 }
 0x20f   : > { %v2464_v15 = vadd.f32 %v2463_v9, %v2271_v50  ;;  %v8513_v13 = vpop.f32.mrf.mxu1  ;;  %v3393_v56 = vmax.f32 %v2462_v57, 0.0 }
 0x210   : > { %10845 = vst [vmem:[#allocation50_spill] sm:$0xff] %v8513_v13  ;;  %v2465_v5 = vpop.f32.mrf.mxu0  ;;  %v7227_v13 = vld [vmem:[%s7547_s11 + $0xd8] ss:$12 sps:$4 sm:$0xff]  }
 0x211   : > { %v3400_v25 = vmax.f32 %v2464_v15, 0.0  ;;  %v2466_v23 = vadd.f32 %v2465_v5, %v2273_v17  ;;  %v8515_v18 = vpop.f32.mrf.mxu1  ;;  %v7228_v17 = vld [vmem:[%s7547_s11 + $0xf4] ss:$12 sps:$4 sm:$0xff]  }
 0x212   : > { %v2469_v8 = vpop.f32.mrf.mxu0  ;;  %2934 = vmatmul.mubr.bf16.gmra.mxu0 %v7226_v38 }
 0x213   : > { %v8520_v10 = vpack.c.bf16 %v3400_v25, %v3392_v44  ;;  %v3401_v39 = vmax.f32 %v2466_v23, 0.0  ;;  %v2470_v50 = vadd.f32 %v2469_v8, %v2277_v6  ;;  %v8522_v9 = vpop.f32.mrf.mxu1  ;;  %3127 = vmatmul.mubr.bf16.gmra.mxu1 %v7227_v13  ;;  %2943 = vmatprep.mubr.bf16.mxu0 %v10707_v12  ;;  %v2283_v6 = vadd.f32 %v8119_v41, %v8483_v35 }
 0x214   : > { %v2471_v3 = vpop.f32.mrf.mxu0  ;;  %3136 = vmatprep.mubr.bf16.mxu1 %v7228_v17  ;;  %v2287_v13 = vadd.f32 %v8124_v7, %v8463_v26  ;;  %v7229_v17 = vld [vmem:[%s7547_s11 + $0xf8] ss:$12 sps:$4 sm:$0xff]  }
 0x215   : > { %10846 = vst [vmem:[#allocation51_spill] sm:$0xff] %v8520_v10  ;;  %v2472_v15 = vadd.f32 %v2471_v3, %v2279_v4  ;;  %v8529_v5 = vpop.f32.mrf.mxu1  ;;  %v8531_v57 = vpack.c.bf16 %v3401_v39, %v3393_v56  ;;  %v3408_v38 = vmax.f32 %v2470_v50, 0.0  ;;  %v2289_v56 = vadd.f32 %v8132_v27, %v8483_v35 }
 0x216   : > { %v2473_v44 = vpop.f32.mrf.mxu0  ;;  %v2291_v27 = vadd.f32 %v8136_v36, %v8463_v26 }
 0x217   : > { %10847 = vst [vmem:[#allocation52_spill] sm:$0xff] %v8531_v57  ;;  %v2474_v25 = vadd.f32 %v2473_v44, %v2281_v59  ;;  %v8537_v23 = vpop.f32.mrf.mxu1  ;;  %v3409_v41 = vmax.f32 %v2472_v15, 0.0  ;;  %v7230_v57 = vld [vmem:[%s7547_s11 + $0xf0] ss:$12 sps:$4 sm:$0xff]  }
 0x218   : > { %v2475_v8 = vpop.f32.mrf.mxu0 }
 0x219   : > { %v3416_v62 = vmax.f32 %v2474_v25, 0.0  ;;  %v2476_v4 = vadd.f32 %v2475_v8, %v2283_v6  ;;  %v8539_v3 = vpop.f32.mrf.mxu1  ;;  %v7231_v6 = vld [vmem:[%s7547_s11 + $0x10c] ss:$12 sps:$4 sm:$0xff]  }
 0x21a   : > { %v2479_v39 = vpop.f32.mrf.mxu0  ;;  %2944 = vmatmul.mubr.bf16.gmra.mxu0 %v7229_v17 }
 0x21b   : > { %v8544_v10 = vpack.c.bf16 %v3416_v62, %v3408_v38  ;;  %v3417_v7 = vmax.f32 %v2476_v4, 0.0  ;;  %v2480_v59 = vadd.f32 %v2479_v39, %v2287_v13  ;;  %v8546_v44 = vpop.f32.mrf.mxu1  ;;  %3137 = vmatmul.mubr.bf16.gmra.mxu1 %v7230_v57  ;;  %2953 = vmatprep.mubr.bf16.mxu0 %v10707_v12  ;;  %v2293_v13 = vadd.f32 %v8143_v60, %v8483_v35 }
 0x21c   : > { %v2481_v50 = vpop.f32.mrf.mxu0  ;;  %3146 = vmatprep.mubr.bf16.mxu1 %v7231_v6  ;;  %v2297_v57 = vadd.f32 %v8148_v30, %v8463_v26  ;;  %v7232_v6 = vld [vmem:[%s7547_s11 + $0x110] ss:$12 sps:$4 sm:$0xff]  }
 0x21d   : > { %10848 = vst [vmem:[#allocation53_spill] sm:$0xff] %v8544_v10  ;;  %v2482_v25 = vadd.f32 %v2481_v50, %v2289_v56  ;;  %v8553_v8 = vpop.f32.mrf.mxu1  ;;  %v8555_v15 = vpack.c.bf16 %v3417_v7, %v3409_v41  ;;  %v3424_v17 = vmax.f32 %v2480_v59, 0.0  ;;  %v2299_v41 = vadd.f32 %v8156_v22, %v8483_v35 }
 0x21e   : > { %v2483_v38 = vpop.f32.mrf.mxu0  ;;  %v2301_v22 = vadd.f32 %v8160_v19, %v8463_v26 }
 0x21f   : > { %10849 = vst [vmem:[#allocation54_spill] sm:$0xff] %v8555_v15  ;;  %v2484_v62 = vadd.f32 %v2483_v38, %v2291_v27  ;;  %v8561_v4 = vpop.f32.mrf.mxu1  ;;  %v3425_v60 = vmax.f32 %v2482_v25, 0.0  ;;  %v7233_v15 = vld [vmem:[%s7547_s11 + $0x108] ss:$12 sps:$4 sm:$0xff]  }
 0x220   : > { %v2485_v39 = vpop.f32.mrf.mxu0 }
 0x221   : > { %v3432_v36 = vmax.f32 %v2484_v62, 0.0  ;;  %v2486_v56 = vadd.f32 %v2485_v39, %v2293_v13  ;;  %v8563_v50 = vpop.f32.mrf.mxu1  ;;  %v7234_v13 = vld [vmem:[%s7547_s11 + $0x124] ss:$12 sps:$4 sm:$0xff]  }
 0x222   : > { %v2489_v7 = vpop.f32.mrf.mxu0  ;;  %2954 = vmatmul.mubr.bf16.gmra.mxu0 %v7232_v6 }
 0x223   : > { %v8568_v10 = vpack.c.bf16 %v3432_v36, %v3424_v17  ;;  %v3433_v30 = vmax.f32 %v2486_v56, 0.0  ;;  %v2490_v27 = vadd.f32 %v2489_v7, %v2297_v57  ;;  %v8570_v38 = vpop.f32.mrf.mxu1  ;;  %3147 = vmatmul.mubr.bf16.gmra.mxu1 %v7233_v15  ;;  %2963 = vmatprep.mubr.bf16.mxu0 %v10707_v12  ;;  %v2303_v57 = vadd.f32 %v8167_v11, %v8483_v35 }
 0x224   : > { %v2491_v59 = vpop.f32.mrf.mxu0  ;;  %3156 = vmatprep.mubr.bf16.mxu1 %v7234_v13  ;;  %v2307_v15 = vadd.f32 %v8172_v47, %v8463_v26  ;;  %v7235_v13 = vld [vmem:[%s7547_s11 + $0x128] ss:$12 sps:$4 sm:$0xff]  }
 0x225   : > { %10850 = vst [vmem:[#allocation56_spill] sm:$0xff] %v8568_v10  ;;  %v2492_v62 = vadd.f32 %v2491_v59, %v2299_v41  ;;  %v8577_v39 = vpop.f32.mrf.mxu1  ;;  %v8579_v25 = vpack.c.bf16 %v3433_v30, %v3425_v60  ;;  %v3440_v6 = vmax.f32 %v2490_v27, 0.0  ;;  %v2309_v60 = vadd.f32 %v8180_v42, %v8483_v35 }
 0x226   : > { %v2493_v17 = vpop.f32.mrf.mxu0  ;;  %v2311_v42 = vadd.f32 %v8184_v31, %v8463_v26 }
 0x227   : > { %10851 = vst [vmem:[#allocation57_spill] sm:$0xff] %v8579_v25  ;;  %v2494_v36 = vadd.f32 %v2493_v17, %v2301_v22  ;;  %v8585_v56 = vpop.f32.mrf.mxu1  ;;  %v3441_v11 = vmax.f32 %v2492_v62, 0.0  ;;  %v7236_v25 = vld [vmem:[%s7547_s11 + $0x120] ss:$12 sps:$4 sm:$0xff]  }
 0x228   : > { %v2495_v7 = vpop.f32.mrf.mxu0 }
 0x229   : > { %v3448_v19 = vmax.f32 %v2494_v36, 0.0  ;;  %v2496_v41 = vadd.f32 %v2495_v7, %v2303_v57  ;;  %v8587_v59 = vpop.f32.mrf.mxu1  ;;  %v7237_v57 = vld [vmem:[%s7547_s11 + $0x13c] ss:$12 sps:$4 sm:$0xff]  }
 0x22a   : > { %v2499_v30 = vpop.f32.mrf.mxu0  ;;  %2964 = vmatmul.mubr.bf16.gmra.mxu0 %v7235_v13 }
 0x22b   : > { %v8592_v10 = vpack.c.bf16 %v3448_v19, %v3440_v6  ;;  %v3449_v47 = vmax.f32 %v2496_v41, 0.0  ;;  %v2500_v22 = vadd.f32 %v2499_v30, %v2307_v15  ;;  %v8594_v17 = vpop.f32.mrf.mxu1  ;;  %3157 = vmatmul.mubr.bf16.gmra.mxu1 %v7236_v25  ;;  %2973 = vmatprep.mubr.bf16.mxu0 %v10707_v12  ;;  %v2313_v15 = vadd.f32 %v8191_v37, %v8483_v35 }
 0x22c   : > { %v2501_v27 = vpop.f32.mrf.mxu0  ;;  %3166 = vmatprep.mubr.bf16.mxu1 %v7237_v57  ;;  %v2317_v25 = vadd.f32 %v8196_v21, %v8463_v26  ;;  %v7238_v57 = vld [vmem:[%s7547_s11 + $0x140] ss:$12 sps:$4 sm:$0xff]  }
 0x22d   : > { %10852 = vst [vmem:[#allocation68_spill] sm:$0xff] %v8592_v10  ;;  %v2502_v36 = vadd.f32 %v2501_v27, %v2309_v60  ;;  %v8601_v7 = vpop.f32.mrf.mxu1  ;;  %v8603_v62 = vpack.c.bf16 %v3449_v47, %v3441_v11  ;;  %v3456_v13 = vmax.f32 %v2500_v22, 0.0  ;;  %v2319_v11 = vadd.f32 %v8204_v24, %v8483_v35 }
 0x22e   : > { %v2503_v6 = vpop.f32.mrf.mxu0  ;;  %v2321_v24 = vadd.f32 %v8208_v33, %v8463_v26 }
 0x22f   : > { %10853 = vst [vmem:[#allocation69_spill] sm:$0xff] %v8603_v62  ;;  %v2504_v19 = vadd.f32 %v2503_v6, %v2311_v42  ;;  %v8609_v41 = vpop.f32.mrf.mxu1  ;;  %v3457_v37 = vmax.f32 %v2502_v36, 0.0  ;;  %v7239_v62 = vld [vmem:[%s7547_s11 + $0x138] ss:$12 sps:$4 sm:$0xff]  }
 0x230   : > { %v2505_v30 = vpop.f32.mrf.mxu0 }
 0x231   : > { %v3464_v31 = vmax.f32 %v2504_v19, 0.0  ;;  %v2506_v60 = vadd.f32 %v2505_v30, %v2313_v15  ;;  %v8611_v27 = vpop.f32.mrf.mxu1  ;;  %v7240_v15 = vld [vmem:[%s7547_s11 + $0x154] ss:$12 sps:$4 sm:$0xff]  }
 0x232   : > { %v2509_v47 = vpop.f32.mrf.mxu0  ;;  %2974 = vmatmul.mubr.bf16.gmra.mxu0 %v7238_v57 }
 0x233   : > { %v8616_v10 = vpack.c.bf16 %v3464_v31, %v3456_v13  ;;  %v3465_v21 = vmax.f32 %v2506_v60, 0.0  ;;  %v2510_v42 = vadd.f32 %v2509_v47, %v2317_v25  ;;  %v8618_v6 = vpop.f32.mrf.mxu1  ;;  %3167 = vmatmul.mubr.bf16.gmra.mxu1 %v7239_v62  ;;  %2983 = vmatprep.mubr.bf16.mxu0 %v10707_v12  ;;  %v2323_v25 = vadd.f32 %v8215_v20, %v8483_v35 }
 0x234   : > { %v2511_v22 = vpop.f32.mrf.mxu0  ;;  %3176 = vmatprep.mubr.bf16.mxu1 %v7240_v15  ;;  %v2327_v62 = vadd.f32 %v8220_v54, %v8463_v26  ;;  %v7241_v15 = vld [vmem:[%s7547_s11 + $0x158] ss:$12 sps:$4 sm:$0xff]  }
 0x235   : > { %10854 = vst [vmem:[#allocation70_spill] sm:$0xff] %v8616_v10  ;;  %v2512_v19 = vadd.f32 %v2511_v22, %v2319_v11  ;;  %v8625_v30 = vpop.f32.mrf.mxu1  ;;  %v8627_v36 = vpack.c.bf16 %v3465_v21, %v3457_v37  ;;  %v3472_v57 = vmax.f32 %v2510_v42, 0.0  ;;  %v2329_v37 = vadd.f32 %v8228_v29, %v8483_v35 }
 0x236   : > { %v2513_v13 = vpop.f32.mrf.mxu0  ;;  %v2331_v29 = vadd.f32 %v8232_v1, %v8463_v26 }
 0x237   : > { %10855 = vst [vmem:[#allocation71_spill] sm:$0xff] %v8627_v36  ;;  %v2514_v31 = vadd.f32 %v2513_v13, %v2321_v24  ;;  %v8633_v60 = vpop.f32.mrf.mxu1  ;;  %v3473_v20 = vmax.f32 %v2512_v19, 0.0  ;;  %v7242_v36 = vld [vmem:[%s7547_s11 + $0x150] ss:$12 sps:$4 sm:$0xff]  }
 0x238   : > { %v2515_v47 = vpop.f32.mrf.mxu0 }
 0x239   : > { %v3480_v33 = vmax.f32 %v2514_v31, 0.0  ;;  %v2516_v11 = vadd.f32 %v2515_v47, %v2323_v25  ;;  %v8635_v22 = vpop.f32.mrf.mxu1  ;;  %v7243_v25 = vld [vmem:[%s7547_s11 + $0x16c] ss:$12 sps:$4 sm:$0xff]  }
 0x23a   : > { %v2519_v21 = vpop.f32.mrf.mxu0  ;;  %2984 = vmatmul.mubr.bf16.gmra.mxu0 %v7241_v15 }
 0x23b   : > { %v8640_v10 = vpack.c.bf16 %v3480_v33, %v3472_v57  ;;  %v3481_v54 = vmax.f32 %v2516_v11, 0.0  ;;  %v2520_v24 = vadd.f32 %v2519_v21, %v2327_v62  ;;  %v8642_v13 = vpop.f32.mrf.mxu1  ;;  %3177 = vmatmul.mubr.bf16.gmra.mxu1 %v7242_v36  ;;  %2993 = vmatprep.mubr.bf16.mxu0 %v10707_v12  ;;  %v2333_v62 = vadd.f32 %v8239_v32, %v8483_v35 }
 0x23c   : > { %v2521_v42 = vpop.f32.mrf.mxu0  ;;  %3186 = vmatprep.mubr.bf16.mxu1 %v7243_v25  ;;  %v2337_v36 = vadd.f32 %v8244_v2, %v8463_v26 }
 0x23d   : > { %10856 = vst [vmem:[#allocation72_spill] sm:$0xff] %v8640_v10  ;;  %v2522_v31 = vadd.f32 %v2521_v42, %v2329_v37  ;;  %v8649_v47 = vpop.f32.mrf.mxu1  ;;  %v8651_v19 = vpack.c.bf16 %v3481_v54, %v3473_v20  ;;  %v3488_v15 = vmax.f32 %v2520_v24, 0.0  ;;  %v2339_v20 = vadd.f32 %v8252_v58, %v8483_v35  ;;  %v7244_v42 = vld [vmem:[%s7547_s11 + $0x170] ss:$12 sps:$4 sm:$0xff]  }
 0x23e   : > { %v2523_v57 = vpop.f32.mrf.mxu0  ;;  %v2341_v58 = vadd.f32 %v8256_v14, %v8463_v26 }
 0x23f   : > { %10857 = vst [vmem:[#allocation73_spill] sm:$0xff] %v8651_v19  ;;  %v2524_v33 = vadd.f32 %v2523_v57, %v2331_v29  ;;  %v8657_v11 = vpop.f32.mrf.mxu1  ;;  %v3489_v32 = vmax.f32 %v2522_v31, 0.0  ;;  %v7245_v19 = vld [vmem:[%s7547_s11 + $0x168] ss:$12 sps:$4 sm:$0xff]  }
 0x240   : > { %v2525_v21 = vpop.f32.mrf.mxu0 }
 0x241   : > { %v3496_v1 = vmax.f32 %v2524_v33, 0.0  ;;  %v2526_v25 = vadd.f32 %v2525_v21, %v2333_v62  ;;  %v8659_v37 = vpop.f32.mrf.mxu1 }
 0x242   : > { %10858 = vst [vmem:[#allocation74_spill] sm:$0xff] %v8659_v37  ;;  %v2529_v54 = vpop.f32.mrf.mxu0  ;;  %2994 = vmatmul.mubr.bf16.gmra.mxu0 %v7244_v42 }
 0x243   : > { %v8664_v10 = vpack.c.bf16 %v3496_v1, %v3488_v15  ;;  %v3497_v2 = vmax.f32 %v2526_v25, 0.0  ;;  %v2530_v29 = vadd.f32 %v2529_v54, %v2337_v36  ;;  %v8666_v57 = vpop.f32.mrf.mxu1  ;;  %3187 = vmatmul.mubr.bf16.gmra.mxu1 %v7245_v19  ;;  %3229 = vmatprep.mubr.bf16.mxu0 %v10707_v12  ;;  %v10863_v36 = vld [vmem:[#allocation67_spill] sm:$0xff]  ;;  %v10864_v19 = vld [vmem:[#allocation42_spill] sm:$0xff] }
 0x244   : > { %10860 = vst [vmem:[#allocation76_spill] sm:$0xff] %v8666_v57  ;;  %4586 = vmatprep.mubr.bf16.mxu1 %v8377_v45  ;;  %v2531_v24 = vpop.f32.mrf.mxu0  ;;  %v2343_v15 = vadd.f32 %v10863_v36, %v8483_v35  ;;  %v2347_v1 = vadd.f32 %v10864_v19, %v8463_v26  ;;  %v6900_v45 = vld [vmem:[#allocation6 + $0x170] ss:$8 sps:$4 sm:$0xff]   ;;  %v7246_v36 = vld [vmem:[%s7547_s11 + $0x8] ss:$12 sps:$4 sm:$0xff]  }
 0x245   : > { %10859 = vst [vmem:[#allocation75_spill] sm:$0xff] %v8664_v10  ;;  %v2532_v62 = vadd.f32 %v2531_v24, %v2339_v20  ;;  %v8673_v33 = vpop.f32.mrf.mxu1  ;;  %v8675_v31 = vpack.c.bf16 %v3497_v2, %v3489_v32  ;;  %v3504_v10 = vmax.f32 %v2530_v29, 0.0  ;;  %v6905_v32 = vld [vmem:[#allocation6 + $0x164] ss:$8 sps:$4 sm:$0xff]   ;;  %v6927_v2 = vld [vmem:[#allocation6 + $0x270] ss:$8 sps:$4 sm:$0xff]  }
 0x246   : > { %10861 = vst [vmem:[#allocation77_spill] sm:$0xff] %v8673_v33  ;;  %v2533_v21 = vpop.f32.mrf.mxu0  ;;  %v6932_v57 = vld [vmem:[#allocation6 + $0x264] ss:$8 sps:$4 sm:$0xff]   ;;  %v6903_v29 = vld [vmem:[#allocation6 + $0x160] ss:$8 sps:$4 sm:$0xff]  }
 0x247   : > { %10862 = vst [vmem:[#allocation78_spill] sm:$0xff] %v8675_v31  ;;  %v2534_v25 = vadd.f32 %v2533_v21, %v2341_v58  ;;  %v8681_v54 = vpop.f32.mrf.mxu1  ;;  %v2349_v31 = vadd.f32 %v8282_v53, %v8483_v35  ;;  %v3505_v19 = vmax.f32 %v2532_v62, 0.0  ;;  %v6908_v53 = vld [vmem:[#allocation6 + $0x154] ss:$8 sps:$4 sm:$0xff]  }
 0x248   : > { %10865 = vst [vmem:[#allocation67_spill] sm:$0xff] %v8681_v54  ;;  %v2535_v42 = vpop.f32.mrf.mxu0 }
 0x249   : > { %v3512_v14 = vmax.f32 %v2534_v25, 0.0  ;;  %v2536_v20 = vadd.f32 %v2535_v42, %v2343_v15  ;;  %v8683_v24 = vpop.f32.mrf.mxu1  ;;  %v2351_v25 = vadd.f32 %v8286_v63, %v8463_v26  ;;  %v10868_v42 = vld [vmem:[#allocation17_spill] sm:$0xff] }
 0x24a   : > { %v2539_v33 = vpop.f32.mrf.mxu0  ;;  %3230 = vmatmul.mubr.bf16.vlgmr.msra.gmra.mxu0 %v7246_v36 }
 0x24b   : > { %v8688_v58 = vpack.c.bf16 %v3512_v14, %v3504_v10  ;;  %v3513_v21 = vmax.f32 %v2536_v20, 0.0  ;;  %v2540_v54 = vadd.f32 %v2539_v33, %v2347_v1  ;;  %v8690_v37 = vpop.f32.mrf.mxu1  ;;  %4587 = vmatmul.mubr.bf16.vlgmr.msra.gmra.mxu1 %v8366_v0  ;;  %4748 = vmatpush1.bf16.msra.mxu0 %v6900_v45  ;;  %v6930_v33 = vld [vmem:[#allocation6 + $0x260] ss:$8 sps:$4 sm:$0xff]   ;;  %v6938_v45 = vld [vmem:[#allocation6 + $0x254] ss:$8 sps:$4 sm:$0xff]   ;;  %v2357_v14 = vadd.f32 %v10868_v42, %v8463_v26 }
 0x24c   : > { %4596 = vmatprep.mubr.bf16.mxu1 %v8401_v48  ;;  %v2541_v15 = vpop.f32.mrf.mxu0  ;;  %3239 = vmatprep.mubr.bf16.mxu0 %v10707_v12  ;;  %v2353_v48 = vadd.f32 %v8294_v46, %v8483_v35  ;;  %v10869_v46 = vld [vmem:[#allocation45_spill] sm:$0xff] }
 0x24d   : > { %10866 = vst [vmem:[#allocation42_spill] sm:$0xff] %v8688_v58  ;;  %v2542_v62 = vadd.f32 %v2541_v15, %v2349_v31  ;;  %v8697_v10 = vpop.f32.mrf.mxu1  ;;  %4749 = vmatprep.subr.bf16.mxu0 %v6905_v32  ;;  %4941 = vmatpush1.bf16.msra.mxu1 %v6927_v2  ;;  %v8699_v1 = vpack.c.bf16 %v3513_v21, %v3505_v19  ;;  %v6906_v32 = vld [vmem:[#allocation6 + $0x150] ss:$8 sps:$4 sm:$0xff]   ;;  %v3520_v2 = vmax.f32 %v2540_v54, 0.0 }
 0x24e   : > { %v2543_v0 = vpop.f32.mrf.mxu0  ;;  %4942 = vmatprep.subr.bf16.mxu1 %v6932_v57  ;;  %v6911_v57 = vld [vmem:[#allocation6 + $0x144] ss:$8 sps:$4 sm:$0xff]   ;;  %v6936_v15 = vld [vmem:[#allocation6 + $0x250] ss:$8 sps:$4 sm:$0xff]   ;;  %v2359_v58 = vadd.f32 %v10869_v46, %v8483_v35 }
 0x24f   : > { %10867 = vst [vmem:[#allocation79_spill] sm:$0xff] %v8699_v1  ;;  %v2544_v20 = vadd.f32 %v2543_v0, %v2351_v25  ;;  %v8705_v63 = vpop.f32.mrf.mxu1  ;;  %4750 = vmatpush1.bf16.msra.mxu0 %v6903_v29  ;;  %v7247_v1 = vld [vmem:[%s7547_s11 + $0x20] ss:$12 sps:$4 sm:$0xff]   ;;  %v3521_v29 = vmax.f32 %v2542_v62, 0.0 }
 0x250   : > { %v2545_v31 = vpop.f32.mrf.mxu0  ;;  %4751 = vmatprep.subr.bf16.mxu0 %v6908_v53  ;;  %v6941_v25 = vld [vmem:[#allocation6 + $0x244] ss:$8 sps:$4 sm:$0xff]  }
 0x251   : > { %v3528_v36 = vmax.f32 %v2544_v20, 0.0  ;;  %v2546_v19 = vadd.f32 %v2545_v31, %v2353_v48  ;;  %v8707_v21 = vpop.f32.mrf.mxu1  ;;  %4943 = vmatpush1.bf16.msra.mxu1 %v6930_v33  ;;  %v6909_v48 = vld [vmem:[#allocation6 + $0x140] ss:$8 sps:$4 sm:$0xff]  }
 0x252   : > { %v2549_v42 = vpop.f32.mrf.mxu0  ;;  %3240 = vmatmul.mubr.bf16.gmra.mxu0 %v7247_v1  ;;  %4944 = vmatprep.subr.bf16.mxu1 %v6938_v45  ;;  %v10871_v1 = vld [vmem:[#allocation18_spill] sm:$0xff] }
 0x253   : > { %v8712_v0 = vpack.c.bf16 %v3528_v36, %v3520_v2  ;;  %v3529_v53 = vmax.f32 %v2546_v19, 0.0  ;;  %v2550_v54 = vadd.f32 %v2549_v42, %v2357_v14  ;;  %v8714_v20 = vpop.f32.mrf.mxu1  ;;  %4597 = vmatmul.mubr.bf16.gmra.mxu1 %v8390_v43  ;;  %3249 = vmatprep.mubr.bf16.mxu0 %v10707_v12  ;;  %v2361_v45 = vadd.f32 %v10871_v1, %v8463_v26  ;;  %v6914_v2 = vld [vmem:[#allocation6 + $0x134] ss:$8 sps:$4 sm:$0xff]   ;;  %v6939_v14 = vld [vmem:[#allocation6 + $0x240] ss:$8 sps:$4 sm:$0xff]  }
 0x254   : > { %4606 = vmatprep.mubr.bf16.mxu1 %v8425_v61  ;;  %v2551_v33 = vpop.f32.mrf.mxu0  ;;  %4752 = vmatpush1.bf16.msra.mxu0 %v6906_v32  ;;  %v6947_v19 = vld [vmem:[#allocation6 + $0x234] ss:$8 sps:$4 sm:$0xff]   ;;  %v10875_v32 = vld [vmem:[#allocation22_spill] sm:$0xff] }
 0x255   : > { %10870 = vst [vmem:[#allocation17_spill] sm:$0xff] %v8712_v0  ;;  %v2552_v31 = vadd.f32 %v2551_v33, %v2359_v58  ;;  %v8721_v62 = vpop.f32.mrf.mxu1  ;;  %4753 = vmatprep.subr.bf16.mxu0 %v6911_v57  ;;  %4945 = vmatpush1.bf16.msra.mxu1 %v6936_v15  ;;  %v8723_v36 = vpack.c.bf16 %v3529_v53, %v3521_v29  ;;  %v10874_v61 = vld [vmem:[#allocation20_spill] sm:$0xff]  ;;  %v3536_v15 = vmax.f32 %v2550_v54, 0.0 }
 0x256   : > { %10872 = vst [vmem:[#allocation45_spill] sm:$0xff] %v8721_v62  ;;  %v2553_v43 = vpop.f32.mrf.mxu0  ;;  %4946 = vmatprep.subr.bf16.mxu1 %v6941_v25  ;;  %v2363_v46 = vadd.f32 %v10874_v61, %v8483_v35  ;;  %v2367_v42 = vadd.f32 %v10875_v32, %v8463_v26  ;;  %v6912_v57 = vld [vmem:[#allocation6 + $0x130] ss:$8 sps:$4 sm:$0xff]   ;;  %v6917_v25 = vld [vmem:[#allocation6 + $0x124] ss:$8 sps:$4 sm:$0xff]   ;;  %v2369_v61 = vadd.f32 %v8349_v51, %v8483_v35 }
 0x257   : > { %10873 = vst [vmem:[#allocation18_spill] sm:$0xff] %v8723_v36  ;;  %v2554_v1 = vadd.f32 %v2553_v43, %v2361_v45  ;;  %v8729_v58 = vpop.f32.mrf.mxu1  ;;  %v6945_v36 = vld [vmem:[#allocation6 + $0x230] ss:$8 sps:$4 sm:$0xff]   ;;  %v6950_v45 = vld [vmem:[#allocation6 + $0x224] ss:$8 sps:$4 sm:$0xff]   ;;  %v3537_v43 = vmax.f32 %v2552_v31, 0.0 }
 0x258   : > { %10876 = vst [vmem:[#allocation20_spill] sm:$0xff] %v8729_v58  ;;  %v2555_v33 = vpop.f32.mrf.mxu0  ;;  %4754 = vmatpush1.bf16.msra.mxu0 %v6909_v48  ;;  %v7248_v62 = vld [vmem:[%s7547_s11 + $0x38] ss:$12 sps:$4 sm:$0xff]   ;;  %v6915_v51 = vld [vmem:[#allocation6 + $0x120] ss:$8 sps:$4 sm:$0xff]  }
 0x259   : > { %v3544_v0 = vmax.f32 %v2554_v1, 0.0  ;;  %v2556_v29 = vadd.f32 %v2555_v33, %v2363_v46  ;;  %v8731_v53 = vpop.f32.mrf.mxu1  ;;  %4755 = vmatprep.subr.bf16.mxu0 %v6914_v2  ;;  %4947 = vmatpush1.bf16.msra.mxu1 %v6939_v14  ;;  %v10880_v33 = vld [vmem:[#allocation34_spill] sm:$0xff]  ;;  %v10881_v2 = vld [vmem:[#allocation41_spill] sm:$0xff]  ;;  %v7249_v58 = vld [vmem:[%s7547_s11 + $0x50] ss:$12 sps:$4 sm:$0xff]  }
 0x25a   : > { %10877 = vst [vmem:[#allocation22_spill] sm:$0xff] %v8731_v53  ;;  %v2559_v32 = vpop.f32.mrf.mxu0  ;;  %3250 = vmatmul.mubr.bf16.gmra.mxu0 %v7248_v62  ;;  %4948 = vmatprep.subr.bf16.mxu1 %v6947_v19  ;;  %v10882_v62 = vld [vmem:[#allocation21_spill] sm:$0xff] }
 0x25b   : > { %v8736_v48 = vpack.c.bf16 %v3544_v0, %v3536_v15  ;;  %v3545_v54 = vmax.f32 %v2556_v29, 0.0  ;;  %v2560_v1 = vadd.f32 %v2559_v32, %v2367_v42  ;;  %v8738_v46 = vpop.f32.mrf.mxu1  ;;  %4607 = vmatmul.mubr.bf16.gmra.mxu1 %v10880_v33  ;;  %3259 = vmatprep.mubr.bf16.mxu0 %v10707_v12  ;;  %v2371_v19 = vadd.f32 %v10882_v62, %v8463_v26  ;;  %v6920_v0 = vld [vmem:[#allocation6 + $0x114] ss:$8 sps:$4 sm:$0xff]   ;;  %v6948_v42 = vld [vmem:[#allocation6 + $0x220] ss:$8 sps:$4 sm:$0xff]  }
 0x25c   : > { %10879 = vst [vmem:[#allocation81_spill] sm:$0xff] %v8738_v46  ;;  %4616 = vmatprep.mubr.bf16.mxu1 %v10881_v2  ;;  %v2561_v14 = vpop.f32.mrf.mxu0  ;;  %4756 = vmatpush1.bf16.msra.mxu0 %v6912_v57  ;;  %v6956_v32 = vld [vmem:[#allocation6 + $0x214] ss:$8 sps:$4 sm:$0xff]   ;;  %v10886_v57 = vld [vmem:[#allocation25_spill] sm:$0xff] }
 0x25d   : > { %10878 = vst [vmem:[#allocation80_spill] sm:$0xff] %v8736_v48  ;;  %v2562_v53 = vadd.f32 %v2561_v14, %v2369_v61  ;;  %v8745_v31 = vpop.f32.mrf.mxu1  ;;  %4757 = vmatprep.subr.bf16.mxu0 %v6917_v25  ;;  %4949 = vmatpush1.bf16.msra.mxu1 %v6945_v36  ;;  %v8747_v15 = vpack.c.bf16 %v3545_v54, %v3537_v43  ;;  %v10885_v33 = vld [vmem:[#allocation23_spill] sm:$0xff]  ;;  %v3552_v36 = vmax.f32 %v2560_v1, 0.0 }
 0x25e   : > { %10883 = vst [vmem:[#allocation34_spill] sm:$0xff] %v8745_v31  ;;  %v2563_v29 = vpop.f32.mrf.mxu0  ;;  %4950 = vmatprep.subr.bf16.mxu1 %v6950_v45  ;;  %v2373_v2 = vadd.f32 %v10885_v33, %v8483_v35  ;;  %v2377_v48 = vadd.f32 %v10886_v57, %v8463_v26  ;;  %v6918_v25 = vld [vmem:[#allocation6 + $0x110] ss:$8 sps:$4 sm:$0xff]   ;;  %v6923_v45 = vld [vmem:[#allocation6 + $0x104] ss:$8 sps:$4 sm:$0xff]  }
 0x25f   : > { %10884 = vst [vmem:[#allocation41_spill] sm:$0xff] %v8747_v15  ;;  %v2564_v62 = vadd.f32 %v2563_v29, %v2371_v19  ;;  %v8753_v61 = vpop.f32.mrf.mxu1  ;;  %v6954_v15 = vld [vmem:[#allocation6 + $0x210] ss:$8 sps:$4 sm:$0xff]   ;;  %v10888_v33 = vld [vmem:[#allocation26_spill] sm:$0xff]  ;;  %v3553_v29 = vmax.f32 %v2562_v53, 0.0 }
 0x260   : > { %v2565_v14 = vpop.f32.mrf.mxu0  ;;  %4758 = vmatpush1.bf16.msra.mxu0 %v6915_v51  ;;  %v2379_v46 = vadd.f32 %v10888_v33, %v8483_v35  ;;  %v6959_v19 = vld [vmem:[#allocation6 + $0x204] ss:$8 sps:$4 sm:$0xff]  }
 0x261   : > { %v3560_v31 = vmax.f32 %v2564_v62, 0.0  ;;  %v2566_v43 = vadd.f32 %v2565_v14, %v2373_v2  ;;  %v8755_v54 = vpop.f32.mrf.mxu1  ;;  %4759 = vmatprep.subr.bf16.mxu0 %v6920_v0  ;;  %4951 = vmatpush1.bf16.msra.mxu1 %v6948_v42  ;;  %v10891_v14 = vld [vmem:[#allocation38_spill] sm:$0xff] }
 0x262   : > { %10887 = vst [vmem:[#allocation21_spill] sm:$0xff] %v8755_v54  ;;  %v2569_v57 = vpop.f32.mrf.mxu0  ;;  %3260 = vmatmul.mubr.bf16.gmra.mxu0 %v7249_v58  ;;  %4952 = vmatprep.subr.bf16.mxu1 %v6956_v32  ;;  %v6921_v42 = vld [vmem:[#allocation6 + $0x100] ss:$8 sps:$4 sm:$0xff]   ;;  %v10892_v58 = vld [vmem:[#allocation28_spill] sm:$0xff] }
 0x263   : > { %v8760_v51 = vpack.c.bf16 %v3560_v31, %v3552_v36  ;;  %v3561_v1 = vmax.f32 %v2566_v43, 0.0  ;;  %v2570_v62 = vadd.f32 %v2569_v57, %v2377_v48  ;;  %v8762_v2 = vpop.f32.mrf.mxu1  ;;  %4617 = vmatmul.mubr.bf16.gmra.mxu1 %v10891_v14  ;;  %3269 = vmatprep.mubr.bf16.mxu0 %v10707_v12  ;;  %v2381_v32 = vadd.f32 %v10892_v58, %v8463_v26  ;;  %v6926_v31 = vld [vmem:[#allocation6 + $0x1f4] ss:$8 sps:$4 sm:$0xff]   ;;  %v6957_v48 = vld [vmem:[#allocation6 + $0x200] ss:$8 sps:$4 sm:$0xff]  }
 0x264   : > { %10890 = vst [vmem:[#allocation25_spill] sm:$0xff] %v8762_v2  ;;  %4626 = vmatprep.mubr.bf16.mxu1 %v8478_v34  ;;  %v2571_v0 = vpop.f32.mrf.mxu0  ;;  %4760 = vmatpush1.bf16.msra.mxu0 %v6918_v25  ;;  %v6965_v57 = vld [vmem:[#allocation6 + $0x2f4] ss:$8 sps:$4 sm:$0xff]   ;;  %v10896_v25 = vld [vmem:[#allocation29_spill] sm:$0xff] }
 0x265   : > { %10889 = vst [vmem:[#allocation23_spill] sm:$0xff] %v8760_v51  ;;  %v2572_v33 = vadd.f32 %v2571_v0, %v2379_v46  ;;  %v8769_v53 = vpop.f32.mrf.mxu1  ;;  %4761 = vmatprep.subr.bf16.mxu0 %v6923_v45  ;;  %4953 = vmatpush1.bf16.msra.mxu1 %v6954_v15  ;;  %v8771_v36 = vpack.c.bf16 %v3561_v1, %v3553_v29  ;;  %v10895_v34 = vld [vmem:[#allocation27_spill] sm:$0xff]  ;;  %v3568_v15 = vmax.f32 %v2570_v62, 0.0 }
 0x266   : > { %10893 = vst [vmem:[#allocation26_spill] sm:$0xff] %v8769_v53  ;;  %v2573_v43 = vpop.f32.mrf.mxu0  ;;  %4954 = vmatprep.subr.bf16.mxu1 %v6959_v19  ;;  %v2383_v14 = vadd.f32 %v10895_v34, %v8483_v35  ;;  %v2387_v51 = vadd.f32 %v10896_v25, %v8463_v26  ;;  %v6924_v45 = vld [vmem:[#allocation6 + $0x1f0] ss:$8 sps:$4 sm:$0xff]   ;;  %v6935_v19 = vld [vmem:[#allocation6 + $0x1e4] ss:$8 sps:$4 sm:$0xff]  }
 0x267   : > { %10894 = vst [vmem:[#allocation38_spill] sm:$0xff] %v8771_v36  ;;  %v2574_v58 = vadd.f32 %v2573_v43, %v2381_v32  ;;  %v8777_v46 = vpop.f32.mrf.mxu1  ;;  %v6963_v36 = vld [vmem:[#allocation6 + $0x2f0] ss:$8 sps:$4 sm:$0xff]   ;;  %v10897_v34 = vld [vmem:[#allocation30_spill] sm:$0xff]  ;;  %v3569_v43 = vmax.f32 %v2572_v33, 0.0 }
 0x268   : > { %v2575_v0 = vpop.f32.mrf.mxu0  ;;  %4762 = vmatpush1.bf16.msra.mxu0 %v6921_v42  ;;  %v2389_v2 = vadd.f32 %v10897_v34, %v8483_v35  ;;  %v7250_v54 = vld [vmem:[%s7547_s11 + $0x68] ss:$12 sps:$4 sm:$0xff]   ;;  %v6968_v32 = vld [vmem:[#allocation6 + $0x2e4] ss:$8 sps:$4 sm:$0xff]  }
 0x269   : > { %v3576_v53 = vmax.f32 %v2574_v58, 0.0  ;;  %v2576_v29 = vadd.f32 %v2575_v0, %v2383_v14  ;;  %v8779_v1 = vpop.f32.mrf.mxu1  ;;  %4763 = vmatprep.subr.bf16.mxu0 %v6926_v31  ;;  %4955 = vmatpush1.bf16.msra.mxu1 %v6957_v48  ;;  %v6933_v48 = vld [vmem:[#allocation6 + $0x1e0] ss:$8 sps:$4 sm:$0xff]  }
 0x26a   : > { %v2579_v25 = vpop.f32.mrf.mxu0  ;;  %3270 = vmatmul.mubr.bf16.gmra.mxu0 %v7250_v54  ;;  %4956 = vmatprep.subr.bf16.mxu1 %v6965_v57  ;;  %v10900_v54 = vld [vmem:[#allocation31_spill] sm:$0xff] }
 0x26b   : > { %v8784_v42 = vpack.c.bf16 %v3576_v53, %v3568_v15  ;;  %v3577_v62 = vmax.f32 %v2576_v29, 0.0  ;;  %v2580_v58 = vadd.f32 %v2579_v25, %v2387_v51  ;;  %v8786_v14 = vpop.f32.mrf.mxu1  ;;  %4627 = vmatmul.mubr.bf16.gmra.mxu1 %v8467_v55  ;;  %3279 = vmatprep.mubr.bf16.mxu0 %v10707_v12  ;;  %v2391_v57 = vadd.f32 %v10900_v54, %v8463_v26  ;;  %v6944_v53 = vld [vmem:[#allocation6 + $0x1d4] ss:$8 sps:$4 sm:$0xff]   ;;  %v6966_v51 = vld [vmem:[#allocation6 + $0x2e0] ss:$8 sps:$4 sm:$0xff]  }
 0x26c   : > { %10899 = vst [vmem:[#allocation27_spill] sm:$0xff] %v8786_v14  ;;  %4636 = vmatprep.mubr.bf16.mxu1 %v8507_v40  ;;  %v2581_v31 = vpop.f32.mrf.mxu0  ;;  %4764 = vmatpush2.bf16.msra.mxu0 %v6924_v45  ;;  %v6974_v29 = vld [vmem:[#allocation6 + $0x2d4] ss:$8 sps:$4 sm:$0xff]   ;;  %v10904_v45 = vld [vmem:[#allocation33_spill] sm:$0xff] }
 0x26d   : > { %10898 = vst [vmem:[#allocation28_spill] sm:$0xff] %v8784_v42  ;;  %v2582_v0 = vadd.f32 %v2581_v31, %v2389_v2  ;;  %v8793_v33 = vpop.f32.mrf.mxu1  ;;  %4765 = vmatprep.subr.bf16.mxu0 %v6935_v19  ;;  %4957 = vmatpush2.bf16.msra.mxu1 %v6963_v36  ;;  %v8795_v15 = vpack.c.bf16 %v3577_v62, %v3569_v43  ;;  %v10903_v40 = vld [vmem:[#allocation32_spill] sm:$0xff]  ;;  %v3584_v36 = vmax.f32 %v2580_v58, 0.0  ;;  %v7251_v14 = vld [vmem:[%s7547_s11 + $0x80] ss:$12 sps:$4 sm:$0xff]  }
 0x26e   : > { %10901 = vst [vmem:[#allocation29_spill] sm:$0xff] %v8793_v33  ;;  %v2583_v55 = vpop.f32.mrf.mxu0  ;;  %4958 = vmatprep.subr.bf16.mxu1 %v6968_v32  ;;  %v2393_v34 = vadd.f32 %v10903_v40, %v8483_v35  ;;  %v2397_v25 = vadd.f32 %v10904_v45, %v8463_v26  ;;  %v6942_v19 = vld [vmem:[#allocation6 + $0x1d0] ss:$8 sps:$4 sm:$0xff]   ;;  %v6953_v32 = vld [vmem:[#allocation6 + $0x1c4] ss:$8 sps:$4 sm:$0xff]  }
 0x26f   : > { %10902 = vst [vmem:[#allocation30_spill] sm:$0xff] %v8795_v15  ;;  %v2584_v54 = vadd.f32 %v2583_v55, %v2391_v57  ;;  %v8801_v2 = vpop.f32.mrf.mxu1  ;;  %v6972_v15 = vld [vmem:[#allocation6 + $0x2d0] ss:$8 sps:$4 sm:$0xff]   ;;  %v6977_v57 = vld [vmem:[#allocation6 + $0x2c4] ss:$8 sps:$4 sm:$0xff]   ;;  %v3585_v55 = vmax.f32 %v2582_v0, 0.0 }
 0x270   : > { %10905 = vst [vmem:[#allocation31_spill] sm:$0xff] %v8801_v2  ;;  %v2585_v31 = vpop.f32.mrf.mxu0  ;;  %4766 = vmatpush2.bf16.msra.mxu0 %v6933_v48  ;;  %v10907_v40 = vld [vmem:[#allocation35_spill] sm:$0xff] }
 0x271   : > { %v3592_v42 = vmax.f32 %v2584_v54, 0.0  ;;  %v2586_v43 = vadd.f32 %v2585_v31, %v2393_v34  ;;  %v8803_v62 = vpop.f32.mrf.mxu1  ;;  %4767 = vmatprep.subr.bf16.mxu0 %v6944_v53  ;;  %4959 = vmatpush2.bf16.msra.mxu1 %v6966_v51  ;;  %v2399_v33 = vadd.f32 %v10907_v40, %v8483_v35  ;;  %v10910_v53 = vld [vmem:[#allocation59_spill] sm:$0xff]  ;;  %v6951_v31 = vld [vmem:[#allocation6 + $0x1c0] ss:$8 sps:$4 sm:$0xff]  }
 0x272   : > { %10906 = vst [vmem:[#allocation32_spill] sm:$0xff] %v8803_v62  ;;  %v2589_v45 = vpop.f32.mrf.mxu0  ;;  %3280 = vmatmul.mubr.bf16.gmra.mxu0 %v7251_v14  ;;  %4960 = vmatprep.subr.bf16.mxu1 %v6974_v29  ;;  %v10911_v14 = vld [vmem:[#allocation36_spill] sm:$0xff] }
 0x273   : > { %v8808_v48 = vpack.c.bf16 %v3592_v42, %v3584_v36  ;;  %v3593_v58 = vmax.f32 %v2586_v43, 0.0  ;;  %v2590_v54 = vadd.f32 %v2589_v45, %v2397_v25  ;;  %v8810_v34 = vpop.f32.mrf.mxu1  ;;  %4637 = vmatmul.mubr.bf16.gmra.mxu1 %v8496_v16  ;;  %3289 = vmatprep.mubr.bf16.mxu0 %v10707_v12  ;;  %v2401_v29 = vadd.f32 %v10911_v14, %v8463_v26  ;;  %v6962_v42 = vld [vmem:[#allocation6 + $0x1b4] ss:$8 sps:$4 sm:$0xff]   ;;  %v6975_v25 = vld [vmem:[#allocation6 + $0x2c0] ss:$8 sps:$4 sm:$0xff]  }
 0x274   : > { %10909 = vst [vmem:[#allocation35_spill] sm:$0xff] %v8810_v34  ;;  %4646 = vmatprep.mubr.bf16.mxu1 %v10910_v53  ;;  %v2591_v51 = vpop.f32.mrf.mxu0  ;;  %4768 = vmatpush2.bf16.msra.mxu0 %v6942_v19  ;;  %v6983_v43 = vld [vmem:[#allocation6 + $0x2b4] ss:$8 sps:$4 sm:$0xff]   ;;  %v10914_v45 = vld [vmem:[#allocation37_spill] sm:$0xff] }
 0x275   : > { %10908 = vst [vmem:[#allocation33_spill] sm:$0xff] %v8808_v48  ;;  %v2592_v40 = vadd.f32 %v2591_v51, %v2399_v33  ;;  %v8817_v0 = vpop.f32.mrf.mxu1  ;;  %4769 = vmatprep.subr.bf16.mxu0 %v6953_v32  ;;  %4961 = vmatpush2.bf16.msra.mxu1 %v6972_v15  ;;  %v8819_v36 = vpack.c.bf16 %v3593_v58, %v3585_v55  ;;  %v10915_v19 = vld [vmem:[#allocation39_spill] sm:$0xff]  ;;  %v3600_v15 = vmax.f32 %v2590_v54, 0.0  ;;  %v7252_v62 = vld [vmem:[%s7547_s11 + $0x98] ss:$12 sps:$4 sm:$0xff]  }
 0x276   : > { %10912 = vst [vmem:[#allocation59_spill] sm:$0xff] %v8817_v0  ;;  %v2593_v16 = vpop.f32.mrf.mxu0  ;;  %4962 = vmatprep.subr.bf16.mxu1 %v6977_v57  ;;  %v2403_v53 = vadd.f32 %v10914_v45, %v8483_v35  ;;  %v2407_v48 = vadd.f32 %v10915_v19, %v8463_v26  ;;  %v6960_v32 = vld [vmem:[#allocation6 + $0x1b0] ss:$8 sps:$4 sm:$0xff]   ;;  %v6971_v57 = vld [vmem:[#allocation6 + $0x1a4] ss:$8 sps:$4 sm:$0xff]  }
 0x277   : > { %10913 = vst [vmem:[#allocation36_spill] sm:$0xff] %v8819_v36  ;;  %v2594_v14 = vadd.f32 %v2593_v16, %v2401_v29  ;;  %v8825_v33 = vpop.f32.mrf.mxu1  ;;  %v6981_v36 = vld [vmem:[#allocation6 + $0x2b0] ss:$8 sps:$4 sm:$0xff]   ;;  %v6986_v29 = vld [vmem:[#allocation6 + $0x2a4] ss:$8 sps:$4 sm:$0xff]   ;;  %v3601_v16 = vmax.f32 %v2592_v40, 0.0 }
 0x278   : > { %10916 = vst [vmem:[#allocation37_spill] sm:$0xff] %v8825_v33  ;;  %v2595_v51 = vpop.f32.mrf.mxu0  ;;  %4770 = vmatpush2.bf16.msra.mxu0 %v6951_v31  ;;  %v10918_v45 = vld [vmem:[#allocation40_spill] sm:$0xff] }
 0x279   : > { %v3608_v0 = vmax.f32 %v2594_v14, 0.0  ;;  %v2596_v55 = vadd.f32 %v2595_v51, %v2403_v53  ;;  %v8827_v58 = vpop.f32.mrf.mxu1  ;;  %4771 = vmatprep.subr.bf16.mxu0 %v6962_v42  ;;  %4963 = vmatpush2.bf16.msra.mxu1 %v6975_v25  ;;  %v2409_v34 = vadd.f32 %v10918_v45, %v8483_v35  ;;  %v10921_v51 = vld [vmem:[#allocation58_spill] sm:$0xff]  ;;  %v10922_v42 = vld [vmem:[#allocation61_spill] sm:$0xff]  ;;  %v7253_v33 = vld [vmem:[%s7547_s11 + $0xb0] ss:$12 sps:$4 sm:$0xff]  }
 0x27a   : > { %10917 = vst [vmem:[#allocation39_spill] sm:$0xff] %v8827_v58  ;;  %v2599_v19 = vpop.f32.mrf.mxu0  ;;  %3290 = vmatmul.mubr.bf16.gmra.mxu0 %v7252_v62  ;;  %4964 = vmatprep.subr.bf16.mxu1 %v6983_v43  ;;  %v6969_v45 = vld [vmem:[#allocation6 + $0x1a0] ss:$8 sps:$4 sm:$0xff]   ;;  %v10923_v62 = vld [vmem:[#allocation43_spill] sm:$0xff] }
 0x27b   : > { %v8832_v31 = vpack.c.bf16 %v3608_v0, %v3600_v15  ;;  %v3609_v54 = vmax.f32 %v2596_v55, 0.0  ;;  %v2600_v14 = vadd.f32 %v2599_v19, %v2407_v48  ;;  %v8834_v53 = vpop.f32.mrf.mxu1  ;;  %4647 = vmatmul.mubr.bf16.gmra.mxu1 %v10921_v51  ;;  %3299 = vmatprep.mubr.bf16.mxu0 %v10707_v12  ;;  %v2411_v43 = vadd.f32 %v10923_v62, %v8463_v26  ;;  %v6980_v0 = vld [vmem:[#allocation6 + $0x194] ss:$8 sps:$4 sm:$0xff]   ;;  %v6984_v48 = vld [vmem:[#allocation6 + $0x2a0] ss:$8 sps:$4 sm:$0xff]  }
 0x27c   : > { %10920 = vst [vmem:[#allocation82_spill] sm:$0xff] %v8834_v53  ;;  %4656 = vmatprep.mubr.bf16.mxu1 %v10922_v42  ;;  %v2601_v25 = vpop.f32.mrf.mxu0  ;;  %4772 = vmatpush2.bf16.msra.mxu0 %v6960_v32  ;;  %v6992_v19 = vld [vmem:[#allocation6 + $0x294] ss:$8 sps:$4 sm:$0xff]   ;;  %v10926_v51 = vld [vmem:[#allocation46_spill] sm:$0xff] }
 0x27d   : > { %10919 = vst [vmem:[#allocation40_spill] sm:$0xff] %v8832_v31  ;;  %v2602_v58 = vadd.f32 %v2601_v25, %v2409_v34  ;;  %v8841_v40 = vpop.f32.mrf.mxu1  ;;  %4773 = vmatprep.subr.bf16.mxu0 %v6971_v57  ;;  %4965 = vmatpush2.bf16.msra.mxu1 %v6981_v36  ;;  %v8843_v15 = vpack.c.bf16 %v3609_v54, %v3601_v16  ;;  %v10927_v32 = vld [vmem:[#allocation44_spill] sm:$0xff]  ;;  %v10929_v25 = vld [vmem:[#allocation49_spill] sm:$0xff]  ;;  %v3616_v16 = vmax.f32 %v2600_v14, 0.0 }
 0x27e   : > { %10924 = vst [vmem:[#allocation58_spill] sm:$0xff] %v8841_v40  ;;  %v2603_v55 = vpop.f32.mrf.mxu0  ;;  %4966 = vmatprep.subr.bf16.mxu1 %v6986_v29  ;;  %v2413_v42 = vadd.f32 %v10926_v51, %v8483_v35  ;;  %v2417_v31 = vadd.f32 %v10927_v32, %v8463_v26  ;;  %v608_v57 = vsub.s32 4, %v10929_v25  ;;  %v6978_v36 = vld [vmem:[#allocation6 + $0x190] ss:$8 sps:$4 sm:$0xff]   ;;  %v6989_v51 = vld [vmem:[#allocation6 + $0x184] ss:$8 sps:$4 sm:$0xff]  }
 0x27f   : > { %10925 = vst [vmem:[#allocation61_spill] sm:$0xff] %v8843_v15  ;;  %v2604_v53 = vadd.f32 %v2603_v55, %v2411_v43  ;;  %v8849_v34 = vpop.f32.mrf.mxu1  ;;  %v6990_v40 = vld [vmem:[#allocation6 + $0x290] ss:$8 sps:$4 sm:$0xff]   ;;  %v3617_v2 = vmax.f32 %v2602_v58, 0.0  ;;  %v612_v58 = vsub.s32 5, %v10929_v25 }
 0x280   : > { %10928 = vst [vmem:[#allocation43_spill] sm:$0xff] %v8849_v34  ;;  %v2605_v62 = vpop.f32.mrf.mxu0  ;;  %4774 = vmatpush2.bf16.msra.mxu0 %v6969_v45  ;;  %v10930_v32 = vld [vmem:[#allocation47_spill] sm:$0xff]  ;;  %v6995_v34 = vld [vmem:[#allocation6 + $0x284] ss:$8 sps:$4 sm:$0xff]  }
 0x281   : > { %v3624_v54 = vmax.f32 %v2604_v53, 0.0  ;;  %v2606_v15 = vadd.f32 %v2605_v62, %v2413_v42  ;;  %v8852_v29 = vpop.f32.mrf.mxu1  ;;  %4775 = vmatprep.subr.bf16.mxu0 %v6980_v0  ;;  %4967 = vmatpush2.bf16.msra.mxu1 %v6984_v48  ;;  %v2419_v43 = vadd.f32 %v10930_v32, %v8483_v35  ;;  %v10933_v62 = vld [vmem:[#allocation60_spill] sm:$0xff]  ;;  %v8866_v0 = vld [vmem:[%s10650_s2] sm:$0xff]  ;;  %v10934_v48 = vld [vmem:[#allocation63_spill] sm:$0xff] }
 0x282   : > { %v2609_v55 = vpop.f32.mrf.mxu0  ;;  %3300 = vmatmul.mubr.bf16.gmra.mxu0 %v7253_v33  ;;  %4968 = vmatprep.subr.bf16.mxu1 %v6992_v19  ;;  %v8869_v33 = vrot.slane %v8866_v0, %v608_v57  ;;  %v10935_v19 = vld [vmem:[#allocation48_spill] sm:$0xff] }
 0x283   : > { %v8857_v45 = vpack.c.bf16 %v3624_v54, %v3616_v16  ;;  %v3625_v14 = vmax.f32 %v2606_v15, 0.0  ;;  %v2610_v53 = vadd.f32 %v2609_v55, %v2417_v31  ;;  %v8859_v42 = vpop.f32.mrf.mxu1  ;;  %4657 = vmatmul.mubr.bf16.gmra.mxu1 %v10933_v62  ;;  %3309 = vmatprep.mubr.bf16.mxu0 %v10707_v12  ;;  %v6987_v31 = vld [vmem:[#allocation6 + $0x180] ss:$8 sps:$4 sm:$0xff]   ;;  %v2421_v16 = vadd.f32 %v10935_v19, %v8463_v26  ;;  %v6998_v62 = vld [vmem:[#allocation6 + $0x374] ss:$8 sps:$4 sm:$0xff]  }
 0x284   : > { %10932 = vst [vmem:[#allocation44_spill] sm:$0xff] %v8859_v42  ;;  %4666 = vmatprep.mubr.bf16.mxu1 %v10934_v48  ;;  %v2611_v15 = vpop.f32.mrf.mxu0  ;;  %4776 = vmatpush2.bf16.msra.mxu0 %v6978_v36  ;;  %v6993_v55 = vld [vmem:[#allocation6 + $0x280] ss:$8 sps:$4 sm:$0xff]   ;;  %v2423_v48 = vadd.f32 %v8491_v49, %v8483_v35  ;;  %v8884_v26 = vrot.slane %v8866_v0, %v612_v58 }
 0x285   : > { %10931 = vst [vmem:[#allocation46_spill] sm:$0xff] %v8857_v45  ;;  %v2612_v54 = vadd.f32 %v2611_v15, %v2419_v43  ;;  %v8875_v32 = vpop.f32.mrf.mxu1  ;;  %4777 = vmatprep.subr.bf16.mxu0 %v6989_v51  ;;  %4969 = vmatpush2.bf16.msra.mxu1 %v6990_v40  ;;  %v8877_v45 = vpack.c.bf16 %v3625_v14, %v3617_v2  ;;  %v3632_v51 = vmax.f32 %v2610_v53, 0.0  ;;  %v7255_v49 = vld [vmem:[%s7547_s11 + $0xc8] ss:$12 sps:$4 sm:$0xff]  }
 0x286   : > { %v2613_v57 = vpop.f32.mrf.mxu0  ;;  %4970 = vmatprep.subr.bf16.mxu1 %v6995_v34  ;;  %v2653_v40 = vadd.f32 %v8498_v28, %v8869_v33  ;;  %v10939_v28 = vld [vmem:[#allocation65_spill] sm:$0xff] }
 0x287   : > { %10936 = vst [vmem:[#allocation49_spill] sm:$0xff] %v8877_v45  ;;  %v2614_v36 = vadd.f32 %v2613_v57, %v2421_v16  ;;  %v8881_v42 = vpop.f32.mrf.mxu1  ;;  %v3633_v35 = vmax.f32 %v2612_v54, 0.0 }
 0x288   : > { %v2615_v43 = vpop.f32.mrf.mxu0  ;;  %4778 = vmatpush2.bf16.msra.mxu0 %v6987_v31  ;;  %v10938_v31 = vld [vmem:[#allocation62_spill] sm:$0xff] }
 0x289   : > { %v3640_v2 = vmax.f32 %v2614_v36, 0.0  ;;  %v2616_v14 = vadd.f32 %v2615_v43, %v2423_v48  ;;  %v8888_v15 = vpop.f32.mrf.mxu1  ;;  %4971 = vmatpush2.bf16.msra.mxu1 %v6993_v55  ;;  %5133 = vmatprep.subr.bf16.mxu0 %v6998_v62  ;;  %v2655_v55 = vadd.f32 %v8505_v52, %v8884_v26  ;;  %v10940_v62 = vld [vmem:[#allocation50_spill] sm:$0xff]  ;;  %v2663_v52 = vadd.f32 %v8522_v9, %v8869_v33 }
 0x28a   : > { %v2845_v34 = vpop.f32.mrf.mxu0  ;;  %3310 = vmatmul.mubr.bf16.gmra.mxu0 %v7255_v49  ;;  %v2657_v57 = vadd.f32 %v10940_v62, %v8869_v33 }
 0x28b   : > { %v8891_v19 = vpack.c.bf16 %v3640_v2, %v3632_v51  ;;  %v3641_v58 = vmax.f32 %v2616_v14, 0.0  ;;  %v8893_v16 = vpop.f32.mrf.mxu1  ;;  %4667 = vmatmul.mubr.bf16.gmra.mxu1 %v10938_v31  ;;  %3319 = vmatprep.mubr.bf16.mxu0 %v10707_v12  ;;  %v2846_v54 = vadd.f32 %v2845_v34, %v2653_v40  ;;  %v2659_v51 = vadd.f32 %v8515_v18, %v8884_v26 }
 0x28c   : > { %4676 = vmatprep.mubr.bf16.mxu1 %v10939_v28  ;;  %v2847_v53 = vpop.f32.mrf.mxu0 }
 0x28d   : > { %10937 = vst [vmem:[#allocation47_spill] sm:$0xff] %v8891_v19  ;;  %v8902_v48 = vpop.f32.mrf.mxu1  ;;  %v8904_v36 = vpack.c.bf16 %v3641_v58, %v3633_v35  ;;  %v2848_v2 = vadd.f32 %v2847_v53, %v2655_v55  ;;  %v3394_v28 = vmax.f32 %v2846_v54, 0.0  ;;  %v7256_v35 = vld [vmem:[%s7547_s11 + $0xe0] ss:$12 sps:$4 sm:$0xff]   ;;  %v10942_v55 = vld [vmem:[#allocation64_spill] sm:$0xff]  ;;  %v2665_v54 = vadd.f32 %v8529_v5, %v8884_v26 }
 0x28e   : > { %v2849_v43 = vpop.f32.mrf.mxu0  ;;  %v2673_v5 = vadd.f32 %v8546_v44, %v8869_v33 }
 0x28f   : > { %10941 = vst [vmem:[#allocation60_spill] sm:$0xff] %v8904_v36  ;;  %v2850_v14 = vadd.f32 %v2849_v43, %v2657_v57  ;;  %v8908_v49 = vpop.f32.mrf.mxu1  ;;  %v3395_v58 = vmax.f32 %v2848_v2, 0.0  ;;  %v10943_v57 = vld [vmem:[#allocation66_spill] sm:$0xff]  ;;  %v2667_v43 = vadd.f32 %v8537_v23, %v8869_v33 }
 0x290   : > { %v2851_v31 = vpop.f32.mrf.mxu0 }
 0x291   : > { %v3402_v62 = vmax.f32 %v2850_v14, 0.0  ;;  %v2852_v19 = vadd.f32 %v2851_v31, %v2659_v51  ;;  %v8912_v40 = vpop.f32.mrf.mxu1  ;;  %v2669_v31 = vadd.f32 %v8539_v3, %v8884_v26 }
 0x292   : > { %v2855_v34 = vpop.f32.mrf.mxu0  ;;  %3320 = vmatmul.mubr.bf16.gmra.mxu0 %v7256_v35 }
 0x293   : > { %v8915_v36 = vpack.c.bf16 %v3402_v62, %v3394_v28  ;;  %v3403_v18 = vmax.f32 %v2852_v19, 0.0  ;;  %v8917_v53 = vpop.f32.mrf.mxu1  ;;  %4677 = vmatmul.mubr.bf16.gmra.mxu1 %v10942_v55  ;;  %3329 = vmatprep.mubr.bf16.mxu0 %v10707_v12  ;;  %v2856_v51 = vadd.f32 %v2855_v34, %v2663_v52 }
 0x294   : > { %4686 = vmatprep.mubr.bf16.mxu1 %v10943_v57  ;;  %v2857_v9 = vpop.f32.mrf.mxu0 }
 0x295   : > { %v8926_v2 = vpop.f32.mrf.mxu1  ;;  %v8928_v19 = vpack.c.bf16 %v3403_v18, %v3395_v58  ;;  %v2858_v28 = vadd.f32 %v2857_v9, %v2665_v54  ;;  %v3410_v57 = vmax.f32 %v2856_v51, 0.0  ;;  %v7257_v58 = vld [vmem:[%s7547_s11 + $0xf8] ss:$12 sps:$4 sm:$0xff]   ;;  %v2675_v51 = vadd.f32 %v8553_v8, %v8884_v26 }
 0x296   : > { %10944 = vst [vmem:[#allocation63_spill] sm:$0xff] %v8926_v2  ;;  %v2859_v14 = vpop.f32.mrf.mxu0  ;;  %v10946_v54 = vld [vmem:[#allocation9_spill] sm:$0xff]  ;;  %v2683_v8 = vadd.f32 %v8570_v38, %v8869_v33 }
 0x297   : > { %v2860_v62 = vadd.f32 %v2859_v14, %v2667_v43  ;;  %v8932_v35 = vpop.f32.mrf.mxu1  ;;  %v3411_v18 = vmax.f32 %v2858_v28, 0.0  ;;  %v10947_v43 = vld [vmem:[#allocation11_spill] sm:$0xff]  ;;  %v2677_v14 = vadd.f32 %v8561_v4, %v8869_v33 }
 0x298   : > { %v2861_v55 = vpop.f32.mrf.mxu0 }
 0x299   : > { %v3418_v23 = vmax.f32 %v2860_v62, 0.0  ;;  %v2862_v45 = vadd.f32 %v2861_v55, %v2669_v31  ;;  %v8936_v52 = vpop.f32.mrf.mxu1  ;;  %v2679_v55 = vadd.f32 %v8563_v50, %v8884_v26 }
 0x29a   : > { %v2865_v34 = vpop.f32.mrf.mxu0  ;;  %3330 = vmatmul.mubr.bf16.gmra.mxu0 %v7257_v58 }
 0x29b   : > { %v8939_v2 = vpack.c.bf16 %v3418_v23, %v3410_v57  ;;  %v3419_v3 = vmax.f32 %v2862_v45, 0.0  ;;  %v8941_v9 = vpop.f32.mrf.mxu1  ;;  %4687 = vmatmul.mubr.bf16.gmra.mxu1 %v10946_v54  ;;  %3339 = vmatprep.mubr.bf16.mxu0 %v10707_v12  ;;  %v2866_v31 = vadd.f32 %v2865_v34, %v2673_v5 }
 0x29c   : > { %10945 = vst [vmem:[#allocation48_spill] sm:$0xff] %v8941_v9  ;;  %4696 = vmatprep.mubr.bf16.mxu1 %v10947_v43  ;;  %v2867_v44 = vpop.f32.mrf.mxu0 }
 0x29d   : > { %v8950_v28 = vpop.f32.mrf.mxu1  ;;  %v8952_v45 = vpack.c.bf16 %v3419_v3, %v3411_v18  ;;  %v2868_v57 = vadd.f32 %v2867_v44, %v2675_v51  ;;  %v3426_v43 = vmax.f32 %v2866_v31, 0.0  ;;  %v7258_v18 = vld [vmem:[%s7547_s11 + $0x110] ss:$12 sps:$4 sm:$0xff]   ;;  %v10950_v51 = vld [vmem:[#allocation10_spill] sm:$0xff]  ;;  %v2685_v31 = vadd.f32 %v8577_v39, %v8884_v26 }
 0x29e   : > { %10948 = vst [vmem:[#allocation62_spill] sm:$0xff] %v8950_v28  ;;  %v2869_v62 = vpop.f32.mrf.mxu0  ;;  %v2693_v39 = vadd.f32 %v8594_v17, %v8869_v33 }
 0x29f   : > { %v2870_v23 = vadd.f32 %v2869_v62, %v2677_v14  ;;  %v8956_v58 = vpop.f32.mrf.mxu1  ;;  %v3427_v3 = vmax.f32 %v2868_v57, 0.0  ;;  %v10951_v14 = vld [vmem:[#allocation13_spill] sm:$0xff]  ;;  %v2687_v62 = vadd.f32 %v8585_v56, %v8869_v33 }
 0x2a0   : > { %v2871_v54 = vpop.f32.mrf.mxu0 }
 0x2a1   : > { %v3434_v4 = vmax.f32 %v2870_v23, 0.0  ;;  %v2872_v9 = vadd.f32 %v2871_v54, %v2679_v55  ;;  %v8960_v5 = vpop.f32.mrf.mxu1  ;;  %v2689_v54 = vadd.f32 %v8587_v59, %v8884_v26 }
 0x2a2   : > { %v2875_v34 = vpop.f32.mrf.mxu0  ;;  %3340 = vmatmul.mubr.bf16.gmra.mxu0 %v7258_v18 }
 0x2a3   : > { %v8963_v28 = vpack.c.bf16 %v3434_v4, %v3426_v43  ;;  %v3435_v50 = vmax.f32 %v2872_v9, 0.0  ;;  %v8965_v44 = vpop.f32.mrf.mxu1  ;;  %4697 = vmatmul.mubr.bf16.gmra.mxu1 %v10950_v51  ;;  %3349 = vmatprep.mubr.bf16.mxu0 %v10707_v12  ;;  %v2876_v55 = vadd.f32 %v2875_v34, %v2683_v8 }
 0x2a4   : > { %10949 = vst [vmem:[#allocation65_spill] sm:$0xff] %v8965_v44  ;;  %4706 = vmatprep.mubr.bf16.mxu1 %v10951_v14  ;;  %v2877_v38 = vpop.f32.mrf.mxu0 }
 0x2a5   : > { %v8974_v57 = vpop.f32.mrf.mxu1  ;;  %v8976_v9 = vpack.c.bf16 %v3435_v50, %v3427_v3  ;;  %v2878_v43 = vadd.f32 %v2877_v38, %v2685_v31  ;;  %v3442_v14 = vmax.f32 %v2876_v55, 0.0  ;;  %v7259_v3 = vld [vmem:[%s7547_s11 + $0x128] ss:$12 sps:$4 sm:$0xff]   ;;  %v10954_v31 = vld [vmem:[#allocation12_spill] sm:$0xff]  ;;  %v2695_v55 = vadd.f32 %v8601_v7, %v8884_v26 }
 0x2a6   : > { %10952 = vst [vmem:[#allocation50_spill] sm:$0xff] %v8974_v57  ;;  %v2879_v23 = vpop.f32.mrf.mxu0  ;;  %v2703_v7 = vadd.f32 %v8618_v6, %v8869_v33 }
 0x2a7   : > { %v2880_v4 = vadd.f32 %v2879_v23, %v2687_v62  ;;  %v8980_v18 = vpop.f32.mrf.mxu1  ;;  %v3443_v50 = vmax.f32 %v2878_v43, 0.0  ;;  %v10955_v62 = vld [vmem:[#allocation16_spill] sm:$0xff]  ;;  %v2697_v23 = vadd.f32 %v8609_v41, %v8869_v33 }
 0x2a8   : > { %v2881_v51 = vpop.f32.mrf.mxu0 }
 0x2a9   : > { %v3450_v56 = vmax.f32 %v2880_v4, 0.0  ;;  %v2882_v44 = vadd.f32 %v2881_v51, %v2689_v54  ;;  %v8984_v8 = vpop.f32.mrf.mxu1  ;;  %v2699_v51 = vadd.f32 %v8611_v27, %v8884_v26 }
 0x2aa   : > { %v2885_v34 = vpop.f32.mrf.mxu0  ;;  %3350 = vmatmul.mubr.bf16.gmra.mxu0 %v7259_v3 }
 0x2ab   : > { %v8987_v57 = vpack.c.bf16 %v3450_v56, %v3442_v14  ;;  %v3451_v59 = vmax.f32 %v2882_v44, 0.0  ;;  %v8989_v38 = vpop.f32.mrf.mxu1  ;;  %4707 = vmatmul.mubr.bf16.gmra.mxu1 %v10954_v31  ;;  %3359 = vmatprep.mubr.bf16.mxu0 %v10707_v12  ;;  %v2886_v54 = vadd.f32 %v2885_v34, %v2693_v39 }
 0x2ac   : > { %10953 = vst [vmem:[#allocation64_spill] sm:$0xff] %v8989_v38  ;;  %4716 = vmatprep.mubr.bf16.mxu1 %v10955_v62  ;;  %v2887_v17 = vpop.f32.mrf.mxu0 }
 0x2ad   : > { %v8998_v43 = vpop.f32.mrf.mxu1  ;;  %v9000_v44 = vpack.c.bf16 %v3451_v59, %v3443_v50  ;;  %v2888_v14 = vadd.f32 %v2887_v17, %v2695_v55  ;;  %v3458_v62 = vmax.f32 %v2886_v54, 0.0  ;;  %v7260_v50 = vld [vmem:[%s7547_s11 + $0x140] ss:$12 sps:$4 sm:$0xff]   ;;  %v2705_v54 = vadd.f32 %v8625_v30, %v8884_v26 }
 0x2ae   : > { %10956 = vst [vmem:[#allocation66_spill] sm:$0xff] %v8998_v43  ;;  %v2889_v4 = vpop.f32.mrf.mxu0  ;;  %v10958_v55 = vld [vmem:[#allocation14_spill] sm:$0xff]  ;;  %v2713_v30 = vadd.f32 %v8642_v13, %v8869_v33 }
 0x2af   : > { %v2890_v56 = vadd.f32 %v2889_v4, %v2697_v23  ;;  %v9004_v3 = vpop.f32.mrf.mxu1  ;;  %v3459_v59 = vmax.f32 %v2888_v14, 0.0  ;;  %v10959_v23 = vld [vmem:[#allocation19_spill] sm:$0xff]  ;;  %v2707_v4 = vadd.f32 %v8633_v60, %v8869_v33 }
 0x2b0   : > { %v2891_v31 = vpop.f32.mrf.mxu0 }
 0x2b1   : > { %v3466_v41 = vmax.f32 %v2890_v56, 0.0  ;;  %v2892_v38 = vadd.f32 %v2891_v31, %v2699_v51  ;;  %v9008_v39 = vpop.f32.mrf.mxu1  ;;  %v2709_v31 = vadd.f32 %v8635_v22, %v8884_v26 }
 0x2b2   : > { %v2895_v34 = vpop.f32.mrf.mxu0  ;;  %3360 = vmatmul.mubr.bf16.gmra.mxu0 %v7260_v50 }
 0x2b3   : > { %v9011_v43 = vpack.c.bf16 %v3466_v41, %v3458_v62  ;;  %v3467_v27 = vmax.f32 %v2892_v38, 0.0  ;;  %v9013_v17 = vpop.f32.mrf.mxu1  ;;  %4717 = vmatmul.mubr.bf16.gmra.mxu1 %v10958_v55  ;;  %3369 = vmatprep.mubr.bf16.mxu0 %v10707_v12  ;;  %v2896_v51 = vadd.f32 %v2895_v34, %v2703_v7 }
 0x2b4   : > { %10957 = vst [vmem:[#allocation9_spill] sm:$0xff] %v9013_v17  ;;  %4726 = vmatprep.mubr.bf16.mxu1 %v10959_v23  ;;  %v2897_v6 = vpop.f32.mrf.mxu0 }
 0x2b5   : > { %v9022_v14 = vpop.f32.mrf.mxu1  ;;  %v9024_v38 = vpack.c.bf16 %v3467_v27, %v3459_v59  ;;  %v2898_v62 = vadd.f32 %v2897_v6, %v2705_v54  ;;  %v3474_v23 = vmax.f32 %v2896_v51, 0.0  ;;  %v7261_v59 = vld [vmem:[%s7547_s11 + $0x158] ss:$12 sps:$4 sm:$0xff]   ;;  %v10963_v54 = vld [vmem:[#allocation15_spill] sm:$0xff]  ;;  %v2715_v51 = vadd.f32 %v8649_v47, %v8884_v26 }
 0x2b6   : > { %10960 = vst [vmem:[#allocation11_spill] sm:$0xff] %v9022_v14  ;;  %v2899_v56 = vpop.f32.mrf.mxu0  ;;  %v10968_v47 = vld [vmem:[#allocation76_spill] sm:$0xff] }
 0x2b7   : > { %v2900_v41 = vadd.f32 %v2899_v56, %v2707_v4  ;;  %v9028_v50 = vpop.f32.mrf.mxu1  ;;  %v3475_v27 = vmax.f32 %v2898_v62, 0.0  ;;  %v10964_v4 = vld [vmem:[#allocation24_spill] sm:$0xff]  ;;  %v2717_v56 = vadd.f32 %v8657_v11, %v8869_v33 }
 0x2b8   : > { %v2901_v55 = vpop.f32.mrf.mxu0 }
 0x2b9   : > { %v3482_v60 = vmax.f32 %v2900_v41, 0.0  ;;  %v2902_v17 = vadd.f32 %v2901_v55, %v2709_v31  ;;  %v9032_v7 = vpop.f32.mrf.mxu1  ;;  %v10966_v55 = vld [vmem:[#allocation74_spill] sm:$0xff] }
 0x2ba   : > { %10961 = vst [vmem:[#allocation10_spill] sm:$0xff] %v9032_v7  ;;  %v2905_v34 = vpop.f32.mrf.mxu0  ;;  %3370 = vmatmul.mubr.bf16.gmra.mxu0 %v7261_v59 }
 0x2bb   : > { %v9035_v14 = vpack.c.bf16 %v3482_v60, %v3474_v23  ;;  %v3483_v22 = vmax.f32 %v2902_v17, 0.0  ;;  %v9037_v6 = vpop.f32.mrf.mxu1  ;;  %4727 = vmatmul.mubr.bf16.gmra.mxu1 %v10963_v54  ;;  %3379 = vmatprep.mubr.bf16.mxu0 %v10707_v12  ;;  %v2906_v31 = vadd.f32 %v2905_v34, %v2713_v30  ;;  %v2719_v23 = vadd.f32 %v10966_v55, %v8884_v26 }
 0x2bc   : > { %10962 = vst [vmem:[#allocation13_spill] sm:$0xff] %v9037_v6  ;;  %4736 = vmatprep.mubr.bf16.mxu1 %v10964_v4  ;;  %v2907_v13 = vpop.f32.mrf.mxu0  ;;  %v2723_v4 = vadd.f32 %v10968_v47, %v8869_v33 }
 0x2bd   : > { %v9046_v62 = vpop.f32.mrf.mxu1  ;;  %v9048_v17 = vpack.c.bf16 %v3483_v22, %v3475_v27  ;;  %v2908_v12 = vadd.f32 %v2907_v13, %v2715_v51  ;;  %v3490_v6 = vmax.f32 %v2906_v31, 0.0  ;;  %v7262_v27 = vld [vmem:[%s7547_s11 + $0x170] ss:$12 sps:$4 sm:$0xff]  }
 0x2be   : > { %10965 = vst [vmem:[#allocation12_spill] sm:$0xff] %v9046_v62  ;;  %v2909_v41 = vpop.f32.mrf.mxu0  ;;  %v10971_v51 = vld [vmem:[#allocation55_spill] sm:$0xff] }
 0x2bf   : > { %v2910_v60 = vadd.f32 %v2909_v41, %v2717_v56  ;;  %v9052_v59 = vpop.f32.mrf.mxu1  ;;  %v3491_v22 = vmax.f32 %v2908_v12, 0.0  ;;  %v10972_v56 = vld [vmem:[#allocation52_spill] sm:$0xff]  ;;  %v10973_v41 = vld [vmem:[#allocation77_spill] sm:$0xff] }
 0x2c0   : > { %10967 = vst [vmem:[#allocation16_spill] sm:$0xff] %v9052_v59  ;;  %v2911_v54 = vpop.f32.mrf.mxu0 }
 0x2c1   : > { %v3498_v11 = vmax.f32 %v2910_v60, 0.0  ;;  %v2912_v7 = vadd.f32 %v2911_v54, %v2719_v23  ;;  %v9056_v30 = vpop.f32.mrf.mxu1  ;;  %v2725_v23 = vadd.f32 %v10973_v41, %v8884_v26  ;;  %v10974_v60 = vld [vmem:[#allocation67_spill] sm:$0xff]  ;;  %v2733_v41 = vadd.f32 %v8690_v37, %v8869_v33 }
 0x2c2   : > { %10969 = vst [vmem:[#allocation14_spill] sm:$0xff] %v9056_v30  ;;  %v2915_v34 = vpop.f32.mrf.mxu0  ;;  %3380 = vmatmul.mubr.bf16.gmra.mxu0 %v7262_v27  ;;  %v2727_v54 = vadd.f32 %v10974_v60, %v8869_v33 }
 0x2c3   : > { %v9059_v62 = vpack.c.bf16 %v3498_v11, %v3490_v6  ;;  %v3499_v55 = vmax.f32 %v2912_v7, 0.0  ;;  %v9061_v13 = vpop.f32.mrf.mxu1  ;;  %4737 = vmatmul.mubr.bf16.gmra.mxu1 %v10971_v51  ;;  %4779 = vmatprep.mubr.bf16.mxu0 %v10972_v56  ;;  %v2916_v47 = vadd.f32 %v2915_v34, %v2723_v4  ;;  %v2729_v11 = vadd.f32 %v8683_v24, %v8884_v26 }
 0x2c4   : > { %10970 = vst [vmem:[#allocation19_spill] sm:$0xff] %v9061_v13  ;;  %4972 = vmatprep.mubr.bf16.mxu1 %v8928_v19  ;;  %v2917_v31 = vpop.f32.mrf.mxu0  ;;  %v6996_v13 = vld [vmem:[#allocation6 + $0x370] ss:$8 sps:$4 sm:$0xff]  }
 0x2c5   : > { %v9070_v12 = vpop.f32.mrf.mxu1  ;;  %v9072_v6 = vpack.c.bf16 %v3499_v55, %v3491_v22  ;;  %v2918_v27 = vadd.f32 %v2917_v31, %v2725_v23  ;;  %v3506_v30 = vmax.f32 %v2916_v47, 0.0  ;;  %v7001_v22 = vld [vmem:[#allocation6 + $0x364] ss:$8 sps:$4 sm:$0xff]   ;;  %v6999_v47 = vld [vmem:[#allocation6 + $0x360] ss:$8 sps:$4 sm:$0xff]  }
 0x2c6   : > { %10975 = vst [vmem:[#allocation15_spill] sm:$0xff] %v9070_v12  ;;  %v2919_v7 = vpop.f32.mrf.mxu0  ;;  %v10976_v12 = vld [vmem:[#allocation51_spill] sm:$0xff] }
 0x2c7   : > { %v2920_v51 = vadd.f32 %v2919_v7, %v2727_v54  ;;  %v9076_v56 = vpop.f32.mrf.mxu1  ;;  %v3507_v59 = vmax.f32 %v2918_v27, 0.0  ;;  %v10977_v54 = vld [vmem:[#allocation54_spill] sm:$0xff]  ;;  %v2735_v7 = vadd.f32 %v8697_v10, %v8884_v26  ;;  %v7004_v27 = vld [vmem:[#allocation6 + $0x354] ss:$8 sps:$4 sm:$0xff]   ;;  %v7002_v10 = vld [vmem:[#allocation6 + $0x350] ss:$8 sps:$4 sm:$0xff]  }
 0x2c8   : > { %v2921_v19 = vpop.f32.mrf.mxu0 }
 0x2c9   : > { %v3514_v60 = vmax.f32 %v2920_v51, 0.0  ;;  %v2922_v4 = vadd.f32 %v2921_v19, %v2729_v11  ;;  %v9080_v34 = vpop.f32.mrf.mxu1 }
 0x2ca   : > { %v2925_v55 = vpop.f32.mrf.mxu0  ;;  %4780 = vmatmul.mubr.bf16.vlgmr.msra.gmra.mxu0 %v10976_v12  ;;  %v2737_v12 = vadd.f32 %v8705_v63, %v8869_v33  ;;  %v2743_v63 = vadd.f32 %v8714_v20, %v8869_v33 }
 0x2cb   : > { %v9083_v24 = vpack.c.bf16 %v3514_v60, %v3506_v30  ;;  %v3515_v31 = vmax.f32 %v2922_v4, 0.0  ;;  %v9085_v23 = vpop.f32.mrf.mxu1  ;;  %4973 = vmatmul.mubr.bf16.vlgmr.msra.gmra.mxu1 %v8915_v36  ;;  %4789 = vmatprep.mubr.bf16.mxu0 %v10977_v54  ;;  %v2926_v30 = vadd.f32 %v2925_v55, %v2733_v41 }
 0x2cc   : > { %4982 = vmatprep.mubr.bf16.mxu1 %v8952_v45  ;;  %5134 = vmatpush1.bf16.msra.mxu0 %v6996_v13  ;;  %v2927_v37 = vpop.f32.mrf.mxu0  ;;  %v2739_v45 = vadd.f32 %v8707_v21, %v8884_v26 }
 0x2cd   : > { %v9094_v11 = vpop.f32.mrf.mxu1  ;;  %5135 = vmatprep.subr.bf16.mxu0 %v7001_v22  ;;  %v9096_v51 = vpack.c.bf16 %v3515_v31, %v3507_v59  ;;  %v2928_v13 = vadd.f32 %v2927_v37, %v2735_v7  ;;  %v3522_v41 = vmax.f32 %v2926_v30, 0.0  ;;  %v7007_v59 = vld [vmem:[#allocation6 + $0x344] ss:$8 sps:$4 sm:$0xff]   ;;  %v7005_v30 = vld [vmem:[#allocation6 + $0x340] ss:$8 sps:$4 sm:$0xff]  }
 0x2ce   : > { %10978 = vst [vmem:[#allocation24_spill] sm:$0xff] %v9094_v11  ;;  %v2929_v36 = vpop.f32.mrf.mxu0  ;;  %v10981_v11 = vld [vmem:[#allocation53_spill] sm:$0xff] }
 0x2cf   : > { %v2930_v19 = vadd.f32 %v2929_v36, %v2737_v12  ;;  %v9100_v60 = vpop.f32.mrf.mxu1  ;;  %v3523_v21 = vmax.f32 %v2928_v13, 0.0 }
 0x2d0   : > { %10979 = vst [vmem:[#allocation74_spill] sm:$0xff] %v9100_v60  ;;  %v2931_v4 = vpop.f32.mrf.mxu0  ;;  %5136 = vmatpush1.bf16.msra.mxu0 %v6999_v47  ;;  %v10983_v47 = vld [vmem:[#allocation57_spill] sm:$0xff]  ;;  %v10990_v60 = vld [vmem:[#allocation56_spill] sm:$0xff] }
 0x2d1   : > { %v3530_v55 = vmax.f32 %v2930_v19, 0.0  ;;  %v2932_v22 = vadd.f32 %v2931_v4, %v2739_v45  ;;  %v9104_v54 = vpop.f32.mrf.mxu1  ;;  %5137 = vmatprep.subr.bf16.mxu0 %v7004_v27  ;;  %v10984_v27 = vld [vmem:[#allocation45_spill] sm:$0xff]  ;;  %v7010_v4 = vld [vmem:[#allocation6 + $0x334] ss:$8 sps:$4 sm:$0xff]  }
 0x2d2   : > { %10980 = vst [vmem:[#allocation76_spill] sm:$0xff] %v9104_v54  ;;  %v2935_v31 = vpop.f32.mrf.mxu0  ;;  %4790 = vmatmul.mubr.bf16.gmra.mxu0 %v10981_v11  ;;  %v2745_v36 = vadd.f32 %v10984_v27, %v8884_v26  ;;  %v10985_v11 = vld [vmem:[#allocation20_spill] sm:$0xff] }
 0x2d3   : > { %v9107_v37 = vpack.c.bf16 %v3530_v55, %v3522_v41  ;;  %v3531_v7 = vmax.f32 %v2932_v22, 0.0  ;;  %v9109_v12 = vpop.f32.mrf.mxu1  ;;  %4983 = vmatmul.mubr.bf16.gmra.mxu1 %v8939_v2  ;;  %4799 = vmatprep.mubr.bf16.mxu0 %v10983_v47  ;;  %v2747_v45 = vadd.f32 %v10985_v11, %v8869_v33  ;;  %v2936_v13 = vadd.f32 %v2935_v31, %v2743_v63  ;;  %v10987_v55 = vld [vmem:[#allocation22_spill] sm:$0xff]  ;;  %v7008_v27 = vld [vmem:[#allocation6 + $0x330] ss:$8 sps:$4 sm:$0xff]   ;;  %v10988_v11 = vld [vmem:[#allocation81_spill] sm:$0xff] }
 0x2d4   : > { %10982 = vst [vmem:[#allocation55_spill] sm:$0xff] %v9109_v12  ;;  %4992 = vmatprep.mubr.bf16.mxu1 %v8976_v9  ;;  %v2937_v20 = vpop.f32.mrf.mxu0  ;;  %5138 = vmatpush1.bf16.msra.mxu0 %v7002_v10  ;;  %v2749_v9 = vadd.f32 %v10987_v55, %v8884_v26  ;;  %v2753_v63 = vadd.f32 %v10988_v11, %v8869_v33  ;;  %v10995_v11 = vld [vmem:[#allocation21_spill] sm:$0xff] }
 0x2d5   : > { %v9118_v19 = vpop.f32.mrf.mxu1  ;;  %5139 = vmatprep.subr.bf16.mxu0 %v7007_v59  ;;  %v9120_v41 = vpack.c.bf16 %v3531_v7, %v3523_v21  ;;  %v2938_v22 = vadd.f32 %v2937_v20, %v2745_v36  ;;  %v3538_v31 = vmax.f32 %v2936_v13, 0.0  ;;  %v7013_v21 = vld [vmem:[#allocation6 + $0x324] ss:$8 sps:$4 sm:$0xff]   ;;  %v7011_v13 = vld [vmem:[#allocation6 + $0x320] ss:$8 sps:$4 sm:$0xff]  }
 0x2d6   : > { %10986 = vst [vmem:[#allocation52_spill] sm:$0xff] %v9118_v19  ;;  %v2939_v2 = vpop.f32.mrf.mxu0 }
 0x2d7   : > { %v2940_v10 = vadd.f32 %v2939_v2, %v2747_v45  ;;  %v9124_v47 = vpop.f32.mrf.mxu1  ;;  %v3539_v20 = vmax.f32 %v2938_v22, 0.0  ;;  %v7016_v22 = vld [vmem:[#allocation6 + $0x314] ss:$8 sps:$4 sm:$0xff]  }
 0x2d8   : > { %v2941_v12 = vpop.f32.mrf.mxu0  ;;  %5140 = vmatpush1.bf16.msra.mxu0 %v7005_v30  ;;  %v10992_v30 = vld [vmem:[#allocation69_spill] sm:$0xff] }
 0x2d9   : > { %v3546_v19 = vmax.f32 %v2940_v10, 0.0  ;;  %v2942_v59 = vadd.f32 %v2941_v12, %v2749_v9  ;;  %v9128_v54 = vpop.f32.mrf.mxu1  ;;  %5141 = vmatprep.subr.bf16.mxu0 %v7010_v4  ;;  %v10993_v4 = vld [vmem:[#allocation34_spill] sm:$0xff] }
 0x2da   : > { %10989 = vst [vmem:[#allocation77_spill] sm:$0xff] %v9128_v54  ;;  %v2945_v7 = vpop.f32.mrf.mxu0  ;;  %4800 = vmatmul.mubr.bf16.gmra.mxu0 %v10990_v60  ;;  %v2755_v55 = vadd.f32 %v10993_v4, %v8884_v26  ;;  %v2757_v60 = vadd.f32 %v8753_v61, %v8869_v33  ;;  %v7014_v4 = vld [vmem:[#allocation6 + $0x310] ss:$8 sps:$4 sm:$0xff]   ;;  %v10996_v61 = vld [vmem:[#allocation25_spill] sm:$0xff] }
 0x2db   : > { %v9131_v36 = vpack.c.bf16 %v3546_v19, %v3538_v31  ;;  %v3547_v45 = vmax.f32 %v2942_v59, 0.0  ;;  %v9133_v2 = vpop.f32.mrf.mxu1  ;;  %4993 = vmatmul.mubr.bf16.gmra.mxu1 %v8963_v28  ;;  %4809 = vmatprep.mubr.bf16.mxu0 %v10992_v30  ;;  %v2946_v19 = vadd.f32 %v2945_v7, %v2753_v63  ;;  %v2763_v63 = vadd.f32 %v10996_v61, %v8869_v33  ;;  %v10997_v54 = vld [vmem:[#allocation68_spill] sm:$0xff] }
 0x2dc   : > { %10991 = vst [vmem:[#allocation67_spill] sm:$0xff] %v9133_v2  ;;  %5002 = vmatprep.mubr.bf16.mxu1 %v9000_v44  ;;  %v2947_v12 = vpop.f32.mrf.mxu0  ;;  %5142 = vmatpush1.bf16.msra.mxu0 %v7008_v27  ;;  %v2759_v44 = vadd.f32 %v10995_v11, %v8884_v26  ;;  %v7017_v11 = vld [vmem:[#allocation6 + $0x300] ss:$8 sps:$4 sm:$0xff]  }
 0x2dd   : > { %v9142_v9 = vpop.f32.mrf.mxu1  ;;  %5143 = vmatprep.subr.bf16.mxu0 %v7013_v21  ;;  %v9144_v10 = vpack.c.bf16 %v3547_v45, %v3539_v20  ;;  %v2948_v31 = vadd.f32 %v2947_v12, %v2755_v55  ;;  %v3554_v7 = vmax.f32 %v2946_v19, 0.0  ;;  %v7019_v20 = vld [vmem:[#allocation6 + $0x304] ss:$8 sps:$4 sm:$0xff]  }
 0x2de   : > { %10994 = vst [vmem:[#allocation51_spill] sm:$0xff] %v9142_v9  ;;  %v2949_v28 = vpop.f32.mrf.mxu0 }
 0x2df   : > { %v2950_v27 = vadd.f32 %v2949_v28, %v2757_v60  ;;  %v9148_v59 = vpop.f32.mrf.mxu1  ;;  %v3555_v12 = vmax.f32 %v2948_v31, 0.0 }
 0x2e0   : > { %v2951_v30 = vpop.f32.mrf.mxu0  ;;  %5144 = vmatpush1.bf16.msra.mxu0 %v7011_v13  ;;  %v10999_v13 = vld [vmem:[#allocation71_spill] sm:$0xff] }
 0x2e1   : > { %v3562_v9 = vmax.f32 %v2950_v27, 0.0  ;;  %v2952_v21 = vadd.f32 %v2951_v30, %v2759_v44  ;;  %v9152_v2 = vpop.f32.mrf.mxu1  ;;  %5145 = vmatprep.subr.bf16.mxu0 %v7016_v22  ;;  %v11000_v22 = vld [vmem:[#allocation26_spill] sm:$0xff]  ;;  %v7022_v27 = vld [vmem:[#allocation6 + $0x3f4] ss:$8 sps:$4 sm:$0xff]  }
 0x2e2   : > { %v2955_v45 = vpop.f32.mrf.mxu0  ;;  %4810 = vmatmul.mubr.bf16.gmra.mxu0 %v10997_v54  ;;  %v2765_v44 = vadd.f32 %v11000_v22, %v8884_v26  ;;  %v2767_v54 = vadd.f32 %v8777_v46, %v8869_v33  ;;  %v11003_v46 = vld [vmem:[#allocation27_spill] sm:$0xff] }
 0x2e3   : > { %v9155_v55 = vpack.c.bf16 %v3562_v9, %v3554_v7  ;;  %v3563_v60 = vmax.f32 %v2952_v21, 0.0  ;;  %v9157_v28 = vpop.f32.mrf.mxu1  ;;  %5003 = vmatmul.mubr.bf16.gmra.mxu1 %v8987_v57  ;;  %4819 = vmatprep.mubr.bf16.mxu0 %v10999_v13  ;;  %v2956_v9 = vadd.f32 %v2955_v45, %v2763_v63  ;;  %v7020_v13 = vld [vmem:[#allocation6 + $0x3f0] ss:$8 sps:$4 sm:$0xff]   ;;  %v2773_v63 = vadd.f32 %v11003_v46, %v8869_v33  ;;  %v7028_v46 = vld [vmem:[#allocation6 + $0x3d4] ss:$8 sps:$4 sm:$0xff]  }
 0x2e4   : > { %10998 = vst [vmem:[#allocation54_spill] sm:$0xff] %v9157_v28  ;;  %5012 = vmatprep.mubr.bf16.mxu1 %v9024_v38  ;;  %v2957_v19 = vpop.f32.mrf.mxu0  ;;  %5146 = vmatpush1.bf16.msra.mxu0 %v7014_v4  ;;  %v2769_v38 = vadd.f32 %v8779_v1, %v8884_v26  ;;  %v11005_v28 = vld [vmem:[#allocation70_spill] sm:$0xff] }
 0x2e5   : > { %v9166_v31 = vpop.f32.mrf.mxu1  ;;  %5147 = vmatprep.subr.bf16.mxu0 %v7019_v20  ;;  %v9168_v30 = vpack.c.bf16 %v3563_v60, %v3555_v12  ;;  %v2958_v61 = vadd.f32 %v2957_v19, %v2765_v44  ;;  %v3570_v45 = vmax.f32 %v2956_v9, 0.0  ;;  %v7025_v12 = vld [vmem:[#allocation6 + $0x3e4] ss:$8 sps:$4 sm:$0xff]  }
 0x2e6   : > { %11001 = vst [vmem:[#allocation53_spill] sm:$0xff] %v9166_v31  ;;  %v2959_v57 = vpop.f32.mrf.mxu0 }
 0x2e7   : > { %v2960_v4 = vadd.f32 %v2959_v57, %v2767_v54  ;;  %v9172_v7 = vpop.f32.mrf.mxu1  ;;  %v3571_v1 = vmax.f32 %v2958_v61, 0.0  ;;  %v7023_v57 = vld [vmem:[#allocation6 + $0x3e0] ss:$8 sps:$4 sm:$0xff]  }
 0x2e8   : > { %11002 = vst [vmem:[#allocation57_spill] sm:$0xff] %v9172_v7  ;;  %v2961_v21 = vpop.f32.mrf.mxu0  ;;  %5148 = vmatpush1.bf16.msra.mxu0 %v7017_v11  ;;  %v11007_v11 = vld [vmem:[#allocation73_spill] sm:$0xff]  ;;  %v11015_v7 = vld [vmem:[#allocation72_spill] sm:$0xff] }
 0x2e9   : > { %v3578_v22 = vmax.f32 %v2960_v4, 0.0  ;;  %v2962_v20 = vadd.f32 %v2961_v21, %v2769_v38  ;;  %v9176_v31 = vpop.f32.mrf.mxu1  ;;  %5149 = vmatprep.subr.bf16.mxu0 %v7022_v27  ;;  %v11008_v27 = vld [vmem:[#allocation29_spill] sm:$0xff] }
 0x2ea   : > { %11004 = vst [vmem:[#allocation45_spill] sm:$0xff] %v9176_v31  ;;  %v2965_v60 = vpop.f32.mrf.mxu0  ;;  %4820 = vmatmul.mubr.bf16.gmra.mxu0 %v11005_v28  ;;  %v2775_v38 = vadd.f32 %v11008_v27, %v8884_v26  ;;  %v11009_v28 = vld [vmem:[#allocation31_spill] sm:$0xff] }
 0x2eb   : > { %v9179_v19 = vpack.c.bf16 %v3578_v22, %v3570_v45  ;;  %v3579_v44 = vmax.f32 %v2962_v20, 0.0  ;;  %v9181_v54 = vpop.f32.mrf.mxu1  ;;  %5013 = vmatmul.mubr.bf16.gmra.mxu1 %v9011_v43  ;;  %4829 = vmatprep.mubr.bf16.mxu0 %v11007_v11  ;;  %v2777_v61 = vadd.f32 %v11009_v28, %v8869_v33  ;;  %v2966_v4 = vadd.f32 %v2965_v60, %v2773_v63  ;;  %v11011_v22 = vld [vmem:[#allocation32_spill] sm:$0xff]  ;;  %v11013_v28 = vld [vmem:[#allocation35_spill] sm:$0xff] }
 0x2ec   : > { %11006 = vst [vmem:[#allocation20_spill] sm:$0xff] %v9181_v54  ;;  %5022 = vmatprep.mubr.bf16.mxu1 %v9048_v17  ;;  %v2967_v9 = vpop.f32.mrf.mxu0  ;;  %5150 = vmatpush2.bf16.msra.mxu0 %v7020_v13  ;;  %v2779_v17 = vadd.f32 %v11011_v22, %v8884_v26  ;;  %v7026_v27 = vld [vmem:[#allocation6 + $0x3d0] ss:$8 sps:$4 sm:$0xff]   ;;  %v2783_v63 = vadd.f32 %v11013_v28, %v8869_v33 }
 0x2ed   : > { %v9190_v21 = vpop.f32.mrf.mxu1  ;;  %5151 = vmatprep.subr.bf16.mxu0 %v7025_v12  ;;  %v9192_v45 = vpack.c.bf16 %v3579_v44, %v3571_v1  ;;  %v2968_v20 = vadd.f32 %v2967_v9, %v2775_v38  ;;  %v3586_v60 = vmax.f32 %v2966_v4, 0.0  ;;  %v7031_v1 = vld [vmem:[#allocation6 + $0x3c4] ss:$8 sps:$4 sm:$0xff]   ;;  %v7029_v4 = vld [vmem:[#allocation6 + $0x3c0] ss:$8 sps:$4 sm:$0xff]  }
 0x2ee   : > { %11010 = vst [vmem:[#allocation22_spill] sm:$0xff] %v9190_v21  ;;  %v2969_v43 = vpop.f32.mrf.mxu0 }
 0x2ef   : > { %v2970_v13 = vadd.f32 %v2969_v43, %v2777_v61  ;;  %v9196_v11 = vpop.f32.mrf.mxu1  ;;  %v3587_v9 = vmax.f32 %v2968_v20, 0.0 }
 0x2f0   : > { %11012 = vst [vmem:[#allocation81_spill] sm:$0xff] %v9196_v11  ;;  %v2971_v54 = vpop.f32.mrf.mxu0  ;;  %5152 = vmatpush2.bf16.msra.mxu0 %v7023_v57  ;;  %v11017_v57 = vld [vmem:[#allocation78_spill] sm:$0xff]  ;;  %v11023_v11 = vld [vmem:[#allocation75_spill] sm:$0xff] }
 0x2f1   : > { %v3594_v21 = vmax.f32 %v2970_v13, 0.0  ;;  %v2972_v12 = vadd.f32 %v2971_v54, %v2779_v17  ;;  %v9200_v31 = vpop.f32.mrf.mxu1  ;;  %5153 = vmatprep.subr.bf16.mxu0 %v7028_v46  ;;  %v11018_v46 = vld [vmem:[#allocation59_spill] sm:$0xff] }
 0x2f2   : > { %11014 = vst [vmem:[#allocation56_spill] sm:$0xff] %v9200_v31  ;;  %v2975_v44 = vpop.f32.mrf.mxu0  ;;  %4830 = vmatmul.mubr.bf16.gmra.mxu0 %v11015_v7  ;;  %v2785_v22 = vadd.f32 %v11018_v46, %v8884_v26  ;;  %v11019_v7 = vld [vmem:[#allocation37_spill] sm:$0xff]  ;;  %v7032_v46 = vld [vmem:[#allocation6 + $0x3b0] ss:$8 sps:$4 sm:$0xff]  }
 0x2f3   : > { %v9203_v38 = vpack.c.bf16 %v3594_v21, %v3586_v60  ;;  %v3595_v61 = vmax.f32 %v2972_v12, 0.0  ;;  %v9205_v43 = vpop.f32.mrf.mxu1  ;;  %5023 = vmatmul.mubr.bf16.gmra.mxu1 %v9035_v14  ;;  %4839 = vmatprep.mubr.bf16.mxu0 %v11017_v57  ;;  %v2787_v17 = vadd.f32 %v11019_v7, %v8869_v33  ;;  %v2976_v21 = vadd.f32 %v2975_v44, %v2783_v63  ;;  %v7034_v14 = vld [vmem:[#allocation6 + $0x3b4] ss:$8 sps:$4 sm:$0xff]   ;;  %v11022_v7 = vld [vmem:[#allocation82_spill] sm:$0xff] }
 0x2f4   : > { %11016 = vst [vmem:[#allocation69_spill] sm:$0xff] %v9205_v43  ;;  %5032 = vmatprep.mubr.bf16.mxu1 %v9072_v6  ;;  %v2977_v54 = vpop.f32.mrf.mxu0  ;;  %5154 = vmatpush2.bf16.msra.mxu0 %v7026_v27  ;;  %v11021_v60 = vld [vmem:[#allocation39_spill] sm:$0xff]  ;;  %v2793_v63 = vadd.f32 %v11022_v7, %v8869_v33 }
 0x2f5   : > { %v9214_v20 = vpop.f32.mrf.mxu1  ;;  %5155 = vmatprep.subr.bf16.mxu0 %v7031_v1  ;;  %v9216_v13 = vpack.c.bf16 %v3595_v61, %v3587_v9  ;;  %v2789_v6 = vadd.f32 %v11021_v60, %v8884_v26  ;;  %v2978_v12 = vadd.f32 %v2977_v54, %v2785_v22  ;;  %v3602_v44 = vmax.f32 %v2976_v21, 0.0  ;;  %v7037_v61 = vld [vmem:[#allocation6 + $0x3a4] ss:$8 sps:$4 sm:$0xff]   ;;  %v7035_v21 = vld [vmem:[#allocation6 + $0x3a0] ss:$8 sps:$4 sm:$0xff]  }
 0x2f6   : > { %11020 = vst [vmem:[#allocation34_spill] sm:$0xff] %v9214_v20  ;;  %v2979_v28 = vpop.f32.mrf.mxu0 }
 0x2f7   : > { %v2980_v27 = vadd.f32 %v2979_v28, %v2787_v17  ;;  %v9220_v57 = vpop.f32.mrf.mxu1  ;;  %v3603_v54 = vmax.f32 %v2978_v12, 0.0 }
 0x2f8   : > { %v2981_v43 = vpop.f32.mrf.mxu0  ;;  %5156 = vmatpush2.bf16.msra.mxu0 %v7029_v4  ;;  %v11025_v4 = vld [vmem:[#allocation79_spill] sm:$0xff] }
 0x2f9   : > { %v3610_v20 = vmax.f32 %v2980_v27, 0.0  ;;  %v2982_v1 = vadd.f32 %v2981_v43, %v2789_v6  ;;  %v9224_v9 = vpop.f32.mrf.mxu1  ;;  %5157 = vmatprep.subr.bf16.mxu0 %v7034_v14  ;;  %v11026_v14 = vld [vmem:[#allocation58_spill] sm:$0xff] }
 0x2fa   : > { %v2985_v31 = vpop.f32.mrf.mxu0  ;;  %4840 = vmatmul.mubr.bf16.gmra.mxu0 %v11023_v11  ;;  %v2795_v60 = vadd.f32 %v11026_v14, %v8884_v26  ;;  %v11027_v11 = vld [vmem:[#allocation43_spill] sm:$0xff] }
 0x2fb   : > { %v9227_v22 = vpack.c.bf16 %v3610_v20, %v3602_v44  ;;  %v3611_v17 = vmax.f32 %v2982_v1, 0.0  ;;  %v9229_v28 = vpop.f32.mrf.mxu1  ;;  %5033 = vmatmul.mubr.bf16.gmra.mxu1 %v9059_v62  ;;  %4849 = vmatprep.mubr.bf16.mxu0 %v11025_v4  ;;  %v2797_v6 = vadd.f32 %v11027_v11, %v8869_v33  ;;  %v2986_v20 = vadd.f32 %v2985_v31, %v2793_v63  ;;  %v7040_v62 = vld [vmem:[#allocation6 + $0x394] ss:$8 sps:$4 sm:$0xff]   ;;  %v7038_v11 = vld [vmem:[#allocation6 + $0x390] ss:$8 sps:$4 sm:$0xff]  }
 0x2fc   : > { %11024 = vst [vmem:[#allocation21_spill] sm:$0xff] %v9229_v28  ;;  %5042 = vmatprep.mubr.bf16.mxu1 %v9096_v51  ;;  %v2987_v43 = vpop.f32.mrf.mxu0  ;;  %5158 = vmatpush2.bf16.msra.mxu0 %v7032_v46  ;;  %v2799_v51 = vadd.f32 %v8852_v29, %v8884_v26  ;;  %v616_v4 = vsub.s32 6, %v10929_v25  ;;  %v11030_v31 = vld [vmem:[#allocation44_spill] sm:$0xff]  ;;  %v7043_v28 = vld [vmem:[#allocation6 + $0x384] ss:$8 sps:$4 sm:$0xff]  }
 0x2fd   : > { %v9238_v12 = vpop.f32.mrf.mxu1  ;;  %v9240_v27 = vpack.c.bf16 %v3611_v17, %v3603_v54  ;;  %5159 = vmatprep.subr.bf16.mxu0 %v7037_v61  ;;  %v2988_v44 = vadd.f32 %v2987_v43, %v2795_v60  ;;  %v2803_v63 = vadd.f32 %v11030_v31, %v8869_v33  ;;  %v3618_v54 = vmax.f32 %v2986_v20, 0.0  ;;  %v11031_v43 = vld [vmem:[#allocation42_spill] sm:$0xff] }
 0x2fe   : > { %11028 = vst [vmem:[#allocation25_spill] sm:$0xff] %v9238_v12  ;;  %v2989_v7 = vpop.f32.mrf.mxu0  ;;  %v9259_v20 = vrot.slane %v8866_v0, %v616_v4 }
 0x2ff   : > { %v2990_v46 = vadd.f32 %v2989_v7, %v2797_v6  ;;  %v9244_v1 = vpop.f32.mrf.mxu1  ;;  %v3619_v60 = vmax.f32 %v2988_v44, 0.0  ;;  %v2805_v44 = vadd.f32 %v8875_v32, %v8884_v26 }
 0x300   : > { %11029 = vst [vmem:[#allocation68_spill] sm:$0xff] %v9244_v1  ;;  %v2991_v14 = vpop.f32.mrf.mxu0  ;;  %5160 = vmatpush2.bf16.msra.mxu0 %v7035_v21  ;;  %v11032_v21 = vld [vmem:[#allocation18_spill] sm:$0xff] }
 0x301   : > { %v3626_v17 = vmax.f32 %v2990_v46, 0.0  ;;  %v2992_v61 = vadd.f32 %v2991_v14, %v2799_v51  ;;  %v9249_v12 = vpop.f32.mrf.mxu1  ;;  %5161 = vmatprep.subr.bf16.mxu0 %v7040_v62  ;;  %v620_v51 = vsub.s32 7, %v10929_v25  ;;  %v7041_v46 = vld [vmem:[#allocation6 + $0x380] ss:$8 sps:$4 sm:$0xff]   ;;  %v2807_v14 = vadd.f32 %v8881_v42, %v8869_v33 }
 0x302   : > { %v2995_v29 = vpop.f32.mrf.mxu0  ;;  %4850 = vmatmul.mubr.bf16.gmra.mxu0 %v11031_v43  ;;  %v3039_v42 = vadd.f32 %v8893_v16, %v9259_v20 }
 0x303   : > { %v9252_v6 = vpack.c.bf16 %v3626_v17, %v3618_v54  ;;  %v3627_v7 = vmax.f32 %v2992_v61, 0.0  ;;  %v9254_v1 = vpop.f32.mrf.mxu1  ;;  %5043 = vmatmul.mubr.bf16.gmra.mxu1 %v9083_v24  ;;  %4859 = vmatprep.mubr.bf16.mxu0 %v11032_v21  ;;  %v2996_v31 = vadd.f32 %v2995_v29, %v2803_v63  ;;  %v2809_v17 = vadd.f32 %v8888_v15, %v8884_v26 }
 0x304   : > { %5052 = vmatprep.mubr.bf16.mxu1 %v9120_v41  ;;  %v2997_v62 = vpop.f32.mrf.mxu0  ;;  %5162 = vmatpush2.bf16.msra.mxu0 %v7038_v11  ;;  %v9276_v43 = vrot.slane %v8866_v0, %v620_v51  ;;  %v11034_v0 = vld [vmem:[#allocation41_spill] sm:$0xff] }
 0x305   : > { %v9267_v24 = vpop.f32.mrf.mxu1  ;;  %v9269_v54 = vpack.c.bf16 %v3627_v7, %v3619_v60  ;;  %5163 = vmatprep.subr.bf16.mxu0 %v7043_v28  ;;  %v2998_v41 = vadd.f32 %v2997_v62, %v2805_v44  ;;  %v3634_v33 = vmax.f32 %v2996_v31, 0.0  ;;  %v11033_v7 = vld [vmem:[#allocation17_spill] sm:$0xff] }
 0x306   : > { %v2999_v4 = vpop.f32.mrf.mxu0  ;;  %v3041_v51 = vadd.f32 %v8902_v48, %v9276_v43  ;;  %v3049_v48 = vadd.f32 %v8917_v53, %v9259_v20 }
 0x307   : > { %v3000_v61 = vadd.f32 %v2999_v4, %v2807_v14  ;;  %v9273_v11 = vpop.f32.mrf.mxu1  ;;  %v3635_v26 = vmax.f32 %v2998_v41, 0.0 }
 0x308   : > { %v3001_v32 = vpop.f32.mrf.mxu0  ;;  %5164 = vmatpush2.bf16.msra.mxu0 %v7041_v46  ;;  %v3043_v46 = vadd.f32 %v8908_v49, %v9259_v20 }
 0x309   : > { %v3642_v63 = vmax.f32 %v3000_v61, 0.0  ;;  %v3002_v29 = vadd.f32 %v3001_v32, %v2809_v17  ;;  %v9280_v28 = vpop.f32.mrf.mxu1 }
 0x30a   : > { %v3231_v60 = vpop.f32.mrf.mxu0  ;;  %4860 = vmatmul.mubr.bf16.gmra.mxu0 %v11033_v7 }
 0x30b   : > { %v9283_v15 = vpack.c.bf16 %v3642_v63, %v3634_v33  ;;  %v3643_v21 = vmax.f32 %v3002_v29, 0.0  ;;  %v9285_v62 = vpop.f32.mrf.mxu1  ;;  %5053 = vmatmul.mubr.bf16.gmra.mxu1 %v9107_v37  ;;  %4869 = vmatprep.mubr.bf16.mxu0 %v11034_v0  ;;  %v3232_v44 = vadd.f32 %v3231_v60, %v3039_v42  ;;  %v3045_v37 = vadd.f32 %v8912_v40, %v9276_v43  ;;  %v11035_v29 = vld [vmem:[#allocation80_spill] sm:$0xff]  ;;  %v11037_v0 = vld [vmem:[#allocation63_spill] sm:$0xff] }
 0x30c   : > { %5062 = vmatprep.mubr.bf16.mxu1 %v9144_v10  ;;  %v3233_v16 = vpop.f32.mrf.mxu0 }
 0x30d   : > { %v9294_v14 = vpop.f32.mrf.mxu1  ;;  %v9296_v31 = vpack.c.bf16 %v3643_v21, %v3635_v26  ;;  %v3234_v17 = vadd.f32 %v3233_v16, %v3041_v51  ;;  %v3396_v32 = vmax.f32 %v3232_v44, 0.0  ;;  %v11036_v21 = vld [vmem:[#allocation38_spill] sm:$0xff]  ;;  %v3051_v16 = vadd.f32 %v11037_v0, %v9276_v43 }
 0x30e   : > { %v3235_v4 = vpop.f32.mrf.mxu0  ;;  %v3053_v51 = vadd.f32 %v8932_v35, %v9259_v20  ;;  %v11040_v0 = vld [vmem:[#allocation30_spill] sm:$0xff] }
 0x30f   : > { %v3236_v41 = vadd.f32 %v3235_v4, %v3043_v46  ;;  %v9300_v61 = vpop.f32.mrf.mxu1  ;;  %v3397_v60 = vmax.f32 %v3234_v17, 0.0 }
 0x310   : > { %v3237_v10 = vpop.f32.mrf.mxu0 }
 0x311   : > { %v3404_v33 = vmax.f32 %v3236_v41, 0.0  ;;  %v3238_v49 = vadd.f32 %v3237_v10, %v3045_v37  ;;  %v9304_v42 = vpop.f32.mrf.mxu1 }
 0x312   : > { %v3241_v63 = vpop.f32.mrf.mxu0  ;;  %4870 = vmatmul.mubr.bf16.gmra.mxu0 %v11035_v29 }
 0x313   : > { %v9307_v7 = vpack.c.bf16 %v3404_v33, %v3396_v32  ;;  %v3405_v40 = vmax.f32 %v3238_v49, 0.0  ;;  %v9309_v26 = vpop.f32.mrf.mxu1  ;;  %5063 = vmatmul.mubr.bf16.gmra.mxu1 %v9131_v36  ;;  %4879 = vmatprep.mubr.bf16.mxu0 %v11036_v21  ;;  %v3242_v46 = vadd.f32 %v3241_v63, %v3049_v48  ;;  %v3055_v36 = vadd.f32 %v8936_v52, %v9276_v43  ;;  %v11038_v32 = vld [vmem:[#allocation48_spill] sm:$0xff] }
 0x314   : > { %5072 = vmatprep.mubr.bf16.mxu1 %v9168_v30  ;;  %v3243_v53 = vpop.f32.mrf.mxu0  ;;  %v3059_v33 = vadd.f32 %v11038_v32, %v9259_v20 }
 0x315   : > { %v9318_v44 = vpop.f32.mrf.mxu1  ;;  %v9320_v4 = vpack.c.bf16 %v3405_v40, %v3397_v60  ;;  %v3244_v17 = vadd.f32 %v3243_v53, %v3051_v16  ;;  %v3412_v49 = vmax.f32 %v3242_v46, 0.0  ;;  %v11039_v60 = vld [vmem:[#allocation23_spill] sm:$0xff]  ;;  %v7044_v16 = vld [vmem:[%s10653_s5 + $0x78] sm:$0xff]  }
 0x316   : > { %v3245_v37 = vpop.f32.mrf.mxu0  ;;  %6590 = vmatprep.subr.bf16.mxu1 %v7044_v16 }
 0x317   : > { %v3246_v41 = vadd.f32 %v3245_v37, %v3053_v51  ;;  %v9324_v10 = vpop.f32.mrf.mxu1  ;;  %v3413_v40 = vmax.f32 %v3244_v17, 0.0  ;;  %v7045_v51 = vld [vmem:[%s10653_s5 + $0x38] sm:$0xff]   ;;  %v11041_v37 = vld [vmem:[#allocation62_spill] sm:$0xff]  ;;  %v3063_v17 = vadd.f32 %v8956_v58, %v9259_v20 }
 0x318   : > { %v3247_v30 = vpop.f32.mrf.mxu0  ;;  %6591 = vmatpush3.bf16.msra.mxu1 %v7045_v51 }
 0x319   : > { %v3420_v29 = vmax.f32 %v3246_v41, 0.0  ;;  %v3248_v35 = vadd.f32 %v3247_v30, %v3055_v36  ;;  %v9328_v48 = vpop.f32.mrf.mxu1  ;;  %v3061_v36 = vadd.f32 %v11041_v37, %v9276_v43 }
 0x31a   : > { %v3251_v63 = vpop.f32.mrf.mxu0  ;;  %4880 = vmatmul.mubr.bf16.gmra.mxu0 %v11039_v60 }
 0x31b   : > { %v9331_v21 = vpack.c.bf16 %v3420_v29, %v3412_v49  ;;  %v3421_v52 = vmax.f32 %v3248_v35, 0.0  ;;  %v9333_v53 = vpop.f32.mrf.mxu1  ;;  %5073 = vmatmul.mubr.bf16.gmra.mxu1 %v9155_v55  ;;  %4889 = vmatprep.mubr.bf16.mxu0 %v11040_v0  ;;  %v3252_v55 = vadd.f32 %v3251_v63, %v3059_v33  ;;  %v3065_v49 = vadd.f32 %v8960_v5, %v9276_v43  ;;  %v11043_v0 = vld [vmem:[#allocation65_spill] sm:$0xff] }
 0x31c   : > { %5082 = vmatprep.mubr.bf16.mxu1 %v9192_v45  ;;  %v3253_v46 = vpop.f32.mrf.mxu0  ;;  %v3069_v37 = vadd.f32 %v11043_v0, %v9259_v20 }
 0x31d   : > { %v9348_v41 = vpop.f32.mrf.mxu1  ;;  %v9350_v30 = vpack.c.bf16 %v3421_v52, %v3413_v40  ;;  %v3254_v29 = vadd.f32 %v3253_v46, %v3061_v36  ;;  %v3428_v58 = vmax.f32 %v3252_v55, 0.0  ;;  %v11044_v52 = vld [vmem:[#allocation28_spill] sm:$0xff]  ;;  %v11047_v55 = vld [vmem:[#allocation50_spill] sm:$0xff] }
 0x31e   : > { %11042 = vst [vmem:[#allocation71_spill] sm:$0xff] %v9348_v41  ;;  %v3255_v32 = vpop.f32.mrf.mxu0  ;;  %v11046_v36 = vld [vmem:[#allocation36_spill] sm:$0xff] }
 0x31f   : > { %v3256_v45 = vadd.f32 %v3255_v32, %v3063_v17  ;;  %v9354_v35 = vpop.f32.mrf.mxu1  ;;  %v3429_v16 = vmax.f32 %v3254_v29, 0.0  ;;  %v3071_v32 = vadd.f32 %v11047_v55, %v9276_v43 }
 0x320   : > { %v3257_v60 = vpop.f32.mrf.mxu0 }
 0x321   : > { %v3436_v33 = vmax.f32 %v3256_v45, 0.0  ;;  %v3258_v63 = vadd.f32 %v3257_v60, %v3065_v49  ;;  %v9358_v41 = vpop.f32.mrf.mxu1  ;;  %v3073_v49 = vadd.f32 %v8980_v18, %v9259_v20 }
 0x322   : > { %v3261_v40 = vpop.f32.mrf.mxu0  ;;  %4890 = vmatmul.mubr.bf16.gmra.mxu0 %v11044_v52  ;;  %v11049_v52 = vld [vmem:[#allocation64_spill] sm:$0xff] }
 0x323   : > { %v9361_v51 = vpack.c.bf16 %v3436_v33, %v3428_v58  ;;  %v3437_v5 = vmax.f32 %v3258_v63, 0.0  ;;  %v9363_v46 = vpop.f32.mrf.mxu1  ;;  %5083 = vmatmul.mubr.bf16.gmra.mxu1 %v9179_v19  ;;  %4899 = vmatprep.mubr.bf16.mxu0 %v11046_v36  ;;  %v3262_v45 = vadd.f32 %v3261_v40, %v3069_v37  ;;  %v3075_v19 = vadd.f32 %v8984_v8, %v9276_v43 }
 0x324   : > { %11045 = vst [vmem:[#allocation26_spill] sm:$0xff] %v9363_v46  ;;  %5092 = vmatprep.mubr.bf16.mxu1 %v9216_v13  ;;  %v3263_v17 = vpop.f32.mrf.mxu0  ;;  %v3079_v36 = vadd.f32 %v11049_v52, %v9259_v20 }
 0x325   : > { %v9372_v29 = vpop.f32.mrf.mxu1  ;;  %v9374_v60 = vpack.c.bf16 %v3437_v5, %v3429_v16  ;;  %v3264_v58 = vadd.f32 %v3263_v17, %v3071_v32  ;;  %v3444_v55 = vmax.f32 %v3262_v45, 0.0  ;;  %v11050_v16 = vld [vmem:[#allocation33_spill] sm:$0xff]  ;;  %v7047_v45 = vld [vmem:[%s10653_s5 + $0x30] sm:$0xff]  }
 0x326   : > { %11048 = vst [vmem:[#allocation27_spill] sm:$0xff] %v9372_v29  ;;  %v3265_v0 = vpop.f32.mrf.mxu0  ;;  %v11052_v32 = vld [vmem:[#allocation61_spill] sm:$0xff] }
 0x327   : > { %v3266_v33 = vadd.f32 %v3265_v0, %v3073_v49  ;;  %v9378_v63 = vpop.f32.mrf.mxu1  ;;  %v3445_v5 = vmax.f32 %v3264_v58, 0.0  ;;  %v7046_v49 = vld [vmem:[%s10653_s5 + $0x70] sm:$0xff]   ;;  %v3083_v58 = vadd.f32 %v9004_v3, %v9259_v20 }
 0x328   : > { %v3267_v13 = vpop.f32.mrf.mxu0  ;;  %6592 = vmatprep.subr.bf16.mxu1 %v7046_v49 }
 0x329   : > { %v3452_v46 = vmax.f32 %v3266_v33, 0.0  ;;  %v3268_v18 = vadd.f32 %v3267_v13, %v3075_v19  ;;  %v9382_v37 = vpop.f32.mrf.mxu1  ;;  %6593 = vmatpush3.bf16.msra.mxu1 %v7047_v45 }
 0x32a   : > { %v3271_v40 = vpop.f32.mrf.mxu0  ;;  %4900 = vmatmul.mubr.bf16.gmra.mxu0 %v11050_v16 }
 0x32b   : > { %v9385_v29 = vpack.c.bf16 %v3452_v46, %v3444_v55  ;;  %v3453_v8 = vmax.f32 %v3268_v18, 0.0  ;;  %v9387_v17 = vpop.f32.mrf.mxu1  ;;  %5093 = vmatmul.mubr.bf16.gmra.mxu1 %v9203_v38  ;;  %4909 = vmatprep.mubr.bf16.mxu0 %v11052_v32  ;;  %v11053_v46 = vld [vmem:[#allocation66_spill] sm:$0xff]  ;;  %v3272_v38 = vadd.f32 %v3271_v40, %v3079_v36  ;;  %v3085_v55 = vadd.f32 %v9008_v39, %v9276_v43 }
 0x32c   : > { %11051 = vst [vmem:[#allocation70_spill] sm:$0xff] %v9387_v17  ;;  %5102 = vmatprep.mubr.bf16.mxu1 %v9240_v27  ;;  %v3273_v0 = vpop.f32.mrf.mxu0  ;;  %v3081_v19 = vadd.f32 %v11053_v46, %v9276_v43  ;;  %v11055_v46 = vld [vmem:[#allocation9_spill] sm:$0xff] }
 0x32d   : > { %v9402_v33 = vpop.f32.mrf.mxu1  ;;  %v9404_v13 = vpack.c.bf16 %v3453_v8, %v3445_v5  ;;  %v3089_v17 = vadd.f32 %v11055_v46, %v9259_v20  ;;  %v3460_v3 = vmax.f32 %v3272_v38, 0.0  ;;  %v11057_v8 = vld [vmem:[#allocation40_spill] sm:$0xff]  ;;  %v11060_v38 = vld [vmem:[#allocation11_spill] sm:$0xff] }
 0x32e   : > { %11054 = vst [vmem:[#allocation73_spill] sm:$0xff] %v9402_v33  ;;  %v3275_v52 = vpop.f32.mrf.mxu0  ;;  %v3274_v18 = vadd.f32 %v3273_v0, %v3081_v19  ;;  %v11059_v19 = vld [vmem:[#allocation49_spill] sm:$0xff] }
 0x32f   : > { %v3276_v27 = vadd.f32 %v3275_v52, %v3083_v58  ;;  %v9408_v16 = vpop.f32.mrf.mxu1  ;;  %v3091_v52 = vadd.f32 %v11060_v38, %v9276_v43 }
 0x330   : > { %v3277_v32 = vpop.f32.mrf.mxu0  ;;  %v3461_v49 = vmax.f32 %v3274_v18, 0.0 }
 0x331   : > { %v3468_v36 = vmax.f32 %v3276_v27, 0.0  ;;  %v3278_v40 = vadd.f32 %v3277_v32, %v3085_v55  ;;  %v9412_v33 = vpop.f32.mrf.mxu1  ;;  %v3093_v55 = vadd.f32 %v9028_v50, %v9259_v20 }
 0x332   : > { %11056 = vst [vmem:[#allocation29_spill] sm:$0xff] %v9412_v33  ;;  %v3281_v5 = vpop.f32.mrf.mxu0  ;;  %4910 = vmatmul.mubr.bf16.gmra.mxu0 %v11057_v8 }
 0x333   : > { %v9415_v45 = vpack.c.bf16 %v3468_v36, %v3460_v3  ;;  %v3469_v39 = vmax.f32 %v3278_v40, 0.0  ;;  %v9417_v0 = vpop.f32.mrf.mxu1  ;;  %5103 = vmatmul.mubr.bf16.gmra.mxu1 %v9227_v22  ;;  %4919 = vmatprep.mubr.bf16.mxu0 %v11059_v19  ;;  %v3282_v27 = vadd.f32 %v3281_v5, %v3089_v17  ;;  %v11062_v3 = vld [vmem:[#allocation10_spill] sm:$0xff]  ;;  %v11064_v19 = vld [vmem:[#allocation13_spill] sm:$0xff] }
 0x334   : > { %11058 = vst [vmem:[#allocation31_spill] sm:$0xff] %v9417_v0  ;;  %5112 = vmatprep.mubr.bf16.mxu1 %v9269_v54  ;;  %v3283_v58 = vpop.f32.mrf.mxu0  ;;  %v3095_v22 = vadd.f32 %v11062_v3, %v9276_v43  ;;  %v3099_v38 = vadd.f32 %v11064_v19, %v9259_v20 }
 0x335   : > { %v9426_v18 = vpop.f32.mrf.mxu1  ;;  %v9428_v32 = vpack.c.bf16 %v3469_v39, %v3461_v49  ;;  %v3284_v36 = vadd.f32 %v3283_v58, %v3091_v52  ;;  %v3476_v33 = vmax.f32 %v3282_v27, 0.0  ;;  %v11066_v49 = vld [vmem:[#allocation46_spill] sm:$0xff]  ;;  %v11068_v52 = vld [vmem:[#allocation60_spill] sm:$0xff] }
 0x336   : > { %11061 = vst [vmem:[#allocation32_spill] sm:$0xff] %v9426_v18  ;;  %v3285_v46 = vpop.f32.mrf.mxu0  ;;  %v7049_v27 = vld [vmem:[%s10653_s5 + $0x28] sm:$0xff]  }
 0x337   : > { %v3286_v40 = vadd.f32 %v3285_v46, %v3093_v55  ;;  %v9432_v8 = vpop.f32.mrf.mxu1  ;;  %v3477_v39 = vmax.f32 %v3284_v36, 0.0  ;;  %v7048_v55 = vld [vmem:[%s10653_s5 + $0x68] sm:$0xff]  }
 0x338   : > { %11063 = vst [vmem:[#allocation35_spill] sm:$0xff] %v9432_v8  ;;  %v3287_v54 = vpop.f32.mrf.mxu0  ;;  %6594 = vmatprep.subr.bf16.mxu1 %v7048_v55 }
 0x339   : > { %v3484_v0 = vmax.f32 %v3286_v40, 0.0  ;;  %v3288_v50 = vadd.f32 %v3287_v54, %v3095_v22  ;;  %v9436_v17 = vpop.f32.mrf.mxu1  ;;  %v11070_v22 = vld [vmem:[#allocation16_spill] sm:$0xff]  ;;  %6595 = vmatpush3.bf16.msra.mxu1 %v7049_v27 }
 0x33a   : > { %11065 = vst [vmem:[#allocation72_spill] sm:$0xff] %v9436_v17  ;;  %v3291_v5 = vpop.f32.mrf.mxu0  ;;  %4920 = vmatmul.mubr.bf16.gmra.mxu0 %v11066_v49  ;;  %v3103_v36 = vadd.f32 %v11070_v22, %v9259_v20 }
 0x33b   : > { %v9439_v18 = vpack.c.bf16 %v3484_v0, %v3476_v33  ;;  %v3485_v3 = vmax.f32 %v3288_v50, 0.0  ;;  %v9441_v58 = vpop.f32.mrf.mxu1  ;;  %5113 = vmatmul.mubr.bf16.gmra.mxu1 %v9252_v6  ;;  %4929 = vmatprep.mubr.bf16.mxu0 %v11068_v52  ;;  %v11069_v33 = vld [vmem:[#allocation12_spill] sm:$0xff]  ;;  %v3292_v6 = vadd.f32 %v3291_v5, %v3099_v38  ;;  %v11072_v50 = vld [vmem:[#allocation14_spill] sm:$0xff] }
 0x33c   : > { %11067 = vst [vmem:[#allocation78_spill] sm:$0xff] %v9441_v58  ;;  %5122 = vmatprep.mubr.bf16.mxu1 %v9296_v31  ;;  %v3293_v46 = vpop.f32.mrf.mxu0  ;;  %v3101_v0 = vadd.f32 %v11069_v33, %v9276_v43  ;;  %v3105_v49 = vadd.f32 %v11072_v50, %v9276_v43  ;;  %v11073_v33 = vld [vmem:[#allocation19_spill] sm:$0xff] }
 0x33d   : > { %v9456_v40 = vpop.f32.mrf.mxu1  ;;  %v9458_v54 = vpack.c.bf16 %v3485_v3, %v3477_v39  ;;  %v3109_v8 = vadd.f32 %v11073_v33, %v9259_v20  ;;  %v3492_v22 = vmax.f32 %v3292_v6, 0.0  ;;  %v11075_v3 = vld [vmem:[#allocation47_spill] sm:$0xff]  ;;  %v3115_v33 = vadd.f32 %v9080_v34, %v9276_v43 }
 0x33e   : > { %11071 = vst [vmem:[#allocation59_spill] sm:$0xff] %v9456_v40  ;;  %v3295_v19 = vpop.f32.mrf.mxu0  ;;  %v3294_v52 = vadd.f32 %v3293_v46, %v3101_v0 }
 0x33f   : > { %v3296_v31 = vadd.f32 %v3295_v19, %v3103_v36  ;;  %v9462_v17 = vpop.f32.mrf.mxu1  ;;  %v11076_v36 = vld [vmem:[#allocation15_spill] sm:$0xff] }
 0x340   : > { %v3297_v58 = vpop.f32.mrf.mxu0  ;;  %v3493_v55 = vmax.f32 %v3294_v52, 0.0  ;;  %v3111_v6 = vadd.f32 %v11076_v36, %v9276_v43 }
 0x341   : > { %v3500_v38 = vmax.f32 %v3296_v31, 0.0  ;;  %v3298_v5 = vadd.f32 %v3297_v58, %v3105_v49  ;;  %v9466_v40 = vpop.f32.mrf.mxu1  ;;  %v3113_v58 = vadd.f32 %v9076_v56, %v9259_v20 }
 0x342   : > { %11074 = vst [vmem:[#allocation37_spill] sm:$0xff] %v9466_v40  ;;  %v3301_v39 = vpop.f32.mrf.mxu0  ;;  %4930 = vmatmul.mubr.bf16.gmra.mxu0 %v11075_v3 }
 0x343   : > { %v9469_v27 = vpack.c.bf16 %v3500_v38, %v3492_v22  ;;  %v3501_v50 = vmax.f32 %v3298_v5, 0.0  ;;  %v9471_v46 = vpop.f32.mrf.mxu1  ;;  %5123 = vmatmul.mubr.bf16.gmra.mxu1 %v9283_v15  ;;  %5165 = vmatprep.mubr.bf16.mxu0 %v9320_v4  ;;  %v3302_v19 = vadd.f32 %v3301_v39, %v3109_v8  ;;  %v3119_v5 = vadd.f32 %v9085_v23, %v9259_v20  ;;  %v7050_v23 = vld [vmem:[%s10653_s5 + $0x60] sm:$0xff]  }
 0x344   : > { %v3303_v0 = vpop.f32.mrf.mxu0  ;;  %6596 = vmatprep.subr.bf16.mxu1 %v7050_v23 }
 0x345   : > { %v9479_v49 = vpop.f32.mrf.mxu1  ;;  %v9481_v52 = vpack.c.bf16 %v3501_v50, %v3493_v55  ;;  %v3304_v22 = vadd.f32 %v3303_v0, %v3111_v6  ;;  %v3508_v3 = vmax.f32 %v3302_v19, 0.0  ;;  %v7051_v6 = vld [vmem:[%s10653_s5 + $0x20] sm:$0xff]   ;;  %v11080_v19 = vld [vmem:[#allocation24_spill] sm:$0xff] }
 0x346   : > { %v3305_v31 = vpop.f32.mrf.mxu0  ;;  %6597 = vmatpush3.bf16.msra.mxu1 %v7051_v6 }
 0x347   : > { %v3306_v15 = vadd.f32 %v3305_v31, %v3113_v58  ;;  %v9485_v38 = vpop.f32.mrf.mxu1  ;;  %v3509_v55 = vmax.f32 %v3304_v22, 0.0  ;;  %v11081_v31 = vld [vmem:[#allocation74_spill] sm:$0xff] }
 0x348   : > { %11077 = vst [vmem:[#allocation39_spill] sm:$0xff] %v9485_v38  ;;  %v3307_v4 = vpop.f32.mrf.mxu0 }
 0x349   : > { %v3516_v36 = vmax.f32 %v3306_v15, 0.0  ;;  %v3308_v56 = vadd.f32 %v3307_v4, %v3115_v33  ;;  %v9489_v8 = vpop.f32.mrf.mxu1  ;;  %v3123_v33 = vadd.f32 %v11081_v31, %v9259_v20 }
 0x34a   : > { %11078 = vst [vmem:[#allocation82_spill] sm:$0xff] %v9489_v8  ;;  %v3311_v39 = vpop.f32.mrf.mxu0  ;;  %5166 = vmatmul.mubr.bf16.vlgmr.msra.gmra.mxu0 %v9307_v7  ;;  %v3121_v7 = vadd.f32 %v11080_v19, %v9276_v43  ;;  %v11084_v19 = vld [vmem:[#allocation55_spill] sm:$0xff] }
 0x34b   : > { %v9492_v50 = vpack.c.bf16 %v3516_v36, %v3508_v3  ;;  %v3517_v34 = vmax.f32 %v3308_v56, 0.0  ;;  %v9494_v0 = vpop.f32.mrf.mxu1  ;;  %5175 = vmatprep.mubr.bf16.mxu0 %v9350_v30  ;;  %v3312_v22 = vadd.f32 %v3311_v39, %v3119_v5  ;;  %v11083_v3 = vld [vmem:[#allocation76_spill] sm:$0xff]  ;;  %v3129_v38 = vadd.f32 %v11084_v19, %v9259_v20 }
 0x34c   : > { %11079 = vst [vmem:[#allocation75_spill] sm:$0xff] %v9494_v0  ;;  %v3313_v58 = vpop.f32.mrf.mxu0  ;;  %v3125_v36 = vadd.f32 %v11083_v3, %v9276_v43 }
 0x34d   : > { %v9507_v15 = vpop.f32.mrf.mxu1  ;;  %v9509_v4 = vpack.c.bf16 %v3517_v34, %v3509_v55  ;;  %v3314_v56 = vadd.f32 %v3313_v58, %v3121_v7  ;;  %v3524_v31 = vmax.f32 %v3312_v22, 0.0 }
 0x34e   : > { %11082 = vst [vmem:[#allocation79_spill] sm:$0xff] %v9507_v15  ;;  %v3315_v30 = vpop.f32.mrf.mxu0 }
 0x34f   : > { %v3316_v8 = vadd.f32 %v3315_v30, %v3123_v33  ;;  %v9513_v40 = vpop.f32.mrf.mxu1  ;;  %v3525_v34 = vmax.f32 %v3314_v56, 0.0  ;;  %v11087_v33 = vld [vmem:[#allocation52_spill] sm:$0xff] }
 0x350   : > { %v3317_v0 = vpop.f32.mrf.mxu0  ;;  %v3131_v30 = vadd.f32 %v11087_v33, %v9276_v43 }
 0x351   : > { %v3532_v5 = vmax.f32 %v3316_v8, 0.0  ;;  %v3318_v39 = vadd.f32 %v3317_v0, %v3125_v36  ;;  %v9517_v15 = vpop.f32.mrf.mxu1  ;;  %v3133_v8 = vadd.f32 %v9124_v47, %v9259_v20  ;;  %v11088_v36 = vld [vmem:[#allocation77_spill] sm:$0xff] }
 0x352   : > { %11085 = vst [vmem:[#allocation58_spill] sm:$0xff] %v9517_v15  ;;  %v3321_v55 = vpop.f32.mrf.mxu0  ;;  %5176 = vmatmul.mubr.bf16.gmra.mxu0 %v9331_v21  ;;  %v3135_v56 = vadd.f32 %v11088_v36, %v9276_v43 }
 0x353   : > { %v9520_v23 = vpack.c.bf16 %v3532_v5, %v3524_v31  ;;  %v3533_v6 = vmax.f32 %v3318_v39, 0.0  ;;  %v9522_v58 = vpop.f32.mrf.mxu1  ;;  %5185 = vmatprep.mubr.bf16.mxu0 %v9374_v60  ;;  %v3322_v0 = vadd.f32 %v3321_v55, %v3129_v38  ;;  %v11089_v39 = vld [vmem:[#allocation67_spill] sm:$0xff] }
 0x354   : > { %11086 = vst [vmem:[#allocation43_spill] sm:$0xff] %v9522_v58  ;;  %v3323_v7 = vpop.f32.mrf.mxu0  ;;  %v3139_v33 = vadd.f32 %v11089_v39, %v9259_v20 }
 0x355   : > { %v9529_v22 = vpop.f32.mrf.mxu1  ;;  %v9531_v3 = vpack.c.bf16 %v3533_v6, %v3525_v34  ;;  %v3324_v19 = vadd.f32 %v3323_v7, %v3131_v30  ;;  %v3540_v15 = vmax.f32 %v3322_v0, 0.0  ;;  %v7052_v30 = vld [vmem:[%s10653_s5 + $0x58] sm:$0xff]  }
 0x356   : > { %v3325_v21 = vpop.f32.mrf.mxu0  ;;  %6598 = vmatprep.subr.bf16.mxu1 %v7052_v30 }
 0x357   : > { %v3326_v31 = vadd.f32 %v3325_v21, %v3133_v8  ;;  %v9535_v5 = vpop.f32.mrf.mxu1  ;;  %v3541_v34 = vmax.f32 %v3324_v19, 0.0  ;;  %v7053_v8 = vld [vmem:[%s10653_s5 + $0x18] sm:$0xff]   ;;  %v11092_v21 = vld [vmem:[#allocation51_spill] sm:$0xff] }
 0x358   : > { %v3327_v60 = vpop.f32.mrf.mxu0  ;;  %6599 = vmatpush3.bf16.msra.mxu1 %v7053_v8 }
 0x359   : > { %v3548_v58 = vmax.f32 %v3326_v31, 0.0  ;;  %v3328_v47 = vadd.f32 %v3327_v60, %v3135_v56  ;;  %v9539_v38 = vpop.f32.mrf.mxu1  ;;  %v3145_v31 = vadd.f32 %v9152_v2, %v9276_v43 }
 0x35a   : > { %11090 = vst [vmem:[#allocation44_spill] sm:$0xff] %v9539_v38  ;;  %v3331_v55 = vpop.f32.mrf.mxu0  ;;  %5186 = vmatmul.mubr.bf16.gmra.mxu0 %v9361_v51  ;;  %v3141_v51 = vadd.f32 %v11092_v21, %v9276_v43  ;;  %v11095_v21 = vld [vmem:[#allocation54_spill] sm:$0xff] }
 0x35b   : > { %v9542_v6 = vpack.c.bf16 %v3548_v58, %v3540_v15  ;;  %v3549_v36 = vmax.f32 %v3328_v47, 0.0  ;;  %v9544_v7 = vpop.f32.mrf.mxu1  ;;  %5195 = vmatprep.mubr.bf16.mxu0 %v9404_v13  ;;  %v3143_v15 = vadd.f32 %v9148_v59, %v9259_v20  ;;  %v3332_v58 = vadd.f32 %v3331_v55, %v3139_v33 }
 0x35c   : > { %11091 = vst [vmem:[#allocation42_spill] sm:$0xff] %v9544_v7  ;;  %v3333_v0 = vpop.f32.mrf.mxu0  ;;  %v3149_v7 = vadd.f32 %v11095_v21, %v9259_v20 }
 0x35d   : > { %v9557_v56 = vpop.f32.mrf.mxu1  ;;  %v9559_v19 = vpack.c.bf16 %v3549_v36, %v3541_v34  ;;  %v3334_v60 = vadd.f32 %v3333_v0, %v3141_v51  ;;  %v3556_v59 = vmax.f32 %v3332_v58, 0.0  ;;  %v11098_v51 = vld [vmem:[#allocation53_spill] sm:$0xff] }
 0x35e   : > { %11093 = vst [vmem:[#allocation18_spill] sm:$0xff] %v9557_v56  ;;  %v3335_v13 = vpop.f32.mrf.mxu0  ;;  %v11099_v58 = vld [vmem:[#allocation57_spill] sm:$0xff] }
 0x35f   : > { %v3336_v39 = vadd.f32 %v3335_v13, %v3143_v15  ;;  %v9563_v47 = vpop.f32.mrf.mxu1  ;;  %v3557_v36 = vmax.f32 %v3334_v60, 0.0  ;;  %v3151_v15 = vadd.f32 %v11098_v51, %v9276_v43  ;;  %v11101_v60 = vld [vmem:[#allocation45_spill] sm:$0xff] }
 0x360   : > { %11094 = vst [vmem:[#allocation17_spill] sm:$0xff] %v9563_v47  ;;  %v3337_v38 = vpop.f32.mrf.mxu0  ;;  %v3155_v21 = vadd.f32 %v11101_v60, %v9276_v43 }
 0x361   : > { %v3564_v33 = vmax.f32 %v3336_v39, 0.0  ;;  %v3338_v55 = vadd.f32 %v3337_v38, %v3145_v31  ;;  %v9567_v56 = vpop.f32.mrf.mxu1  ;;  %v3153_v38 = vadd.f32 %v11099_v58, %v9259_v20 }
 0x362   : > { %11096 = vst [vmem:[#allocation41_spill] sm:$0xff] %v9567_v56  ;;  %v3341_v34 = vpop.f32.mrf.mxu0  ;;  %5196 = vmatmul.mubr.bf16.gmra.mxu0 %v9385_v29  ;;  %v11103_v56 = vld [vmem:[#allocation20_spill] sm:$0xff] }
 0x363   : > { %v9570_v30 = vpack.c.bf16 %v3564_v33, %v3556_v59  ;;  %v3565_v2 = vmax.f32 %v3338_v55, 0.0  ;;  %v9572_v8 = vpop.f32.mrf.mxu1  ;;  %5205 = vmatprep.mubr.bf16.mxu0 %v9428_v32  ;;  %v3342_v13 = vadd.f32 %v3341_v34, %v3149_v7  ;;  %v3159_v51 = vadd.f32 %v11103_v56, %v9259_v20  ;;  %v7054_v56 = vld [vmem:[%s10653_s5 + $0x50] sm:$0xff]  }
 0x364   : > { %11097 = vst [vmem:[#allocation80_spill] sm:$0xff] %v9572_v8  ;;  %v3343_v0 = vpop.f32.mrf.mxu0  ;;  %6600 = vmatprep.subr.bf16.mxu1 %v7054_v56 }
 0x365   : > { %v9579_v31 = vpop.f32.mrf.mxu1  ;;  %v9581_v39 = vpack.c.bf16 %v3565_v2, %v3557_v36  ;;  %v3344_v59 = vadd.f32 %v3343_v0, %v3151_v15  ;;  %v3572_v8 = vmax.f32 %v3342_v13, 0.0  ;;  %v7055_v15 = vld [vmem:[%s10653_s5 + $0x10] sm:$0xff]   ;;  %v11106_v13 = vld [vmem:[#allocation22_spill] sm:$0xff] }
 0x366   : > { %11100 = vst [vmem:[#allocation38_spill] sm:$0xff] %v9579_v31  ;;  %v3345_v29 = vpop.f32.mrf.mxu0  ;;  %6601 = vmatpush3.bf16.msra.mxu1 %v7055_v15 }
 0x367   : > { %v3346_v33 = vadd.f32 %v3345_v29, %v3153_v38  ;;  %v9585_v55 = vpop.f32.mrf.mxu1  ;;  %v3573_v36 = vmax.f32 %v3344_v59, 0.0 }
 0x368   : > { %11102 = vst [vmem:[#allocation63_spill] sm:$0xff] %v9585_v55  ;;  %v3347_v32 = vpop.f32.mrf.mxu0 }
 0x369   : > { %v3580_v47 = vmax.f32 %v3346_v33, 0.0  ;;  %v3348_v58 = vadd.f32 %v3347_v32, %v3155_v21  ;;  %v9589_v7 = vpop.f32.mrf.mxu1  ;;  %v11109_v33 = vld [vmem:[#allocation56_spill] sm:$0xff] }
 0x36a   : > { %11104 = vst [vmem:[#allocation48_spill] sm:$0xff] %v9589_v7  ;;  %v3351_v34 = vpop.f32.mrf.mxu0  ;;  %5206 = vmatmul.mubr.bf16.gmra.mxu0 %v9415_v45  ;;  %v3161_v45 = vadd.f32 %v11106_v13, %v9276_v43  ;;  %v3165_v32 = vadd.f32 %v11109_v33, %v9276_v43  ;;  %v11110_v13 = vld [vmem:[#allocation69_spill] sm:$0xff] }
 0x36b   : > { %v9592_v2 = vpack.c.bf16 %v3580_v47, %v3572_v8  ;;  %v3581_v60 = vmax.f32 %v3348_v58, 0.0  ;;  %v9594_v0 = vpop.f32.mrf.mxu1  ;;  %5215 = vmatprep.mubr.bf16.mxu0 %v9458_v54  ;;  %v11107_v47 = vld [vmem:[#allocation81_spill] sm:$0xff]  ;;  %v3352_v29 = vadd.f32 %v3351_v34, %v3159_v51  ;;  %v3169_v31 = vadd.f32 %v11110_v13, %v9259_v20 }
 0x36c   : > { %11105 = vst [vmem:[#allocation23_spill] sm:$0xff] %v9594_v0  ;;  %v3353_v38 = vpop.f32.mrf.mxu0  ;;  %v3163_v8 = vadd.f32 %v11107_v47, %v9259_v20 }
 0x36d   : > { %v9607_v21 = vpop.f32.mrf.mxu1  ;;  %v9609_v59 = vpack.c.bf16 %v3581_v60, %v3573_v36  ;;  %v3354_v58 = vadd.f32 %v3353_v38, %v3161_v45  ;;  %v3588_v47 = vmax.f32 %v3352_v29, 0.0 }
 0x36e   : > { %11108 = vst [vmem:[#allocation30_spill] sm:$0xff] %v9607_v21  ;;  %v3355_v54 = vpop.f32.mrf.mxu0 }
 0x36f   : > { %v3356_v7 = vadd.f32 %v3355_v54, %v3163_v8  ;;  %v9613_v0 = vpop.f32.mrf.mxu1  ;;  %v3589_v60 = vmax.f32 %v3354_v58, 0.0  ;;  %v11112_v8 = vld [vmem:[#allocation34_spill] sm:$0xff] }
 0x370   : > { %v3357_v55 = vpop.f32.mrf.mxu0  ;;  %v3171_v54 = vadd.f32 %v11112_v8, %v9276_v43 }
 0x371   : > { %v3596_v51 = vmax.f32 %v3356_v7, 0.0  ;;  %v3358_v34 = vadd.f32 %v3357_v55, %v3165_v32  ;;  %v9617_v21 = vpop.f32.mrf.mxu1  ;;  %v3173_v55 = vadd.f32 %v9220_v57, %v9259_v20  ;;  %v3175_v32 = vadd.f32 %v9224_v9, %v9276_v43 }
 0x372   : > { %11111 = vst [vmem:[#allocation62_spill] sm:$0xff] %v9617_v21  ;;  %v3361_v36 = vpop.f32.mrf.mxu0  ;;  %5216 = vmatmul.mubr.bf16.gmra.mxu0 %v9439_v18 }
 0x373   : > { %v9620_v56 = vpack.c.bf16 %v3596_v51, %v3588_v47  ;;  %v3597_v15 = vmax.f32 %v3358_v34, 0.0  ;;  %v9622_v38 = vpop.f32.mrf.mxu1  ;;  %5225 = vmatprep.mubr.bf16.mxu0 %v9481_v52  ;;  %v3362_v7 = vadd.f32 %v3361_v36, %v3169_v31  ;;  %v11113_v51 = vld [vmem:[#allocation21_spill] sm:$0xff] }
 0x374   : > { %v3363_v45 = vpop.f32.mrf.mxu0  ;;  %v3179_v34 = vadd.f32 %v11113_v51, %v9259_v20  ;;  %v3185_v51 = vadd.f32 %v9249_v12, %v9276_v43 }
 0x375   : > { %v9629_v29 = vpop.f32.mrf.mxu1  ;;  %v9631_v33 = vpack.c.bf16 %v3597_v15, %v3589_v60  ;;  %v3364_v58 = vadd.f32 %v3363_v45, %v3171_v54  ;;  %v3604_v8 = vmax.f32 %v3362_v7, 0.0  ;;  %v7056_v54 = vld [vmem:[%s10653_s5 + $0x48] sm:$0xff]  }
 0x376   : > { %v3365_v18 = vpop.f32.mrf.mxu0  ;;  %6602 = vmatprep.subr.bf16.mxu1 %v7056_v54 }
 0x377   : > { %v3366_v13 = vadd.f32 %v3365_v18, %v3173_v55  ;;  %v9635_v47 = vpop.f32.mrf.mxu1  ;;  %v3605_v60 = vmax.f32 %v3364_v58, 0.0  ;;  %v7057_v55 = vld [vmem:[%s10653_s5 + $0x8] sm:$0xff]   ;;  %v11116_v18 = vld [vmem:[#allocation25_spill] sm:$0xff] }
 0x378   : > { %v3367_v52 = vpop.f32.mrf.mxu0  ;;  %6603 = vmatpush3.bf16.msra.mxu1 %v7057_v55 }
 0x379   : > { %v3612_v21 = vmax.f32 %v3366_v13, 0.0  ;;  %v3368_v57 = vadd.f32 %v3367_v52, %v3175_v32  ;;  %v9639_v31 = vpop.f32.mrf.mxu1 }
 0x37a   : > { %11114 = vst [vmem:[#allocation65_spill] sm:$0xff] %v9639_v31  ;;  %v3371_v36 = vpop.f32.mrf.mxu0  ;;  %5226 = vmatmul.mubr.bf16.gmra.mxu0 %v9469_v27  ;;  %v3181_v27 = vadd.f32 %v11116_v18, %v9276_v43  ;;  %v3189_v18 = vadd.f32 %v9254_v1, %v9259_v20  ;;  %v11119_v1 = vsub.s32 0, %v10929_v25 }
 0x37b   : > { %v9642_v15 = vpack.c.bf16 %v3612_v21, %v3604_v8  ;;  %v3613_v9 = vmax.f32 %v3368_v57, 0.0  ;;  %v9644_v45 = vpop.f32.mrf.mxu1  ;;  %5235 = vmatprep.mubr.bf16.mxu0 %v9509_v4  ;;  %v11117_v21 = vld [vmem:[#allocation68_spill] sm:$0xff]  ;;  %v3372_v58 = vadd.f32 %v3371_v36, %v3179_v34  ;;  %v3902_v34 = vld [vmem:[%s10652_s4] sm:$0x3] }
 0x37c   : > { %11115 = vst [vmem:[#allocation28_spill] sm:$0xff] %v9644_v45  ;;  %v3373_v7 = vpop.f32.mrf.mxu0  ;;  %v3183_v32 = vadd.f32 %v11117_v21, %v9259_v20 }
 0x37d   : > { %v9657_v13 = vpop.f32.mrf.mxu1  ;;  %v9659_v52 = vpack.c.bf16 %v3613_v9, %v3605_v60  ;;  %v3374_v8 = vadd.f32 %v3373_v7, %v3181_v27  ;;  %v3620_v36 = vmax.f32 %v3372_v58, 0.0 }
 0x37e   : > { %v3375_v4 = vpop.f32.mrf.mxu0 }
 0x37f   : > { %v3376_v57 = vadd.f32 %v3375_v4, %v3183_v32  ;;  %v9663_v31 = vpop.f32.mrf.mxu1  ;;  %v3621_v12 = vmax.f32 %v3374_v8, 0.0  ;;  %v9680_v32 = vrot.slane %v3902_v34, %v11119_v1  ;;  %v3193_v4 = vadd.f32 %v9273_v11, %v9259_v20 }
 0x380   : > { %v3377_v45 = vpop.f32.mrf.mxu0 }
 0x381   : > { %v3628_v60 = vmax.f32 %v3376_v57, 0.0  ;;  %v3378_v9 = vadd.f32 %v3377_v45, %v3185_v51  ;;  %v9670_v54 = vpop.f32.mrf.mxu1  ;;  %v3191_v45 = vadd.f32 %v9267_v24, %v9276_v43  ;;  %v11120_v57 = vsub.s32 1, %v10929_v25 }
 0x382   : > { %11118 = vst [vmem:[#allocation36_spill] sm:$0xff] %v9670_v54  ;;  %v3381_v55 = vpop.f32.mrf.mxu0  ;;  %5236 = vmatmul.mubr.bf16.gmra.mxu0 %v9492_v50  ;;  %v4589_v20 = vadd.f32 %v9285_v62, %v9680_v32  ;;  %v7058_v62 = vld [vmem:[%s10653_s5 + $0x40] sm:$0xff]  }
 0x383   : > { %v9673_v7 = vpack.c.bf16 %v3628_v60, %v3620_v36  ;;  %v3629_v27 = vmax.f32 %v3378_v9, 0.0  ;;  %v9675_v21 = vpop.f32.mrf.mxu1  ;;  %5245 = vmatprep.mubr.bf16.mxu0 %v9531_v3  ;;  %v3382_v50 = vadd.f32 %v3381_v55, %v3189_v18  ;;  %v9692_v36 = vrot.slane %v3902_v34, %v11120_v57  ;;  %6604 = vmatprep.subr.bf16.mxu1 %v7058_v62 }
 0x384   : > { %v3383_v58 = vpop.f32.mrf.mxu0  ;;  %v3195_v60 = vadd.f32 %v9280_v28, %v9276_v43 }
 0x385   : > { %v9686_v51 = vpop.f32.mrf.mxu1  ;;  %v9688_v8 = vpack.c.bf16 %v3629_v27, %v3621_v12  ;;  %v3384_v9 = vadd.f32 %v3383_v58, %v3191_v45  ;;  %v3636_v11 = vmax.f32 %v3382_v50, 0.0  ;;  %v4591_v25 = vadd.f32 %v9294_v14, %v9692_v36  ;;  %v7059_v14 = vld [vmem:[%s10653_s5] sm:$0xff]  }
 0x386   : > { %v3385_v3 = vpop.f32.mrf.mxu0  ;;  %6605 = vmatpush3.bf16.msra.mxu1 %v7059_v14 }
 0x387   : > { %v3386_v1 = vadd.f32 %v3385_v3, %v3193_v4  ;;  %v9696_v54 = vpop.f32.mrf.mxu1  ;;  %v3637_v43 = vmax.f32 %v3384_v9, 0.0 }
 0x388   : > { %v3387_v24 = vpop.f32.mrf.mxu0 }
 0x389   : > { %v3644_v18 = vmax.f32 %v3386_v1, 0.0  ;;  %v3388_v55 = vadd.f32 %v3387_v24, %v3195_v60  ;;  %v9700_v12 = vpop.f32.mrf.mxu1  ;;  %v4595_v60 = vadd.f32 %v9304_v42, %v9692_v36  ;;  %v4599_v24 = vadd.f32 %v9309_v26, %v9680_v32 }
 0x38a   : > { %11121 = vst [vmem:[#allocation50_spill] sm:$0xff] %v9700_v12  ;;  %v4781_v34 = vpop.f32.mrf.mxu0  ;;  %5246 = vmatmul.mubr.bf16.gmra.mxu0 %v9520_v23  ;;  %v4593_v23 = vadd.f32 %v9300_v61, %v9680_v32 }
 0x38b   : > { %v9705_v28 = vpack.c.bf16 %v3644_v18, %v3636_v11  ;;  %v3645_v27 = vmax.f32 %v3388_v55, 0.0  ;;  %v9707_v58 = vadd.f32 %v4781_v34, %v4589_v20  ;;  %v9709_v45 = vpop.f32.mrf.mxu1  ;;  %5255 = vmatprep.mubr.bf16.mxu0 %v9559_v19  ;;  %v4601_v18 = vadd.f32 %v9318_v44, %v9692_v36 }
 0x38c   : > { %v4783_v4 = vpop.f32.mrf.mxu0  ;;  %v4609_v44 = vadd.f32 %v9333_v53, %v9680_v32 }
 0x38d   : > { %v9720_v50 = vadd.f32 %v4783_v4, %v4591_v25  ;;  %v9722_v57 = vpack.c.bf16 %v3645_v27, %v3637_v43  ;;  %v9724_v3 = vpop.f32.mrf.mxu1  ;;  %v4603_v25 = vadd.f32 %v9324_v10, %v9680_v32  ;;  %v4605_v27 = vadd.f32 %v9328_v48, %v9692_v36  ;;  %v11122_v10 = vld [vmem:[#allocation71_spill] sm:$0xff] }
 0x38e   : > { %v4785_v19 = vpop.f32.mrf.mxu0 }
 0x38f   : > { %v9728_v9 = vadd.f32 %v4785_v19, %v4593_v23  ;;  %v9734_v61 = vpop.f32.mrf.mxu1  ;;  %v4611_v23 = vadd.f32 %v11122_v10, %v9692_v36 }
 0x390   : > { %v4787_v1 = vpop.f32.mrf.mxu0 }
 0x391   : > { %v9732_v20 = vadd.f32 %v4787_v1, %v4595_v60  ;;  %v9746_v26 = vpop.f32.mrf.mxu1  ;;  %v4613_v60 = vadd.f32 %v9354_v35, %v9680_v32  ;;  %v11124_v35 = vld [vmem:[#allocation27_spill] sm:$0xff] }
 0x392   : > { %v4791_v11 = vpop.f32.mrf.mxu0  ;;  %5256 = vmatmul.mubr.bf16.gmra.mxu0 %v9542_v6 }
 0x393   : > { %v9739_v55 = vadd.f32 %v4791_v11, %v4599_v24  ;;  %5265 = vmatprep.mubr.bf16.mxu0 %v9581_v39  ;;  %v9756_v39 = vpop.f32.mrf.mxu1  ;;  %v4615_v11 = vadd.f32 %v9358_v41, %v9692_v36 }
 0x394   : > { %v4793_v42 = vpop.f32.mrf.mxu0 }
 0x395   : > { %v9744_v34 = vadd.f32 %v4793_v42, %v4601_v18  ;;  %v9768_v53 = vpop.f32.mrf.mxu1  ;;  %v11123_v42 = vld [vmem:[#allocation26_spill] sm:$0xff] }
 0x396   : > { %v4795_v43 = vpop.f32.mrf.mxu0 }
 0x397   : > { %v9750_v6 = vadd.f32 %v4795_v43, %v4603_v25  ;;  %v4619_v25 = vadd.f32 %v11123_v42, %v9680_v32 }
 0x398   : > { %v4797_v62 = vpop.f32.mrf.mxu0 }
 0x399   : > { %v9754_v14 = vadd.f32 %v4797_v62, %v4605_v27  ;;  %v4621_v62 = vadd.f32 %v11124_v35, %v9692_v36 }
 0x39a   : > { %v4801_v4 = vpop.f32.mrf.mxu0  ;;  %5266 = vmatmul.mubr.bf16.gmra.mxu0 %v9570_v30 }
 0x39b   : > { %v9761_v19 = vadd.f32 %v4801_v4, %v4609_v44  ;;  %5275 = vmatprep.mubr.bf16.mxu0 %v9609_v59  ;;  %v9778_v59 = vpop.f32.mrf.mxu1  ;;  %v4623_v4 = vadd.f32 %v9378_v63, %v9680_v32  ;;  %v11126_v63 = vld [vmem:[#allocation73_spill] sm:$0xff] }
 0x39c   : > { %v4803_v48 = vpop.f32.mrf.mxu0 }
 0x39d   : > { %v9766_v1 = vadd.f32 %v4803_v48, %v4611_v23  ;;  %v9790_v23 = vpop.f32.mrf.mxu1 }
 0x39e   : > { %v4805_v24 = vpop.f32.mrf.mxu0 }
 0x39f   : > { %v9772_v30 = vadd.f32 %v4805_v24, %v4613_v60  ;;  %v4625_v60 = vadd.f32 %v9382_v37, %v9692_v36 }
 0x3a0   : > { %v4807_v18 = vpop.f32.mrf.mxu0 }
 0x3a1   : > { %v9776_v43 = vadd.f32 %v4807_v18, %v4615_v11  ;;  %v11125_v11 = vld [vmem:[#allocation70_spill] sm:$0xff] }
 0x3a2   : > { %v4811_v27 = vpop.f32.mrf.mxu0  ;;  %5276 = vmatmul.mubr.bf16.gmra.mxu0 %v9592_v2  ;;  %v4629_v18 = vadd.f32 %v11125_v11, %v9680_v32 }
 0x3a3   : > { %v9783_v44 = vadd.f32 %v4811_v27, %v4619_v25  ;;  %5285 = vmatprep.mubr.bf16.mxu0 %v9631_v33  ;;  %v9800_v33 = vpop.f32.mrf.mxu1  ;;  %v4631_v27 = vadd.f32 %v11126_v63, %v9692_v36 }
 0x3a4   : > { %v4813_v41 = vpop.f32.mrf.mxu0 }
 0x3a5   : > { %v9788_v10 = vadd.f32 %v4813_v41, %v4621_v62  ;;  %v4633_v62 = vadd.f32 %v9408_v16, %v9680_v32 }
 0x3a6   : > { %v4815_v48 = vpop.f32.mrf.mxu0 }
 0x3a7   : > { %v9794_v2 = vadd.f32 %v4815_v48, %v4623_v4  ;;  %v9812_v4 = vpop.f32.mrf.mxu1 }
 0x3a8   : > { %v4817_v24 = vpop.f32.mrf.mxu0 }
 0x3a9   : > { %v9798_v42 = vadd.f32 %v4817_v24, %v4625_v60 }
 0x3aa   : > { %v4821_v25 = vpop.f32.mrf.mxu0  ;;  %5286 = vmatmul.mubr.bf16.gmra.mxu0 %v9620_v56  ;;  %v11129_v56 = vld [vmem:[#allocation31_spill] sm:$0xff] }
 0x3ab   : > { %v9805_v35 = vadd.f32 %v4821_v25, %v4629_v18  ;;  %5295 = vmatprep.mubr.bf16.mxu0 %v9659_v52  ;;  %v4639_v11 = vadd.f32 %v11129_v56, %v9680_v32  ;;  %v9820_v18 = vpop.f32.mrf.mxu1  ;;  %v11130_v52 = vld [vmem:[#allocation32_spill] sm:$0xff] }
 0x3ac   : > { %v4823_v37 = vpop.f32.mrf.mxu0  ;;  %v4641_v16 = vadd.f32 %v11130_v52, %v9692_v36 }
 0x3ad   : > { %v9810_v41 = vadd.f32 %v4823_v37, %v4631_v27  ;;  %v11132_v37 = vld [vmem:[#allocation35_spill] sm:$0xff]  ;;  %v9832_v12 = vpop.f32.mrf.mxu1 }
 0x3ae   : > { %v4825_v48 = vpop.f32.mrf.mxu0 }
 0x3af   : > { %11127 = vst [vmem:[#allocation64_spill] sm:$0xff] %v9810_v41  ;;  %v9814_v60 = vadd.f32 %v4825_v48, %v4633_v62  ;;  %v4643_v62 = vadd.f32 %v11132_v37, %v9680_v32 }
 0x3b0   : > { %v9816_v24 = vpop.f32.mrf.mxu0 }
 0x3b1   : > { %11128 = vst [vmem:[#allocation33_spill] sm:$0xff] %v9814_v60 }
 0x3b2   : > { %v4831_v25 = vpop.f32.mrf.mxu0  ;;  %5296 = vmatmul.mubr.bf16.gmra.mxu0 %v9642_v15  ;;  %v11136_v15 = vld [vmem:[#allocation78_spill] sm:$0xff] }
 0x3b3   : > { %v9825_v63 = vadd.f32 %v4831_v25, %v4639_v11  ;;  %5305 = vmatprep.mubr.bf16.mxu0 %v9688_v8  ;;  %v4649_v52 = vadd.f32 %v11136_v15, %v9680_v32  ;;  %v9840_v11 = vpop.f32.mrf.mxu1  ;;  %v11137_v8 = vld [vmem:[#allocation59_spill] sm:$0xff] }
 0x3b4   : > { %v4833_v27 = vpop.f32.mrf.mxu0  ;;  %v4651_v37 = vadd.f32 %v11137_v8, %v9692_v36 }
 0x3b5   : > { %11131 = vst [vmem:[#allocation61_spill] sm:$0xff] %v9825_v63  ;;  %v9830_v48 = vadd.f32 %v4833_v27, %v4641_v16 }
 0x3b6   : > { %v4835_v56 = vpop.f32.mrf.mxu0 }
 0x3b7   : > { %11133 = vst [vmem:[#allocation66_spill] sm:$0xff] %v9830_v48  ;;  %v9834_v60 = vadd.f32 %v4835_v56, %v4643_v62  ;;  %v4653_v62 = vadd.f32 %v9462_v17, %v9680_v32  ;;  %v4661_v17 = vadd.f32 %v9479_v49, %v9692_v36 }
 0x3b8   : > { %v9836_v41 = vpop.f32.mrf.mxu0 }
 0x3b9   : > { %11134 = vst [vmem:[#allocation9_spill] sm:$0xff] %v9834_v60  ;;  %11135 = vst [vmem:[#allocation40_spill] sm:$0xff] %v9836_v41  ;;  %v9852_v60 = vpop.f32.mrf.mxu1 }
 0x3ba   : > { %v4841_v25 = vpop.f32.mrf.mxu0  ;;  %5306 = vmatmul.mubr.bf16.gmra.mxu0 %v9673_v7  ;;  %v4659_v7 = vadd.f32 %v9471_v46, %v9680_v32 }
 0x3bb   : > { %v9845_v16 = vadd.f32 %v4841_v25, %v4649_v52  ;;  %5315 = vmatprep.mubr.bf16.mxu0 %v9722_v57  ;;  %v9860_v52 = vpop.f32.mrf.mxu1 }
 0x3bc   : > { %v4843_v27 = vpop.f32.mrf.mxu0 }
 0x3bd   : > { %11138 = vst [vmem:[#allocation49_spill] sm:$0xff] %v9845_v16  ;;  %v9850_v56 = vadd.f32 %v4843_v27, %v4651_v37  ;;  %v11143_v37 = vld [vmem:[#allocation39_spill] sm:$0xff] }
 0x3be   : > { %v4845_v15 = vpop.f32.mrf.mxu0  ;;  %v4663_v27 = vadd.f32 %v11143_v37, %v9680_v32 }
 0x3bf   : > { %11139 = vst [vmem:[#allocation11_spill] sm:$0xff] %v9850_v56  ;;  %v9854_v48 = vadd.f32 %v4845_v15, %v4653_v62  ;;  %v9871_v15 = vpop.f32.mrf.mxu1 }
 0x3c0   : > { %v9856_v41 = vpop.f32.mrf.mxu0 }
 0x3c1   : > { %11140 = vst [vmem:[#allocation10_spill] sm:$0xff] %v9854_v48  ;;  %11141 = vst [vmem:[#allocation13_spill] sm:$0xff] %v9856_v41  ;;  %v9879_v16 = vpop.f32.mrf.mxu1 }
 0x3c2   : > { %v4851_v25 = vpop.f32.mrf.mxu0  ;;  %5316 = vmatmul.mubr.bf16.gmra.mxu0 %v9705_v28  ;;  %v11147_v28 = vld [vmem:[#allocation75_spill] sm:$0xff] }
 0x3c3   : > { %v9865_v57 = vadd.f32 %v4851_v25, %v4659_v7  ;;  %v4669_v41 = vadd.f32 %v11147_v28, %v9680_v32  ;;  %v11148_v7 = vld [vmem:[#allocation79_spill] sm:$0xff] }
 0x3c4   : > { %v4853_v8 = vpop.f32.mrf.mxu0  ;;  %v4671_v25 = vadd.f32 %v11148_v7, %v9692_v36 }
 0x3c5   : > { %11142 = vst [vmem:[#allocation46_spill] sm:$0xff] %v9865_v57  ;;  %v9869_v62 = vadd.f32 %v4853_v8, %v4661_v17  ;;  %v4673_v8 = vadd.f32 %v9513_v40, %v9680_v32 }
 0x3c6   : > { %v4855_v48 = vpop.f32.mrf.mxu0 }
 0x3c7   : > { %11144 = vst [vmem:[#allocation60_spill] sm:$0xff] %v9869_v62  ;;  %v9873_v46 = vadd.f32 %v4855_v48, %v4663_v27  ;;  %v9889_v48 = vpop.f32.mrf.mxu1  ;;  %v11153_v62 = vld [vmem:[#allocation43_spill] sm:$0xff] }
 0x3c8   : > { %v9875_v56 = vpop.f32.mrf.mxu0 }
 0x3c9   : > { %11145 = vst [vmem:[#allocation12_spill] sm:$0xff] %v9873_v46  ;;  %11146 = vst [vmem:[#allocation16_spill] sm:$0xff] %v9875_v56  ;;  %v4679_v56 = vadd.f32 %v11153_v62, %v9680_v32  ;;  %v9897_v63 = vpop.f32.mrf.mxu1 }
 0x3ca   : > { %v4861_v49 = vpop.f32.mrf.mxu0 }
 0x3cb   : > { %v9883_v57 = vadd.f32 %v4861_v49, %v4669_v41  ;;  %v4681_v49 = vadd.f32 %v9529_v22, %v9692_v36 }
 0x3cc   : > { %v4863_v17 = vpop.f32.mrf.mxu0 }
 0x3cd   : > { %11149 = vst [vmem:[#allocation14_spill] sm:$0xff] %v9883_v57  ;;  %v9887_v37 = vadd.f32 %v4863_v17, %v4671_v25  ;;  %v4683_v25 = vadd.f32 %v9535_v5, %v9680_v32 }
 0x3ce   : > { %v4865_v27 = vpop.f32.mrf.mxu0 }
 0x3cf   : > { %11150 = vst [vmem:[#allocation19_spill] sm:$0xff] %v9887_v37  ;;  %v9891_v46 = vadd.f32 %v4865_v27, %v4673_v8  ;;  %v9907_v8 = vpop.f32.mrf.mxu1  ;;  %v11159_v37 = vld [vmem:[#allocation42_spill] sm:$0xff] }
 0x3d0   : > { %v9893_v28 = vpop.f32.mrf.mxu0  ;;  %11156 = vst [vmem:[#allocation76_spill] sm:$0xff] %v9907_v8 }
 0x3d1   : > { %11151 = vst [vmem:[#allocation47_spill] sm:$0xff] %v9891_v46  ;;  %11152 = vst [vmem:[#allocation15_spill] sm:$0xff] %v9893_v28  ;;  %v4689_v28 = vadd.f32 %v11159_v37, %v9680_v32  ;;  %v9915_v57 = vpop.f32.mrf.mxu1 }
 0x3d2   : > { %v4871_v41 = vpop.f32.mrf.mxu0  ;;  %11160 = vst [vmem:[#allocation77_spill] sm:$0xff] %v9915_v57 }
 0x3d3   : > { %v9901_v7 = vadd.f32 %v4871_v41, %v4679_v56  ;;  %v11161_v56 = vld [vmem:[#allocation18_spill] sm:$0xff] }
 0x3d4   : > { %v4873_v40 = vpop.f32.mrf.mxu0  ;;  %v4691_v41 = vadd.f32 %v11161_v56, %v9692_v36 }
 0x3d5   : > { %11154 = vst [vmem:[#allocation24_spill] sm:$0xff] %v9901_v7  ;;  %v9905_v17 = vadd.f32 %v4873_v40, %v4681_v49  ;;  %v11163_v49 = vld [vmem:[#allocation17_spill] sm:$0xff] }
 0x3d6   : > { %v4875_v27 = vpop.f32.mrf.mxu0  ;;  %v4693_v40 = vadd.f32 %v11163_v49, %v9680_v32 }
 0x3d7   : > { %11155 = vst [vmem:[#allocation74_spill] sm:$0xff] %v9905_v17  ;;  %v9909_v46 = vadd.f32 %v4875_v27, %v4683_v25  ;;  %v9925_v25 = vpop.f32.mrf.mxu1 }
 0x3d8   : > { %v9911_v62 = vpop.f32.mrf.mxu0  ;;  %11165 = vst [vmem:[#allocation54_spill] sm:$0xff] %v9925_v25 }
 0x3d9   : > { %11157 = vst [vmem:[#allocation55_spill] sm:$0xff] %v9909_v46  ;;  %11158 = vst [vmem:[#allocation52_spill] sm:$0xff] %v9911_v62  ;;  %v11168_v62 = vld [vmem:[#allocation80_spill] sm:$0xff]  ;;  %v9933_v8 = vpop.f32.mrf.mxu1 }
 0x3da   : > { %v4881_v22 = vpop.f32.mrf.mxu0  ;;  %v4699_v57 = vadd.f32 %v11168_v62, %v9680_v32  ;;  %11169 = vst [vmem:[#allocation45_spill] sm:$0xff] %v9933_v8 }
 0x3db   : > { %v9919_v7 = vadd.f32 %v4881_v22, %v4689_v28  ;;  %v11170_v22 = vld [vmem:[#allocation38_spill] sm:$0xff] }
 0x3dc   : > { %v4883_v5 = vpop.f32.mrf.mxu0  ;;  %v4701_v56 = vadd.f32 %v11170_v22, %v9692_v36 }
 0x3dd   : > { %11162 = vst [vmem:[#allocation67_spill] sm:$0xff] %v9919_v7  ;;  %v9923_v17 = vadd.f32 %v4883_v5, %v4691_v41  ;;  %v11172_v5 = vld [vmem:[#allocation63_spill] sm:$0xff] }
 0x3de   : > { %v4885_v27 = vpop.f32.mrf.mxu0  ;;  %v4703_v49 = vadd.f32 %v11172_v5, %v9680_v32 }
 0x3df   : > { %11164 = vst [vmem:[#allocation51_spill] sm:$0xff] %v9923_v17  ;;  %v9927_v46 = vadd.f32 %v4885_v27, %v4693_v40  ;;  %v9943_v40 = vpop.f32.mrf.mxu1 }
 0x3e0   : > { %v9929_v37 = vpop.f32.mrf.mxu0 }
 0x3e1   : > { %11166 = vst [vmem:[#allocation53_spill] sm:$0xff] %v9927_v46  ;;  %11167 = vst [vmem:[#allocation57_spill] sm:$0xff] %v9929_v37  ;;  %v11176_v37 = vld [vmem:[#allocation23_spill] sm:$0xff]  ;;  %v9951_v25 = vpop.f32.mrf.mxu1 }
 0x3e2   : > { %v4891_v28 = vpop.f32.mrf.mxu0  ;;  %v4709_v8 = vadd.f32 %v11176_v37, %v9680_v32 }
 0x3e3   : > { %v9937_v7 = vadd.f32 %v4891_v28, %v4699_v57  ;;  %v11177_v28 = vld [vmem:[#allocation30_spill] sm:$0xff] }
 0x3e4   : > { %v4893_v41 = vpop.f32.mrf.mxu0  ;;  %v4711_v22 = vadd.f32 %v11177_v28, %v9692_v36 }
 0x3e5   : > { %11171 = vst [vmem:[#allocation20_spill] sm:$0xff] %v9937_v7  ;;  %v9941_v17 = vadd.f32 %v4893_v41, %v4701_v56  ;;  %v4713_v41 = vadd.f32 %v9613_v0, %v9680_v32 }
 0x3e6   : > { %v4895_v27 = vpop.f32.mrf.mxu0 }
 0x3e7   : > { %11173 = vst [vmem:[#allocation22_spill] sm:$0xff] %v9941_v17  ;;  %v9945_v46 = vadd.f32 %v4895_v27, %v4703_v49  ;;  %v9961_v49 = vpop.f32.mrf.mxu1  ;;  %v4719_v17 = vadd.f32 %v9622_v38, %v9680_v32 }
 0x3e8   : > { %v9947_v62 = vpop.f32.mrf.mxu0 }
 0x3e9   : > { %11174 = vst [vmem:[#allocation81_spill] sm:$0xff] %v9945_v46  ;;  %11175 = vst [vmem:[#allocation56_spill] sm:$0xff] %v9947_v62  ;;  %v9969_v62 = vpop.f32.mrf.mxu1 }
 0x3ea   : > { %v4901_v57 = vpop.f32.mrf.mxu0 }
 0x3eb   : > { %v9955_v7 = vadd.f32 %v4901_v57, %v4709_v8  ;;  %v4721_v57 = vadd.f32 %v9629_v29, %v9692_v36 }
 0x3ec   : > { %v4903_v56 = vpop.f32.mrf.mxu0 }
 0x3ed   : > { %11178 = vst [vmem:[#allocation69_spill] sm:$0xff] %v9955_v7  ;;  %v9959_v5 = vadd.f32 %v4903_v56, %v4711_v22  ;;  %v4723_v22 = vadd.f32 %v9635_v47, %v9680_v32 }
 0x3ee   : > { %v4905_v27 = vpop.f32.mrf.mxu0 }
 0x3ef   : > { %11179 = vst [vmem:[#allocation34_spill] sm:$0xff] %v9959_v5  ;;  %v9963_v46 = vadd.f32 %v4905_v27, %v4713_v41  ;;  %v9979_v41 = vpop.f32.mrf.mxu1  ;;  %v11185_v5 = vld [vmem:[#allocation28_spill] sm:$0xff] }
 0x3f0   : > { %v9965_v37 = vpop.f32.mrf.mxu0 }
 0x3f1   : > { %11180 = vst [vmem:[#allocation21_spill] sm:$0xff] %v9963_v46  ;;  %11181 = vst [vmem:[#allocation25_spill] sm:$0xff] %v9965_v37  ;;  %v4729_v37 = vadd.f32 %v11185_v5, %v9680_v32  ;;  %v9987_v7 = vpop.f32.mrf.mxu1 }
 0x3f2   : > { %v4911_v8 = vpop.f32.mrf.mxu0 }
 0x3f3   : > { %v9973_v28 = vadd.f32 %v4911_v8, %v4719_v17  ;;  %v4731_v17 = vadd.f32 %v9657_v13, %v9692_v36 }
 0x3f4   : > { %v4913_v0 = vpop.f32.mrf.mxu0 }
 0x3f5   : > { %v9977_v56 = vadd.f32 %v4913_v0, %v4721_v57  ;;  %v4733_v57 = vadd.f32 %v9663_v31, %v9680_v32 }
 0x3f6   : > { %v4915_v27 = vpop.f32.mrf.mxu0 }
 0x3f7   : > { %11182 = vst [vmem:[#allocation68_spill] sm:$0xff] %v9977_v56  ;;  %v9981_v46 = vadd.f32 %v4915_v27, %v4723_v22  ;;  %v9997_v22 = vpop.f32.mrf.mxu1  ;;  %v4739_v56 = vadd.f32 %v9675_v21, %v9680_v32 }
 0x3f8   : > { %v9983_v38 = vpop.f32.mrf.mxu0 }
 0x3f9   : > { %11183 = vst [vmem:[#allocation71_spill] sm:$0xff] %v9981_v46  ;;  %11184 = vst [vmem:[#allocation26_spill] sm:$0xff] %v9983_v38  ;;  %v10005_v38 = vpop.f32.mrf.mxu1 }
 0x3fa   : > { %v4921_v29 = vpop.f32.mrf.mxu0 }
 0x3fb   : > { %v9991_v8 = vadd.f32 %v4921_v29, %v4729_v37  ;;  %v4741_v37 = vadd.f32 %v9686_v51, %v9692_v36  ;;  %v4975_v51 = vadd.f32 %v9709_v45, %v9707_v58 }
 0x3fc   : > { %v4923_v47 = vpop.f32.mrf.mxu0 }
 0x3fd   : > { %11186 = vst [vmem:[#allocation27_spill] sm:$0xff] %v9991_v8  ;;  %v9995_v0 = vadd.f32 %v4923_v47, %v4731_v17  ;;  %v4743_v17 = vadd.f32 %v9696_v54, %v9680_v32  ;;  %v4979_v54 = vadd.f32 %v9734_v61, %v9728_v9 }
 0x3fe   : > { %v4925_v27 = vpop.f32.mrf.mxu0 }
 0x3ff   : > { %11187 = vst [vmem:[#allocation70_spill] sm:$0xff] %v9995_v0  ;;  %v9999_v46 = vadd.f32 %v4925_v27, %v4733_v57  ;;  %v10015_v57 = vpop.f32.mrf.mxu1 }
 0x400   : > { %v10001_v5 = vpop.f32.mrf.mxu0 }
 0x401   : > { %11188 = vst [vmem:[#allocation73_spill] sm:$0xff] %v9999_v46  ;;  %11189 = vst [vmem:[#allocation31_spill] sm:$0xff] %v10001_v5  ;;  %v10021_v0 = vpop.f32.mrf.mxu1 }
 0x402   : > { %v4931_v13 = vpop.f32.mrf.mxu0 }
 0x403   : > { %v10009_v29 = vadd.f32 %v4931_v13, %v4739_v56  ;;  %v4977_v13 = vadd.f32 %v9724_v3, %v9720_v50  ;;  %v4985_v50 = vadd.f32 %v9756_v39, %v9739_v55 }
 0x404   : > { %v4933_v31 = vpop.f32.mrf.mxu0 }
 0x405   : > { %11190 = vst [vmem:[#allocation32_spill] sm:$0xff] %v10009_v29  ;;  %v10013_v47 = vadd.f32 %v4933_v31, %v4741_v37  ;;  %v10029_v37 = vpop.f32.mrf.mxu1 }
 0x406   : > { %v4935_v27 = vpop.f32.mrf.mxu0 }
 0x407   : > { %11191 = vst [vmem:[#allocation35_spill] sm:$0xff] %v10013_v47  ;;  %v10017_v46 = vadd.f32 %v4935_v27, %v4743_v17  ;;  %v4981_v17 = vadd.f32 %v9746_v26, %v9732_v20  ;;  %v10033_v45 = vpop.f32.mrf.mxu1  ;;  %v4989_v20 = vadd.f32 %v9778_v59, %v9750_v6  ;;  %v4995_v6 = vadd.f32 %v9800_v33, %v9761_v19 }
 0x408   : > { %v10019_v21 = vpop.f32.mrf.mxu0 }
 0x409   : > { %11192 = vst [vmem:[#allocation78_spill] sm:$0xff] %v10017_v46  ;;  %11193 = vst [vmem:[#allocation59_spill] sm:$0xff] %v10019_v21 }
 0x40a   : > { %v5167_v5 = vpop.f32.mrf.mxu0 }
 0x40b   : > { %v5168_v32 = vadd.f32 %v5167_v5, %v4975_v51  ;;  %v4987_v51 = vadd.f32 %v9768_v53, %v9744_v34 }
 0x40c   : > { %v5169_v56 = vpop.f32.mrf.mxu0 }
 0x40d   : > { %v5170_v27 = vadd.f32 %v5169_v56, %v4977_v13  ;;  %v5326_v21 = vmax.f32 %v5168_v32, 0.0  ;;  %v4991_v13 = vadd.f32 %v9790_v23, %v9754_v14  ;;  %v4997_v14 = vadd.f32 %v9812_v4, %v9766_v1 }
 0x40e   : > { %v5171_v31 = vpop.f32.mrf.mxu0  ;;  %v4999_v23 = vadd.f32 %v9820_v18, %v9772_v30  ;;  %v5005_v30 = vadd.f32 %v9840_v11, %v9783_v44 }
 0x40f   : > { %v5172_v46 = vadd.f32 %v5171_v31, %v4979_v54  ;;  %v5327_v3 = vmax.f32 %v5170_v27, 0.0 }
 0x410   : > { %v5173_v47 = vpop.f32.mrf.mxu0 }
 0x411   : > { %v5328_v29 = vmax.f32 %v5172_v46, 0.0  ;;  %v5174_v58 = vadd.f32 %v5173_v47, %v4981_v17  ;;  %v10041_v46 = vpop.f32.mrf.mxu1 }
 0x412   : > { %v5177_v8 = vpop.f32.mrf.mxu0 }
 0x413   : > { %v5390_v9 = vpack.c.bf16 %v5328_v29, %v5326_v21  ;;  %v5329_v61 = vmax.f32 %v5174_v58, 0.0  ;;  %v5178_v56 = vadd.f32 %v5177_v8, %v4985_v50  ;;  %v10045_v34 = vpop.f32.mrf.mxu1 }
 0x414   : > { %v5179_v5 = vpop.f32.mrf.mxu0 }
 0x415   : > { %v5391_v26 = vpack.c.bf16 %v5329_v61, %v5327_v3  ;;  %v5180_v54 = vadd.f32 %v5179_v5, %v4987_v51  ;;  %v5330_v29 = vmax.f32 %v5178_v56, 0.0  ;;  %v10053_v50 = vpop.f32.mrf.mxu1 }
 0x416   : > { %v5181_v47 = vpop.f32.mrf.mxu0 }
 0x417   : > { %v5182_v55 = vadd.f32 %v5181_v47, %v4989_v20  ;;  %5589 = vmatprep.mubr.bf16.mxu1 %v5391_v26  ;;  %v5331_v59 = vmax.f32 %v5180_v54, 0.0  ;;  %v10057_v1 = vpop.f32.mrf.mxu1 }
 0x418   : > { %v5183_v39 = vpop.f32.mrf.mxu0  ;;  %5590 = vmatmul.mubr.bf16.vlgmr.msra.gmra.mxu1 %v5390_v9  ;;  %v5001_v9 = vadd.f32 %v9832_v12, %v9776_v43  ;;  %v5007_v12 = vadd.f32 %v9852_v60, %v9788_v10  ;;  %v5009_v43 = vadd.f32 %v9860_v52, %v9794_v2  ;;  %v5015_v2 = vadd.f32 %v9879_v16, %v9805_v35  ;;  %v11197_v16 = vld [vmem:[#allocation76_spill] sm:$0xff] }
 0x419   : > { %v5332_v21 = vmax.f32 %v5182_v55, 0.0  ;;  %v5184_v32 = vadd.f32 %v5183_v39, %v4991_v13  ;;  %v10065_v55 = vpop.f32.mrf.mxu1 }
 0x41a   : > { %v5187_v53 = vpop.f32.mrf.mxu0 }
 0x41b   : > { %v5392_v8 = vpack.c.bf16 %v5332_v21, %v5330_v29  ;;  %v5333_v31 = vmax.f32 %v5184_v32, 0.0  ;;  %v5188_v58 = vadd.f32 %v5187_v53, %v4995_v6  ;;  %v5011_v29 = vadd.f32 %v9871_v15, %v9798_v42  ;;  %v11194_v32 = vld [vmem:[#allocation29_spill] sm:$0xff]  ;;  %v10073_v52 = vpop.f32.mrf.mxu1 }
 0x41c   : > { %v5189_v17 = vpop.f32.mrf.mxu0  ;;  %v4635_v53 = vadd.f32 %v11194_v32, %v9692_v36  ;;  %v11204_v32 = vld [vmem:[#allocation9_spill] sm:$0xff] }
 0x41d   : > { %v5393_v27 = vpack.c.bf16 %v5333_v31, %v5331_v59  ;;  %v5190_v61 = vadd.f32 %v5189_v17, %v4997_v14  ;;  %v5334_v5 = vmax.f32 %v5188_v58, 0.0  ;;  %v11195_v14 = vld [vmem:[#allocation64_spill] sm:$0xff] }
 0x41e   : > { %v5191_v3 = vpop.f32.mrf.mxu0 }
 0x41f   : > { %v5192_v19 = vadd.f32 %v5191_v3, %v4999_v23  ;;  %5597 = vmatprep.mubr.bf16.mxu1 %v5393_v27  ;;  %v5335_v18 = vmax.f32 %v5190_v61, 0.0  ;;  %v5017_v23 = vadd.f32 %v9889_v48, %v11195_v14  ;;  %v11196_v27 = vld [vmem:[#allocation33_spill] sm:$0xff]  ;;  %v10080_v61 = vpop.f32.mrf.mxu1 }
 0x420   : > { %v5193_v33 = vpop.f32.mrf.mxu0  ;;  %5598 = vmatmul.mubr.bf16.gmra.mxu1 %v5392_v8  ;;  %v4828_v8 = vadd.f32 %v9816_v24, %v4635_v53  ;;  %v5019_v58 = vadd.f32 %v9897_v63, %v11196_v27  ;;  %v11200_v63 = vld [vmem:[#allocation77_spill] sm:$0xff] }
 0x421   : > { %v5336_v51 = vmax.f32 %v5192_v19, 0.0  ;;  %v5194_v20 = vadd.f32 %v5193_v33, %v5001_v9  ;;  %v11205_v53 = vld [vmem:[#allocation45_spill] sm:$0xff] }
 0x422   : > { %v5197_v4 = vpop.f32.mrf.mxu0  ;;  %v5021_v19 = vadd.f32 %v11197_v16, %v4828_v8 }
 0x423   : > { %v5394_v26 = vpack.c.bf16 %v5336_v51, %v5334_v5  ;;  %v5337_v56 = vmax.f32 %v5194_v20, 0.0  ;;  %v5198_v54 = vadd.f32 %v5197_v4, %v5005_v30  ;;  %v11198_v51 = vld [vmem:[#allocation72_spill] sm:$0xff] }
 0x424   : > { %v5199_v47 = vpop.f32.mrf.mxu0  ;;  %v4645_v20 = vadd.f32 %v11198_v51, %v9692_v36 }
 0x425   : > { %v5395_v13 = vpack.c.bf16 %v5337_v56, %v5335_v18  ;;  %v5200_v21 = vadd.f32 %v5199_v47, %v5007_v12  ;;  %v5338_v10 = vmax.f32 %v5198_v54, 0.0  ;;  %v11199_v18 = vld [vmem:[#allocation61_spill] sm:$0xff]  ;;  %v10087_v56 = vpop.f32.mrf.mxu1  ;;  %v11201_v12 = vld [vmem:[#allocation40_spill] sm:$0xff] }
 0x426   : > { %v5201_v39 = vpop.f32.mrf.mxu0 }
 0x427   : > { %v5202_v44 = vadd.f32 %v5201_v39, %v5009_v43  ;;  %5605 = vmatprep.mubr.bf16.mxu1 %v5395_v13  ;;  %v5339_v42 = vmax.f32 %v5200_v21, 0.0  ;;  %v4838_v43 = vadd.f32 %v11201_v12, %v4645_v20  ;;  %v11202_v21 = vld [vmem:[#allocation66_spill] sm:$0xff]  ;;  %v11209_v20 = vld [vmem:[#allocation11_spill] sm:$0xff] }
 0x428   : > { %v5203_v11 = vpop.f32.mrf.mxu0  ;;  %5606 = vmatmul.mubr.bf16.gmra.mxu1 %v5394_v26  ;;  %v5025_v26 = vadd.f32 %v11200_v63, %v11199_v18 }
 0x429   : > { %v5340_v60 = vmax.f32 %v5202_v44, 0.0  ;;  %v5204_v6 = vadd.f32 %v5203_v11, %v5011_v29  ;;  %v11203_v44 = vld [vmem:[#allocation54_spill] sm:$0xff]  ;;  %v5031_v8 = vadd.f32 %v9943_v40, %v4838_v43 }
 0x42a   : > { %v5207_v59 = vpop.f32.mrf.mxu0  ;;  %v5027_v11 = vadd.f32 %v11203_v44, %v11202_v21  ;;  %v11212_v44 = vld [vmem:[#allocation46_spill] sm:$0xff] }
 0x42b   : > { %v5396_v15 = vpack.c.bf16 %v5340_v60, %v5338_v10  ;;  %v5341_v31 = vmax.f32 %v5204_v6, 0.0  ;;  %v5208_v9 = vadd.f32 %v5207_v59, %v5015_v2  ;;  %v5029_v10 = vadd.f32 %v11205_v53, %v11204_v32  ;;  %v10094_v2 = vpop.f32.mrf.mxu1  ;;  %v11213_v53 = vld [vmem:[#allocation16_spill] sm:$0xff] }
 0x42c   : > { %v5209_v17 = vpop.f32.mrf.mxu0 }
 0x42d   : > { %v5397_v3 = vpack.c.bf16 %v5341_v31, %v5339_v42  ;;  %v5210_v33 = vadd.f32 %v5209_v17, %v5017_v23  ;;  %v5342_v4 = vmax.f32 %v5208_v9, 0.0  ;;  %v11206_v17 = vld [vmem:[#allocation37_spill] sm:$0xff] }
 0x42e   : > { %v5211_v35 = vpop.f32.mrf.mxu0  ;;  %v4655_v14 = vadd.f32 %v11206_v17, %v9692_v36 }
 0x42f   : > { %v5212_v5 = vadd.f32 %v5211_v35, %v5019_v58  ;;  %5613 = vmatprep.mubr.bf16.mxu1 %v5397_v3  ;;  %v5343_v13 = vmax.f32 %v5210_v33, 0.0  ;;  %v11207_v3 = vld [vmem:[#allocation49_spill] sm:$0xff]  ;;  %v10101_v35 = vpop.f32.mrf.mxu1 }
 0x430   : > { %v5213_v24 = vpop.f32.mrf.mxu0  ;;  %5614 = vmatmul.mubr.bf16.gmra.mxu1 %v5396_v15  ;;  %v5035_v9 = vadd.f32 %v9951_v25, %v11207_v3 }
 0x431   : > { %v5344_v48 = vmax.f32 %v5212_v5, 0.0  ;;  %v5214_v30 = vadd.f32 %v5213_v24, %v5021_v19  ;;  %v11208_v19 = vld [vmem:[#allocation13_spill] sm:$0xff] }
 0x432   : > { %v5217_v47 = vpop.f32.mrf.mxu0  ;;  %v4848_v33 = vadd.f32 %v11208_v19, %v4655_v14 }
 0x433   : > { %v5398_v54 = vpack.c.bf16 %v5344_v48, %v5342_v4  ;;  %v5345_v39 = vmax.f32 %v5214_v30, 0.0  ;;  %v5218_v6 = vadd.f32 %v5217_v47, %v5025_v26  ;;  %v5037_v4 = vadd.f32 %v9961_v49, %v11209_v20  ;;  %v11210_v48 = vld [vmem:[#allocation10_spill] sm:$0xff]  ;;  %v10108_v26 = vpop.f32.mrf.mxu1  ;;  %v11218_v20 = vld [vmem:[#allocation15_spill] sm:$0xff] }
 0x434   : > { %v5219_v29 = vpop.f32.mrf.mxu0  ;;  %v5039_v30 = vadd.f32 %v9969_v62, %v11210_v48  ;;  %v5041_v47 = vadd.f32 %v9979_v41, %v4848_v33  ;;  %v5045_v62 = vadd.f32 %v9987_v7, %v11212_v44  ;;  %v11221_v44 = vld [vmem:[#allocation44_spill] sm:$0xff] }
 0x435   : > { %v5399_v60 = vpack.c.bf16 %v5345_v39, %v5343_v13  ;;  %v5220_v42 = vadd.f32 %v5219_v29, %v5027_v11  ;;  %v5346_v23 = vmax.f32 %v5218_v6, 0.0  ;;  %v10115_v11 = vpop.f32.mrf.mxu1 }
 0x436   : > { %v5221_v59 = vpop.f32.mrf.mxu0 }
 0x437   : > { %v5222_v15 = vadd.f32 %v5221_v59, %v5029_v10  ;;  %5621 = vmatprep.mubr.bf16.mxu1 %v5399_v60  ;;  %v5347_v40 = vmax.f32 %v5220_v42, 0.0 }
 0x438   : > { %v5223_v31 = vpop.f32.mrf.mxu0  ;;  %5622 = vmatmul.mubr.bf16.gmra.mxu1 %v5398_v54  ;;  %v11211_v54 = vld [vmem:[#allocation82_spill] sm:$0xff] }
 0x439   : > { %v5348_v27 = vmax.f32 %v5222_v15, 0.0  ;;  %v5224_v58 = vadd.f32 %v5223_v31, %v5031_v8  ;;  %v4665_v39 = vadd.f32 %v11211_v54, %v9692_v36  ;;  %v11214_v8 = vld [vmem:[#allocation60_spill] sm:$0xff] }
 0x43a   : > { %v5227_v16 = vpop.f32.mrf.mxu0  ;;  %v5047_v42 = vadd.f32 %v9997_v22, %v11214_v8  ;;  %v11215_v15 = vld [vmem:[#allocation12_spill] sm:$0xff] }
 0x43b   : > { %v5400_v5 = vpack.c.bf16 %v5348_v27, %v5346_v23  ;;  %v5349_v24 = vmax.f32 %v5224_v58, 0.0  ;;  %v5228_v63 = vadd.f32 %v5227_v16, %v5035_v9  ;;  %v4858_v10 = vadd.f32 %v11213_v53, %v4665_v39  ;;  %v10122_v23 = vpop.f32.mrf.mxu1  ;;  %v11216_v16 = vld [vmem:[#allocation58_spill] sm:$0xff] }
 0x43c   : > { %v5229_v51 = vpop.f32.mrf.mxu0  ;;  %v5049_v31 = vadd.f32 %v10005_v38, %v11215_v15  ;;  %v4675_v19 = vadd.f32 %v11216_v16, %v9692_v36 }
 0x43d   : > { %v5401_v18 = vpack.c.bf16 %v5349_v24, %v5347_v40  ;;  %v5230_v12 = vadd.f32 %v5229_v51, %v5037_v4  ;;  %v5350_v29 = vmax.f32 %v5228_v63, 0.0  ;;  %v5051_v27 = vadd.f32 %v10015_v57, %v4858_v10  ;;  %v10129_v24 = vpop.f32.mrf.mxu1  ;;  %v11219_v63 = vld [vmem:[#allocation19_spill] sm:$0xff]  ;;  %v11222_v10 = vld [vmem:[#allocation24_spill] sm:$0xff] }
 0x43e   : > { %v5231_v25 = vpop.f32.mrf.mxu0  ;;  %v4868_v4 = vadd.f32 %v11218_v20, %v4675_v19 }
 0x43f   : > { %v5232_v43 = vadd.f32 %v5231_v25, %v5039_v30  ;;  %5629 = vmatprep.mubr.bf16.mxu1 %v5401_v18  ;;  %v5351_v41 = vmax.f32 %v5230_v12, 0.0  ;;  %v5057_v25 = vadd.f32 %v10029_v37, %v11219_v63  ;;  %v10136_v54 = vpop.f32.mrf.mxu1 }
 0x440   : > { %v5233_v13 = vpop.f32.mrf.mxu0  ;;  %5630 = vmatmul.mubr.bf16.gmra.mxu1 %v5400_v5  ;;  %v11217_v5 = vld [vmem:[#allocation14_spill] sm:$0xff]  ;;  %v5061_v39 = vadd.f32 %v10041_v46, %v4868_v4 }
 0x441   : > { %v5352_v49 = vmax.f32 %v5232_v43, 0.0  ;;  %v5234_v21 = vadd.f32 %v5233_v13, %v5041_v47  ;;  %v5055_v38 = vadd.f32 %v10021_v0, %v11217_v5  ;;  %v11220_v47 = vld [vmem:[#allocation47_spill] sm:$0xff] }
 0x442   : > { %v5237_v32 = vpop.f32.mrf.mxu0  ;;  %v5059_v12 = vadd.f32 %v10033_v45, %v11220_v47  ;;  %v5065_v45 = vadd.f32 %v10045_v34, %v11222_v10  ;;  %v11232_v10 = vld [vmem:[#allocation20_spill] sm:$0xff] }
 0x443   : > { %v5402_v60 = vpack.c.bf16 %v5352_v49, %v5350_v29  ;;  %v5353_v6 = vmax.f32 %v5234_v21, 0.0  ;;  %v5238_v14 = vadd.f32 %v5237_v32, %v5045_v62  ;;  %v4685_v62 = vadd.f32 %v11221_v44, %v9692_v36 }
 0x444   : > { %v5239_v59 = vpop.f32.mrf.mxu0 }
 0x445   : > { %v5403_v17 = vpack.c.bf16 %v5353_v6, %v5351_v41  ;;  %v5240_v58 = vadd.f32 %v5239_v59, %v5047_v42  ;;  %v5354_v33 = vmax.f32 %v5238_v14, 0.0  ;;  %v10143_v41 = vpop.f32.mrf.mxu1  ;;  %v11223_v6 = vld [vmem:[#allocation52_spill] sm:$0xff]  ;;  %v11225_v14 = vld [vmem:[#allocation55_spill] sm:$0xff] }
 0x446   : > { %v5241_v7 = vpop.f32.mrf.mxu0  ;;  %v4878_v59 = vadd.f32 %v11223_v6, %v4685_v62  ;;  %v11231_v62 = vld [vmem:[#allocation48_spill] sm:$0xff] }
 0x447   : > { %v5242_v3 = vadd.f32 %v5241_v7, %v5049_v31  ;;  %5637 = vmatprep.mubr.bf16.mxu1 %v5403_v17  ;;  %v5355_v57 = vmax.f32 %v5240_v58, 0.0  ;;  %v11224_v31 = vld [vmem:[#allocation74_spill] sm:$0xff]  ;;  %v5069_v7 = vadd.f32 %v10057_v1, %v11225_v14  ;;  %v11233_v6 = vld [vmem:[#allocation56_spill] sm:$0xff] }
 0x448   : > { %v5243_v9 = vpop.f32.mrf.mxu0  ;;  %5638 = vmatmul.mubr.bf16.gmra.mxu1 %v5402_v60  ;;  %v5067_v17 = vadd.f32 %v10053_v50, %v11224_v31 }
 0x449   : > { %v5356_v22 = vmax.f32 %v5242_v3, 0.0  ;;  %v5244_v40 = vadd.f32 %v5243_v9, %v5051_v27  ;;  %v10150_v3 = vpop.f32.mrf.mxu1  ;;  %v5071_v9 = vadd.f32 %v10065_v55, %v4878_v59 }
 0x44a   : > { %v5247_v51 = vpop.f32.mrf.mxu0 }
 0x44b   : > { %v5404_v48 = vpack.c.bf16 %v5356_v22, %v5354_v33  ;;  %v5357_v30 = vmax.f32 %v5244_v40, 0.0  ;;  %v5248_v13 = vadd.f32 %v5247_v51, %v5055_v38  ;;  %v11226_v22 = vld [vmem:[#allocation41_spill] sm:$0xff]  ;;  %v11227_v51 = vld [vmem:[#allocation67_spill] sm:$0xff]  ;;  %v10157_v20 = vpop.f32.mrf.mxu1 }
 0x44c   : > { %v5249_v18 = vpop.f32.mrf.mxu0  ;;  %v4695_v40 = vadd.f32 %v11226_v22, %v9692_v36  ;;  %v5075_v1 = vadd.f32 %v10073_v52, %v11227_v51 }
 0x44d   : > { %v5405_v43 = vpack.c.bf16 %v5357_v30, %v5355_v57  ;;  %v5250_v29 = vadd.f32 %v5249_v18, %v5057_v25  ;;  %v5358_v32 = vmax.f32 %v5248_v13, 0.0  ;;  %v11228_v57 = vld [vmem:[#allocation57_spill] sm:$0xff]  ;;  %v11229_v25 = vld [vmem:[#allocation51_spill] sm:$0xff] }
 0x44e   : > { %v5251_v0 = vpop.f32.mrf.mxu0  ;;  %v5077_v47 = vadd.f32 %v10080_v61, %v11229_v25 }
 0x44f   : > { %v5252_v49 = vadd.f32 %v5251_v0, %v5059_v12  ;;  %5645 = vmatprep.mubr.bf16.mxu1 %v5405_v43  ;;  %v5359_v46 = vmax.f32 %v5250_v29, 0.0  ;;  %v11230_v12 = vld [vmem:[#allocation53_spill] sm:$0xff] }
 0x450   : > { %v5253_v21 = vpop.f32.mrf.mxu0  ;;  %5646 = vmatmul.mubr.bf16.gmra.mxu1 %v5404_v48  ;;  %v4888_v48 = vadd.f32 %v11228_v57, %v4695_v40  ;;  %v5079_v43 = vadd.f32 %v10087_v56, %v11230_v12  ;;  %v5085_v56 = vadd.f32 %v10101_v35, %v11232_v10 }
 0x451   : > { %v5360_v37 = vmax.f32 %v5252_v49, 0.0  ;;  %v5254_v53 = vadd.f32 %v5253_v21, %v5061_v39  ;;  %v10164_v39 = vpop.f32.mrf.mxu1 }
 0x452   : > { %v5257_v60 = vpop.f32.mrf.mxu0  ;;  %v5081_v29 = vadd.f32 %v10094_v2, %v4888_v48 }
 0x453   : > { %v5406_v8 = vpack.c.bf16 %v5360_v37, %v5358_v32  ;;  %v5361_v42 = vmax.f32 %v5254_v53, 0.0  ;;  %v5258_v58 = vadd.f32 %v5257_v60, %v5065_v45  ;;  %v4705_v32 = vadd.f32 %v11231_v62, %v9692_v36  ;;  %v5108_v45 = vpop.f32.mrf.mxu1 }
 0x454   : > { %v5259_v15 = vpop.f32.mrf.mxu0 }
 0x455   : > { %v5407_v27 = vpack.c.bf16 %v5361_v42, %v5359_v46  ;;  %v5260_v16 = vadd.f32 %v5259_v15, %v5067_v17  ;;  %v5362_v5 = vmax.f32 %v5258_v58, 0.0  ;;  %v4898_v59 = vadd.f32 %v11233_v6, %v4705_v32  ;;  %v11234_v15 = vld [vmem:[#allocation22_spill] sm:$0xff]  ;;  %v11235_v17 = vld [vmem:[#allocation81_spill] sm:$0xff]  ;;  %v5110_v58 = vpop.f32.mrf.mxu1  ;;  %v11243_v6 = vld [vmem:[#allocation68_spill] sm:$0xff] }
 0x456   : > { %v5261_v34 = vpop.f32.mrf.mxu0  ;;  %v5087_v31 = vadd.f32 %v10108_v26, %v11234_v15  ;;  %v5089_v14 = vadd.f32 %v10115_v11, %v11235_v17 }
 0x457   : > { %v5262_v19 = vadd.f32 %v5261_v34, %v5069_v7  ;;  %5653 = vmatprep.mubr.bf16.mxu1 %v5407_v27  ;;  %v5363_v55 = vmax.f32 %v5260_v16, 0.0  ;;  %v5091_v35 = vadd.f32 %v10122_v23, %v4898_v59  ;;  %v5107_v59 = vadd.f32 %v10164_v39, %v11243_v6 }
 0x458   : > { %v5263_v33 = vpop.f32.mrf.mxu0  ;;  %5654 = vmatmul.mubr.bf16.gmra.mxu1 %v5406_v8 }
 0x459   : > { %v5364_v50 = vmax.f32 %v5262_v19, 0.0  ;;  %v5264_v38 = vadd.f32 %v5263_v33, %v5071_v9  ;;  %v11236_v33 = vld [vmem:[#allocation62_spill] sm:$0xff] }
 0x45a   : > { %v5267_v4 = vpop.f32.mrf.mxu0  ;;  %v4715_v22 = vadd.f32 %v11236_v33, %v9692_v36  ;;  %v11247_v33 = vld [vmem:[#allocation31_spill] sm:$0xff] }
 0x45b   : > { %v5408_v30 = vpack.c.bf16 %v5364_v50, %v5362_v5  ;;  %v5365_v18 = vmax.f32 %v5264_v38, 0.0  ;;  %v5268_v0 = vadd.f32 %v5267_v4, %v5075_v1  ;;  %v11237_v50 = vld [vmem:[#allocation69_spill] sm:$0xff]  ;;  %v5114_v38 = vpop.f32.mrf.mxu1 }
 0x45c   : > { %v5269_v63 = vpop.f32.mrf.mxu0  ;;  %v5095_v11 = vadd.f32 %v10129_v24, %v11237_v50  ;;  %v11238_v1 = vld [vmem:[#allocation25_spill] sm:$0xff]  ;;  %v11248_v50 = vld [vmem:[#allocation70_spill] sm:$0xff] }
 0x45d   : > { %v5409_v13 = vpack.c.bf16 %v5365_v18, %v5363_v55  ;;  %v5270_v49 = vadd.f32 %v5269_v63, %v5077_v47  ;;  %v5366_v37 = vmax.f32 %v5268_v0, 0.0  ;;  %v4908_v4 = vadd.f32 %v11238_v1, %v4715_v22  ;;  %v11240_v63 = vld [vmem:[#allocation21_spill] sm:$0xff] }
 0x45e   : > { %v5271_v52 = vpop.f32.mrf.mxu0  ;;  %v5099_v25 = vadd.f32 %v10143_v41, %v11240_v63  ;;  %v5105_v41 = vadd.f32 %v10157_v20, %v9973_v28  ;;  %v11250_v63 = vld [vmem:[#allocation50_spill] sm:$0xff] }
 0x45f   : > { %v5272_v21 = vadd.f32 %v5271_v52, %v5079_v43  ;;  %5661 = vmatprep.mubr.bf16.mxu1 %v5409_v13  ;;  %v5367_v46 = vmax.f32 %v5270_v49, 0.0  ;;  %v5116_v43 = vpop.f32.mrf.mxu1  ;;  %v5101_v24 = vadd.f32 %v10150_v3, %v4908_v4  ;;  %v11241_v49 = vld [vmem:[#allocation65_spill] sm:$0xff] }
 0x460   : > { %v5273_v44 = vpop.f32.mrf.mxu0  ;;  %5662 = vmatmul.mubr.bf16.gmra.mxu1 %v5408_v30  ;;  %v11239_v30 = vld [vmem:[#allocation34_spill] sm:$0xff] }
 0x461   : > { %v5368_v61 = vmax.f32 %v5272_v21, 0.0  ;;  %v5274_v53 = vadd.f32 %v5273_v44, %v5081_v29  ;;  %v5097_v18 = vadd.f32 %v10136_v54, %v11239_v30  ;;  %v4725_v21 = vadd.f32 %v11241_v49, %v9692_v36  ;;  %v5118_v32 = vpop.f32.mrf.mxu1 }
 0x462   : > { %v5277_v60 = vpop.f32.mrf.mxu0 }
 0x463   : > { %v5410_v2 = vpack.c.bf16 %v5368_v61, %v5366_v37  ;;  %v5369_v8 = vmax.f32 %v5274_v53, 0.0  ;;  %v5278_v27 = vadd.f32 %v5277_v60, %v5085_v56  ;;  %v11242_v61 = vld [vmem:[#allocation26_spill] sm:$0xff]  ;;  %v5120_v15 = vpop.f32.mrf.mxu1 }
 0x464   : > { %v5279_v42 = vpop.f32.mrf.mxu0  ;;  %v4918_v53 = vadd.f32 %v11242_v61, %v4725_v21 }
 0x465   : > { %v5411_v7 = vpack.c.bf16 %v5369_v8, %v5367_v46  ;;  %v5280_v9 = vadd.f32 %v5279_v42, %v5087_v31  ;;  %v5370_v40 = vmax.f32 %v5278_v27, 0.0  ;;  %v11244_v46 = vld [vmem:[#allocation71_spill] sm:$0xff] }
 0x466   : > { %v5281_v34 = vpop.f32.mrf.mxu0  ;;  %v5111_v17 = vadd.f32 %v5110_v58, %v4918_v53 }
 0x467   : > { %v5282_v16 = vadd.f32 %v5281_v34, %v5089_v14  ;;  %5669 = vmatprep.mubr.bf16.mxu1 %v5411_v7  ;;  %v5371_v57 = vmax.f32 %v5280_v9, 0.0  ;;  %v11245_v7 = vld [vmem:[#allocation36_spill] sm:$0xff] }
 0x468   : > { %v5283_v19 = vpop.f32.mrf.mxu0  ;;  %5670 = vmatmul.mubr.bf16.gmra.mxu1 %v5410_v2  ;;  %v5109_v2 = vadd.f32 %v5108_v45, %v11244_v46  ;;  %v4735_v27 = vadd.f32 %v11245_v7, %v9692_v36 }
 0x469   : > { %v5372_v5 = vmax.f32 %v5282_v16, 0.0  ;;  %v5284_v26 = vadd.f32 %v5283_v19, %v5091_v35  ;;  %v11246_v16 = vld [vmem:[#allocation27_spill] sm:$0xff]  ;;  %v5124_v19 = vpop.f32.mrf.mxu1 }
 0x46a   : > { %v5287_v51 = vpop.f32.mrf.mxu0  ;;  %v5115_v39 = vadd.f32 %v5114_v38, %v11246_v16  ;;  %v4928_v22 = vadd.f32 %v11247_v33, %v4735_v27 }
 0x46b   : > { %v5412_v23 = vpack.c.bf16 %v5372_v5, %v5370_v40  ;;  %v5373_v48 = vmax.f32 %v5284_v26, 0.0  ;;  %v5288_v12 = vadd.f32 %v5287_v51, %v5095_v11  ;;  %v5117_v11 = vadd.f32 %v5116_v43, %v11248_v50  ;;  %v11249_v51 = vld [vmem:[#allocation73_spill] sm:$0xff] }
 0x46c   : > { %v5289_v55 = vpop.f32.mrf.mxu0  ;;  %v5119_v1 = vadd.f32 %v5118_v32, %v11249_v51 }
 0x46d   : > { %v5413_v47 = vpack.c.bf16 %v5373_v48, %v5371_v57  ;;  %v5290_v0 = vadd.f32 %v5289_v55, %v5097_v18  ;;  %v5374_v44 = vmax.f32 %v5288_v12, 0.0  ;;  %v5121_v55 = vadd.f32 %v5120_v15, %v4928_v22 }
 0x46e   : > { %v5291_v13 = vpop.f32.mrf.mxu0 }
 0x46f   : > { %v5292_v52 = vadd.f32 %v5291_v13, %v5099_v25  ;;  %5677 = vmatprep.mubr.bf16.mxu1 %v5413_v47  ;;  %v5375_v10 = vmax.f32 %v5290_v0, 0.0  ;;  %v4745_v25 = vadd.f32 %v11250_v63, %v9692_v36 }
 0x470   : > { %v5293_v29 = vpop.f32.mrf.mxu0  ;;  %5678 = vmatmul.mubr.bf16.gmra.mxu1 %v5412_v23  ;;  %v5126_v23 = vpop.f32.mrf.mxu1 }
 0x471   : > { %v5376_v62 = vmax.f32 %v5292_v52, 0.0  ;;  %v5294_v54 = vadd.f32 %v5293_v29, %v5101_v24  ;;  %v11251_v24 = vld [vmem:[#allocation32_spill] sm:$0xff]  ;;  %v11252_v29 = vld [vmem:[#allocation59_spill] sm:$0xff] }
 0x472   : > { %v5297_v37 = vpop.f32.mrf.mxu0  ;;  %v5125_v43 = vadd.f32 %v5124_v19, %v11251_v24  ;;  %v5128_v0 = vpop.f32.mrf.mxu1  ;;  %v4938_v49 = vadd.f32 %v11252_v29, %v4745_v25 }
 0x473   : > { %v5414_v3 = vpack.c.bf16 %v5376_v62, %v5374_v44  ;;  %v5377_v56 = vmax.f32 %v5294_v54, 0.0  ;;  %v5298_v42 = vadd.f32 %v5297_v37, %v5105_v41  ;;  %v11253_v41 = vld [vmem:[#allocation35_spill] sm:$0xff]  ;;  %v11254_v37 = vld [vmem:[#allocation78_spill] sm:$0xff] }
 0x474   : > { %v5299_v60 = vpop.f32.mrf.mxu0  ;;  %v5127_v32 = vadd.f32 %v5126_v23, %v11253_v41  ;;  %v5129_v61 = vadd.f32 %v5128_v0, %v11254_v37  ;;  %v5130_v36 = vpop.f32.mrf.mxu1 }
 0x475   : > { %v5415_v8 = vpack.c.bf16 %v5377_v56, %v5375_v10  ;;  %v5300_v14 = vadd.f32 %v5299_v60, %v5107_v59  ;;  %v5378_v34 = vmax.f32 %v5298_v42, 0.0  ;;  %v5131_v56 = vadd.f32 %v5130_v36, %v4938_v49 }
 0x476   : > { %v5301_v31 = vpop.f32.mrf.mxu0 }
 0x477   : > { %v5302_v28 = vadd.f32 %v5301_v31, %v5109_v2  ;;  %5685 = vmatprep.mubr.bf16.mxu1 %v5415_v8  ;;  %v5379_v40 = vmax.f32 %v5300_v14, 0.0 }
 0x478   : > { %v5303_v20 = vpop.f32.mrf.mxu0  ;;  %5686 = vmatmul.mubr.bf16.gmra.mxu1 %v5414_v3 }
 0x479   : > { %v5380_v35 = vmax.f32 %v5302_v28, 0.0  ;;  %v5304_v9 = vadd.f32 %v5303_v20, %v5111_v17  ;;  %v10210_v20 = vld [vmem:[%s10654_s6] ss:$0 sm:$0xff] }
 0x47a   : > { %v5307_v45 = vpop.f32.mrf.mxu0 }
 0x47b   : > { %v5416_v5 = vpack.c.bf16 %v5380_v35, %v5378_v34  ;;  %v5381_v58 = vmax.f32 %v5304_v9, 0.0  ;;  %v5308_v57 = vadd.f32 %v5307_v45, %v5115_v39 }
 0x47c   : > { %v5309_v26 = vpop.f32.mrf.mxu0 }
 0x47d   : > { %v5417_v4 = vpack.c.bf16 %v5381_v58, %v5379_v40  ;;  %v5310_v30 = vadd.f32 %v5309_v26, %v5117_v11  ;;  %v5382_v47 = vmax.f32 %v5308_v57, 0.0 }
 0x47e   : > { %v5311_v48 = vpop.f32.mrf.mxu0 }
 0x47f   : > { %v5312_v18 = vadd.f32 %v5311_v48, %v5119_v1  ;;  %5693 = vmatprep.mubr.bf16.mxu1 %v5417_v4  ;;  %v5383_v21 = vmax.f32 %v5310_v30, 0.0 }
 0x480   : > { %v5313_v38 = vpop.f32.mrf.mxu0  ;;  %5694 = vmatmul.mubr.bf16.gmra.mxu1 %v5416_v5 }
 0x481   : > { %v5384_v12 = vmax.f32 %v5312_v18, 0.0  ;;  %v5314_v13 = vadd.f32 %v5313_v38, %v5121_v55 }
 0x482   : > { %v5317_v52 = vpop.f32.mrf.mxu0 }
 0x483   : > { %v5418_v44 = vpack.c.bf16 %v5384_v12, %v5382_v47  ;;  %v5385_v62 = vmax.f32 %v5314_v13, 0.0  ;;  %v5318_v10 = vadd.f32 %v5317_v52, %v5125_v43 }
 0x484   : > { %v5319_v54 = vpop.f32.mrf.mxu0 }
 0x485   : > { %v5419_v53 = vpack.c.bf16 %v5385_v62, %v5383_v21  ;;  %v5320_v60 = vadd.f32 %v5319_v54, %v5127_v32  ;;  %v5386_v46 = vmax.f32 %v5318_v10, 0.0 }
 0x486   : > { %v5321_v3 = vpop.f32.mrf.mxu0 }
 0x487   : > { %v5322_v6 = vadd.f32 %v5321_v3, %v5129_v61  ;;  %5701 = vmatprep.mubr.bf16.mxu1 %v5419_v53  ;;  %v5387_v42 = vmax.f32 %v5320_v60, 0.0 }
 0x488   : > { %v5323_v59 = vpop.f32.mrf.mxu0  ;;  %5702 = vmatmul.mubr.bf16.gmra.mxu1 %v5418_v44 }
 0x489   : > { %v5388_v2 = vmax.f32 %v5322_v6, 0.0  ;;  %v5324_v8 = vadd.f32 %v5323_v59, %v5131_v56 }
 0x48b   : > { %v5420_v15 = vpack.c.bf16 %v5388_v2, %v5386_v46  ;;  %v5389_v31 = vmax.f32 %v5324_v8, 0.0 }
 0x48d   : > { %v5421_v17 = vpack.c.bf16 %v5389_v31, %v5387_v42 }
 0x48f   : > { %5709 = vmatprep.mubr.bf16.mxu1 %v5421_v17 }
 0x490   : > { %5710 = vmatmul.mubr.bf16.gmra.mxu1 %v5420_v15 }
 0x4d8   : > { %v6606_v14 = vpop.f32.mrf.mxu1 }
 0x4da   : > { %v6607_v28 = vpop.f32.mrf.mxu1 }
 0x4db   : > { %v6608_v7 = vadd.f32 %v6607_v28, %v6606_v14 }
 0x4dc   : > { %v6609_v27 = vpop.f32.mrf.mxu1 }
 0x4dd   : > { %v10213_v34 = vadd.f32 %v6608_v7, %v10210_v20 }
 0x4de   : > { %v6610_v35 = vpop.f32.mrf.mxu1 }
 0x4df   : > { %v6611_v9 = vadd.f32 %v6610_v35, %v6609_v27  ;;  %v5719_v16 = vsel %vm5718_vm0, %v10213_v34, -inf }
 0x4e0   : > { %v6612_v39 = vpop.f32.mrf.mxu1  ;;  %5720 = vmax.xlane.f32.xlu0 %v5719_v16 }
 0x4e1   : > { %v10218_v19 = vadd.f32 %v6611_v9, %v10210_v20 }
 0x4e2   : > { %v6613_v45 = vpop.f32.mrf.mxu1 }
 0x4e3   : > { %v6614_v33 = vadd.f32 %v6613_v45, %v6612_v39  ;;  %v5722_v22 = vsel %vm5718_vm0, %v10218_v19, -inf }
 0x4e4   : > { %v6615_v40 = vpop.f32.mrf.mxu1  ;;  %5723 = vmax.xlane.f32.xlu0 %v5722_v22 }
 0x4e5   : > { %v10223_v5 = vadd.f32 %v6614_v33, %v10210_v20 }
 0x4e6   : > { %v6616_v58 = vpop.f32.mrf.mxu1 }
 0x4e7   : > { %v6617_v26 = vadd.f32 %v6616_v58, %v6615_v40  ;;  %v5725_v50 = vsel %vm5718_vm0, %v10223_v5, -inf }
 0x4e8   : > { %v6618_v11 = vpop.f32.mrf.mxu1  ;;  %5726 = vmax.xlane.f32.xlu1 %v5725_v50 }
 0x4e9   : > { %v10228_v51 = vadd.f32 %v6617_v26, %v10210_v20 }
 0x4ea   : > { %v6619_v1 = vpop.f32.mrf.mxu1 }
 0x4eb   : > { %v6620_v4 = vadd.f32 %v6619_v1, %v6618_v11  ;;  %v5728_v57 = vsel %vm5718_vm0, %v10228_v51, -inf }
 0x4ec   : > { %v6621_v23 = vpop.f32.mrf.mxu1  ;;  %5729 = vmax.xlane.f32.xlu1 %v5728_v57 }
 0x4ed   : > { %v10233_v48 = vadd.f32 %v6620_v4, %v10210_v20 }
 0x4ee   : > { %v6622_v55 = vpop.f32.mrf.mxu1 }
 0x4ef   : > { %v6623_v30 = vadd.f32 %v6622_v55, %v6621_v23  ;;  %v5731_v18 = vsel %vm5718_vm0, %v10233_v48, -inf }
 0x4f0   : > { %v6624_v38 = vpop.f32.mrf.mxu1  ;;  %5732 = vmax.xlane.f32.xlu0 %v5731_v18 }
 0x4f1   : > { %v10238_v63 = vadd.f32 %v6623_v30, %v10210_v20 }
 0x4f2   : > { %v6625_v25 = vpop.f32.mrf.mxu1 }
 0x4f3   : > { %v6626_v47 = vadd.f32 %v6625_v25, %v6624_v38  ;;  %v5734_v12 = vsel %vm5718_vm0, %v10238_v63, -inf }
 0x4f4   : > { %v6627_v13 = vpop.f32.mrf.mxu1  ;;  %5735 = vmax.xlane.f32.xlu1 %v5734_v12 }
 0x4f5   : > { %v10243_v24 = vadd.f32 %v6626_v47, %v10210_v20 }
 0x4f6   : > { %v6628_v43 = vpop.f32.mrf.mxu1 }
 0x4f7   : > { %v6629_v0 = vadd.f32 %v6628_v43, %v6627_v13  ;;  %v5737_v52 = vsel %vm5718_vm0, %v10243_v24, -inf }
 0x4f8   : > { %v6630_v29 = vpop.f32.mrf.mxu1  ;;  %5738 = vmax.xlane.f32.xlu0 %v5737_v52 }
 0x4f9   : > { %v10248_v49 = vadd.f32 %v6629_v0, %v10210_v20 }
 0x4fa   : > { %v6631_v21 = vpop.f32.mrf.mxu1 }
 0x4fb   : > { %v6632_v44 = vadd.f32 %v6631_v21, %v6630_v29  ;;  %v5740_v62 = vsel %vm5718_vm0, %v10248_v49, -inf }
 0x4fc   : > { %v6633_v54 = vpop.f32.mrf.mxu1  ;;  %5741 = vmax.xlane.f32.xlu1 %v5740_v62 }
 0x4fd   : > { %v10253_v41 = vadd.f32 %v6632_v44, %v10210_v20 }
 0x4fe   : > { %v6634_v32 = vpop.f32.mrf.mxu1 }
 0x4ff   : > { %v6635_v37 = vadd.f32 %v6634_v32, %v6633_v54  ;;  %v5743_v61 = vsel %vm5718_vm0, %v10253_v41, -inf }
 0x500   : > { %v6636_v53 = vpop.f32.mrf.mxu1  ;;  %5744 = vmax.xlane.f32.xlu0 %v5743_v61 }
 0x501   : > { %v10258_v10 = vadd.f32 %v6635_v37, %v10210_v20 }
 0x502   : > { %v6637_v36 = vpop.f32.mrf.mxu1 }
 0x503   : > { %v6638_v3 = vadd.f32 %v6637_v36, %v6636_v53  ;;  %v5746_v56 = vsel %vm5718_vm0, %v10258_v10, -inf }
 0x504   : > { %v6639_v60 = vpop.f32.mrf.mxu1  ;;  %5747 = vmax.xlane.f32.xlu1 %v5746_v56 }
 0x505   : > { %v10263_v6 = vadd.f32 %v6638_v3, %v10210_v20 }
 0x506   : > { %v6640_v59 = vpop.f32.mrf.mxu1 }
 0x507   : > { %v6641_v46 = vadd.f32 %v6640_v59, %v6639_v60  ;;  %v5749_v2 = vsel %vm5718_vm0, %v10263_v6, -inf }
 0x508   : > { %v6642_v8 = vpop.f32.mrf.mxu1  ;;  %5750 = vmax.xlane.f32.xlu0 %v5749_v2 }
 0x509   : > { %v10268_v42 = vadd.f32 %v6641_v46, %v10210_v20 }
 0x50a   : > { %v6643_v15 = vpop.f32.mrf.mxu1 }
 0x50b   : > { %v6644_v31 = vadd.f32 %v6643_v15, %v6642_v8  ;;  %v5752_v17 = vsel %vm5718_vm0, %v10268_v42, -inf }
 0x50c   : > { %v6645_v14 = vpop.f32.mrf.mxu1  ;;  %5753 = vmax.xlane.f32.xlu1 %v5752_v17 }
 0x50d   : > { %v10273_v28 = vadd.f32 %v6644_v31, %v10210_v20 }
 0x50e   : > { %v6646_v7 = vpop.f32.mrf.mxu1 }
 0x50f   : > { %v6647_v27 = vadd.f32 %v6646_v7, %v6645_v14  ;;  %v5755_v35 = vsel %vm5718_vm0, %v10273_v28, -inf }
 0x510   : > { %v6648_v9 = vpop.f32.mrf.mxu1  ;;  %5756 = vmax.xlane.f32.xlu0 %v5755_v35 }
 0x511   : > { %v10278_v16 = vadd.f32 %v6647_v27, %v10210_v20 }
 0x512   : > { %v6649_v39 = vpop.f32.mrf.mxu1 }
 0x513   : > { %v6650_v45 = vadd.f32 %v6649_v39, %v6648_v9  ;;  %v5758_v33 = vsel %vm5718_vm0, %v10278_v16, -inf }
 0x514   : > { %v6651_v22 = vpop.f32.mrf.mxu1  ;;  %5759 = vmax.xlane.f32.xlu1 %v5758_v33 }
 0x515   : > { %v10283_v40 = vadd.f32 %v6650_v45, %v10210_v20 }
 0x516   : > { %v6652_v58 = vpop.f32.mrf.mxu1 }
 0x517   : > { %v6653_v26 = vadd.f32 %v6652_v58, %v6651_v22  ;;  %v5761_v50 = vsel %vm5718_vm0, %v10283_v40, -inf }
 0x518   : > { %v6654_v11 = vpop.f32.mrf.mxu1  ;;  %5762 = vmax.xlane.f32.xlu0 %v5761_v50 }
 0x519   : > { %v10288_v1 = vadd.f32 %v6653_v26, %v10210_v20 }
 0x51a   : > { %v6655_v4 = vpop.f32.mrf.mxu1 }
 0x51b   : > { %v6656_v57 = vadd.f32 %v6655_v4, %v6654_v11  ;;  %v5764_v23 = vsel %vm5718_vm0, %v10288_v1, -inf }
 0x51c   : > { %v6657_v55 = vpop.f32.mrf.mxu1  ;;  %5765 = vmax.xlane.f32.xlu1 %v5764_v23 }
 0x51d   : > { %v10293_v30 = vadd.f32 %v6656_v57, %v10210_v20 }
 0x51e   : > { %v6658_v18 = vpop.f32.mrf.mxu1 }
 0x51f   : > { %v6659_v38 = vadd.f32 %v6658_v18, %v6657_v55  ;;  %v5767_v25 = vsel %vm5718_vm0, %v10293_v30, -inf }
 0x520   : > { %v6660_v47 = vpop.f32.mrf.mxu1  ;;  %5768 = vmax.xlane.f32.xlu0 %v5767_v25 }
 0x521   : > { %v10298_v12 = vadd.f32 %v6659_v38, %v10210_v20 }
 0x522   : > { %v6661_v13 = vpop.f32.mrf.mxu1 }
 0x523   : > { %v6662_v43 = vadd.f32 %v6661_v13, %v6660_v47  ;;  %v5770_v0 = vsel %vm5718_vm0, %v10298_v12, -inf }
 0x524   : > { %v6663_v52 = vpop.f32.mrf.mxu1  ;;  %5771 = vmax.xlane.f32.xlu1 %v5770_v0 }
 0x525   : > { %v10303_v29 = vadd.f32 %v6662_v43, %v10210_v20 }
 0x526   : > { %v6664_v21 = vpop.f32.mrf.mxu1 }
 0x527   : > { %v6665_v44 = vadd.f32 %v6664_v21, %v6663_v52  ;;  %v5773_v62 = vsel %vm5718_vm0, %v10303_v29, -inf }
 0x528   : > { %v6666_v54 = vpop.f32.mrf.mxu1  ;;  %5774 = vmax.xlane.f32.xlu0 %v5773_v62 }
 0x529   : > { %v10308_v32 = vadd.f32 %v6665_v44, %v10210_v20 }
 0x52a   : > { %v6667_v37 = vpop.f32.mrf.mxu1 }
 0x52b   : > { %v6668_v61 = vadd.f32 %v6667_v37, %v6666_v54  ;;  %v5776_v53 = vsel %vm5718_vm0, %v10308_v32, -inf }
 0x52c   : > { %v6669_v36 = vpop.f32.mrf.mxu1  ;;  %5777 = vmax.xlane.f32.xlu1 %v5776_v53 }
 0x52d   : > { %v10313_v3 = vadd.f32 %v6668_v61, %v10210_v20 }
 0x52e   : > { %v6670_v56 = vpop.f32.mrf.mxu1 }
 0x52f   : > { %v6671_v60 = vadd.f32 %v6670_v56, %v6669_v36  ;;  %v5779_v59 = vsel %vm5718_vm0, %v10313_v3, -inf }
 0x530   : > { %v6672_v46 = vpop.f32.mrf.mxu1  ;;  %5780 = vmax.xlane.f32.xlu0 %v5779_v59 }
 0x531   : > { %v10318_v2 = vadd.f32 %v6671_v60, %v10210_v20 }
 0x532   : > { %v6673_v8 = vpop.f32.mrf.mxu1 }
 0x533   : > { %v6674_v15 = vadd.f32 %v6673_v8, %v6672_v46  ;;  %v5782_v31 = vsel %vm5718_vm0, %v10318_v2, -inf }
 0x534   : > { %v6675_v17 = vpop.f32.mrf.mxu1  ;;  %5783 = vmax.xlane.f32.xlu1 %v5782_v31 }
 0x535   : > { %v10323_v14 = vadd.f32 %v6674_v15, %v10210_v20 }
 0x536   : > { %v6676_v7 = vpop.f32.mrf.mxu1 }
 0x537   : > { %v6677_v27 = vadd.f32 %v6676_v7, %v6675_v17  ;;  %v5785_v35 = vsel %vm5718_vm0, %v10323_v14, -inf }
 0x538   : > { %v6678_v9 = vpop.f32.mrf.mxu1  ;;  %5786 = vmax.xlane.f32.xlu0 %v5785_v35 }
 0x539   : > { %v10328_v39 = vadd.f32 %v6677_v27, %v10210_v20 }
 0x53a   : > { %v6679_v45 = vpop.f32.mrf.mxu1 }
 0x53b   : > { %v6680_v33 = vadd.f32 %v6679_v45, %v6678_v9  ;;  %v5788_v22 = vsel %vm5718_vm0, %v10328_v39, -inf }
 0x53c   : > { %v6681_v58 = vpop.f32.mrf.mxu1  ;;  %5789 = vmax.xlane.f32.xlu1 %v5788_v22 }
 0x53d   : > { %v10333_v26 = vadd.f32 %v6680_v33, %v10210_v20 }
 0x53e   : > { %v6682_v50 = vpop.f32.mrf.mxu1 }
 0x53f   : > { %v6683_v11 = vadd.f32 %v6682_v50, %v6681_v58  ;;  %v5791_v4 = vsel %vm5718_vm0, %v10333_v26, -inf }
 0x540   : > { %v6684_v57 = vpop.f32.mrf.mxu1  ;;  %5792 = vmax.xlane.f32.xlu0 %v5791_v4 }
 0x541   : > { %v10338_v23 = vadd.f32 %v6683_v11, %v10210_v20 }
 0x542   : > { %v6685_v55 = vpop.f32.mrf.mxu1 }
 0x543   : > { %v6686_v18 = vadd.f32 %v6685_v55, %v6684_v57  ;;  %v5794_v38 = vsel %vm5718_vm0, %v10338_v23, -inf }
 0x544   : > { %v6687_v25 = vpop.f32.mrf.mxu1  ;;  %5795 = vmax.xlane.f32.xlu1 %v5794_v38 }
 0x545   : > { %v10343_v47 = vadd.f32 %v6686_v18, %v10210_v20 }
 0x546   : > { %v6688_v13 = vpop.f32.mrf.mxu1 }
 0x547   : > { %v6689_v43 = vadd.f32 %v6688_v13, %v6687_v25  ;;  %v5797_v0 = vsel %vm5718_vm0, %v10343_v47, -inf }
 0x548   : > { %v6690_v52 = vpop.f32.mrf.mxu1  ;;  %5798 = vmax.xlane.f32.xlu0 %v5797_v0 }
 0x549   : > { %v10348_v21 = vadd.f32 %v6689_v43, %v10210_v20 }
 0x54a   : > { %v6691_v44 = vpop.f32.mrf.mxu1 }
 0x54b   : > { %v6692_v62 = vadd.f32 %v6691_v44, %v6690_v52  ;;  %v5800_v54 = vsel %vm5718_vm0, %v10348_v21, -inf }
 0x54c   : > { %v6693_v37 = vpop.f32.mrf.mxu1  ;;  %5801 = vmax.xlane.f32.xlu1 %v5800_v54 }
 0x54d   : > { %v10353_v61 = vadd.f32 %v6692_v62, %v10210_v20 }
 0x54e   : > { %v6694_v53 = vpop.f32.mrf.mxu1 }
 0x54f   : > { %v6695_v36 = vadd.f32 %v6694_v53, %v6693_v37  ;;  %v5803_v56 = vsel %vm5718_vm0, %v10353_v61, -inf }
 0x550   : > { %v6696_v60 = vpop.f32.mrf.mxu1  ;;  %5804 = vmax.xlane.f32.xlu0 %v5803_v56 }
 0x551   : > { %v10358_v59 = vadd.f32 %v6695_v36, %v10210_v20 }
 0x552   : > { %v6697_v46 = vpop.f32.mrf.mxu1 }
 0x553   : > { %v6698_v8 = vadd.f32 %v6697_v46, %v6696_v60  ;;  %v5806_v15 = vsel %vm5718_vm0, %v10358_v59, -inf }
 0x554   : > { %v6699_v31 = vpop.f32.mrf.mxu1  ;;  %5807 = vmax.xlane.f32.xlu1 %v5806_v15 }
 0x555   : > { %v10363_v17 = vadd.f32 %v6698_v8, %v10210_v20 }
 0x556   : > { %v6700_v7 = vpop.f32.mrf.mxu1 }
 0x557   : > { %v6701_v27 = vadd.f32 %v6700_v7, %v6699_v31  ;;  %v5809_v35 = vsel %vm5718_vm0, %v10363_v17, -inf }
 0x558   : > { %5810 = vmax.xlane.f32.xlu0 %v5809_v35 }
 0x559   : > { %v10368_v9 = vadd.f32 %v6701_v27, %v10210_v20 }
 0x55b   : > { %v5812_v45 = vsel %vm5718_vm0, %v10368_v9, -inf }
 0x55c   : > { %5813 = vmax.xlane.f32.xlu1 %v5812_v45 }
 0x569   : > { %v5721_v33 = vpop.xlane.xlu0 %5720 }
 0x56a   : > { %v5815_v22 = vsub.f32 %v10213_v34, %v5721_v33 }
 0x56c   : > { %v5847_v58 = vmul.f32 1.442695, %v5815_v22 }
 0x56d   : > { %v5724_v50 = vpop.xlane.xlu0 %5723 }
 0x56e   : > { %7060 = vpow2.f32 %v5847_v58  ;;  %v5816_v11 = vsub.f32 %v10218_v19, %v5724_v50 }
 0x570   : > { %v5849_v4 = vmul.f32 1.442695, %v5816_v11 }
 0x571   : > { %v5727_v57 = vpop.xlane.xlu1 %5726 }
 0x572   : > { %7062 = vpow2.f32 %v5849_v4  ;;  %v5817_v55 = vsub.f32 %v10223_v5, %v5727_v57 }
 0x574   : > { %v5851_v18 = vmul.f32 1.442695, %v5817_v55 }
 0x575   : > { %v5730_v20 = vpop.xlane.xlu1 %5729 }
 0x576   : > { %7064 = vpow2.f32 %v5851_v18  ;;  %v5818_v38 = vsub.f32 %v10228_v51, %v5730_v20 }
 0x578   : > { %v5853_v25 = vmul.f32 1.442695, %v5818_v38 }
 0x579   : > { %v5733_v13 = vpop.xlane.xlu0 %5732 }
 0x57a   : > { %7066 = vpow2.f32 %v5853_v25  ;;  %v5819_v34 = vsub.f32 %v10233_v48, %v5733_v13 }
 0x57b   : > { %v10377_v43 = vpop.eup %7060 }
 0x57c   : > { %v5855_v0 = vmul.f32 1.442695, %v5819_v34  ;;  %v5911_v19 = vsel %vm5718_vm0, %v10377_v43, 0.0 }
 0x57d   : > { %v5736_v52 = vpop.xlane.xlu1 %5735  ;;  %5912 = vadd.xlane.f32.xlu0 %v5911_v19 }
 0x57e   : > { %7068 = vpow2.f32 %v5855_v0  ;;  %v5820_v5 = vsub.f32 %v10238_v63, %v5736_v52 }
 0x57f   : > { %v10382_v44 = vpop.eup %7062 }
 0x580   : > { %v5857_v62 = vmul.f32 1.442695, %v5820_v5  ;;  %v5914_v51 = vsel %vm5718_vm0, %v10382_v44, 0.0 }
 0x581   : > { %5915 = vadd.xlane.f32.xlu1 %v5914_v51  ;;  %v5739_v54 = vpop.xlane.xlu0 %5738 }
 0x582   : > { %7070 = vpow2.f32 %v5857_v62  ;;  %v5821_v48 = vsub.f32 %v10243_v24, %v5739_v54 }
 0x583   : > { %v10387_v37 = vpop.eup %7064 }
 0x584   : > { %v5859_v53 = vmul.f32 1.442695, %v5821_v48  ;;  %v5917_v36 = vsel %vm5718_vm0, %v10387_v37, 0.0 }
 0x585   : > { %v5742_v56 = vpop.xlane.xlu1 %5741  ;;  %5918 = vadd.xlane.f32.xlu0 %v5917_v36 }
 0x586   : > { %7072 = vpow2.f32 %v5859_v53  ;;  %v5822_v63 = vsub.f32 %v10248_v49, %v5742_v56 }
 0x587   : > { %v10392_v60 = vpop.eup %7066 }
 0x588   : > { %v5861_v46 = vmul.f32 1.442695, %v5822_v63  ;;  %v5920_v8 = vsel %vm5718_vm0, %v10392_v60, 0.0 }
 0x589   : > { %5921 = vadd.xlane.f32.xlu1 %v5920_v8  ;;  %v5745_v15 = vpop.xlane.xlu0 %5744 }
 0x58a   : > { %7074 = vpow2.f32 %v5861_v46  ;;  %v5823_v24 = vsub.f32 %v10253_v41, %v5745_v15 }
 0x58b   : > { %v10397_v31 = vpop.eup %7068 }
 0x58c   : > { %v5863_v7 = vmul.f32 1.442695, %v5823_v24  ;;  %v5923_v27 = vsel %vm5718_vm0, %v10397_v31, 0.0 }
 0x58d   : > { %v5748_v35 = vpop.xlane.xlu1 %5747  ;;  %5924 = vadd.xlane.f32.xlu0 %v5923_v27 }
 0x58e   : > { %7076 = vpow2.f32 %v5863_v7  ;;  %v5824_v49 = vsub.f32 %v10258_v10, %v5748_v35 }
 0x58f   : > { %v10402_v45 = vpop.eup %7070 }
 0x590   : > { %v5865_v33 = vmul.f32 1.442695, %v5824_v49  ;;  %v5926_v22 = vsel %vm5718_vm0, %v10402_v45, 0.0 }
 0x591   : > { %5927 = vadd.xlane.f32.xlu1 %v5926_v22  ;;  %v5751_v58 = vpop.xlane.xlu0 %5750 }
 0x592   : > { %7078 = vpow2.f32 %v5865_v33  ;;  %v5825_v41 = vsub.f32 %v10263_v6, %v5751_v58 }
 0x593   : > { %v10407_v50 = vpop.eup %7072 }
 0x594   : > { %v5867_v11 = vmul.f32 1.442695, %v5825_v41  ;;  %v5929_v4 = vsel %vm5718_vm0, %v10407_v50, 0.0 }
 0x595   : > { %v5754_v57 = vpop.xlane.xlu1 %5753  ;;  %5930 = vadd.xlane.f32.xlu0 %v5929_v4 }
 0x596   : > { %7080 = vpow2.f32 %v5867_v11  ;;  %v5826_v10 = vsub.f32 %v10268_v42, %v5754_v57 }
 0x597   : > { %v10412_v55 = vpop.eup %7074 }
 0x598   : > { %v5869_v18 = vmul.f32 1.442695, %v5826_v10  ;;  %v5932_v20 = vsel %vm5718_vm0, %v10412_v55, 0.0 }
 0x599   : > { %5933 = vadd.xlane.f32.xlu1 %v5932_v20  ;;  %v5757_v38 = vpop.xlane.xlu0 %5756 }
 0x59a   : > { %7082 = vpow2.f32 %v5869_v18  ;;  %v5827_v6 = vsub.f32 %v10273_v28, %v5757_v38 }
 0x59b   : > { %v10417_v25 = vpop.eup %7076 }
 0x59c   : > { %v5871_v13 = vmul.f32 1.442695, %v5827_v6  ;;  %v5935_v34 = vsel %vm5718_vm0, %v10417_v25, 0.0 }
 0x59d   : > { %v5760_v0 = vpop.xlane.xlu1 %5759  ;;  %5936 = vadd.xlane.f32.xlu0 %v5935_v34 }
 0x59e   : > { %7084 = vpow2.f32 %v5871_v13  ;;  %v5828_v42 = vsub.f32 %v10278_v16, %v5760_v0 }
 0x59f   : > { %v10422_v19 = vpop.eup %7078 }
 0x5a0   : > { %v5873_v52 = vmul.f32 1.442695, %v5828_v42  ;;  %v5938_v5 = vsel %vm5718_vm0, %v10422_v19, 0.0 }
 0x5a1   : > { %5939 = vadd.xlane.f32.xlu1 %v5938_v5  ;;  %v5763_v62 = vpop.xlane.xlu0 %5762 }
 0x5a2   : > { %7086 = vpow2.f32 %v5873_v52  ;;  %v5829_v28 = vsub.f32 %v10283_v40, %v5763_v62 }
 0x5a3   : > { %v10427_v51 = vpop.eup %7080 }
 0x5a4   : > { %v5875_v54 = vmul.f32 1.442695, %v5829_v28  ;;  %v5941_v48 = vsel %vm5718_vm0, %v10427_v51, 0.0 }
 0x5a5   : > { %v5766_v53 = vpop.xlane.xlu1 %5765  ;;  %5942 = vadd.xlane.f32.xlu0 %v5941_v48 }
 0x5a6   : > { %7088 = vpow2.f32 %v5875_v54  ;;  %v5830_v16 = vsub.f32 %v10288_v1, %v5766_v53 }
 0x5a7   : > { %v10432_v36 = vpop.eup %7082 }
 0x5a8   : > { %v5877_v56 = vmul.f32 1.442695, %v5830_v16  ;;  %v5944_v63 = vsel %vm5718_vm0, %v10432_v36, 0.0 }
 0x5a9   : > { %5945 = vadd.xlane.f32.xlu1 %v5944_v63  ;;  %v5769_v46 = vpop.xlane.xlu0 %5768 }
 0x5aa   : > { %7090 = vpow2.f32 %v5877_v56  ;;  %v5831_v40 = vsub.f32 %v10293_v30, %v5769_v46 }
 0x5ab   : > { %v10437_v8 = vpop.eup %7084 }
 0x5ac   : > { %v5879_v15 = vmul.f32 1.442695, %v5831_v40  ;;  %v5947_v24 = vsel %vm5718_vm0, %v10437_v8, 0.0 }
 0x5ad   : > { %v5772_v7 = vpop.xlane.xlu1 %5771  ;;  %5948 = vadd.xlane.f32.xlu0 %v5947_v24 }
 0x5ae   : > { %7092 = vpow2.f32 %v5879_v15  ;;  %v5832_v1 = vsub.f32 %v10298_v12, %v5772_v7 }
 0x5af   : > { %v10442_v27 = vpop.eup %7086 }
 0x5b0   : > { %v5881_v35 = vmul.f32 1.442695, %v5832_v1  ;;  %v5950_v49 = vsel %vm5718_vm0, %v10442_v27, 0.0 }
 0x5b1   : > { %5951 = vadd.xlane.f32.xlu1 %v5950_v49  ;;  %v5775_v33 = vpop.xlane.xlu0 %5774 }
 0x5b2   : > { %7094 = vpow2.f32 %v5881_v35  ;;  %v5833_v30 = vsub.f32 %v10303_v29, %v5775_v33 }
 0x5b3   : > { %v10447_v22 = vpop.eup %7088 }
 0x5b4   : > { %v5883_v58 = vmul.f32 1.442695, %v5833_v30  ;;  %v5953_v41 = vsel %vm5718_vm0, %v10447_v22, 0.0 }
 0x5b5   : > { %v5778_v11 = vpop.xlane.xlu1 %5777  ;;  %5954 = vadd.xlane.f32.xlu0 %v5953_v41 }
 0x5b6   : > { %7096 = vpow2.f32 %v5883_v58  ;;  %v5834_v12 = vsub.f32 %v10308_v32, %v5778_v11 }
 0x5b7   : > { %v10452_v4 = vpop.eup %7090 }
 0x5b8   : > { %v5885_v57 = vmul.f32 1.442695, %v5834_v12  ;;  %v5956_v10 = vsel %vm5718_vm0, %v10452_v4, 0.0 }
 0x5b9   : > { %5957 = vadd.xlane.f32.xlu1 %v5956_v10  ;;  %v5781_v18 = vpop.xlane.xlu0 %5780 }
 0x5ba   : > { %7098 = vpow2.f32 %v5885_v57  ;;  %v5835_v29 = vsub.f32 %v10313_v3, %v5781_v18 }
 0x5bb   : > { %v10457_v20 = vpop.eup %7092 }
 0x5bc   : > { %v5887_v38 = vmul.f32 1.442695, %v5835_v29  ;;  %v5959_v6 = vsel %vm5718_vm0, %v10457_v20, 0.0 }
 0x5bd   : > { %v5784_v13 = vpop.xlane.xlu1 %5783  ;;  %5960 = vadd.xlane.f32.xlu0 %v5959_v6 }
 0x5be   : > { %7100 = vpow2.f32 %v5887_v38  ;;  %v5836_v32 = vsub.f32 %v10318_v2, %v5784_v13 }
 0x5bf   : > { %v10462_v34 = vpop.eup %7094 }
 0x5c0   : > { %v5889_v0 = vmul.f32 1.442695, %v5836_v32  ;;  %v5962_v42 = vsel %vm5718_vm0, %v10462_v34, 0.0 }
 0x5c1   : > { %5963 = vadd.xlane.f32.xlu1 %v5962_v42  ;;  %v5787_v52 = vpop.xlane.xlu0 %5786 }
 0x5c2   : > { %7102 = vpow2.f32 %v5889_v0  ;;  %v5837_v3 = vsub.f32 %v10323_v14, %v5787_v52 }
 0x5c3   : > { %v10467_v5 = vpop.eup %7096 }
 0x5c4   : > { %v5891_v62 = vmul.f32 1.442695, %v5837_v3  ;;  %v5965_v28 = vsel %vm5718_vm0, %v10467_v5, 0.0 }
 0x5c5   : > { %v5790_v54 = vpop.xlane.xlu1 %5789  ;;  %5966 = vadd.xlane.f32.xlu0 %v5965_v28 }
 0x5c6   : > { %7104 = vpow2.f32 %v5891_v62  ;;  %v5838_v2 = vsub.f32 %v10328_v39, %v5790_v54 }
 0x5c7   : > { %v10472_v48 = vpop.eup %7098 }
 0x5c8   : > { %v5893_v53 = vmul.f32 1.442695, %v5838_v2  ;;  %v5968_v16 = vsel %vm5718_vm0, %v10472_v48, 0.0 }
 0x5c9   : > { %5969 = vadd.xlane.f32.xlu1 %v5968_v16  ;;  %v5793_v56 = vpop.xlane.xlu0 %5792 }
 0x5ca   : > { %7106 = vpow2.f32 %v5893_v53  ;;  %v5839_v14 = vsub.f32 %v10333_v26, %v5793_v56 }
 0x5cb   : > { %v10477_v63 = vpop.eup %7100 }
 0x5cc   : > { %v5895_v46 = vmul.f32 1.442695, %v5839_v14  ;;  %v5971_v40 = vsel %vm5718_vm0, %v10477_v63, 0.0 }
 0x5cd   : > { %v5796_v15 = vpop.xlane.xlu1 %5795  ;;  %5972 = vadd.xlane.f32.xlu0 %v5971_v40 }
 0x5ce   : > { %7108 = vpow2.f32 %v5895_v46  ;;  %v5840_v39 = vsub.f32 %v10338_v23, %v5796_v15 }
 0x5cf   : > { %v10482_v24 = vpop.eup %7102 }
 0x5d0   : > { %v5897_v7 = vmul.f32 1.442695, %v5840_v39  ;;  %v5974_v1 = vsel %vm5718_vm0, %v10482_v24, 0.0 }
 0x5d1   : > { %5975 = vadd.xlane.f32.xlu1 %v5974_v1  ;;  %v5799_v35 = vpop.xlane.xlu0 %5798 }
 0x5d2   : > { %7110 = vpow2.f32 %v5897_v7  ;;  %v5841_v26 = vsub.f32 %v10343_v47, %v5799_v35 }
 0x5d3   : > { %v10487_v49 = vpop.eup %7104 }
 0x5d4   : > { %v5899_v33 = vmul.f32 1.442695, %v5841_v26  ;;  %v5977_v30 = vsel %vm5718_vm0, %v10487_v49, 0.0 }
 0x5d5   : > { %v5802_v58 = vpop.xlane.xlu1 %5801  ;;  %5978 = vadd.xlane.f32.xlu0 %v5977_v30 }
 0x5d6   : > { %7112 = vpow2.f32 %v5899_v33  ;;  %v5842_v23 = vsub.f32 %v10348_v21, %v5802_v58 }
 0x5d7   : > { %v10492_v41 = vpop.eup %7106 }
 0x5d8   : > { %v5901_v11 = vmul.f32 1.442695, %v5842_v23  ;;  %v5980_v12 = vsel %vm5718_vm0, %v10492_v41, 0.0 }
 0x5d9   : > { %5981 = vadd.xlane.f32.xlu1 %v5980_v12  ;;  %v5805_v57 = vpop.xlane.xlu0 %5804 }
 0x5da   : > { %7114 = vpow2.f32 %v5901_v11  ;;  %v5843_v47 = vsub.f32 %v10353_v61, %v5805_v57 }
 0x5db   : > { %v10497_v10 = vpop.eup %7108 }
 0x5dc   : > { %v5903_v18 = vmul.f32 1.442695, %v5843_v47  ;;  %v5983_v29 = vsel %vm5718_vm0, %v10497_v10, 0.0 }
 0x5dd   : > { %v5808_v38 = vpop.xlane.xlu1 %5807  ;;  %5984 = vadd.xlane.f32.xlu0 %v5983_v29 }
 0x5de   : > { %7116 = vpow2.f32 %v5903_v18  ;;  %v5844_v21 = vsub.f32 %v10358_v59, %v5808_v38 }
 0x5df   : > { %v10502_v6 = vpop.eup %7110 }
 0x5e0   : > { %v5905_v13 = vmul.f32 1.442695, %v5844_v21  ;;  %v5986_v32 = vsel %vm5718_vm0, %v10502_v6, 0.0 }
 0x5e1   : > { %5987 = vadd.xlane.f32.xlu1 %v5986_v32  ;;  %v5811_v0 = vpop.xlane.xlu0 %5810 }
 0x5e2   : > { %7118 = vpow2.f32 %v5905_v13  ;;  %v5845_v61 = vsub.f32 %v10363_v17, %v5811_v0 }
 0x5e3   : > { %v10507_v42 = vpop.eup %7112 }
 0x5e4   : > { %v5907_v52 = vmul.f32 1.442695, %v5845_v61  ;;  %v5989_v3 = vsel %vm5718_vm0, %v10507_v42, 0.0 }
 0x5e5   : > { %v5814_v62 = vpop.xlane.xlu1 %5813  ;;  %5990 = vadd.xlane.f32.xlu0 %v5989_v3 }
 0x5e6   : > { %7120 = vpow2.f32 %v5907_v52  ;;  %v5846_v59 = vsub.f32 %v10368_v9, %v5814_v62 }
 0x5e7   : > { %v10512_v28 = vpop.eup %7114 }
 0x5e8   : > { %v5909_v54 = vmul.f32 1.442695, %v5846_v59  ;;  %v5992_v2 = vsel %vm5718_vm0, %v10512_v28, 0.0 }
 0x5e9   : > { %5993 = vadd.xlane.f32.xlu1 %v5992_v2 }
 0x5ea   : > { %7122 = vpow2.f32 %v5909_v54 }
 0x5eb   : > { %v10516_v17 = vpop.eup %7116 }
 0x5ec   : > { %v5995_v53 = vsel %vm5718_vm0, %v10516_v17, 0.0 }
 0x5ed   : > { %5996 = vadd.xlane.f32.xlu0 %v5995_v53 }
 0x5ef   : > { %v10520_v16 = vpop.eup %7118 }
 0x5f0   : > { %v5998_v9 = vsel %vm5718_vm0, %v10520_v16, 0.0 }
 0x5f1   : > { %5999 = vadd.xlane.f32.xlu1 %v5998_v9 }
 0x5f3   : > { %v10524_v56 = vpop.eup %7120 }
 0x5f4   : > { %v6001_v14 = vsel %vm5718_vm0, %v10524_v56, 0.0 }
 0x5f5   : > { %6002 = vadd.xlane.f32.xlu0 %v6001_v14 }
 0x5f7   : > { %v10528_v46 = vpop.eup %7122 }
 0x5f8   : > { %v6004_v40 = vsel %vm5718_vm0, %v10528_v46, 0.0 }
 0x5f9   : > { %6005 = vadd.xlane.f32.xlu1 %v6004_v40 }
 0x606   : > { %v5913_v15 = vpop.xlane.xlu0 %5912 }
 0x607   : > { %7124 = vrcp.f32 %v5913_v15 }
 0x60a   : > { %v5916_v39 = vpop.xlane.xlu1 %5915 }
 0x60b   : > { %7126 = vrcp.f32 %v5916_v39 }
 0x60e   : > { %v5919_v7 = vpop.xlane.xlu0 %5918 }
 0x60f   : > { %7128 = vrcp.f32 %v5919_v7 }
 0x612   : > { %v5922_v1 = vpop.xlane.xlu1 %5921 }
 0x613   : > { %7130 = vrcp.f32 %v5922_v1 }
 0x614   : > { %v7125_v35 = vpop.eup %7124 }
 0x615   : > { %v6008_v26 = vmul.f32 %v7125_v35, %v10377_v43 }
 0x616   : > { %v5925_v33 = vpop.xlane.xlu0 %5924 }
 0x617   : > { %6071 = vst.msk [vmem:[%s10537_s23] sm:$0xff] %vm5718_vm0, %v6008_v26  ;;  %7132 = vrcp.f32 %v5925_v33 }
 0x618   : > { %v7127_v30 = vpop.eup %7126 }
 0x619   : > { %v6010_v58 = vmul.f32 %v7127_v30, %v10382_v44 }
 0x61a   : > { %v5928_v23 = vpop.xlane.xlu1 %5927 }
 0x61b   : > { %6072 = vst.msk [vmem:[%s10537_s23 + $0x8] sm:$0xff] %vm5718_vm0, %v6010_v58  ;;  %7134 = vrcp.f32 %v5928_v23 }
 0x61c   : > { %v7129_v11 = vpop.eup %7128 }
 0x61d   : > { %v6012_v12 = vmul.f32 %v7129_v11, %v10387_v37 }
 0x61e   : > { %v5931_v57 = vpop.xlane.xlu0 %5930 }
 0x61f   : > { %6073 = vst.msk [vmem:[%s10537_s23 + $0x10] sm:$0xff] %vm5718_vm0, %v6012_v12  ;;  %7136 = vrcp.f32 %v5931_v57 }
 0x620   : > { %v7131_v43 = vpop.eup %7130 }
 0x621   : > { %v6014_v47 = vmul.f32 %v7131_v43, %v10392_v60 }
 0x622   : > { %v5934_v18 = vpop.xlane.xlu1 %5933 }
 0x623   : > { %6074 = vst.msk [vmem:[%s10537_s23 + $0x18] sm:$0xff] %vm5718_vm0, %v6014_v47  ;;  %7138 = vrcp.f32 %v5934_v18 }
 0x624   : > { %v7133_v44 = vpop.eup %7132 }
 0x625   : > { %v6016_v29 = vmul.f32 %v7133_v44, %v10397_v31 }
 0x626   : > { %v5937_v38 = vpop.xlane.xlu0 %5936 }
 0x627   : > { %6075 = vst.msk [vmem:[%s10537_s23 + $0x20] sm:$0xff] %vm5718_vm0, %v6016_v29  ;;  %7140 = vrcp.f32 %v5937_v38 }
 0x628   : > { %v7135_v37 = vpop.eup %7134 }
 0x629   : > { %v6018_v21 = vmul.f32 %v7135_v37, %v10402_v45 }
 0x62a   : > { %v5940_v13 = vpop.xlane.xlu1 %5939 }
 0x62b   : > { %6076 = vst.msk [vmem:[%s10537_s23 + $0x28] sm:$0xff] %vm5718_vm0, %v6018_v21  ;;  %7142 = vrcp.f32 %v5940_v13 }
 0x62c   : > { %v7137_v60 = vpop.eup %7136 }
 0x62d   : > { %v6020_v32 = vmul.f32 %v7137_v60, %v10407_v50 }
 0x62e   : > { %v5943_v0 = vpop.xlane.xlu0 %5942 }
 0x62f   : > { %6077 = vst.msk [vmem:[%s10537_s23 + $0x30] sm:$0xff] %vm5718_vm0, %v6020_v32  ;;  %7144 = vrcp.f32 %v5943_v0 }
 0x630   : > { %v7139_v31 = vpop.eup %7138 }
 0x631   : > { %v6022_v61 = vmul.f32 %v7139_v31, %v10412_v55 }
 0x632   : > { %v5946_v52 = vpop.xlane.xlu1 %5945 }
 0x633   : > { %6078 = vst.msk [vmem:[%s10537_s23 + $0x38] sm:$0xff] %vm5718_vm0, %v6022_v61  ;;  %7146 = vrcp.f32 %v5946_v52 }
 0x634   : > { %v7141_v45 = vpop.eup %7140 }
 0x635   : > { %v6024_v3 = vmul.f32 %v7141_v45, %v10417_v25 }
 0x636   : > { %v5949_v62 = vpop.xlane.xlu0 %5948 }
 0x637   : > { %6079 = vst.msk [vmem:[%s10537_s23 + $0x40] sm:$0xff] %vm5718_vm0, %v6024_v3  ;;  %7148 = vrcp.f32 %v5949_v62 }
 0x638   : > { %v7143_v50 = vpop.eup %7142 }
 0x639   : > { %v6026_v59 = vmul.f32 %v7143_v50, %v10422_v19 }
 0x63a   : > { %v5952_v54 = vpop.xlane.xlu1 %5951 }
 0x63b   : > { %6080 = vst.msk [vmem:[%s10537_s23 + $0x48] sm:$0xff] %vm5718_vm0, %v6026_v59  ;;  %7150 = vrcp.f32 %v5952_v54 }
 0x63c   : > { %v7145_v55 = vpop.eup %7144 }
 0x63d   : > { %v6028_v2 = vmul.f32 %v7145_v55, %v10427_v51 }
 0x63e   : > { %v5955_v53 = vpop.xlane.xlu0 %5954 }
 0x63f   : > { %6081 = vst.msk [vmem:[%s10537_s23 + $0x50] sm:$0xff] %vm5718_vm0, %v6028_v2  ;;  %7152 = vrcp.f32 %v5955_v53 }
 0x640   : > { %v7147_v25 = vpop.eup %7146 }
 0x641   : > { %v6030_v9 = vmul.f32 %v7147_v25, %v10432_v36 }
 0x642   : > { %v5958_v14 = vpop.xlane.xlu1 %5957 }
 0x643   : > { %6082 = vst.msk [vmem:[%s10537_s23 + $0x58] sm:$0xff] %vm5718_vm0, %v6030_v9  ;;  %7154 = vrcp.f32 %v5958_v14 }
 0x644   : > { %v7149_v19 = vpop.eup %7148 }
 0x645   : > { %v6032_v40 = vmul.f32 %v7149_v19, %v10437_v8 }
 0x646   : > { %v5961_v15 = vpop.xlane.xlu0 %5960 }
 0x647   : > { %6083 = vst.msk [vmem:[%s10537_s23 + $0x60] sm:$0xff] %vm5718_vm0, %v6032_v40  ;;  %7156 = vrcp.f32 %v5961_v15 }
 0x648   : > { %v7151_v51 = vpop.eup %7150 }
 0x649   : > { %v6034_v39 = vmul.f32 %v7151_v51, %v10442_v27 }
 0x64a   : > { %v5964_v7 = vpop.xlane.xlu1 %5963 }
 0x64b   : > { %6084 = vst.msk [vmem:[%s10537_s23 + $0x68] sm:$0xff] %vm5718_vm0, %v6034_v39  ;;  %7158 = vrcp.f32 %v5964_v7 }
 0x64c   : > { %v7153_v36 = vpop.eup %7152 }
 0x64d   : > { %v6036_v1 = vmul.f32 %v7153_v36, %v10447_v22 }
 0x64e   : > { %v5967_v35 = vpop.xlane.xlu0 %5966 }
 0x64f   : > { %6085 = vst.msk [vmem:[%s10537_s23 + $0x70] sm:$0xff] %vm5718_vm0, %v6036_v1  ;;  %7160 = vrcp.f32 %v5967_v35 }
 0x650   : > { %v7155_v8 = vpop.eup %7154 }
 0x651   : > { %v6038_v26 = vmul.f32 %v7155_v8, %v10452_v4 }
 0x652   : > { %v5970_v33 = vpop.xlane.xlu1 %5969 }
 0x653   : > { %6086 = vst.msk [vmem:[%s10537_s23 + $0x78] sm:$0xff] %vm5718_vm0, %v6038_v26  ;;  %7162 = vrcp.f32 %v5970_v33 }
 0x654   : > { %v7157_v27 = vpop.eup %7156 }
 0x655   : > { %v6040_v30 = vmul.f32 %v7157_v27, %v10457_v20 }
 0x656   : > { %v5973_v58 = vpop.xlane.xlu0 %5972 }
 0x657   : > { %6087 = vst.msk [vmem:[%s10537_s23 + $0x80] sm:$0xff] %vm5718_vm0, %v6040_v30  ;;  %7164 = vrcp.f32 %v5973_v58 }
 0x658   : > { %v7159_v22 = vpop.eup %7158 }
 0x659   : > { %v6042_v23 = vmul.f32 %v7159_v22, %v10462_v34 }
 0x65a   : > { %v5976_v11 = vpop.xlane.xlu1 %5975 }
 0x65b   : > { %6088 = vst.msk [vmem:[%s10537_s23 + $0x88] sm:$0xff] %vm5718_vm0, %v6042_v23  ;;  %7166 = vrcp.f32 %v5976_v11 }
 0x65c   : > { %v7161_v4 = vpop.eup %7160 }
 0x65d   : > { %v6044_v12 = vmul.f32 %v7161_v4, %v10467_v5 }
 0x65e   : > { %v5979_v57 = vpop.xlane.xlu0 %5978 }
 0x65f   : > { %6089 = vst.msk [vmem:[%s10537_s23 + $0x90] sm:$0xff] %vm5718_vm0, %v6044_v12  ;;  %7168 = vrcp.f32 %v5979_v57 }
 0x660   : > { %v7163_v20 = vpop.eup %7162 }
 0x661   : > { %v6046_v43 = vmul.f32 %v7163_v20, %v10472_v48 }
 0x662   : > { %v5982_v47 = vpop.xlane.xlu1 %5981 }
 0x663   : > { %6090 = vst.msk [vmem:[%s10537_s23 + $0x98] sm:$0xff] %vm5718_vm0, %v6046_v43  ;;  %7170 = vrcp.f32 %v5982_v47 }
 0x664   : > { %v7165_v34 = vpop.eup %7164 }
 0x665   : > { %v6048_v18 = vmul.f32 %v7165_v34, %v10477_v63 }
 0x666   : > { %v5985_v44 = vpop.xlane.xlu0 %5984 }
 0x667   : > { %6091 = vst.msk [vmem:[%s10537_s23 + $0xa0] sm:$0xff] %vm5718_vm0, %v6048_v18  ;;  %7172 = vrcp.f32 %v5985_v44 }
 0x668   : > { %v7167_v5 = vpop.eup %7166 }
 0x669   : > { %v6050_v29 = vmul.f32 %v7167_v5, %v10482_v24 }
 0x66a   : > { %v5988_v38 = vpop.xlane.xlu1 %5987 }
 0x66b   : > { %6092 = vst.msk [vmem:[%s10537_s23 + $0xa8] sm:$0xff] %vm5718_vm0, %v6050_v29  ;;  %7174 = vrcp.f32 %v5988_v38 }
 0x66c   : > { %v7169_v48 = vpop.eup %7168 }
 0x66d   : > { %v6052_v37 = vmul.f32 %v7169_v48, %v10487_v49 }
 0x66e   : > { %v5991_v21 = vpop.xlane.xlu0 %5990 }
 0x66f   : > { %6093 = vst.msk [vmem:[%s10537_s23 + $0xb0] sm:$0xff] %vm5718_vm0, %v6052_v37  ;;  %7176 = vrcp.f32 %v5991_v21 }
 0x670   : > { %v7171_v63 = vpop.eup %7170 }
 0x671   : > { %v6054_v13 = vmul.f32 %v7171_v63, %v10492_v41 }
 0x672   : > { %v5994_v60 = vpop.xlane.xlu1 %5993 }
 0x673   : > { %6094 = vst.msk [vmem:[%s10537_s23 + $0xb8] sm:$0xff] %vm5718_vm0, %v6054_v13  ;;  %7178 = vrcp.f32 %v5994_v60 }
 0x674   : > { %v7173_v24 = vpop.eup %7172 }
 0x675   : > { %v6056_v32 = vmul.f32 %v7173_v24, %v10497_v10 }
 0x676   : > { %v5997_v0 = vpop.xlane.xlu0 %5996 }
 0x677   : > { %6095 = vst.msk [vmem:[%s10537_s23 + $0xc0] sm:$0xff] %vm5718_vm0, %v6056_v32  ;;  %7180 = vrcp.f32 %v5997_v0 }
 0x678   : > { %v7175_v49 = vpop.eup %7174 }
 0x679   : > { %v6058_v31 = vmul.f32 %v7175_v49, %v10502_v6 }
 0x67a   : > { %v6000_v61 = vpop.xlane.xlu1 %5999 }
 0x67b   : > { %6096 = vst.msk [vmem:[%s10537_s23 + $0xc8] sm:$0xff] %vm5718_vm0, %v6058_v31  ;;  %7182 = vrcp.f32 %v6000_v61 }
 0x67c   : > { %v7177_v41 = vpop.eup %7176 }
 0x67d   : > { %v6060_v52 = vmul.f32 %v7177_v41, %v10507_v42 }
 0x67e   : > { %v6003_v45 = vpop.xlane.xlu0 %6002 }
 0x67f   : > { %6097 = vst.msk [vmem:[%s10537_s23 + $0xd0] sm:$0xff] %vm5718_vm0, %v6060_v52  ;;  %7184 = vrcp.f32 %v6003_v45 }
 0x680   : > { %v7179_v10 = vpop.eup %7178 }
 0x681   : > { %v6062_v3 = vmul.f32 %v7179_v10, %v10512_v28 }
 0x682   : > { %v6006_v62 = vpop.xlane.xlu1 %6005 }
 0x683   : > { %6098 = vst.msk [vmem:[%s10537_s23 + $0xd8] sm:$0xff] %vm5718_vm0, %v6062_v3  ;;  %7186 = vrcp.f32 %v6006_v62 }
 0x684   : > { %v7181_v6 = vpop.eup %7180 }
 0x685   : > { %v6064_v50 = vmul.f32 %v7181_v6, %v10516_v17 }
 0x687   : > { %6099 = vst.msk [vmem:[%s10537_s23 + $0xe0] sm:$0xff] %vm5718_vm0, %v6064_v50 }
 0x688   : > { %v7183_v59 = vpop.eup %7182 }
 0x689   : > { %v6066_v42 = vmul.f32 %v7183_v59, %v10520_v16 }
 0x68b   : > { %6100 = vst.msk [vmem:[%s10537_s23 + $0xe8] sm:$0xff] %vm5718_vm0, %v6066_v42 }
 0x68c   : > { %v7185_v54 = vpop.eup %7184 }
 0x68d   : > { %v6068_v55 = vmul.f32 %v7185_v54, %v10524_v56 }
 0x68f   : > { %6101 = vst.msk [vmem:[%s10537_s23 + $0xf0] sm:$0xff] %vm5718_vm0, %v6068_v55 }
 0x690   : > { %v7187_v28 = vpop.eup %7186 }
 0x691   : > { %v6070_v2 = vmul.f32 %v7187_v28, %v10528_v46 }
 0x693   : > { %6102 = vst.msk [vmem:[%s10537_s23 + $0xf8] sm:$0xff] %vm5718_vm0, %v6070_v2 }
 0x694 PF: > { %s11255_s27 = smov %s7498_s24  ;;  %p18_p10 = scmp.ge.s32.totalorder %s7498_s24, 4  }
 0x695   : > { %s11256_s24 = smov %s7373_s25  ;;  %s11257_s25 = smov %s7377_s26 }
 0x696   : > { %s11258_s26 = smov %s7507_s12  ;;  %20 = sbr.rel (!%p18_p10) target bundleno = 4 (0x4), region = 96 }
 0x69b   :  { %6125 = vsyncpa [#allocation3], 1 }
 0x69c   :  { %6127 = vsyncpa [#allocation3 + $0x1], 1 }
 0x69d   :  { %6128 = vsyncpa [#allocation5], 1 }

</bundles_post_ra>
